<compile_context>
chip_gen: v5e
topology: v5e:2x2
jax: 0.10.0
libtpu: 0.0.40
codegen_flags: <defaults>
</compile_context>

<pallas_src>
import jax
import jax.numpy as jnp
from jax.experimental import pallas as pl
from jax.experimental.pallas import tpu as pltpu

K = 5              # conv kernel size
OH1 = 28           # conv1 output spatial size (28x28, padding=2)
RS1 = 800          # rows/image in the conv1/pool1 row space (>= 784, mult. of 32)
L1 = 768           # pool1 slice length (covers all valid pooled rows, <= RS1-29)
CW = 16            # x-stride of the compact post-pool1 row space (14x14 -> 16x16)
CS = 256           # rows/image in the compact row space
L2 = 168           # conv2 slice length (covers the valid 10x10 output rows)
L3 = 144           # pool2 slice length (covers the valid 5x5 pooled rows)
LANES = 128


def _tree_sum(parts):
    """Pairwise-sum equal-shape partials (short accumulator dependency chains)."""
    while len(parts) > 1:
        nxt = [parts[i] + parts[i + 1] for i in range(0, len(parts) - 1, 2)]
        if len(parts) % 2:
            nxt.append(parts[-1])
        parts = nxt
    return parts[0]


# ----------------------------------------------------------------------------
# Fused kernel: whole LeNet forward for one image per grid step
# ----------------------------------------------------------------------------
def _lenet_kernel(x_ref, w1_ref, b1_ref, sel_ref, w2_ref, b2_ref,
                  wf1_ref, bf1_ref, wf2_ref, bf2_ref, wf3_ref, bf3_ref,
                  out_ref):
    f32, bf16 = jnp.float32, jnp.bfloat16

    # conv1: single bf16 matmul over the host-built im2col (taps in lanes)
    x = x_ref[0]                                                  # (RS1, 128) bf16
    a1 = jnp.dot(x, w1_ref[...], preferred_element_type=f32)
    a1 = jnp.maximum(a1 + b1_ref[...], 0.0).astype(bf16)          # (RS1, 128)

    # pool1 (2x2 / stride 2): valid pooled rows land at yy*56 + xx*2
    p1 = jnp.maximum(jnp.maximum(a1[0:L1], a1[1:1 + L1]),
                     jnp.maximum(a1[OH1:OH1 + L1], a1[OH1 + 1:OH1 + 1 + L1]))

    # compact the 14x14 pooled grid to rows yy*16 + xx (constant 0/1 matmul)
    c1 = jnp.dot(sel_ref[...], p1, preferred_element_type=f32).astype(bf16)  # (CS, 128)

    # conv2 (5x5 valid, 6 -> 16 ch): 25 tap dots over the compact grid
    parts = []
    for i in range(K):
        for j in range(K):
            t = i * K + j
            off = i * CW + j
            parts.append(jnp.dot(c1[off:off + L2],
                                 w2_ref[t * LANES:(t + 1) * LANES, :],
                                 preferred_element_type=f32))
    a2 = jnp.maximum(_tree_sum(parts) + b2_ref[...], 0.0).astype(bf16)        # (L2, 128)

    # pool2: valid pooled rows land at zz*32 + ww*2
    p2 = jnp.maximum(jnp.maximum(a2[0:L3], a2[1:1 + L3]),
                     jnp.maximum(a2[CW:CW + L3], a2[CW + 1:CW + 1 + L3]))

    # fc1: contract ONLY the 25 valid pooled rows (torch NCHW flatten order is
    # folded into wf1 on the host), then the small MLP tail.
    hparts = []
    for zz in range(K):
        for ww in range(K):
            pos = zz * K + ww
            r = zz * 2 * CW + ww * 2
            hparts.append(jnp.dot(p2[r:r + 1, :],
                                  wf1_ref[pos * LANES:(pos + 1) * LANES, :],
                                  preferred_element_type=f32))
    h1 = jnp.maximum(_tree_sum(hparts) + bf1_ref[...], 0.0).astype(bf16)      # (1, 128)

    h2 = jnp.dot(h1, wf2_ref[...], preferred_element_type=f32) + bf2_ref[...]
    h2 = jnp.maximum(h2, 0.0).astype(bf16)
    h3 = jnp.dot(h2, wf3_ref[...], preferred_element_type=f32) + bf3_ref[...]  # (1, 128)

    # one full unmasked (1,8,128) store; logits replicated over sublanes,
    # the caller reads sublane 0 / lanes :10.
    out_ref[...] = jnp.broadcast_to(h3.reshape(1, 1, LANES), (1, 8, LANES))


def _const_spec(shape):
    return pl.BlockSpec(shape, lambda b, n=len(shape): (0,) * n)


def lenet_pallas_call(x1, kp):
    B = x1.shape[0]
    weights = (kp["w1"], kp["b1"], kp["sel"], kp["w2"], kp["b2"],
               kp["wf1"], kp["bf1"], kp["wf2"], kp["bf2"], kp["wf3"], kp["bf3"])
    return pl.pallas_call(
        _lenet_kernel,
        out_shape=jax.ShapeDtypeStruct((B, 8, LANES), jnp.float32),
        grid=(B,),
        in_specs=[pl.BlockSpec((1, RS1, LANES), lambda b: (b, 0, 0))]
                 + [_const_spec(w.shape) for w in weights],
        out_specs=pl.BlockSpec((1, 8, LANES), lambda b: (b, 0, 0)),
        compiler_params=pltpu.CompilerParams(
            dimension_semantics=("parallel",),
            vmem_limit_bytes=32 * 1024 * 1024),
    )(x1, *weights)


# ----------------------------------------------------------------------------
# One-time host-side weight preparation (bf16 operands, lane padding, layouts)
# ----------------------------------------------------------------------------
def prep_params(params):
    f32, bf16 = jnp.float32, jnp.bfloat16

    def pad_to(a, shape):
        return jnp.pad(a, [(0, s - d) for s, d in zip(shape, a.shape)])

    # conv1: 25 taps folded into the contraction dim -> (128, 128), row = i*5+j
    w1 = jnp.transpose(params["w_conv1"], (2, 3, 1, 0)).reshape(K * K, 6)
    w1 = pad_to(w1, (LANES, LANES))
    b1 = pad_to(params["b_conv1"], (LANES,)).reshape(1, LANES)

    # conv2 taps: (25*128, 128), row = tap*128 + cin, col = cout
    w2 = jnp.transpose(params["w_conv2"], (2, 3, 1, 0)).reshape(K * K, 6, 16)
    w2 = pad_to(w2, (K * K, LANES, LANES)).reshape(K * K * LANES, LANES)
    b2 = pad_to(params["b_conv2"], (LANES,)).reshape(1, LANES)

    # fc1 (120, 400): torch flatten f = c*25 + pos  ->  row = pos*128 + c
    wf1 = params["w_fc1"].T.reshape(16, K * K, 120)       # [c, pos, n]
    wf1 = jnp.transpose(wf1, (1, 0, 2))                   # [pos, c, n]
    wf1 = pad_to(wf1, (K * K, LANES, LANES)).reshape(K * K * LANES, LANES)
    bf1 = pad_to(params["b_fc1"], (LANES,)).reshape(1, LANES)

    wf2 = pad_to(params["w_fc2"].T, (LANES, LANES))
    bf2 = pad_to(params["b_fc2"], (LANES,)).reshape(1, LANES)
    wf3 = pad_to(params["w_fc3"].T, (LANES, LANES))
    bf3 = pad_to(params["b_fc3"], (LANES,)).reshape(1, LANES)

    # constant 0/1 matrix compacting pool1's valid 14x14 rows (at yy*56 + xx*2)
    # into rows yy*16 + xx; all other rows become exact zeros.
    yy, xx = jnp.meshgrid(jnp.arange(14), jnp.arange(14), indexing="ij")
    rows = (yy * CW + xx).reshape(-1)
    cols = (yy * 2 * OH1 + xx * 2).reshape(-1)
    sel = jnp.zeros((CS, L1), f32).at[rows, cols].set(1.0)

    return dict(
        w1=w1.astype(bf16), b1=b1.astype(f32),
        sel=sel.astype(bf16),
        w2=w2.astype(bf16), b2=b2.astype(f32),
        wf1=wf1.astype(bf16), bf1=bf1.astype(f32),
        wf2=wf2.astype(bf16), bf2=bf2.astype(f32),
        wf3=wf3.astype(bf16), bf3=bf3.astype(f32))


# ----------------------------------------------------------------------------
# Forward: host-side conv1 im2col + one fused kernel call + final slice
# ----------------------------------------------------------------------------
def lenet_forward(x_nchw, kp):
    B = x_nchw.shape[0]
    # conv1 im2col: rows = y*28 + x (28x28 output positions), lanes = 25 taps
    img = jnp.pad(x_nchw[:, 0, :, :], ((0, 0), (2, 2), (2, 2)))          # (B, 32, 32)
    pats = jnp.stack([img[:, i:i + OH1, j:j + OH1]
                      for i in range(K) for j in range(K)], axis=-1)     # (B,28,28,25)
    x1 = pats.reshape(B, OH1 * OH1, K * K)
    x1 = jnp.pad(x1, ((0, 0), (0, RS1 - OH1 * OH1), (0, LANES - K * K)))
    out = lenet_pallas_call(x1.astype(jnp.bfloat16), kp)                  # (B, 8, 128)
    return out[:, 0, :10]


# ----------------------------------------------------------------------------
# Main
# ----------------------------------------------------------------------------
if __name__ == "__main__":
    key = jax.random.PRNGKey(0)
    ks = jax.random.split(key, 11)
    f32 = jnp.float32
    params = {
        "w_conv1": 0.1 * jax.random.normal(ks[0], (6, 1, 5, 5), f32),
        "b_conv1": 0.1 * jax.random.normal(ks[1], (6,), f32),
        "w_conv2": 0.1 * jax.random.normal(ks[2], (16, 6, 5, 5), f32),
        "b_conv2": 0.1 * jax.random.normal(ks[3], (16,), f32),
        "w_fc1": 0.1 * jax.random.normal(ks[4], (120, 400), f32),
        "b_fc1": 0.1 * jax.random.normal(ks[5], (120,), f32),
        "w_fc2": 0.1 * jax.random.normal(ks[6], (84, 120), f32),
        "b_fc2": 0.1 * jax.random.normal(ks[7], (84,), f32),
        "w_fc3": 0.1 * jax.random.normal(ks[8], (10, 84), f32),
        "b_fc3": 0.1 * jax.random.normal(ks[9], (10,), f32),
    }
    # LeNet's 16*5*5 flatten implies 28x28 inputs; small batch = 2.
    x = jax.random.normal(ks[10], (2, 1, 28, 28), f32)

    kp = prep_params(params)                      # one-time weight prep
    out = jax.jit(lenet_forward)(x, kp)
    out = jax.block_until_ready(out)
    assert out.shape == (2, 10) and out.dtype == jnp.float32
    assert bool(jnp.all(jnp.isfinite(out)))
    print("KERNEL_OK")
</pallas_src>

<mosaic_0001>
module attributes {stable_mosaic.version = 11 : i64} {
  func.func @_lenet_kernel(%arg0: i32, %arg1: memref<1x800x128xbf16, #tpu.memory_space<vmem>>, %arg2: memref<128x128xbf16, #tpu.memory_space<vmem>>, %arg3: memref<1x128xf32, #tpu.memory_space<vmem>>, %arg4: memref<256x768xbf16, #tpu.memory_space<vmem>>, %arg5: memref<3200x128xbf16, #tpu.memory_space<vmem>>, %arg6: memref<1x128xf32, #tpu.memory_space<vmem>>, %arg7: memref<3200x128xbf16, #tpu.memory_space<vmem>>, %arg8: memref<1x128xf32, #tpu.memory_space<vmem>>, %arg9: memref<128x128xbf16, #tpu.memory_space<vmem>>, %arg10: memref<1x128xf32, #tpu.memory_space<vmem>>, %arg11: memref<128x128xbf16, #tpu.memory_space<vmem>>, %arg12: memref<1x128xf32, #tpu.memory_space<vmem>>, %arg13: memref<1x8x128xf32, #tpu.memory_space<vmem>>) attributes {dimension_semantics = [#tpu.dimension_semantics<parallel>], iteration_bounds = array<i64: 2>, scalar_prefetch = 0 : i64, scratch_operands = 0 : i64, tpu.core_type = #tpu.core_type<tc>, window_params = [{transform_indices = @transform_0, window_bounds = array<i64: 1, 800, 128>}, {pipeline_mode = #tpu.pipeline_mode<synchronous>, transform_indices = @transform_1, window_bounds = array<i64: 128, 128>}, {pipeline_mode = #tpu.pipeline_mode<synchronous>, transform_indices = @transform_2, window_bounds = array<i64: 1, 128>}, {pipeline_mode = #tpu.pipeline_mode<synchronous>, transform_indices = @transform_3, window_bounds = array<i64: 256, 768>}, {pipeline_mode = #tpu.pipeline_mode<synchronous>, transform_indices = @transform_4, window_bounds = array<i64: 3200, 128>}, {pipeline_mode = #tpu.pipeline_mode<synchronous>, transform_indices = @transform_5, window_bounds = array<i64: 1, 128>}, {pipeline_mode = #tpu.pipeline_mode<synchronous>, transform_indices = @transform_6, window_bounds = array<i64: 3200, 128>}, {pipeline_mode = #tpu.pipeline_mode<synchronous>, transform_indices = @transform_7, window_bounds = array<i64: 1, 128>}, {pipeline_mode = #tpu.pipeline_mode<synchronous>, transform_indices = @transform_8, window_bounds = array<i64: 128, 128>}, {pipeline_mode = #tpu.pipeline_mode<synchronous>, transform_indices = @transform_9, window_bounds = array<i64: 1, 128>}, {pipeline_mode = #tpu.pipeline_mode<synchronous>, transform_indices = @transform_10, window_bounds = array<i64: 128, 128>}, {pipeline_mode = #tpu.pipeline_mode<synchronous>, transform_indices = @transform_11, window_bounds = array<i64: 1, 128>}, {transform_indices = @transform_12, window_bounds = array<i64: 1, 8, 128>}]} {
    %c0 = arith.constant 0 : index
    %c0_0 = arith.constant 0 : index
    %c0_1 = arith.constant 0 : index
    %0 = vector.load %arg1[%c0, %c0_0, %c0_1] : memref<1x800x128xbf16, #tpu.memory_space<vmem>>, vector<1x800x128xbf16>
    %1 = vector.shape_cast %0 : vector<1x800x128xbf16> to vector<800x128xbf16>
    %c0_2 = arith.constant 0 : index
    %c0_3 = arith.constant 0 : index
    %2 = vector.load %arg2[%c0_2, %c0_3] : memref<128x128xbf16, #tpu.memory_space<vmem>>, vector<128x128xbf16>
    %cst = arith.constant dense<0.000000e+00> : vector<800x128xf32>
    %3 = tpu.matmul %1, %2, %cst {dimension_numbers = #tpu.dot_dimension_numbers<[1], [0], [0], [1], [0, 0, 1, 1], [], []>} : vector<800x128xbf16>, vector<128x128xbf16>, vector<800x128xf32> -> vector<800x128xf32>
    %c0_4 = arith.constant 0 : index
    %c0_5 = arith.constant 0 : index
    %4 = vector.load %arg3[%c0_4, %c0_5] : memref<1x128xf32, #tpu.memory_space<vmem>>, vector<1x128xf32>
    %5 = vector.broadcast %4 : vector<1x128xf32> to vector<800x128xf32>
    %6 = arith.addf %3, %5 : vector<800x128xf32>
    %cst_6 = arith.constant 0.000000e+00 : f32
    %7 = vector.broadcast %cst_6 : f32 to vector<800x128xf32>
    %8 = arith.maximumf %6, %7 : vector<800x128xf32>
    %9 = arith.truncf %8 : vector<800x128xf32> to vector<800x128xbf16>
    %10 = vector.extract_strided_slice %9 {offsets = [0, 0], sizes = [768, 128], strides = [1, 1]} : vector<800x128xbf16> to vector<768x128xbf16>
    %11 = vector.extract_strided_slice %9 {offsets = [1, 0], sizes = [768, 128], strides = [1, 1]} : vector<800x128xbf16> to vector<768x128xbf16>
    %12 = arith.maximumf %10, %11 : vector<768x128xbf16>
    %13 = vector.extract_strided_slice %9 {offsets = [28, 0], sizes = [768, 128], strides = [1, 1]} : vector<800x128xbf16> to vector<768x128xbf16>
    %14 = vector.extract_strided_slice %9 {offsets = [29, 0], sizes = [768, 128], strides = [1, 1]} : vector<800x128xbf16> to vector<768x128xbf16>
    %15 = arith.maximumf %13, %14 : vector<768x128xbf16>
    %16 = arith.maximumf %12, %15 : vector<768x128xbf16>
    %c0_7 = arith.constant 0 : index
    %c0_8 = arith.constant 0 : index
    %17 = vector.load %arg4[%c0_7, %c0_8] : memref<256x768xbf16, #tpu.memory_space<vmem>>, vector<256x768xbf16>
    %cst_9 = arith.constant dense<0.000000e+00> : vector<256x128xf32>
    %18 = tpu.matmul %17, %16, %cst_9 {dimension_numbers = #tpu.dot_dimension_numbers<[1], [0], [0], [1], [0, 0, 1, 1], [], []>} : vector<256x768xbf16>, vector<768x128xbf16>, vector<256x128xf32> -> vector<256x128xf32>
    %19 = arith.truncf %18 : vector<256x128xf32> to vector<256x128xbf16>
    %20 = vector.extract_strided_slice %19 {offsets = [0, 0], sizes = [168, 128], strides = [1, 1]} : vector<256x128xbf16> to vector<168x128xbf16>
    %c0_10 = arith.constant 0 : index
    %c0_11 = arith.constant 0 : index
    %21 = vector.load %arg5[%c0_10, %c0_11] : memref<3200x128xbf16, #tpu.memory_space<vmem>>, vector<128x128xbf16>
    %cst_12 = arith.constant dense<0.000000e+00> : vector<168x128xf32>
    %22 = tpu.matmul %20, %21, %cst_12 {dimension_numbers = #tpu.dot_dimension_numbers<[1], [0], [0], [1], [0, 0, 1, 1], [], []>} : vector<168x128xbf16>, vector<128x128xbf16>, vector<168x128xf32> -> vector<168x128xf32>
    %23 = vector.extract_strided_slice %19 {offsets = [1, 0], sizes = [168, 128], strides = [1, 1]} : vector<256x128xbf16> to vector<168x128xbf16>
    %c128 = arith.constant 128 : index
    %c0_13 = arith.constant 0 : index
    %24 = vector.load %arg5[%c128, %c0_13] : memref<3200x128xbf16, #tpu.memory_space<vmem>>, vector<128x128xbf16>
    %cst_14 = arith.constant dense<0.000000e+00> : vector<168x128xf32>
    %25 = tpu.matmul %23, %24, %cst_14 {dimension_numbers = #tpu.dot_dimension_numbers<[1], [0], [0], [1], [0, 0, 1, 1], [], []>} : vector<168x128xbf16>, vector<128x128xbf16>, vector<168x128xf32> -> vector<168x128xf32>
    %26 = vector.extract_strided_slice %19 {offsets = [2, 0], sizes = [168, 128], strides = [1, 1]} : vector<256x128xbf16> to vector<168x128xbf16>
    %c256 = arith.constant 256 : index
    %c0_15 = arith.constant 0 : index
    %27 = vector.load %arg5[%c256, %c0_15] : memref<3200x128xbf16, #tpu.memory_space<vmem>>, vector<128x128xbf16>
    %cst_16 = arith.constant dense<0.000000e+00> : vector<168x128xf32>
    %28 = tpu.matmul %26, %27, %cst_16 {dimension_numbers = #tpu.dot_dimension_numbers<[1], [0], [0], [1], [0, 0, 1, 1], [], []>} : vector<168x128xbf16>, vector<128x128xbf16>, vector<168x128xf32> -> vector<168x128xf32>
    %29 = vector.extract_strided_slice %19 {offsets = [3, 0], sizes = [168, 128], strides = [1, 1]} : vector<256x128xbf16> to vector<168x128xbf16>
    %c384 = arith.constant 384 : index
    %c0_17 = arith.constant 0 : index
    %30 = vector.load %arg5[%c384, %c0_17] : memref<3200x128xbf16, #tpu.memory_space<vmem>>, vector<128x128xbf16>
    %cst_18 = arith.constant dense<0.000000e+00> : vector<168x128xf32>
    %31 = tpu.matmul %29, %30, %cst_18 {dimension_numbers = #tpu.dot_dimension_numbers<[1], [0], [0], [1], [0, 0, 1, 1], [], []>} : vector<168x128xbf16>, vector<128x128xbf16>, vector<168x128xf32> -> vector<168x128xf32>
    %32 = vector.extract_strided_slice %19 {offsets = [4, 0], sizes = [168, 128], strides = [1, 1]} : vector<256x128xbf16> to vector<168x128xbf16>
    %c512 = arith.constant 512 : index
    %c0_19 = arith.constant 0 : index
    %33 = vector.load %arg5[%c512, %c0_19] : memref<3200x128xbf16, #tpu.memory_space<vmem>>, vector<128x128xbf16>
    %cst_20 = arith.constant dense<0.000000e+00> : vector<168x128xf32>
    %34 = tpu.matmul %32, %33, %cst_20 {dimension_numbers = #tpu.dot_dimension_numbers<[1], [0], [0], [1], [0, 0, 1, 1], [], []>} : vector<168x128xbf16>, vector<128x128xbf16>, vector<168x128xf32> -> vector<168x128xf32>
    %35 = vector.extract_strided_slice %19 {offsets = [16, 0], sizes = [168, 128], strides = [1, 1]} : vector<256x128xbf16> to vector<168x128xbf16>
    %c640 = arith.constant 640 : index
    %c0_21 = arith.constant 0 : index
    %36 = vector.load %arg5[%c640, %c0_21] : memref<3200x128xbf16, #tpu.memory_space<vmem>>, vector<128x128xbf16>
    %cst_22 = arith.constant dense<0.000000e+00> : vector<168x128xf32>
    %37 = tpu.matmul %35, %36, %cst_22 {dimension_numbers = #tpu.dot_dimension_numbers<[1], [0], [0], [1], [0, 0, 1, 1], [], []>} : vector<168x128xbf16>, vector<128x128xbf16>, vector<168x128xf32> -> vector<168x128xf32>
    %38 = vector.extract_strided_slice %19 {offsets = [17, 0], sizes = [168, 128], strides = [1, 1]} : vector<256x128xbf16> to vector<168x128xbf16>
    %c768 = arith.constant 768 : index
    %c0_23 = arith.constant 0 : index
    %39 = vector.load %arg5[%c768, %c0_23] : memref<3200x128xbf16, #tpu.memory_space<vmem>>, vector<128x128xbf16>
    %cst_24 = arith.constant dense<0.000000e+00> : vector<168x128xf32>
    %40 = tpu.matmul %38, %39, %cst_24 {dimension_numbers = #tpu.dot_dimension_numbers<[1], [0], [0], [1], [0, 0, 1, 1], [], []>} : vector<168x128xbf16>, vector<128x128xbf16>, vector<168x128xf32> -> vector<168x128xf32>
    %41 = vector.extract_strided_slice %19 {offsets = [18, 0], sizes = [168, 128], strides = [1, 1]} : vector<256x128xbf16> to vector<168x128xbf16>
    %c896 = arith.constant 896 : index
    %c0_25 = arith.constant 0 : index
    %42 = vector.load %arg5[%c896, %c0_25] : memref<3200x128xbf16, #tpu.memory_space<vmem>>, vector<128x128xbf16>
    %cst_26 = arith.constant dense<0.000000e+00> : vector<168x128xf32>
    %43 = tpu.matmul %41, %42, %cst_26 {dimension_numbers = #tpu.dot_dimension_numbers<[1], [0], [0], [1], [0, 0, 1, 1], [], []>} : vector<168x128xbf16>, vector<128x128xbf16>, vector<168x128xf32> -> vector<168x128xf32>
    %44 = vector.extract_strided_slice %19 {offsets = [19, 0], sizes = [168, 128], strides = [1, 1]} : vector<256x128xbf16> to vector<168x128xbf16>
    %c1024 = arith.constant 1024 : index
    %c0_27 = arith.constant 0 : index
    %45 = vector.load %arg5[%c1024, %c0_27] : memref<3200x128xbf16, #tpu.memory_space<vmem>>, vector<128x128xbf16>
    %cst_28 = arith.constant dense<0.000000e+00> : vector<168x128xf32>
    %46 = tpu.matmul %44, %45, %cst_28 {dimension_numbers = #tpu.dot_dimension_numbers<[1], [0], [0], [1], [0, 0, 1, 1], [], []>} : vector<168x128xbf16>, vector<128x128xbf16>, vector<168x128xf32> -> vector<168x128xf32>
    %47 = vector.extract_strided_slice %19 {offsets = [20, 0], sizes = [168, 128], strides = [1, 1]} : vector<256x128xbf16> to vector<168x128xbf16>
    %c1152 = arith.constant 1152 : index
    %c0_29 = arith.constant 0 : index
    %48 = vector.load %arg5[%c1152, %c0_29] : memref<3200x128xbf16, #tpu.memory_space<vmem>>, vector<128x128xbf16>
    %cst_30 = arith.constant dense<0.000000e+00> : vector<168x128xf32>
    %49 = tpu.matmul %47, %48, %cst_30 {dimension_numbers = #tpu.dot_dimension_numbers<[1], [0], [0], [1], [0, 0, 1, 1], [], []>} : vector<168x128xbf16>, vector<128x128xbf16>, vector<168x128xf32> -> vector<168x128xf32>
    %50 = vector.extract_strided_slice %19 {offsets = [32, 0], sizes = [168, 128], strides = [1, 1]} : vector<256x128xbf16> to vector<168x128xbf16>
    %c1280 = arith.constant 1280 : index
    %c0_31 = arith.constant 0 : index
    %51 = vector.load %arg5[%c1280, %c0_31] : memref<3200x128xbf16, #tpu.memory_space<vmem>>, vector<128x128xbf16>
    %cst_32 = arith.constant dense<0.000000e+00> : vector<168x128xf32>
    %52 = tpu.matmul %50, %51, %cst_32 {dimension_numbers = #tpu.dot_dimension_numbers<[1], [0], [0], [1], [0, 0, 1, 1], [], []>} : vector<168x128xbf16>, vector<128x128xbf16>, vector<168x128xf32> -> vector<168x128xf32>
    %53 = vector.extract_strided_slice %19 {offsets = [33, 0], sizes = [168, 128], strides = [1, 1]} : vector<256x128xbf16> to vector<168x128xbf16>
    %c1408 = arith.constant 1408 : index
    %c0_33 = arith.constant 0 : index
    %54 = vector.load %arg5[%c1408, %c0_33] : memref<3200x128xbf16, #tpu.memory_space<vmem>>, vector<128x128xbf16>
    %cst_34 = arith.constant dense<0.000000e+00> : vector<168x128xf32>
    %55 = tpu.matmul %53, %54, %cst_34 {dimension_numbers = #tpu.dot_dimension_numbers<[1], [0], [0], [1], [0, 0, 1, 1], [], []>} : vector<168x128xbf16>, vector<128x128xbf16>, vector<168x128xf32> -> vector<168x128xf32>
    %56 = vector.extract_strided_slice %19 {offsets = [34, 0], sizes = [168, 128], strides = [1, 1]} : vector<256x128xbf16> to vector<168x128xbf16>
    %c1536 = arith.constant 1536 : index
    %c0_35 = arith.constant 0 : index
    %57 = vector.load %arg5[%c1536, %c0_35] : memref<3200x128xbf16, #tpu.memory_space<vmem>>, vector<128x128xbf16>
    %cst_36 = arith.constant dense<0.000000e+00> : vector<168x128xf32>
    %58 = tpu.matmul %56, %57, %cst_36 {dimension_numbers = #tpu.dot_dimension_numbers<[1], [0], [0], [1], [0, 0, 1, 1], [], []>} : vector<168x128xbf16>, vector<128x128xbf16>, vector<168x128xf32> -> vector<168x128xf32>
    %59 = vector.extract_strided_slice %19 {offsets = [35, 0], sizes = [168, 128], strides = [1, 1]} : vector<256x128xbf16> to vector<168x128xbf16>
    %c1664 = arith.constant 1664 : index
    %c0_37 = arith.constant 0 : index
    %60 = vector.load %arg5[%c1664, %c0_37] : memref<3200x128xbf16, #tpu.memory_space<vmem>>, vector<128x128xbf16>
    %cst_38 = arith.constant dense<0.000000e+00> : vector<168x128xf32>
    %61 = tpu.matmul %59, %60, %cst_38 {dimension_numbers = #tpu.dot_dimension_numbers<[1], [0], [0], [1], [0, 0, 1, 1], [], []>} : vector<168x128xbf16>, vector<128x128xbf16>, vector<168x128xf32> -> vector<168x128xf32>
    %62 = vector.extract_strided_slice %19 {offsets = [36, 0], sizes = [168, 128], strides = [1, 1]} : vector<256x128xbf16> to vector<168x128xbf16>
    %c1792 = arith.constant 1792 : index
    %c0_39 = arith.constant 0 : index
    %63 = vector.load %arg5[%c1792, %c0_39] : memref<3200x128xbf16, #tpu.memory_space<vmem>>, vector<128x128xbf16>
    %cst_40 = arith.constant dense<0.000000e+00> : vector<168x128xf32>
    %64 = tpu.matmul %62, %63, %cst_40 {dimension_numbers = #tpu.dot_dimension_numbers<[1], [0], [0], [1], [0, 0, 1, 1], [], []>} : vector<168x128xbf16>, vector<128x128xbf16>, vector<168x128xf32> -> vector<168x128xf32>
    %65 = vector.extract_strided_slice %19 {offsets = [48, 0], sizes = [168, 128], strides = [1, 1]} : vector<256x128xbf16> to vector<168x128xbf16>
    %c1920 = arith.constant 1920 : index
    %c0_41 = arith.constant 0 : index
    %66 = vector.load %arg5[%c1920, %c0_41] : memref<3200x128xbf16, #tpu.memory_space<vmem>>, vector<128x128xbf16>
    %cst_42 = arith.constant dense<0.000000e+00> : vector<168x128xf32>
    %67 = tpu.matmul %65, %66, %cst_42 {dimension_numbers = #tpu.dot_dimension_numbers<[1], [0], [0], [1], [0, 0, 1, 1], [], []>} : vector<168x128xbf16>, vector<128x128xbf16>, vector<168x128xf32> -> vector<168x128xf32>
    %68 = vector.extract_strided_slice %19 {offsets = [49, 0], sizes = [168, 128], strides = [1, 1]} : vector<256x128xbf16> to vector<168x128xbf16>
    %c2048 = arith.constant 2048 : index
    %c0_43 = arith.constant 0 : index
    %69 = vector.load %arg5[%c2048, %c0_43] : memref<3200x128xbf16, #tpu.memory_space<vmem>>, vector<128x128xbf16>
    %cst_44 = arith.constant dense<0.000000e+00> : vector<168x128xf32>
    %70 = tpu.matmul %68, %69, %cst_44 {dimension_numbers = #tpu.dot_dimension_numbers<[1], [0], [0], [1], [0, 0, 1, 1], [], []>} : vector<168x128xbf16>, vector<128x128xbf16>, vector<168x128xf32> -> vector<168x128xf32>
    %71 = vector.extract_strided_slice %19 {offsets = [50, 0], sizes = [168, 128], strides = [1, 1]} : vector<256x128xbf16> to vector<168x128xbf16>
    %c2176 = arith.constant 2176 : index
    %c0_45 = arith.constant 0 : index
    %72 = vector.load %arg5[%c2176, %c0_45] : memref<3200x128xbf16, #tpu.memory_space<vmem>>, vector<128x128xbf16>
    %cst_46 = arith.constant dense<0.000000e+00> : vector<168x128xf32>
    %73 = tpu.matmul %71, %72, %cst_46 {dimension_numbers = #tpu.dot_dimension_numbers<[1], [0], [0], [1], [0, 0, 1, 1], [], []>} : vector<168x128xbf16>, vector<128x128xbf16>, vector<168x128xf32> -> vector<168x128xf32>
    %74 = vector.extract_strided_slice %19 {offsets = [51, 0], sizes = [168, 128], strides = [1, 1]} : vector<256x128xbf16> to vector<168x128xbf16>
    %c2304 = arith.constant 2304 : index
    %c0_47 = arith.constant 0 : index
    %75 = vector.load %arg5[%c2304, %c0_47] : memref<3200x128xbf16, #tpu.memory_space<vmem>>, vector<128x128xbf16>
    %cst_48 = arith.constant dense<0.000000e+00> : vector<168x128xf32>
    %76 = tpu.matmul %74, %75, %cst_48 {dimension_numbers = #tpu.dot_dimension_numbers<[1], [0], [0], [1], [0, 0, 1, 1], [], []>} : vector<168x128xbf16>, vector<128x128xbf16>, vector<168x128xf32> -> vector<168x128xf32>
    %77 = vector.extract_strided_slice %19 {offsets = [52, 0], sizes = [168, 128], strides = [1, 1]} : vector<256x128xbf16> to vector<168x128xbf16>
    %c2432 = arith.constant 2432 : index
    %c0_49 = arith.constant 0 : index
    %78 = vector.load %arg5[%c2432, %c0_49] : memref<3200x128xbf16, #tpu.memory_space<vmem>>, vector<128x128xbf16>
    %cst_50 = arith.constant dense<0.000000e+00> : vector<168x128xf32>
    %79 = tpu.matmul %77, %78, %cst_50 {dimension_numbers = #tpu.dot_dimension_numbers<[1], [0], [0], [1], [0, 0, 1, 1], [], []>} : vector<168x128xbf16>, vector<128x128xbf16>, vector<168x128xf32> -> vector<168x128xf32>
    %80 = vector.extract_strided_slice %19 {offsets = [64, 0], sizes = [168, 128], strides = [1, 1]} : vector<256x128xbf16> to vector<168x128xbf16>
    %c2560 = arith.constant 2560 : index
    %c0_51 = arith.constant 0 : index
    %81 = vector.load %arg5[%c2560, %c0_51] : memref<3200x128xbf16, #tpu.memory_space<vmem>>, vector<128x128xbf16>
    %cst_52 = arith.constant dense<0.000000e+00> : vector<168x128xf32>
    %82 = tpu.matmul %80, %81, %cst_52 {dimension_numbers = #tpu.dot_dimension_numbers<[1], [0], [0], [1], [0, 0, 1, 1], [], []>} : vector<168x128xbf16>, vector<128x128xbf16>, vector<168x128xf32> -> vector<168x128xf32>
    %83 = vector.extract_strided_slice %19 {offsets = [65, 0], sizes = [168, 128], strides = [1, 1]} : vector<256x128xbf16> to vector<168x128xbf16>
    %c2688 = arith.constant 2688 : index
    %c0_53 = arith.constant 0 : index
    %84 = vector.load %arg5[%c2688, %c0_53] : memref<3200x128xbf16, #tpu.memory_space<vmem>>, vector<128x128xbf16>
    %cst_54 = arith.constant dense<0.000000e+00> : vector<168x128xf32>
    %85 = tpu.matmul %83, %84, %cst_54 {dimension_numbers = #tpu.dot_dimension_numbers<[1], [0], [0], [1], [0, 0, 1, 1], [], []>} : vector<168x128xbf16>, vector<128x128xbf16>, vector<168x128xf32> -> vector<168x128xf32>
    %86 = vector.extract_strided_slice %19 {offsets = [66, 0], sizes = [168, 128], strides = [1, 1]} : vector<256x128xbf16> to vector<168x128xbf16>
    %c2816 = arith.constant 2816 : index
    %c0_55 = arith.constant 0 : index
    %87 = vector.load %arg5[%c2816, %c0_55] : memref<3200x128xbf16, #tpu.memory_space<vmem>>, vector<128x128xbf16>
    %cst_56 = arith.constant dense<0.000000e+00> : vector<168x128xf32>
    %88 = tpu.matmul %86, %87, %cst_56 {dimension_numbers = #tpu.dot_dimension_numbers<[1], [0], [0], [1], [0, 0, 1, 1], [], []>} : vector<168x128xbf16>, vector<128x128xbf16>, vector<168x128xf32> -> vector<168x128xf32>
    %89 = vector.extract_strided_slice %19 {offsets = [67, 0], sizes = [168, 128], strides = [1, 1]} : vector<256x128xbf16> to vector<168x128xbf16>
    %c2944 = arith.constant 2944 : index
    %c0_57 = arith.constant 0 : index
    %90 = vector.load %arg5[%c2944, %c0_57] : memref<3200x128xbf16, #tpu.memory_space<vmem>>, vector<128x128xbf16>
    %cst_58 = arith.constant dense<0.000000e+00> : vector<168x128xf32>
    %91 = tpu.matmul %89, %90, %cst_58 {dimension_numbers = #tpu.dot_dimension_numbers<[1], [0], [0], [1], [0, 0, 1, 1], [], []>} : vector<168x128xbf16>, vector<128x128xbf16>, vector<168x128xf32> -> vector<168x128xf32>
    %92 = vector.extract_strided_slice %19 {offsets = [68, 0], sizes = [168, 128], strides = [1, 1]} : vector<256x128xbf16> to vector<168x128xbf16>
    %c3072 = arith.constant 3072 : index
    %c0_59 = arith.constant 0 : index
    %93 = vector.load %arg5[%c3072, %c0_59] : memref<3200x128xbf16, #tpu.memory_space<vmem>>, vector<128x128xbf16>
    %cst_60 = arith.constant dense<0.000000e+00> : vector<168x128xf32>
    %94 = tpu.matmul %92, %93, %cst_60 {dimension_numbers = #tpu.dot_dimension_numbers<[1], [0], [0], [1], [0, 0, 1, 1], [], []>} : vector<168x128xbf16>, vector<128x128xbf16>, vector<168x128xf32> -> vector<168x128xf32>
    %95 = arith.addf %22, %25 : vector<168x128xf32>
    %96 = arith.addf %28, %31 : vector<168x128xf32>
    %97 = arith.addf %34, %37 : vector<168x128xf32>
    %98 = arith.addf %40, %43 : vector<168x128xf32>
    %99 = arith.addf %46, %49 : vector<168x128xf32>
    %100 = arith.addf %52, %55 : vector<168x128xf32>
    %101 = arith.addf %58, %61 : vector<168x128xf32>
    %102 = arith.addf %64, %67 : vector<168x128xf32>
    %103 = arith.addf %70, %73 : vector<168x128xf32>
    %104 = arith.addf %76, %79 : vector<168x128xf32>
    %105 = arith.addf %82, %85 : vector<168x128xf32>
    %106 = arith.addf %88, %91 : vector<168x128xf32>
    %107 = arith.addf %95, %96 : vector<168x128xf32>
    %108 = arith.addf %97, %98 : vector<168x128xf32>
    %109 = arith.addf %99, %100 : vector<168x128xf32>
    %110 = arith.addf %101, %102 : vector<168x128xf32>
    %111 = arith.addf %103, %104 : vector<168x128xf32>
    %112 = arith.addf %105, %106 : vector<168x128xf32>
    %113 = arith.addf %107, %108 : vector<168x128xf32>
    %114 = arith.addf %109, %110 : vector<168x128xf32>
    %115 = arith.addf %111, %112 : vector<168x128xf32>
    %116 = arith.addf %113, %114 : vector<168x128xf32>
    %117 = arith.addf %115, %94 : vector<168x128xf32>
    %118 = arith.addf %116, %117 : vector<168x128xf32>
    %c0_61 = arith.constant 0 : index
    %c0_62 = arith.constant 0 : index
    %119 = vector.load %arg6[%c0_61, %c0_62] : memref<1x128xf32, #tpu.memory_space<vmem>>, vector<1x128xf32>
    %120 = vector.broadcast %119 : vector<1x128xf32> to vector<168x128xf32>
    %121 = arith.addf %118, %120 : vector<168x128xf32>
    %cst_63 = arith.constant 0.000000e+00 : f32
    %122 = vector.broadcast %cst_63 : f32 to vector<168x128xf32>
    %123 = arith.maximumf %121, %122 : vector<168x128xf32>
    %124 = arith.truncf %123 : vector<168x128xf32> to vector<168x128xbf16>
    %125 = vector.extract_strided_slice %124 {offsets = [0, 0], sizes = [144, 128], strides = [1, 1]} : vector<168x128xbf16> to vector<144x128xbf16>
    %126 = vector.extract_strided_slice %124 {offsets = [1, 0], sizes = [144, 128], strides = [1, 1]} : vector<168x128xbf16> to vector<144x128xbf16>
    %127 = arith.maximumf %125, %126 : vector<144x128xbf16>
    %128 = vector.extract_strided_slice %124 {offsets = [16, 0], sizes = [144, 128], strides = [1, 1]} : vector<168x128xbf16> to vector<144x128xbf16>
    %129 = vector.extract_strided_slice %124 {offsets = [17, 0], sizes = [144, 128], strides = [1, 1]} : vector<168x128xbf16> to vector<144x128xbf16>
    %130 = arith.maximumf %128, %129 : vector<144x128xbf16>
    %131 = arith.maximumf %127, %130 : vector<144x128xbf16>
    %132 = vector.extract_strided_slice %131 {offsets = [0, 0], sizes = [1, 128], strides = [1, 1]} : vector<144x128xbf16> to vector<1x128xbf16>
    %c0_64 = arith.constant 0 : index
    %c0_65 = arith.constant 0 : index
    %133 = vector.load %arg7[%c0_64, %c0_65] : memref<3200x128xbf16, #tpu.memory_space<vmem>>, vector<128x128xbf16>
    %cst_66 = arith.constant dense<0.000000e+00> : vector<1x128xf32>
    %134 = tpu.matmul %132, %133, %cst_66 {dimension_numbers = #tpu.dot_dimension_numbers<[1], [0], [0], [1], [0, 0, 1, 1], [], []>} : vector<1x128xbf16>, vector<128x128xbf16>, vector<1x128xf32> -> vector<1x128xf32>
    %135 = vector.extract_strided_slice %131 {offsets = [2, 0], sizes = [1, 128], strides = [1, 1]} : vector<144x128xbf16> to vector<1x128xbf16>
    %c128_67 = arith.constant 128 : index
    %c0_68 = arith.constant 0 : index
    %136 = vector.load %arg7[%c128_67, %c0_68] : memref<3200x128xbf16, #tpu.memory_space<vmem>>, vector<128x128xbf16>
    %cst_69 = arith.constant dense<0.000000e+00> : vector<1x128xf32>
    %137 = tpu.matmul %135, %136, %cst_69 {dimension_numbers = #tpu.dot_dimension_numbers<[1], [0], [0], [1], [0, 0, 1, 1], [], []>} : vector<1x128xbf16>, vector<128x128xbf16>, vector<1x128xf32> -> vector<1x128xf32>
    %138 = vector.extract_strided_slice %131 {offsets = [4, 0], sizes = [1, 128], strides = [1, 1]} : vector<144x128xbf16> to vector<1x128xbf16>
    %c256_70 = arith.constant 256 : index
    %c0_71 = arith.constant 0 : index
    %139 = vector.load %arg7[%c256_70, %c0_71] : memref<3200x128xbf16, #tpu.memory_space<vmem>>, vector<128x128xbf16>
    %cst_72 = arith.constant dense<0.000000e+00> : vector<1x128xf32>
    %140 = tpu.matmul %138, %139, %cst_72 {dimension_numbers = #tpu.dot_dimension_numbers<[1], [0], [0], [1], [0, 0, 1, 1], [], []>} : vector<1x128xbf16>, vector<128x128xbf16>, vector<1x128xf32> -> vector<1x128xf32>
    %141 = vector.extract_strided_slice %131 {offsets = [6, 0], sizes = [1, 128], strides = [1, 1]} : vector<144x128xbf16> to vector<1x128xbf16>
    %c384_73 = arith.constant 384 : index
    %c0_74 = arith.constant 0 : index
    %142 = vector.load %arg7[%c384_73, %c0_74] : memref<3200x128xbf16, #tpu.memory_space<vmem>>, vector<128x128xbf16>
    %cst_75 = arith.constant dense<0.000000e+00> : vector<1x128xf32>
    %143 = tpu.matmul %141, %142, %cst_75 {dimension_numbers = #tpu.dot_dimension_numbers<[1], [0], [0], [1], [0, 0, 1, 1], [], []>} : vector<1x128xbf16>, vector<128x128xbf16>, vector<1x128xf32> -> vector<1x128xf32>
    %144 = vector.extract_strided_slice %131 {offsets = [8, 0], sizes = [1, 128], strides = [1, 1]} : vector<144x128xbf16> to vector<1x128xbf16>
    %c512_76 = arith.constant 512 : index
    %c0_77 = arith.constant 0 : index
    %145 = vector.load %arg7[%c512_76, %c0_77] : memref<3200x128xbf16, #tpu.memory_space<vmem>>, vector<128x128xbf16>
    %cst_78 = arith.constant dense<0.000000e+00> : vector<1x128xf32>
    %146 = tpu.matmul %144, %145, %cst_78 {dimension_numbers = #tpu.dot_dimension_numbers<[1], [0], [0], [1], [0, 0, 1, 1], [], []>} : vector<1x128xbf16>, vector<128x128xbf16>, vector<1x128xf32> -> vector<1x128xf32>
    %147 = vector.extract_strided_slice %131 {offsets = [32, 0], sizes = [1, 128], strides = [1, 1]} : vector<144x128xbf16> to vector<1x128xbf16>
    %c640_79 = arith.constant 640 : index
    %c0_80 = arith.constant 0 : index
    %148 = vector.load %arg7[%c640_79, %c0_80] : memref<3200x128xbf16, #tpu.memory_space<vmem>>, vector<128x128xbf16>
    %cst_81 = arith.constant dense<0.000000e+00> : vector<1x128xf32>
    %149 = tpu.matmul %147, %148, %cst_81 {dimension_numbers = #tpu.dot_dimension_numbers<[1], [0], [0], [1], [0, 0, 1, 1], [], []>} : vector<1x128xbf16>, vector<128x128xbf16>, vector<1x128xf32> -> vector<1x128xf32>
    %150 = vector.extract_strided_slice %131 {offsets = [34, 0], sizes = [1, 128], strides = [1, 1]} : vector<144x128xbf16> to vector<1x128xbf16>
    %c768_82 = arith.constant 768 : index
    %c0_83 = arith.constant 0 : index
    %151 = vector.load %arg7[%c768_82, %c0_83] : memref<3200x128xbf16, #tpu.memory_space<vmem>>, vector<128x128xbf16>
    %cst_84 = arith.constant dense<0.000000e+00> : vector<1x128xf32>
    %152 = tpu.matmul %150, %151, %cst_84 {dimension_numbers = #tpu.dot_dimension_numbers<[1], [0], [0], [1], [0, 0, 1, 1], [], []>} : vector<1x128xbf16>, vector<128x128xbf16>, vector<1x128xf32> -> vector<1x128xf32>
    %153 = vector.extract_strided_slice %131 {offsets = [36, 0], sizes = [1, 128], strides = [1, 1]} : vector<144x128xbf16> to vector<1x128xbf16>
    %c896_85 = arith.constant 896 : index
    %c0_86 = arith.constant 0 : index
    %154 = vector.load %arg7[%c896_85, %c0_86] : memref<3200x128xbf16, #tpu.memory_space<vmem>>, vector<128x128xbf16>
    %cst_87 = arith.constant dense<0.000000e+00> : vector<1x128xf32>
    %155 = tpu.matmul %153, %154, %cst_87 {dimension_numbers = #tpu.dot_dimension_numbers<[1], [0], [0], [1], [0, 0, 1, 1], [], []>} : vector<1x128xbf16>, vector<128x128xbf16>, vector<1x128xf32> -> vector<1x128xf32>
    %156 = vector.extract_strided_slice %131 {offsets = [38, 0], sizes = [1, 128], strides = [1, 1]} : vector<144x128xbf16> to vector<1x128xbf16>
    %c1024_88 = arith.constant 1024 : index
    %c0_89 = arith.constant 0 : index
    %157 = vector.load %arg7[%c1024_88, %c0_89] : memref<3200x128xbf16, #tpu.memory_space<vmem>>, vector<128x128xbf16>
    %cst_90 = arith.constant dense<0.000000e+00> : vector<1x128xf32>
    %158 = tpu.matmul %156, %157, %cst_90 {dimension_numbers = #tpu.dot_dimension_numbers<[1], [0], [0], [1], [0, 0, 1, 1], [], []>} : vector<1x128xbf16>, vector<128x128xbf16>, vector<1x128xf32> -> vector<1x128xf32>
    %159 = vector.extract_strided_slice %131 {offsets = [40, 0], sizes = [1, 128], strides = [1, 1]} : vector<144x128xbf16> to vector<1x128xbf16>
    %c1152_91 = arith.constant 1152 : index
    %c0_92 = arith.constant 0 : index
    %160 = vector.load %arg7[%c1152_91, %c0_92] : memref<3200x128xbf16, #tpu.memory_space<vmem>>, vector<128x128xbf16>
    %cst_93 = arith.constant dense<0.000000e+00> : vector<1x128xf32>
    %161 = tpu.matmul %159, %160, %cst_93 {dimension_numbers = #tpu.dot_dimension_numbers<[1], [0], [0], [1], [0, 0, 1, 1], [], []>} : vector<1x128xbf16>, vector<128x128xbf16>, vector<1x128xf32> -> vector<1x128xf32>
    %162 = vector.extract_strided_slice %131 {offsets = [64, 0], sizes = [1, 128], strides = [1, 1]} : vector<144x128xbf16> to vector<1x128xbf16>
    %c1280_94 = arith.constant 1280 : index
    %c0_95 = arith.constant 0 : index
    %163 = vector.load %arg7[%c1280_94, %c0_95] : memref<3200x128xbf16, #tpu.memory_space<vmem>>, vector<128x128xbf16>
    %cst_96 = arith.constant dense<0.000000e+00> : vector<1x128xf32>
    %164 = tpu.matmul %162, %163, %cst_96 {dimension_numbers = #tpu.dot_dimension_numbers<[1], [0], [0], [1], [0, 0, 1, 1], [], []>} : vector<1x128xbf16>, vector<128x128xbf16>, vector<1x128xf32> -> vector<1x128xf32>
    %165 = vector.extract_strided_slice %131 {offsets = [66, 0], sizes = [1, 128], strides = [1, 1]} : vector<144x128xbf16> to vector<1x128xbf16>
    %c1408_97 = arith.constant 1408 : index
    %c0_98 = arith.constant 0 : index
    %166 = vector.load %arg7[%c1408_97, %c0_98] : memref<3200x128xbf16, #tpu.memory_space<vmem>>, vector<128x128xbf16>
    %cst_99 = arith.constant dense<0.000000e+00> : vector<1x128xf32>
    %167 = tpu.matmul %165, %166, %cst_99 {dimension_numbers = #tpu.dot_dimension_numbers<[1], [0], [0], [1], [0, 0, 1, 1], [], []>} : vector<1x128xbf16>, vector<128x128xbf16>, vector<1x128xf32> -> vector<1x128xf32>
    %168 = vector.extract_strided_slice %131 {offsets = [68, 0], sizes = [1, 128], strides = [1, 1]} : vector<144x128xbf16> to vector<1x128xbf16>
    %c1536_100 = arith.constant 1536 : index
    %c0_101 = arith.constant 0 : index
    %169 = vector.load %arg7[%c1536_100, %c0_101] : memref<3200x128xbf16, #tpu.memory_space<vmem>>, vector<128x128xbf16>
    %cst_102 = arith.constant dense<0.000000e+00> : vector<1x128xf32>
    %170 = tpu.matmul %168, %169, %cst_102 {dimension_numbers = #tpu.dot_dimension_numbers<[1], [0], [0], [1], [0, 0, 1, 1], [], []>} : vector<1x128xbf16>, vector<128x128xbf16>, vector<1x128xf32> -> vector<1x128xf32>
    %171 = vector.extract_strided_slice %131 {offsets = [70, 0], sizes = [1, 128], strides = [1, 1]} : vector<144x128xbf16> to vector<1x128xbf16>
    %c1664_103 = arith.constant 1664 : index
    %c0_104 = arith.constant 0 : index
    %172 = vector.load %arg7[%c1664_103, %c0_104] : memref<3200x128xbf16, #tpu.memory_space<vmem>>, vector<128x128xbf16>
    %cst_105 = arith.constant dense<0.000000e+00> : vector<1x128xf32>
    %173 = tpu.matmul %171, %172, %cst_105 {dimension_numbers = #tpu.dot_dimension_numbers<[1], [0], [0], [1], [0, 0, 1, 1], [], []>} : vector<1x128xbf16>, vector<128x128xbf16>, vector<1x128xf32> -> vector<1x128xf32>
    %174 = vector.extract_strided_slice %131 {offsets = [72, 0], sizes = [1, 128], strides = [1, 1]} : vector<144x128xbf16> to vector<1x128xbf16>
    %c1792_106 = arith.constant 1792 : index
    %c0_107 = arith.constant 0 : index
    %175 = vector.load %arg7[%c1792_106, %c0_107] : memref<3200x128xbf16, #tpu.memory_space<vmem>>, vector<128x128xbf16>
    %cst_108 = arith.constant dense<0.000000e+00> : vector<1x128xf32>
    %176 = tpu.matmul %174, %175, %cst_108 {dimension_numbers = #tpu.dot_dimension_numbers<[1], [0], [0], [1], [0, 0, 1, 1], [], []>} : vector<1x128xbf16>, vector<128x128xbf16>, vector<1x128xf32> -> vector<1x128xf32>
    %177 = vector.extract_strided_slice %131 {offsets = [96, 0], sizes = [1, 128], strides = [1, 1]} : vector<144x128xbf16> to vector<1x128xbf16>
    %c1920_109 = arith.constant 1920 : index
    %c0_110 = arith.constant 0 : index
    %178 = vector.load %arg7[%c1920_109, %c0_110] : memref<3200x128xbf16, #tpu.memory_space<vmem>>, vector<128x128xbf16>
    %cst_111 = arith.constant dense<0.000000e+00> : vector<1x128xf32>
    %179 = tpu.matmul %177, %178, %cst_111 {dimension_numbers = #tpu.dot_dimension_numbers<[1], [0], [0], [1], [0, 0, 1, 1], [], []>} : vector<1x128xbf16>, vector<128x128xbf16>, vector<1x128xf32> -> vector<1x128xf32>
    %180 = vector.extract_strided_slice %131 {offsets = [98, 0], sizes = [1, 128], strides = [1, 1]} : vector<144x128xbf16> to vector<1x128xbf16>
    %c2048_112 = arith.constant 2048 : index
    %c0_113 = arith.constant 0 : index
    %181 = vector.load %arg7[%c2048_112, %c0_113] : memref<3200x128xbf16, #tpu.memory_space<vmem>>, vector<128x128xbf16>
    %cst_114 = arith.constant dense<0.000000e+00> : vector<1x128xf32>
    %182 = tpu.matmul %180, %181, %cst_114 {dimension_numbers = #tpu.dot_dimension_numbers<[1], [0], [0], [1], [0, 0, 1, 1], [], []>} : vector<1x128xbf16>, vector<128x128xbf16>, vector<1x128xf32> -> vector<1x128xf32>
    %183 = vector.extract_strided_slice %131 {offsets = [100, 0], sizes = [1, 128], strides = [1, 1]} : vector<144x128xbf16> to vector<1x128xbf16>
    %c2176_115 = arith.constant 2176 : index
    %c0_116 = arith.constant 0 : index
    %184 = vector.load %arg7[%c2176_115, %c0_116] : memref<3200x128xbf16, #tpu.memory_space<vmem>>, vector<128x128xbf16>
    %cst_117 = arith.constant dense<0.000000e+00> : vector<1x128xf32>
    %185 = tpu.matmul %183, %184, %cst_117 {dimension_numbers = #tpu.dot_dimension_numbers<[1], [0], [0], [1], [0, 0, 1, 1], [], []>} : vector<1x128xbf16>, vector<128x128xbf16>, vector<1x128xf32> -> vector<1x128xf32>
    %186 = vector.extract_strided_slice %131 {offsets = [102, 0], sizes = [1, 128], strides = [1, 1]} : vector<144x128xbf16> to vector<1x128xbf16>
    %c2304_118 = arith.constant 2304 : index
    %c0_119 = arith.constant 0 : index
    %187 = vector.load %arg7[%c2304_118, %c0_119] : memref<3200x128xbf16, #tpu.memory_space<vmem>>, vector<128x128xbf16>
    %cst_120 = arith.constant dense<0.000000e+00> : vector<1x128xf32>
    %188 = tpu.matmul %186, %187, %cst_120 {dimension_numbers = #tpu.dot_dimension_numbers<[1], [0], [0], [1], [0, 0, 1, 1], [], []>} : vector<1x128xbf16>, vector<128x128xbf16>, vector<1x128xf32> -> vector<1x128xf32>
    %189 = vector.extract_strided_slice %131 {offsets = [104, 0], sizes = [1, 128], strides = [1, 1]} : vector<144x128xbf16> to vector<1x128xbf16>
    %c2432_121 = arith.constant 2432 : index
    %c0_122 = arith.constant 0 : index
    %190 = vector.load %arg7[%c2432_121, %c0_122] : memref<3200x128xbf16, #tpu.memory_space<vmem>>, vector<128x128xbf16>
    %cst_123 = arith.constant dense<0.000000e+00> : vector<1x128xf32>
    %191 = tpu.matmul %189, %190, %cst_123 {dimension_numbers = #tpu.dot_dimension_numbers<[1], [0], [0], [1], [0, 0, 1, 1], [], []>} : vector<1x128xbf16>, vector<128x128xbf16>, vector<1x128xf32> -> vector<1x128xf32>
    %192 = vector.extract_strided_slice %131 {offsets = [128, 0], sizes = [1, 128], strides = [1, 1]} : vector<144x128xbf16> to vector<1x128xbf16>
    %c2560_124 = arith.constant 2560 : index
    %c0_125 = arith.constant 0 : index
    %193 = vector.load %arg7[%c2560_124, %c0_125] : memref<3200x128xbf16, #tpu.memory_space<vmem>>, vector<128x128xbf16>
    %cst_126 = arith.constant dense<0.000000e+00> : vector<1x128xf32>
    %194 = tpu.matmul %192, %193, %cst_126 {dimension_numbers = #tpu.dot_dimension_numbers<[1], [0], [0], [1], [0, 0, 1, 1], [], []>} : vector<1x128xbf16>, vector<128x128xbf16>, vector<1x128xf32> -> vector<1x128xf32>
    %195 = vector.extract_strided_slice %131 {offsets = [130, 0], sizes = [1, 128], strides = [1, 1]} : vector<144x128xbf16> to vector<1x128xbf16>
    %c2688_127 = arith.constant 2688 : index
    %c0_128 = arith.constant 0 : index
    %196 = vector.load %arg7[%c2688_127, %c0_128] : memref<3200x128xbf16, #tpu.memory_space<vmem>>, vector<128x128xbf16>
    %cst_129 = arith.constant dense<0.000000e+00> : vector<1x128xf32>
    %197 = tpu.matmul %195, %196, %cst_129 {dimension_numbers = #tpu.dot_dimension_numbers<[1], [0], [0], [1], [0, 0, 1, 1], [], []>} : vector<1x128xbf16>, vector<128x128xbf16>, vector<1x128xf32> -> vector<1x128xf32>
    %198 = vector.extract_strided_slice %131 {offsets = [132, 0], sizes = [1, 128], strides = [1, 1]} : vector<144x128xbf16> to vector<1x128xbf16>
    %c2816_130 = arith.constant 2816 : index
    %c0_131 = arith.constant 0 : index
    %199 = vector.load %arg7[%c2816_130, %c0_131] : memref<3200x128xbf16, #tpu.memory_space<vmem>>, vector<128x128xbf16>
    %cst_132 = arith.constant dense<0.000000e+00> : vector<1x128xf32>
    %200 = tpu.matmul %198, %199, %cst_132 {dimension_numbers = #tpu.dot_dimension_numbers<[1], [0], [0], [1], [0, 0, 1, 1], [], []>} : vector<1x128xbf16>, vector<128x128xbf16>, vector<1x128xf32> -> vector<1x128xf32>
    %201 = vector.extract_strided_slice %131 {offsets = [134, 0], sizes = [1, 128], strides = [1, 1]} : vector<144x128xbf16> to vector<1x128xbf16>
    %c2944_133 = arith.constant 2944 : index
    %c0_134 = arith.constant 0 : index
    %202 = vector.load %arg7[%c2944_133, %c0_134] : memref<3200x128xbf16, #tpu.memory_space<vmem>>, vector<128x128xbf16>
    %cst_135 = arith.constant dense<0.000000e+00> : vector<1x128xf32>
    %203 = tpu.matmul %201, %202, %cst_135 {dimension_numbers = #tpu.dot_dimension_numbers<[1], [0], [0], [1], [0, 0, 1, 1], [], []>} : vector<1x128xbf16>, vector<128x128xbf16>, vector<1x128xf32> -> vector<1x128xf32>
    %204 = vector.extract_strided_slice %131 {offsets = [136, 0], sizes = [1, 128], strides = [1, 1]} : vector<144x128xbf16> to vector<1x128xbf16>
    %c3072_136 = arith.constant 3072 : index
    %c0_137 = arith.constant 0 : index
    %205 = vector.load %arg7[%c3072_136, %c0_137] : memref<3200x128xbf16, #tpu.memory_space<vmem>>, vector<128x128xbf16>
    %cst_138 = arith.constant dense<0.000000e+00> : vector<1x128xf32>
    %206 = tpu.matmul %204, %205, %cst_138 {dimension_numbers = #tpu.dot_dimension_numbers<[1], [0], [0], [1], [0, 0, 1, 1], [], []>} : vector<1x128xbf16>, vector<128x128xbf16>, vector<1x128xf32> -> vector<1x128xf32>
    %207 = arith.addf %134, %137 : vector<1x128xf32>
    %208 = arith.addf %140, %143 : vector<1x128xf32>
    %209 = arith.addf %146, %149 : vector<1x128xf32>
    %210 = arith.addf %152, %155 : vector<1x128xf32>
    %211 = arith.addf %158, %161 : vector<1x128xf32>
    %212 = arith.addf %164, %167 : vector<1x128xf32>
    %213 = arith.addf %170, %173 : vector<1x128xf32>
    %214 = arith.addf %176, %179 : vector<1x128xf32>
    %215 = arith.addf %182, %185 : vector<1x128xf32>
    %216 = arith.addf %188, %191 : vector<1x128xf32>
    %217 = arith.addf %194, %197 : vector<1x128xf32>
    %218 = arith.addf %200, %203 : vector<1x128xf32>
    %219 = arith.addf %207, %208 : vector<1x128xf32>
    %220 = arith.addf %209, %210 : vector<1x128xf32>
    %221 = arith.addf %211, %212 : vector<1x128xf32>
    %222 = arith.addf %213, %214 : vector<1x128xf32>
    %223 = arith.addf %215, %216 : vector<1x128xf32>
    %224 = arith.addf %217, %218 : vector<1x128xf32>
    %225 = arith.addf %219, %220 : vector<1x128xf32>
    %226 = arith.addf %221, %222 : vector<1x128xf32>
    %227 = arith.addf %223, %224 : vector<1x128xf32>
    %228 = arith.addf %225, %226 : vector<1x128xf32>
    %229 = arith.addf %227, %206 : vector<1x128xf32>
    %230 = arith.addf %228, %229 : vector<1x128xf32>
    %c0_139 = arith.constant 0 : index
    %c0_140 = arith.constant 0 : index
    %231 = vector.load %arg8[%c0_139, %c0_140] : memref<1x128xf32, #tpu.memory_space<vmem>>, vector<1x128xf32>
    %232 = arith.addf %230, %231 : vector<1x128xf32>
    %cst_141 = arith.constant 0.000000e+00 : f32
    %233 = vector.broadcast %cst_141 : f32 to vector<1x128xf32>
    %234 = arith.maximumf %232, %233 : vector<1x128xf32>
    %235 = arith.truncf %234 : vector<1x128xf32> to vector<1x128xbf16>
    %c0_142 = arith.constant 0 : index
    %c0_143 = arith.constant 0 : index
    %236 = vector.load %arg9[%c0_142, %c0_143] : memref<128x128xbf16, #tpu.memory_space<vmem>>, vector<128x128xbf16>
    %cst_144 = arith.constant dense<0.000000e+00> : vector<1x128xf32>
    %237 = tpu.matmul %235, %236, %cst_144 {dimension_numbers = #tpu.dot_dimension_numbers<[1], [0], [0], [1], [0, 0, 1, 1], [], []>} : vector<1x128xbf16>, vector<128x128xbf16>, vector<1x128xf32> -> vector<1x128xf32>
    %c0_145 = arith.constant 0 : index
    %c0_146 = arith.constant 0 : index
    %238 = vector.load %arg10[%c0_145, %c0_146] : memref<1x128xf32, #tpu.memory_space<vmem>>, vector<1x128xf32>
    %239 = arith.addf %237, %238 : vector<1x128xf32>
    %cst_147 = arith.constant 0.000000e+00 : f32
    %240 = vector.broadcast %cst_147 : f32 to vector<1x128xf32>
    %241 = arith.maximumf %239, %240 : vector<1x128xf32>
    %242 = arith.truncf %241 : vector<1x128xf32> to vector<1x128xbf16>
    %c0_148 = arith.constant 0 : index
    %c0_149 = arith.constant 0 : index
    %243 = vector.load %arg11[%c0_148, %c0_149] : memref<128x128xbf16, #tpu.memory_space<vmem>>, vector<128x128xbf16>
    %cst_150 = arith.constant dense<0.000000e+00> : vector<1x128xf32>
    %244 = tpu.matmul %242, %243, %cst_150 {dimension_numbers = #tpu.dot_dimension_numbers<[1], [0], [0], [1], [0, 0, 1, 1], [], []>} : vector<1x128xbf16>, vector<128x128xbf16>, vector<1x128xf32> -> vector<1x128xf32>
    %c0_151 = arith.constant 0 : index
    %c0_152 = arith.constant 0 : index
    %245 = vector.load %arg12[%c0_151, %c0_152] : memref<1x128xf32, #tpu.memory_space<vmem>>, vector<1x128xf32>
    %246 = arith.addf %244, %245 : vector<1x128xf32>
    %247 = vector.shape_cast %246 : vector<1x128xf32> to vector<1x1x128xf32>
    %248 = vector.shape_cast %247 : vector<1x1x128xf32> to vector<1x1x128xf32>
    %249 = vector.broadcast %248 : vector<1x1x128xf32> to vector<1x8x128xf32>
    %c0_153 = arith.constant 0 : index
    %c0_154 = arith.constant 0 : index
    %c0_155 = arith.constant 0 : index
    %250 = vector.load %arg13[%c0_153, %c0_154, %c0_155] : memref<1x8x128xf32, #tpu.memory_space<vmem>>, vector<1x8x128xf32>
    tpu.vector_store %arg13[%c0_153, %c0_154, %c0_155], %249 {strides = array<i32>} : memref<1x8x128xf32, #tpu.memory_space<vmem>>, vector<1x8x128xf32>,
    return
  }
  func.func @transform_0(%arg0: i32) -> (i32, i32, i32) {
    %c0_i32 = arith.constant 0 : i32
    %c0_i32_0 = arith.constant 0 : i32
    %c0_i32_1 = arith.constant 0 : i32
    return %arg0, %c0_i32, %c0_i32_0 : i32, i32, i32
  }
  func.func @transform_1(%arg0: i32) -> (i32, i32) {
    %c0_i32 = arith.constant 0 : i32
    %c0_i32_0 = arith.constant 0 : i32
    %c0_i32_1 = arith.constant 0 : i32
    return %c0_i32, %c0_i32_0 : i32, i32
  }
  func.func @transform_2(%arg0: i32) -> (i32, i32) {
    %c0_i32 = arith.constant 0 : i32
    %c0_i32_0 = arith.constant 0 : i32
    %c0_i32_1 = arith.constant 0 : i32
    return %c0_i32, %c0_i32_0 : i32, i32
  }
  func.func @transform_3(%arg0: i32) -> (i32, i32) {
    %c0_i32 = arith.constant 0 : i32
    %c0_i32_0 = arith.constant 0 : i32
    %c0_i32_1 = arith.constant 0 : i32
    return %c0_i32, %c0_i32_0 : i32, i32
  }
  func.func @transform_4(%arg0: i32) -> (i32, i32) {
    %c0_i32 = arith.constant 0 : i32
    %c0_i32_0 = arith.constant 0 : i32
    %c0_i32_1 = arith.constant 0 : i32
    return %c0_i32, %c0_i32_0 : i32, i32
  }
  func.func @transform_5(%arg0: i32) -> (i32, i32) {
    %c0_i32 = arith.constant 0 : i32
    %c0_i32_0 = arith.constant 0 : i32
    %c0_i32_1 = arith.constant 0 : i32
    return %c0_i32, %c0_i32_0 : i32, i32
  }
  func.func @transform_6(%arg0: i32) -> (i32, i32) {
    %c0_i32 = arith.constant 0 : i32
    %c0_i32_0 = arith.constant 0 : i32
    %c0_i32_1 = arith.constant 0 : i32
    return %c0_i32, %c0_i32_0 : i32, i32
  }
  func.func @transform_7(%arg0: i32) -> (i32, i32) {
    %c0_i32 = arith.constant 0 : i32
    %c0_i32_0 = arith.constant 0 : i32
    %c0_i32_1 = arith.constant 0 : i32
    return %c0_i32, %c0_i32_0 : i32, i32
  }
  func.func @transform_8(%arg0: i32) -> (i32, i32) {
    %c0_i32 = arith.constant 0 : i32
    %c0_i32_0 = arith.constant 0 : i32
    %c0_i32_1 = arith.constant 0 : i32
    return %c0_i32, %c0_i32_0 : i32, i32
  }
  func.func @transform_9(%arg0: i32) -> (i32, i32) {
    %c0_i32 = arith.constant 0 : i32
    %c0_i32_0 = arith.constant 0 : i32
    %c0_i32_1 = arith.constant 0 : i32
    return %c0_i32, %c0_i32_0 : i32, i32
  }
  func.func @transform_10(%arg0: i32) -> (i32, i32) {
    %c0_i32 = arith.constant 0 : i32
    %c0_i32_0 = arith.constant 0 : i32
    %c0_i32_1 = arith.constant 0 : i32
    return %c0_i32, %c0_i32_0 : i32, i32
  }
  func.func @transform_11(%arg0: i32) -> (i32, i32) {
    %c0_i32 = arith.constant 0 : i32
    %c0_i32_0 = arith.constant 0 : i32
    %c0_i32_1 = arith.constant 0 : i32
    return %c0_i32, %c0_i32_0 : i32, i32
  }
  func.func @transform_12(%arg0: i32) -> (i32, i32, i32) {
    %c0_i32 = arith.constant 0 : i32
    %c0_i32_0 = arith.constant 0 : i32
    %c0_i32_1 = arith.constant 0 : i32
    return %arg0, %c0_i32, %c0_i32_0 : i32, i32, i32
  }
}

</mosaic_0001>

<bundles_post_ra>
// kernel: lenet_forward.1
= control target key start
LH: loop header
LB: loop body
LE: loop exit
PB: predicated region body
PF: predicated region fallthrough
CT: control target
= control target key end

     0   :  { %s13035_s21 = smov 0   ;;  %s18226_s0 = inlined_call_operand.vmem [shape: bf16[2,800,128], index: 0, kind: input, shape index: {}]   ;;  %s18227_s1 = inlined_call_operand.vmem [shape: bf16[128,128], index: 1, kind: input, shape index: {}]   ;;  %s18228_s2 = inlined_call_operand.vmem [shape: f32[1,128], index: 2, kind: input, shape index: {}]   ;;  %s18229_s3 = inlined_call_operand.vmem [shape: bf16[256,768], index: 3, kind: input, shape index: {}]   ;;  %s18230_s4 = inlined_call_operand.vmem [shape: bf16[3200,128], index: 4, kind: input, shape index: {}]   ;;  %s18231_s5 = inlined_call_operand.vmem [shape: f32[1,128], index: 5, kind: input, shape index: {}]   ;;  %s18232_s6 = inlined_call_operand.vmem [shape: bf16[3200,128], index: 6, kind: input, shape index: {}]   ;;  %s18233_s7 = inlined_call_operand.vmem [shape: f32[1,128], index: 7, kind: input, shape index: {}]   ;;  %s18234_s8 = inlined_call_operand.vmem [shape: bf16[128,128], index: 8, kind: input, shape index: {}]   ;;  %s18235_s9 = inlined_call_operand.vmem [shape: f32[1,128], index: 9, kind: input, shape index: {}]   ;;  %s18236_s10 = inlined_call_operand.vmem [shape: bf16[128,128], index: 10, kind: input, shape index: {}]   ;;  %s18237_s11 = inlined_call_operand.vmem [shape: f32[1,128], index: 11, kind: input, shape index: {}]   ;;  %s18238_s12 = inlined_call_operand.vmem [shape: f32[2,8,128], index: 12, kind: output, shape index: {}]  }
   0x1 LB: > { %s10089_s22 = sadd.s32 4294967295, %s12968_s21   ;;  %p10093_p0 = scmp.ge.s32.totalorder %s12968_s21, 1  ;;  %s12968_s21 = sphi %s13035_s21, %s22_s21  }
   0x2   : > { %p362_p1 = scmp.lt.s32.totalorder %s12968_s21, 3 }
   0x4   : > { %p363_p2 = pnand %p10093_p0, %p362_p1 }
   0x6   : > { %366 = sbr.rel (%p363_p2) target bundleno = 3096 (0xc18), region = 68 }
   0xb   : > { %v12435_v0 = vld [vmem:[%s18227_s1 + $0x38] sm:$0xff]  ;;  %v12434_v1 = vld [vmem:[%s18227_s1 + $0x30] sm:$0xff]  ;;  %v12433_v2 = vld [vmem:[%s18227_s1 + $0x28] sm:$0xff]  ;;  %p403_p3 = scmp.lt.s32.totalorder %s10089_s22, 1  ;;  %vm1533_vm0 = vcmask 1046528   ;;  %vm2236_vm1 = vcmask 1043456  }
   0xc   : > { %880 = vmatpush.bf16.msra.mxu0 %v12435_v0  ;;  %v12432_v3 = vld [vmem:[%s18227_s1 + $0x20] sm:$0xff]  ;;  %v12431_v4 = vld [vmem:[%s18227_s1 + $0x18] sm:$0xff]  ;;  %v12430_v5 = vld [vmem:[%s18227_s1 + $0x10] sm:$0xff]  ;;  %vm3885_vm2 = vsmask.f32 7424  ;;  %vm4661_vm4 = vcmask 1045504  }
   0xd   : > { %s19097_s22 = smov (!%p403_p3, %s10089_s22), 1  ;;  %v12429_v6 = vld [vmem:[%s18227_s1 + $0x8] sm:$0xff]  ;;  %v12428_v7 = vld [vmem:[%s18227_s1] sm:$0xff]  ;;  %vm4127_vm3 = vsmask.f32 6400 }
   0xe   : > { %s12948_s19 = smul.u32 400, %s19097_s22  ;;  %v13087_v18 = vld [vmem:[%s18228_s2] ss:$0 sm:$0xff]  ;;  %s10095_s23 = sshll.u32 %s19097_s22, 3 }
   0xf   : > { %s411_s27 = scalar_lea.vmem %s18238_s12, %s10095_s23 }
  0x10   : > { %881 = vmatpush.bf16.msra.mxu0 %v12434_v1  ;;  %s13073_s26 = scalar_lea.vmem %s18226_s0, %s12948_s19 }
  0x11   : > { %v12378_v8 = vld [vmem:[%s13073_s26] sm:$0xff]  ;;  %v12379_v9 = vld [vmem:[%s13073_s26 + $0x8] sm:$0xff]  ;;  %v12380_v10 = vld [vmem:[%s13073_s26 + $0x10] sm:$0xff] }
  0x12   : > { %v12381_v11 = vld [vmem:[%s13073_s26 + $0x18] sm:$0xff]  ;;  %v12382_v12 = vld [vmem:[%s13073_s26 + $0x20] sm:$0xff]  ;;  %v12383_v13 = vld [vmem:[%s13073_s26 + $0x28] sm:$0xff] }
  0x13   : > { %v12384_v14 = vld [vmem:[%s13073_s26 + $0x30] sm:$0xff]  ;;  %v12385_v15 = vld [vmem:[%s13073_s26 + $0x38] sm:$0xff]  ;;  %v12386_v16 = vld [vmem:[%s13073_s26 + $0x40] sm:$0xff] }
  0x14   : > { %882 = vmatpush.bf16.msra.mxu0 %v12433_v2  ;;  %v12387_v26 = vld [vmem:[%s13073_s26 + $0x48] sm:$0xff]  ;;  %v12388_v39 = vld [vmem:[%s13073_s26 + $0x50] sm:$0xff]  ;;  %v12389_v52 = vld [vmem:[%s13073_s26 + $0x58] sm:$0xff] }
  0x18   : > { %883 = vmatpush.bf16.msra.mxu0 %v12432_v3 }
  0x1c   : > { %884 = vmatpush.bf16.msra.mxu0 %v12431_v4 }
  0x20   : > { %885 = vmatpush.bf16.msra.mxu0 %v12430_v5 }
  0x24   : > { %886 = vmatpush.bf16.msra.mxu0 %v12429_v6 }
  0x28   : > { %887 = vmatpush.bf16.msra.mxu0 %v12428_v7 }
  0x2b   : > { %888 = vmatmul.bf16.vlgmr.msra.gmra.mxu0 %v12378_v8  ;;  %v12390_v8 = vld [vmem:[%s13073_s26 + $0x60] sm:$0xff] }
  0x3b   : > { %893 = vmatmul.bf16.gmra.mxu0 %v12379_v9 }
  0x4b   : > { %898 = vmatmul.bf16.gmra.mxu0 %v12380_v10 }
  0x5b   : > { %903 = vmatmul.bf16.gmra.mxu0 %v12381_v11 }
  0x6b   : > { %908 = vmatmul.bf16.gmra.mxu0 %v12382_v12 }
  0x7b   : > { %913 = vmatmul.bf16.gmra.mxu0 %v12383_v13 }
  0x8b   : > { %918 = vmatmul.bf16.gmra.mxu0 %v12384_v14 }
  0x9b   : > { %923 = vmatmul.bf16.gmra.mxu0 %v12385_v15 }
  0xa8   : > { %v889_v17 = vpop.f32.mrf.mxu0 }
  0xa9   : > { %v890_v19 = vadd.f32 %v13087_v18, %v889_v17 }
  0xab   : > { %928 = vmatmul.bf16.gmra.mxu0 %v12386_v16  ;;  %v1139_v21 = vmax.f32 %v890_v19, 0.0 }
  0xad   : > { %v1534_v24 = vrot.slane %v1139_v21, 1 }
  0xb0   : > { %v891_v20 = vpop.f32.mrf.mxu0 }
  0xb1   : > { %v892_v22 = vadd.f32 %v13087_v18, %v891_v20 }
  0xb3   : > { %v1140_v23 = vmax.f32 %v892_v22, 0.0 }
  0xb5   : > { %v1535_v25 = vrot.slane %v1140_v23, 1 }
  0xb7   : > { %v1536_v27 = vsel %vm1533_vm0, %v1534_v24, %v1535_v25 }
  0xb8   : > { %v894_v28 = vpop.f32.mrf.mxu0  ;;  %v1823_v29 = vmax.f32 %v1139_v21, %v1536_v27 }
  0xb9   : > { %v895_v30 = vadd.f32 %v13087_v18, %v894_v28 }
  0xbb   : > { %v1141_v31 = vmax.f32 %v895_v30, 0.0  ;;  %933 = vmatmul.bf16.gmra.mxu0 %v12387_v26 }
  0xbd   : > { %v1537_v32 = vrot.slane %v1141_v31, 1 }
  0xbf   : > { %v1538_v33 = vsel %vm1533_vm0, %v1535_v25, %v1537_v32 }
  0xc0   : > { %v896_v34 = vpop.f32.mrf.mxu0  ;;  %v1824_v35 = vmax.f32 %v1140_v23, %v1538_v33 }
  0xc1   : > { %v897_v36 = vadd.f32 %v13087_v18, %v896_v34 }
  0xc3   : > { %v1142_v37 = vmax.f32 %v897_v36, 0.0 }
  0xc5   : > { %v1539_v38 = vrot.slane %v1142_v37, 1 }
  0xc7   : > { %v1540_v40 = vsel %vm1533_vm0, %v1537_v32, %v1539_v38 }
  0xc8   : > { %v899_v41 = vpop.f32.mrf.mxu0  ;;  %v1825_v42 = vmax.f32 %v1141_v31, %v1540_v40 }
  0xc9   : > { %v900_v43 = vadd.f32 %v13087_v18, %v899_v41 }
  0xcb   : > { %v1143_v44 = vmax.f32 %v900_v43, 0.0  ;;  %938 = vmatmul.bf16.gmra.mxu0 %v12388_v39 }
  0xcd   : > { %v1541_v45 = vrot.slane %v1143_v44, 1 }
  0xcf   : > { %v1542_v46 = vsel %vm1533_vm0, %v1539_v38, %v1541_v45 }
  0xd0   : > { %v901_v47 = vpop.f32.mrf.mxu0  ;;  %v1826_v48 = vmax.f32 %v1142_v37, %v1542_v46 }
  0xd1   : > { %v902_v49 = vadd.f32 %v13087_v18, %v901_v47 }
  0xd2   : > { %v2237_v58 = vrot.slane %v1826_v48, 4 }
  0xd3   : > { %v1144_v50 = vmax.f32 %v902_v49, 0.0  ;;  %v12392_v49 = vld [vmem:[%s13073_s26 + $0x70] sm:$0xff] }
  0xd5   : > { %v1543_v51 = vrot.slane %v1144_v50, 1 }
  0xd7   : > { %v1544_v53 = vsel %vm1533_vm0, %v1541_v45, %v1543_v51 }
  0xd8   : > { %v904_v54 = vpop.f32.mrf.mxu0  ;;  %v13103_v55 = vmax.f32 %v1143_v44, %v1544_v53 }
  0xd9   : > { %v905_v56 = vadd.f32 %v13087_v18, %v904_v54 }
  0xda   : > { %v2238_v57 = vrot.slane %v13103_v55, 4 }
  0xdb   : > { %v1145_v59 = vmax.f32 %v905_v56, 0.0  ;;  %943 = vmatmul.bf16.gmra.mxu0 %v12389_v52 }
  0xdc   : > { %v2239_v60 = vsel %vm2236_vm1, %v2237_v58, %v2238_v57 }
  0xdd   : > { %v1545_v61 = vrot.slane %v1145_v59, 1  ;;  %v2526_v62 = vmax.f32 %v1823_v29, %v2239_v60  ;;  %v12391_v29 = vld [vmem:[%s13073_s26 + $0x68] sm:$0xff] }
  0xdf   : > { %v1546_v63 = vsel %vm1533_vm0, %v1543_v51, %v1545_v61 }
  0xe0   : > { %v906_v0 = vpop.f32.mrf.mxu0  ;;  %v1828_v1 = vmax.f32 %v1144_v50, %v1546_v63 }
  0xe1   : > { %v907_v2 = vadd.f32 %v13087_v18, %v906_v0 }
  0xe2   : > { %v2240_v3 = vrot.slane %v1828_v1, 4 }
  0xe3   : > { %v1146_v4 = vmax.f32 %v907_v2, 0.0 }
  0xe4   : > { %v2241_v5 = vsel %vm2236_vm1, %v2238_v57, %v2240_v3 }
  0xe5   : > { %v1547_v6 = vrot.slane %v1146_v4, 1  ;;  %v2527_v7 = vmax.f32 %v1824_v35, %v2241_v5  ;;  %v12393_v5 = vld [vmem:[%s13073_s26 + $0x78] sm:$0xff] }
  0xe7   : > { %v1548_v9 = vsel %vm1533_vm0, %v1545_v61, %v1547_v6  ;;  %v13113_v10 = vpack.c.bf16 %v2527_v7, %v2526_v62 }
  0xe8   : > { %v909_v11 = vpop.f32.mrf.mxu0  ;;  %v1829_v12 = vmax.f32 %v1145_v59, %v1548_v9 }
  0xe9   : > { %v910_v13 = vadd.f32 %v13087_v18, %v909_v11 }
  0xea   : > { %v2242_v14 = vrot.slane %v1829_v12, 4 }
  0xeb   : > { %v1147_v15 = vmax.f32 %v910_v13, 0.0  ;;  %948 = vmatmul.bf16.gmra.mxu0 %v12390_v8 }
  0xec   : > { %v2243_v16 = vsel %vm2236_vm1, %v2240_v3, %v2242_v14 }
  0xed   : > { %v1549_v17 = vrot.slane %v1147_v15, 1  ;;  %v2528_v19 = vmax.f32 %v1825_v42, %v2243_v16 }
  0xef   : > { %v1550_v20 = vsel %vm1533_vm0, %v1547_v6, %v1549_v17 }
  0xf0   : > { %v911_v21 = vpop.f32.mrf.mxu0  ;;  %v1830_v22 = vmax.f32 %v1146_v4, %v1550_v20 }
  0xf1   : > { %v912_v23 = vadd.f32 %v13087_v18, %v911_v21 }
  0xf2   : > { %v2244_v24 = vrot.slane %v1830_v22, 4 }
  0xf3   : > { %v1148_v25 = vmax.f32 %v912_v23, 0.0 }
  0xf4   : > { %v2245_v26 = vsel %vm2236_vm1, %v2242_v14, %v2244_v24 }
  0xf5   : > { %v1551_v27 = vrot.slane %v1148_v25, 1  ;;  %v2529_v28 = vmax.f32 %v1826_v48, %v2245_v26 }
  0xf7   : > { %v1552_v30 = vsel %vm1533_vm0, %v1549_v17, %v1551_v27  ;;  %v13122_v31 = vpack.c.bf16 %v2529_v28, %v2528_v19 }
  0xf8   : > { %v914_v32 = vpop.f32.mrf.mxu0  ;;  %v1831_v33 = vmax.f32 %v1147_v15, %v1552_v30 }
  0xf9   : > { %v915_v34 = vadd.f32 %v13087_v18, %v914_v32 }
  0xfa   : > { %v2246_v35 = vrot.slane %v1831_v33, 4 }
  0xfb   : > { %v1149_v36 = vmax.f32 %v915_v34, 0.0  ;;  %953 = vmatmul.bf16.gmra.mxu0 %v12391_v29 }
  0xfc   : > { %v2247_v37 = vsel %vm2236_vm1, %v2244_v24, %v2246_v35 }
  0xfd   : > { %v1553_v38 = vrot.slane %v1149_v36, 1  ;;  %v2530_v39 = vmax.f32 %v13103_v55, %v2247_v37 }
  0xff   : > { %v1554_v40 = vsel %vm1533_vm0, %v1551_v27, %v1553_v38  ;;  %v12394_v27 = vld [vmem:[%s13073_s26 + $0x80] sm:$0xff] }
 0x100   : > { %v916_v41 = vpop.f32.mrf.mxu0  ;;  %v1832_v42 = vmax.f32 %v1148_v25, %v1554_v40 }
 0x101   : > { %v917_v43 = vadd.f32 %v13087_v18, %v916_v41 }
 0x102   : > { %v2248_v44 = vrot.slane %v1832_v42, 4 }
 0x103   : > { %v1150_v45 = vmax.f32 %v917_v43, 0.0 }
 0x104   : > { %v2249_v46 = vsel %vm2236_vm1, %v2246_v35, %v2248_v44 }
 0x105   : > { %v1555_v47 = vrot.slane %v1150_v45, 1  ;;  %v2531_v48 = vmax.f32 %v1828_v1, %v2249_v46 }
 0x107   : > { %v1556_v50 = vsel %vm1533_vm0, %v1553_v38, %v1555_v47  ;;  %v13132_v51 = vpack.c.bf16 %v2531_v48, %v2530_v39 }
 0x108   : > { %v919_v52 = vpop.f32.mrf.mxu0  ;;  %v1833_v53 = vmax.f32 %v1149_v36, %v1556_v50 }
 0x109   : > { %v920_v54 = vadd.f32 %v13087_v18, %v919_v52 }
 0x10a   : > { %v2250_v55 = vrot.slane %v1833_v53, 4 }
 0x10b   : > { %v1151_v56 = vmax.f32 %v920_v54, 0.0  ;;  %958 = vmatmul.bf16.gmra.mxu0 %v12392_v49 }
 0x10c   : > { %v2251_v57 = vsel %vm2236_vm1, %v2248_v44, %v2250_v55 }
 0x10d   : > { %v1557_v58 = vrot.slane %v1151_v56, 1  ;;  %v2532_v59 = vmax.f32 %v1829_v12, %v2251_v57 }
 0x10f   : > { %v1558_v60 = vsel %vm1533_vm0, %v1555_v47, %v1557_v58 }
 0x110   : > { %v921_v61 = vpop.f32.mrf.mxu0  ;;  %v1834_v62 = vmax.f32 %v1150_v45, %v1558_v60  ;;  %v12395_v45 = vld [vmem:[%s13073_s26 + $0x88] sm:$0xff]  ;;  %v12396_v60 = vld [vmem:[%s13073_s26 + $0x90] sm:$0xff] }
 0x111   : > { %v922_v63 = vadd.f32 %v13087_v18, %v921_v61 }
 0x112   : > { %v2252_v0 = vrot.slane %v1834_v62, 4 }
 0x113   : > { %v1152_v1 = vmax.f32 %v922_v63, 0.0 }
 0x114   : > { %v2253_v2 = vsel %vm2236_vm1, %v2250_v55, %v2252_v0 }
 0x115   : > { %v1559_v3 = vrot.slane %v1152_v1, 1  ;;  %v2533_v4 = vmax.f32 %v1830_v22, %v2253_v2 }
 0x117   : > { %v1560_v6 = vsel %vm1533_vm0, %v1557_v58, %v1559_v3  ;;  %v13141_v7 = vpack.c.bf16 %v2533_v4, %v2532_v59 }
 0x118   : > { %v924_v8 = vpop.f32.mrf.mxu0  ;;  %v13143_v9 = vmax.f32 %v1151_v56, %v1560_v6 }
 0x119   : > { %v925_v11 = vadd.f32 %v13087_v18, %v924_v8 }
 0x11a   : > { %v2254_v12 = vrot.slane %v13143_v9, 4 }
 0x11b   : > { %v1153_v13 = vmax.f32 %v925_v11, 0.0  ;;  %963 = vmatmul.bf16.gmra.mxu0 %v12393_v5 }
 0x11c   : > { %v2255_v14 = vsel %vm2236_vm1, %v2252_v0, %v2254_v12 }
 0x11d   : > { %v1561_v15 = vrot.slane %v1153_v13, 1  ;;  %v2534_v16 = vmax.f32 %v1831_v33, %v2255_v14 }
 0x11f   : > { %v1562_v17 = vsel %vm1533_vm0, %v1559_v3, %v1561_v15 }
 0x120   : > { %v926_v19 = vpop.f32.mrf.mxu0  ;;  %v13149_v20 = vmax.f32 %v1152_v1, %v1562_v17 }
 0x121   : > { %v927_v21 = vadd.f32 %v13087_v18, %v926_v19 }
 0x122   : > { %v2256_v22 = vrot.slane %v13149_v20, 4 }
 0x123   : > { %v1154_v23 = vmax.f32 %v927_v21, 0.0 }
 0x124   : > { %v2257_v24 = vsel %vm2236_vm1, %v2254_v12, %v2256_v22 }
 0x125   : > { %v1563_v25 = vrot.slane %v1154_v23, 1  ;;  %v2535_v26 = vmax.f32 %v1832_v42, %v2257_v24 }
 0x127   : > { %v1564_v28 = vsel %vm1533_vm0, %v1561_v15, %v1563_v25  ;;  %v13156_v29 = vpack.c.bf16 %v2535_v26, %v2534_v16 }
 0x128   : > { %v929_v30 = vpop.f32.mrf.mxu0  ;;  %v1837_v33 = vmax.f32 %v1153_v13, %v1564_v28  ;;  %v12397_v28 = vld [vmem:[%s13073_s26 + $0x98] sm:$0xff] }
 0x129   : > { %v930_v32 = vadd.f32 %v13087_v18, %v929_v30 }
 0x12a   : > { %v2258_v36 = vrot.slane %v1837_v33, 4 }
 0x12b   : > { %v1155_v34 = vmax.f32 %v930_v32, 0.0  ;;  %968 = vmatmul.bf16.gmra.mxu0 %v12394_v27 }
 0x12c   : > { %v2259_v41 = vsel %vm2236_vm1, %v2256_v22, %v2258_v36 }
 0x12d   : > { %v1565_v35 = vrot.slane %v1155_v34, 1  ;;  %v2536_v43 = vmax.f32 %v1833_v53, %v2259_v41 }
 0x12f   : > { %v1566_v37 = vsel %vm1533_vm0, %v1563_v25, %v1565_v35 }
 0x130   : > { %v931_v38 = vpop.f32.mrf.mxu0  ;;  %v1838_v39 = vmax.f32 %v1154_v23, %v1566_v37 }
 0x131   : > { %v932_v49 = vadd.f32 %v13087_v18, %v931_v38 }
 0x132   : > { %v2260_v40 = vrot.slane %v1838_v39, 4 }
 0x133   : > { %v1156_v55 = vmax.f32 %v932_v49, 0.0 }
 0x134   : > { %v2261_v42 = vsel %vm2236_vm1, %v2258_v36, %v2260_v40 }
 0x135   : > { %v2537_v44 = vmax.f32 %v1834_v62, %v2261_v42  ;;  %v1567_v59 = vrot.slane %v1156_v55, 1 }
 0x137   : > { %v2627_v46 = vpack.c.bf16 %v2537_v44, %v2536_v43  ;;  %v1568_v1 = vsel %vm1533_vm0, %v1565_v35, %v1567_v59 }
 0x138   : > { %v934_v47 = vpop.f32.mrf.mxu0  ;;  %v1839_v5 = vmax.f32 %v1155_v34, %v1568_v1 }
 0x139   : > { %v935_v48 = vadd.f32 %v13087_v18, %v934_v47 }
 0x13a   : > { %v2262_v17 = vrot.slane %v1839_v5, 4 }
 0x13b   : > { %973 = vmatmul.bf16.gmra.mxu0 %v12395_v45  ;;  %v1157_v52 = vmax.f32 %v935_v48, 0.0 }
 0x13c   : > { %v2263_v26 = vsel %vm2236_vm1, %v2260_v40, %v2262_v17 }
 0x13d   : > { %v1569_v57 = vrot.slane %v1157_v52, 1  ;;  %v2538_v37 = vmax.f32 %v13143_v9, %v2263_v26 }
 0x13f   : > { %v1570_v62 = vsel %vm1533_vm0, %v1567_v59, %v1569_v57 }
 0x140   : > { %v936_v50 = vpop.f32.mrf.mxu0  ;;  %v1840_v3 = vmax.f32 %v1156_v55, %v1570_v62 }
 0x141   : > { %v937_v54 = vadd.f32 %v13087_v18, %v936_v50 }
 0x142   : > { %v2264_v13 = vrot.slane %v1840_v3, 4 }
 0x143   : > { %v1158_v56 = vmax.f32 %v937_v54, 0.0 }
 0x144   : > { %v2265_v22 = vsel %vm2236_vm1, %v2262_v17, %v2264_v13 }
 0x145   : > { %v1571_v58 = vrot.slane %v1158_v56, 1  ;;  %v2539_v30 = vmax.f32 %v13149_v20, %v2265_v22 }
 0x147   : > { %v1572_v53 = vsel %vm1533_vm0, %v1569_v57, %v1571_v58 }
 0x148   : > { %v939_v61 = vpop.f32.mrf.mxu0  ;;  %v13170_v0 = vmax.f32 %v1157_v52, %v1572_v53  ;;  %v12398_v52 = vld [vmem:[%s13073_s26 + $0xa0] sm:$0xff] }
 0x149   : > { %v940_v63 = vadd.f32 %v13087_v18, %v939_v61 }
 0x14a   : > { %v2266_v6 = vrot.slane %v13170_v0, 4 }
 0x14b   : > { %v1159_v2 = vmax.f32 %v940_v63, 0.0  ;;  %978 = vmatmul.bf16.gmra.mxu0 %v12396_v60 }
 0x14c   : > { %v2267_v15 = vsel %vm2236_vm1, %v2264_v13, %v2266_v6 }
 0x14d   : > { %v1573_v4 = vrot.slane %v1159_v2, 1  ;;  %v2540_v24 = vmax.f32 %v1837_v33, %v2267_v15 }
 0x14f   : > { %v1574_v8 = vsel %vm1533_vm0, %v1571_v58, %v1573_v4 }
 0x150   : > { %v13175_v11 = vmax.f32 %v1158_v56, %v1574_v8  ;;  %v941_v12 = vpop.f32.mrf.mxu0 }
 0x151   : > { %v942_v14 = vadd.f32 %v13087_v18, %v941_v12 }
 0x152   : > { %v2268_v16 = vrot.slane %v13175_v11, 4 }
 0x153   : > { %v1160_v19 = vmax.f32 %v942_v14, 0.0 }
 0x154   : > { %v2269_v21 = vsel %vm2236_vm1, %v2266_v6, %v2268_v16 }
 0x155   : > { %v1575_v23 = vrot.slane %v1160_v19, 1  ;;  %v2541_v25 = vmax.f32 %v1838_v39, %v2269_v21  ;;  %v2628_v39 = vpack.c.bf16 %v2539_v30, %v2538_v37 }
 0x157   : > { %v2629_v27 = vpack.c.bf16 %v2541_v25, %v2540_v24  ;;  %v1576_v32 = vsel %vm1533_vm0, %v1573_v4, %v1575_v23 }
 0x158   : > { %v944_v34 = vpop.f32.mrf.mxu0  ;;  %v13186_v35 = vmax.f32 %v1159_v2, %v1576_v32 }
 0x159   : > { %v945_v36 = vadd.f32 %v13087_v18, %v944_v34  ;;  %3246 = vmatpush.bf16.msra.mxu1 %v2629_v27  ;;  %v12400_v27 = vld [vmem:[%s13073_s26 + $0xb0] sm:$0xff] }
 0x15a   : > { %v2270_v38 = vrot.slane %v13186_v35, 4 }
 0x15b   : > { %v1161_v33 = vmax.f32 %v945_v36, 0.0  ;;  %983 = vmatmul.bf16.gmra.mxu0 %v12397_v28 }
 0x15c   : > { %v2271_v40 = vsel %vm2236_vm1, %v2268_v16, %v2270_v38 }
 0x15d   : > { %v1577_v41 = vrot.slane %v1161_v33, 1  ;;  %3247 = vmatpush.bf16.msra.mxu1 %v2628_v39  ;;  %v2542_v20 = vmax.f32 %v1839_v5, %v2271_v40 }
 0x15f   : > { %v1578_v42 = vsel %vm1533_vm0, %v1575_v23, %v1577_v41 }
 0x160   : > { %v946_v43 = vpop.f32.mrf.mxu0  ;;  %v1844_v44 = vmax.f32 %v1160_v19, %v1578_v42 }
 0x161   : > { %v947_v45 = vadd.f32 %v13087_v18, %v946_v43  ;;  %3248 = vmatpush.bf16.msra.mxu1 %v2627_v46 }
 0x162   : > { %v2272_v47 = vrot.slane %v1844_v44, 4 }
 0x163   : > { %v1162_v9 = vmax.f32 %v947_v45, 0.0 }
 0x164   : > { %v2273_v48 = vsel %vm2236_vm1, %v2270_v38, %v2272_v47 }
 0x165   : > { %v1579_v49 = vrot.slane %v1162_v9, 1  ;;  %3249 = vmatpush.bf16.msra.mxu1 %v13156_v29  ;;  %v2543_v50 = vmax.f32 %v1840_v3, %v2273_v48  ;;  %v12401_v48 = vld [vmem:[%s13073_s26 + $0xb8] sm:$0xff] }
 0x167   : > { %v1580_v54 = vsel %vm1533_vm0, %v1577_v41, %v1579_v49  ;;  %v13198_v55 = vpack.c.bf16 %v2543_v50, %v2542_v20 }
 0x168   : > { %v949_v56 = vpop.f32.mrf.mxu0  ;;  %v13200_v57 = vmax.f32 %v1161_v33, %v1580_v54 }
 0x169   : > { %v950_v58 = vadd.f32 %v13087_v18, %v949_v56  ;;  %3250 = vmatpush.bf16.msra.mxu1 %v13141_v7 }
 0x16a   : > { %v2274_v46 = vrot.slane %v13200_v57, 4 }
 0x16b   : > { %v1163_v59 = vmax.f32 %v950_v58, 0.0  ;;  %988 = vmatmul.bf16.gmra.mxu0 %v12398_v52 }
 0x16c   : > { %v2275_v29 = vsel %vm2236_vm1, %v2272_v47, %v2274_v46 }
 0x16d   : > { %v1581_v53 = vrot.slane %v1163_v59, 1  ;;  %3251 = vmatpush.bf16.msra.mxu1 %v13132_v51  ;;  %v2544_v60 = vmax.f32 %v13170_v0, %v2275_v29  ;;  %v12399_v51 = vld [vmem:[%s13073_s26 + $0xa8] sm:$0xff] }
 0x16f   : > { %v1582_v61 = vsel %vm1533_vm0, %v1579_v49, %v1581_v53 }
 0x170   : > { %v951_v62 = vpop.f32.mrf.mxu0  ;;  %v1846_v63 = vmax.f32 %v1162_v9, %v1582_v61 }
 0x171   : > { %v952_v1 = vadd.f32 %v13087_v18, %v951_v62  ;;  %3252 = vmatpush.bf16.msra.mxu1 %v13122_v31 }
 0x172   : > { %v2276_v7 = vrot.slane %v1846_v63, 4 }
 0x173   : > { %v1164_v2 = vmax.f32 %v952_v1, 0.0 }
 0x174   : > { %v2277_v3 = vsel %vm2236_vm1, %v2274_v46, %v2276_v7 }
 0x175   : > { %v1583_v4 = vrot.slane %v1164_v2, 1  ;;  %3253 = vmatpush.bf16.msra.mxu1 %v13113_v10  ;;  %v2545_v5 = vmax.f32 %v13175_v11, %v2277_v3 }
 0x177   : > { %v1584_v0 = vsel %vm1533_vm0, %v1581_v53, %v1583_v4  ;;  %v13216_v6 = vpack.c.bf16 %v2545_v5, %v2544_v60 }
 0x178   : > { %v954_v8 = vpop.f32.mrf.mxu0  ;;  %v1847_v12 = vmax.f32 %v1163_v59, %v1584_v0 }
 0x179   : > { %v955_v13 = vadd.f32 %v13087_v18, %v954_v8 }
 0x17a   : > { %v2278_v31 = vrot.slane %v1847_v12, 4 }
 0x17b   : > { %v1165_v14 = vmax.f32 %v955_v13, 0.0  ;;  %993 = vmatmul.bf16.gmra.mxu0 %v12399_v51 }
 0x17c   : > { %v2279_v15 = vsel %vm2236_vm1, %v2276_v7, %v2278_v31 }
 0x17d   : > { %v1585_v16 = vrot.slane %v1165_v14, 1  ;;  %v2546_v10 = vmax.f32 %v13186_v35, %v2279_v15 }
 0x17f   : > { %v1586_v11 = vsel %vm1533_vm0, %v1583_v4, %v1585_v16  ;;  %v12402_v4 = vld [vmem:[%s13073_s26 + $0xc0] sm:$0xff] }
 0x180   : > { %v956_v17 = vpop.f32.mrf.mxu0  ;;  %v1848_v19 = vmax.f32 %v1164_v2, %v1586_v11 }
 0x181   : > { %v957_v21 = vadd.f32 %v13087_v18, %v956_v17 }
 0x182   : > { %v2280_v22 = vrot.slane %v1848_v19, 4 }
 0x183   : > { %v1166_v23 = vmax.f32 %v957_v21, 0.0 }
 0x184   : > { %v2281_v24 = vsel %vm2236_vm1, %v2278_v31, %v2280_v22 }
 0x185   : > { %v1587_v25 = vrot.slane %v1166_v23, 1  ;;  %v2547_v26 = vmax.f32 %v1844_v44, %v2281_v24 }
 0x187   : > { %v1588_v28 = vsel %vm1533_vm0, %v1585_v16, %v1587_v25  ;;  %v13226_v30 = vpack.c.bf16 %v2547_v26, %v2546_v10 }
 0x188   : > { %v959_v32 = vpop.f32.mrf.mxu0  ;;  %v1849_v34 = vmax.f32 %v1165_v14, %v1588_v28 }
 0x189   : > { %v960_v35 = vadd.f32 %v13087_v18, %v959_v32 }
 0x18a   : > { %v2282_v36 = vrot.slane %v1849_v34, 4 }
 0x18b   : > { %v1167_v37 = vmax.f32 %v960_v35, 0.0  ;;  %998 = vmatmul.bf16.gmra.mxu0 %v12400_v27 }
 0x18c   : > { %v2283_v38 = vsel %vm2236_vm1, %v2280_v22, %v2282_v36 }
 0x18d   : > { %v1589_v33 = vrot.slane %v1167_v37, 1  ;;  %v2548_v39 = vmax.f32 %v13200_v57, %v2283_v38 }
 0x18f   : > { %v1590_v40 = vsel %vm1533_vm0, %v1587_v25, %v1589_v33 }
 0x190   : > { %v961_v41 = vpop.f32.mrf.mxu0  ;;  %v1850_v20 = vmax.f32 %v1166_v23, %v1590_v40  ;;  %v12403_v23 = vld [vmem:[%s13073_s26 + $0xc8] sm:$0xff]  ;;  %v12404_v40 = vld [vmem:[%s13073_s26 + $0xd0] sm:$0xff] }
 0x191   : > { %v962_v42 = vadd.f32 %v13087_v18, %v961_v41 }
 0x192   : > { %v2284_v43 = vrot.slane %v1850_v20, 4 }
 0x193   : > { %v1168_v44 = vmax.f32 %v962_v42, 0.0 }
 0x194   : > { %v2285_v45 = vsel %vm2236_vm1, %v2282_v36, %v2284_v43 }
 0x195   : > { %v1591_v47 = vrot.slane %v1168_v44, 1  ;;  %v2549_v9 = vmax.f32 %v1846_v63, %v2285_v45 }
 0x197   : > { %v1592_v49 = vsel %vm1533_vm0, %v1589_v33, %v1591_v47  ;;  %v13236_v50 = vpack.c.bf16 %v2549_v9, %v2548_v39 }
 0x198   : > { %v964_v52 = vpop.f32.mrf.mxu0  ;;  %v13238_v54 = vmax.f32 %v1167_v37, %v1592_v49 }
 0x199   : > { %v965_v56 = vadd.f32 %v13087_v18, %v964_v52 }
 0x19a   : > { %v2286_v57 = vrot.slane %v13238_v54, 4 }
 0x19b   : > { %v1169_v58 = vmax.f32 %v965_v56, 0.0  ;;  %1003 = vmatmul.bf16.gmra.mxu0 %v12401_v48 }
 0x19c   : > { %v2287_v46 = vsel %vm2236_vm1, %v2284_v43, %v2286_v57 }
 0x19d   : > { %v1593_v59 = vrot.slane %v1169_v58, 1  ;;  %v2550_v29 = vmax.f32 %v1847_v12, %v2287_v46 }
 0x19f   : > { %v1594_v53 = vsel %vm1533_vm0, %v1591_v47, %v1593_v59 }
 0x1a0   : > { %v966_v60 = vpop.f32.mrf.mxu0  ;;  %v13244_v61 = vmax.f32 %v1168_v44, %v1594_v53 }
 0x1a1   : > { %v967_v62 = vadd.f32 %v13087_v18, %v966_v60 }
 0x1a2   : > { %v2288_v63 = vrot.slane %v13244_v61, 4 }
 0x1a3   : > { %v1170_v1 = vmax.f32 %v967_v62, 0.0 }
 0x1a4   : > { %v2289_v7 = vsel %vm2236_vm1, %v2286_v57, %v2288_v63 }
 0x1a5   : > { %v1595_v2 = vrot.slane %v1170_v1, 1  ;;  %v2551_v3 = vmax.f32 %v1848_v19, %v2289_v7 }
 0x1a7   : > { %v1596_v5 = vsel %vm1533_vm0, %v1593_v59, %v1595_v2  ;;  %v13251_v51 = vpack.c.bf16 %v2551_v3, %v2550_v29  ;;  %v10330_v3 = vld [vmem:[%s18229_s3] sm:$0xf] }
 0x1a8   : > { %v969_v0 = vpop.f32.mrf.mxu0  ;;  %v1853_v12 = vmax.f32 %v1169_v58, %v1596_v5 }
 0x1a9   : > { %v970_v8 = vadd.f32 %v13087_v18, %v969_v0 }
 0x1aa   : > { %v2290_v14 = vrot.slane %v1853_v12, 4 }
 0x1ab   : > { %v1171_v13 = vmax.f32 %v970_v8, 0.0  ;;  %1008 = vmatmul.bf16.gmra.mxu0 %v12402_v4  ;;  %v12439_v4 = vld [vmem:[%s18229_s3 + $0x14] sm:$0xf0] }
 0x1ac   : > { %v2291_v17 = vsel %vm2236_vm1, %v2288_v63, %v2290_v14  ;;  %v10331_v0 = vor.u32 %v12439_v4, %v10330_v3 }
 0x1ad   : > { %v1597_v31 = vrot.slane %v1171_v13, 1  ;;  %v2552_v21 = vmax.f32 %v1849_v34, %v2291_v17 }
 0x1ae   : > { %3254 = vmatmul.bf16.vlgmr.msra.gmra.mxu1 %v10331_v0 }
 0x1af   : > { %v1598_v15 = vsel %vm1533_vm0, %v1595_v2, %v1597_v31 }
 0x1b0   : > { %v971_v16 = vpop.f32.mrf.mxu0  ;;  %v1854_v10 = vmax.f32 %v1170_v1, %v1598_v15 }
 0x1b1   : > { %v972_v27 = vadd.f32 %v13087_v18, %v971_v16 }
 0x1b2   : > { %v2292_v11 = vrot.slane %v1854_v10, 4 }
 0x1b3   : > { %v1172_v36 = vmax.f32 %v972_v27, 0.0 }
 0x1b4   : > { %v2293_v19 = vsel %vm2236_vm1, %v2290_v14, %v2292_v11 }
 0x1b5   : > { %v2553_v22 = vmax.f32 %v1850_v20, %v2293_v19  ;;  %v1599_v34 = vrot.slane %v1172_v36, 1 }
 0x1b7   : > { %v13258_v24 = vpack.c.bf16 %v2553_v22, %v2552_v21  ;;  %v1600_v44 = vsel %vm1533_vm0, %v1597_v31, %v1599_v34 }
 0x1b8   : > { %v974_v25 = vpop.f32.mrf.mxu0  ;;  %v1855_v48 = vmax.f32 %v1171_v13, %v1600_v44  ;;  %v12405_v13 = vld [vmem:[%s13073_s26 + $0xd8] sm:$0xff] }
 0x1b9   : > { %v975_v26 = vadd.f32 %v13087_v18, %v974_v25 }
 0x1ba   : > { %v2294_v53 = vrot.slane %v1855_v48, 4 }
 0x1bb   : > { %1013 = vmatmul.bf16.gmra.mxu0 %v12403_v23  ;;  %v1173_v32 = vmax.f32 %v975_v26, 0.0 }
 0x1bc   : > { %v2295_v5 = vsel %vm2236_vm1, %v2292_v11, %v2294_v53 }
 0x1bd   : > { %v1601_v38 = vrot.slane %v1173_v32, 1 }
 0x1bf   : > { %v1602_v20 = vsel %vm1533_vm0, %v1599_v34, %v1601_v38  ;;  %v12406_v34 = vld [vmem:[%s13073_s26 + $0xe0] sm:$0xff] }
 0x1c0   : > { %v976_v28 = vpop.f32.mrf.mxu0  ;;  %v1856_v47 = vmax.f32 %v1172_v36, %v1602_v20  ;;  %v10354_v36 = vld [vmem:[%s18229_s3 + $0x30] sm:$0xf] }
 0x1c1   : > { %v977_v35 = vadd.f32 %v13087_v18, %v976_v28 }
 0x1c2   : > { %v2296_v58 = vrot.slane %v1856_v47, 4 }
 0x1c3   : > { %v1174_v37 = vmax.f32 %v977_v35, 0.0 }
 0x1c4   : > { %v2297_v63 = vsel %vm2236_vm1, %v2294_v53, %v2296_v58 }
 0x1c5   : > { %v1603_v33 = vrot.slane %v1174_v37, 1  ;;  %v2555_v31 = vmax.f32 %v13244_v61, %v2297_v63 }
 0x1c7   : > { %v1604_v39 = vsel %vm1533_vm0, %v1601_v38, %v1603_v33 }
 0x1c8   : > { %v979_v41 = vpop.f32.mrf.mxu0  ;;  %v13267_v43 = vmax.f32 %v1173_v32, %v1604_v39 }
 0x1c9   : > { %v980_v42 = vadd.f32 %v13087_v18, %v979_v41 }
 0x1ca   : > { %v2298_v49 = vrot.slane %v13267_v43, 4 }
 0x1cb   : > { %v1175_v45 = vmax.f32 %v980_v42, 0.0  ;;  %1018 = vmatmul.bf16.gmra.mxu0 %v12404_v40 }
 0x1cc   : > { %v2299_v59 = vsel %vm2236_vm1, %v2296_v58, %v2298_v49 }
 0x1cd   : > { %v1605_v9 = vrot.slane %v1175_v45, 1  ;;  %v2556_v7 = vmax.f32 %v1853_v12, %v2299_v59 }
 0x1cf   : > { %v1606_v52 = vsel %vm1533_vm0, %v1603_v33, %v1605_v9 }
 0x1d0   : > { %v13272_v56 = vmax.f32 %v1174_v37, %v1606_v52  ;;  %v981_v57 = vpop.f32.mrf.mxu0  ;;  %v12445_v37 = vld [vmem:[%s18229_s3 + $0x44] sm:$0xf0] }
 0x1d1   : > { %v982_v46 = vadd.f32 %v13087_v18, %v981_v57  ;;  %v10355_v33 = vor.u32 %v12445_v37, %v10354_v36 }
 0x1d2   : > { %v2300_v29 = vrot.slane %v13272_v56, 4 }
 0x1d3   : > { %v1176_v60 = vmax.f32 %v982_v46, 0.0  ;;  %3259 = vmatmul.bf16.gmra.mxu1 %v10355_v33 }
 0x1d4   : > { %v2301_v62 = vsel %vm2236_vm1, %v2298_v49, %v2300_v29 }
 0x1d5   : > { %v1607_v1 = vrot.slane %v1176_v60, 1  ;;  %v2557_v2 = vmax.f32 %v1854_v10, %v2301_v62  ;;  %v2554_v10 = vmax.f32 %v13238_v54, %v2295_v5 }
 0x1d7   : > { %v2637_v8 = vpack.c.bf16 %v2557_v2, %v2556_v7  ;;  %v1608_v14 = vsel %vm1533_vm0, %v1605_v9, %v1607_v1  ;;  %v2636_v11 = vpack.c.bf16 %v2555_v31, %v2554_v10  ;;  %v10402_v10 = vld [vmem:[%s18229_s3 + $0x90] sm:$0xf] }
 0x1d8   : > { %v984_v15 = vpop.f32.mrf.mxu0  ;;  %v13289_v12 = vmax.f32 %v1175_v45, %v1608_v14 }
 0x1d9   : > { %v985_v16 = vadd.f32 %v13087_v18, %v984_v15  ;;  %3333 = vmatpush.bf16.msra.mxu2 %v2637_v8 }
 0x1da   : > { %v2302_v17 = vrot.slane %v13289_v12, 4 }
 0x1db   : > { %v1177_v19 = vmax.f32 %v985_v16, 0.0  ;;  %1023 = vmatmul.bf16.gmra.mxu0 %v12405_v13 }
 0x1dc   : > { %v2303_v21 = vsel %vm2236_vm1, %v2300_v29, %v2302_v17 }
 0x1dd   : > { %v1609_v22 = vrot.slane %v1177_v19, 1  ;;  %3334 = vmatpush.bf16.msra.mxu2 %v2636_v11  ;;  %v2558_v61 = vmax.f32 %v1855_v48, %v2303_v21 }
 0x1df   : > { %v1610_v23 = vsel %vm1533_vm0, %v1607_v1, %v1609_v22 }
 0x1e0   : > { %v986_v25 = vpop.f32.mrf.mxu0  ;;  %v13296_v26 = vmax.f32 %v1176_v60, %v1610_v23 }
 0x1e1   : > { %v987_v27 = vadd.f32 %v13087_v18, %v986_v25  ;;  %3335 = vmatpush.bf16.msra.mxu2 %v13258_v24 }
 0x1e2   : > { %v2304_v54 = vrot.slane %v13296_v26, 4 }
 0x1e3   : > { %v1178_v28 = vmax.f32 %v987_v27, 0.0 }
 0x1e4   : > { %v2305_v32 = vsel %vm2236_vm1, %v2302_v17, %v2304_v54 }
 0x1e5   : > { %v1611_v35 = vrot.slane %v1178_v28, 1  ;;  %3336 = vmatpush.bf16.msra.mxu2 %v13251_v51  ;;  %v2559_v38 = vmax.f32 %v1856_v47, %v2305_v32 }
 0x1e7   : > { %v1612_v24 = vsel %vm1533_vm0, %v1609_v22, %v1611_v35  ;;  %v13311_v39 = vpack.c.bf16 %v2559_v38, %v2558_v61 }
 0x1e8   : > { %v989_v40 = vpop.f32.mrf.mxu0  ;;  %v13313_v41 = vmax.f32 %v1177_v19, %v1612_v24  ;;  %v12408_v19 = vld [vmem:[%s13073_s26 + $0xf0] sm:$0xff] }
 0x1e9   : > { %v990_v51 = vadd.f32 %v13087_v18, %v989_v40  ;;  %3337 = vmatpush.bf16.msra.mxu2 %v13236_v50 }
 0x1ea   : > { %v2306_v20 = vrot.slane %v13313_v41, 4 }
 0x1eb   : > { %v1179_v42 = vmax.f32 %v990_v51, 0.0  ;;  %1028 = vmatmul.bf16.gmra.mxu0 %v12406_v34  ;;  %v10426_v51 = vld [vmem:[%s18229_s3 + $0xc0] sm:$0xf] }
 0x1ec   : > { %v2307_v44 = vsel %vm2236_vm1, %v2304_v54, %v2306_v20 }
 0x1ed   : > { %v1613_v45 = vrot.slane %v1179_v42, 1  ;;  %3338 = vmatpush.bf16.msra.mxu2 %v13226_v30  ;;  %v2560_v47 = vmax.f32 %v13267_v43, %v2307_v44  ;;  %v10378_v30 = vld [vmem:[%s18229_s3 + $0x60] sm:$0xf]  ;;  %v12451_v43 = vld [vmem:[%s18229_s3 + $0x74] sm:$0xf0] }
 0x1ee   : > { %v10379_v29 = vor.u32 %v12451_v43, %v10378_v30 }
 0x1ef   : > { %v1614_v9 = vsel %vm1533_vm0, %v1611_v35, %v1613_v45 }
 0x1f0   : > { %v991_v48 = vpop.f32.mrf.mxu0  ;;  %v13322_v49 = vmax.f32 %v1178_v28, %v1614_v9  ;;  %3264 = vmatmul.bf16.gmra.mxu1 %v10379_v29 }
 0x1f1   : > { %v992_v52 = vadd.f32 %v13087_v18, %v991_v48  ;;  %3339 = vmatpush.bf16.msra.mxu2 %v13216_v6  ;;  %v12407_v6 = vld [vmem:[%s13073_s26 + $0xe8] sm:$0xff] }
 0x1f2   : > { %v2308_v50 = vrot.slane %v13322_v49, 4 }
 0x1f3   : > { %v1180_v57 = vmax.f32 %v992_v52, 0.0 }
 0x1f4   : > { %v2309_v58 = vsel %vm2236_vm1, %v2306_v20, %v2308_v50 }
 0x1f5   : > { %v1615_v46 = vrot.slane %v1180_v57, 1  ;;  %3340 = vmatpush.bf16.msra.mxu2 %v13198_v55  ;;  %v2561_v59 = vmax.f32 %v13272_v56, %v2309_v58 }
 0x1f7   : > { %v1616_v53 = vsel %vm1533_vm0, %v1613_v45, %v1615_v46  ;;  %v13338_v60 = vpack.c.bf16 %v2561_v59, %v2560_v47 }
 0x1f8   : > { %v994_v62 = vpop.f32.mrf.mxu0  ;;  %v13340_v63 = vmax.f32 %v1179_v42, %v1616_v53  ;;  %v12409_v42 = vld [vmem:[%s13073_s26 + $0xf8] sm:$0xff] }
 0x1f9   : > { %v995_v55 = vadd.f32 %v13087_v18, %v994_v62 }
 0x1fa   : > { %v2310_v1 = vrot.slane %v13340_v63, 4 }
 0x1fb   : > { %v1181_v7 = vmax.f32 %v995_v55, 0.0  ;;  %1033 = vmatmul.bf16.gmra.mxu0 %v12407_v6 }
 0x1fc   : > { %v2311_v2 = vsel %vm2236_vm1, %v2308_v50, %v2310_v1 }
 0x1fd   : > { %v1617_v56 = vrot.slane %v1181_v7, 1  ;;  %v2562_v3 = vmax.f32 %v13289_v12, %v2311_v2  ;;  %v12457_v12 = vld [vmem:[%s18229_s3 + $0xa4] sm:$0xf0]  ;;  %v12410_v2 = vld [vmem:[%s13073_s26 + $0x100] sm:$0xff] }
 0x1fe   : > { %v10403_v17 = vor.u32 %v12457_v12, %v10402_v10 }
 0x1ff   : > { %v1618_v4 = vsel %vm1533_vm0, %v1615_v46, %v1617_v56 }
 0x200   : > { %v996_v5 = vpop.f32.mrf.mxu0  ;;  %v13347_v0 = vmax.f32 %v1180_v57, %v1618_v4  ;;  %3269 = vmatmul.bf16.gmra.mxu1 %v10403_v17  ;;  %v13409_v4 = vld [vmem:[%s18228_s2] ss:$0 sm:$0xff] }
 0x201   : > { %v997_v8 = vadd.f32 %v13087_v18, %v996_v5 }
 0x202   : > { %v2312_v13 = vrot.slane %v13347_v0, 4 }
 0x203   : > { %v1182_v31 = vmax.f32 %v997_v8, 0.0 }
 0x204   : > { %v2313_v14 = vsel %vm2236_vm1, %v2310_v1, %v2312_v13  ;;  %v10450_v1 = vld [vmem:[%s18229_s3 + $0xf0] sm:$0xf] }
 0x205   : > { %v1619_v15 = vrot.slane %v1182_v31, 1  ;;  %v2563_v16 = vmax.f32 %v13296_v26, %v2313_v14 }
 0x207   : > { %v1620_v11 = vsel %vm1533_vm0, %v1617_v56, %v1619_v15  ;;  %v13361_v21 = vpack.c.bf16 %v2563_v16, %v2562_v3 }
 0x208   : > { %v999_v22 = vpop.f32.mrf.mxu0  ;;  %v13363_v61 = vmax.f32 %v1181_v7, %v1620_v11 }
 0x209   : > { %v1000_v23 = vadd.f32 %v13087_v18, %v999_v22  ;;  %v10474_v22 = vld [vmem:[%s18229_s3 + $0x120] sm:$0xf] }
 0x20a   : > { %v2314_v25 = vrot.slane %v13363_v61, 4 }
 0x20b   : > { %v1183_v26 = vmax.f32 %v1000_v23, 0.0  ;;  %1038 = vmatmul.bf16.gmra.mxu0 %v12408_v19  ;;  %v12475_v23 = vld [vmem:[%s18229_s3 + $0x134] sm:$0xf0] }
 0x20c   : > { %v2315_v27 = vsel %vm2236_vm1, %v2312_v13, %v2314_v25 }
 0x20d   : > { %v1621_v54 = vrot.slane %v1183_v26, 1  ;;  %v2564_v28 = vmax.f32 %v13313_v41, %v2315_v27  ;;  %v12463_v41 = vld [vmem:[%s18229_s3 + $0xd4] sm:$0xf0] }
 0x20e   : > { %v10427_v20 = vor.u32 %v12463_v41, %v10426_v51 }
 0x20f   : > { %v1622_v32 = vsel %vm1533_vm0, %v1619_v15, %v1621_v54 }
 0x210   : > { %v1001_v35 = vpop.f32.mrf.mxu0  ;;  %v1866_v36 = vmax.f32 %v1182_v31, %v1622_v32  ;;  %3274 = vmatmul.bf16.gmra.mxu1 %v10427_v20 }
 0x211   : > { %v1002_v37 = vadd.f32 %v13087_v18, %v1001_v35 }
 0x212   : > { %v2316_v38 = vrot.slane %v1866_v36, 4 }
 0x213   : > { %v1184_v33 = vmax.f32 %v1002_v37, 0.0 }
 0x214   : > { %v2317_v34 = vsel %vm2236_vm1, %v2314_v25, %v2316_v38  ;;  %v10475_v25 = vor.u32 %v12475_v23, %v10474_v22 }
 0x215   : > { %v1623_v24 = vrot.slane %v1184_v33, 1  ;;  %v2565_v40 = vmax.f32 %v13322_v49, %v2317_v34 }
 0x217   : > { %v1624_v44 = vsel %vm1533_vm0, %v1621_v54, %v1623_v24  ;;  %v13381_v45 = vpack.c.bf16 %v2565_v40, %v2564_v28  ;;  %v12481_v40 = vld [vmem:[%s18229_s3 + $0x164] sm:$0xf0] }
 0x218   : > { %v1004_v47 = vpop.f32.mrf.mxu0  ;;  %v13383_v9 = vmax.f32 %v1183_v26, %v1624_v44  ;;  %v12411_v26 = vld [vmem:[%s13073_s26 + $0x108] sm:$0xff] }
 0x219   : > { %v1005_v48 = vadd.f32 %v13087_v18, %v1004_v47 }
 0x21a   : > { %v2318_v49 = vrot.slane %v13383_v9, 4 }
 0x21b   : > { %v1185_v52 = vmax.f32 %v1005_v48, 0.0  ;;  %1043 = vmatmul.bf16.gmra.mxu0 %v12409_v42  ;;  %v12412_v42 = vld [vmem:[%s13073_s26 + $0x110] sm:$0xff] }
 0x21c   : > { %v2319_v50 = vsel %vm2236_vm1, %v2316_v38, %v2318_v49 }
 0x21d   : > { %v1625_v57 = vrot.slane %v1185_v52, 1  ;;  %v2566_v58 = vmax.f32 %v13340_v63, %v2319_v50  ;;  %v12469_v63 = vld [vmem:[%s18229_s3 + $0x104] sm:$0xf0] }
 0x21e   : > { %v10451_v7 = vor.u32 %v12469_v63, %v10450_v1 }
 0x21f   : > { %v1626_v46 = vsel %vm1533_vm0, %v1623_v24, %v1625_v57  ;;  %v10498_v24 = vld [vmem:[%s18229_s3 + $0x150] sm:$0xf] }
 0x220   : > { %v1006_v30 = vpop.f32.mrf.mxu0  ;;  %v13390_v43 = vmax.f32 %v1184_v33, %v1626_v46  ;;  %3279 = vmatmul.bf16.gmra.mxu1 %v10451_v7  ;;  %v10499_v51 = vor.u32 %v12481_v40, %v10498_v24 }
 0x221   : > { %v1007_v59 = vadd.f32 %v13087_v18, %v1006_v30 }
 0x222   : > { %v2320_v29 = vrot.slane %v13390_v43, 4 }
 0x223   : > { %v1186_v6 = vmax.f32 %v1007_v59, 0.0 }
 0x224   : > { %v2321_v53 = vsel %vm2236_vm1, %v2318_v49, %v2320_v29 }
 0x225   : > { %v1627_v62 = vrot.slane %v1186_v6, 1  ;;  %v2567_v55 = vmax.f32 %v13347_v0, %v2321_v53 }
 0x227   : > { %v1628_v18 = vsel %vm1533_vm0, %v1625_v57, %v1627_v62  ;;  %v13404_v56 = vpack.c.bf16 %v2567_v55, %v2566_v58 }
 0x228   : > { %v1009_v3 = vpop.f32.mrf.mxu0  ;;  %v13412_v0 = vmax.f32 %v1185_v52, %v1628_v18 }
 0x229   : > { %v1010_v5 = vadd.f32 %v13409_v4, %v1009_v3 }
 0x22a   : > { %v2322_v31 = vrot.slane %v13412_v0, 4 }
 0x22b   : > { %v1187_v8 = vmax.f32 %v1010_v5, 0.0  ;;  %1048 = vmatmul.bf16.gmra.mxu0 %v12410_v2 }
 0x22c   : > { %v2323_v12 = vsel %vm2236_vm1, %v2320_v29, %v2322_v31 }
 0x22d   : > { %v1629_v13 = vrot.slane %v1187_v8, 1  ;;  %v2568_v19 = vmax.f32 %v13363_v61, %v2323_v12 }
 0x22f   : > { %v1630_v14 = vsel %vm1533_vm0, %v1627_v62, %v1629_v13 }
 0x230   : > { %v1011_v15 = vpop.f32.mrf.mxu0  ;;  %v13416_v16 = vmax.f32 %v1186_v6, %v1630_v14  ;;  %3284 = vmatmul.bf16.gmra.mxu1 %v10475_v25  ;;  %v13470_v14 = vpop.f32.mrf.mxu1 }
 0x231   : > { %v1012_v61 = vadd.f32 %v13409_v4, %v1011_v15 }
 0x232   : > { %v2324_v10 = vrot.slane %v13416_v16, 4 }
 0x233   : > { %v1188_v37 = vmax.f32 %v1012_v61, 0.0 }
 0x234   : > { %v2325_v17 = vsel %vm2236_vm1, %v2322_v31, %v2324_v10  ;;  %v10332_v31 = vld [vmem:[%s18229_s3 + $0x18] sm:$0xf0] }
 0x235   : > { %v2569_v11 = vmax.f32 %v1866_v36, %v2325_v17  ;;  %v1631_v41 = vrot.slane %v1188_v37, 1  ;;  %v10522_v17 = vld [vmem:[%s18229_s3 + $0x180] sm:$0xf] }
 0x237   : > { %v13429_v27 = vpack.c.bf16 %v2569_v11, %v2568_v19  ;;  %v1632_v52 = vsel %vm1533_vm0, %v1629_v13, %v1631_v41  ;;  %v12436_v13 = vld [vmem:[%s18229_s3 + $0x4] sm:$0xf]  ;;  %v12413_v19 = vld [vmem:[%s13073_s26 + $0x118] sm:$0xff] }
 0x238   : > { %v1014_v54 = vpop.f32.mrf.mxu0  ;;  %v13449_v46 = vmax.f32 %v1187_v8, %v1632_v52  ;;  %v10335_v12 = vor.u32 %v12436_v13, %v10332_v31  ;;  %v12414_v52 = vld [vmem:[%s13073_s26 + $0x120] sm:$0xff] }
 0x239   : > { %v1015_v28 = vadd.f32 %v13409_v4, %v1014_v54 }
 0x23a   : > { %v2326_v63 = vrot.slane %v13449_v46, 4  ;;  %3341 = vmatmul.bf16.vlgmr.msra.gmra.mxu2 %v10335_v12 }
 0x23b   : > { %1053 = vmatmul.bf16.gmra.mxu0 %v12411_v26  ;;  %v1189_v35 = vmax.f32 %v1015_v28, 0.0 }
 0x23c   : > { %v2327_v15 = vsel %vm2236_vm1, %v2324_v10, %v2326_v63 }
 0x23d   : > { %v1633_v33 = vrot.slane %v1189_v35, 1  ;;  %v2570_v54 = vmax.f32 %v13383_v9, %v2327_v15  ;;  %v10380_v15 = vld [vmem:[%s18229_s3 + $0x78] sm:$0xf0] }
 0x23f   : > { %v1634_v47 = vsel %vm1533_vm0, %v1631_v41, %v1633_v33 }
 0x240   : > { %v1016_v32 = vpop.f32.mrf.mxu0  ;;  %3289 = vmatmul.bf16.gmra.mxu1 %v10499_v51  ;;  %v13447_v57 = vmax.f32 %v1188_v37, %v1634_v47 }
 0x241   : > { %v1017_v36 = vadd.f32 %v13409_v4, %v1016_v32 }
 0x242   : > { %v2328_v53 = vrot.slane %v13447_v57, 4 }
 0x243   : > { %v1190_v38 = vmax.f32 %v1017_v36, 0.0  ;;  %v13488_v36 = vpop.f32.mrf.mxu1 }
 0x244   : > { %v2329_v18 = vsel %vm2236_vm1, %v2326_v63, %v2328_v53 }
 0x245   : > { %v1635_v34 = vrot.slane %v1190_v38, 1  ;;  %v2571_v11 = vmax.f32 %v13390_v43, %v2329_v18 }
 0x247   : > { %v1636_v20 = vsel %vm1533_vm0, %v1633_v33, %v1635_v34  ;;  %v2644_v32 = vpack.c.bf16 %v2571_v11, %v2570_v54 }
 0x248   : > { %v1019_v44 = vpop.f32.mrf.mxu0  ;;  %v13444_v49 = vmax.f32 %v1189_v35, %v1636_v20  ;;  %v12442_v20 = vld [vmem:[%s18229_s3 + $0x34] sm:$0xf] }
 0x249   : > { %v1020_v48 = vadd.f32 %v13409_v4, %v1019_v44 }
 0x24a   : > { %v2330_v30 = vrot.slane %v13444_v49, 4 }
 0x24b   : > { %v1191_v50 = vmax.f32 %v1020_v48, 0.0  ;;  %1058 = vmatmul.bf16.gmra.mxu0 %v12412_v42  ;;  %v10356_v42 = vld [vmem:[%s18229_s3 + $0x48] sm:$0xf0]  ;;  %v10546_v48 = vld [vmem:[%s18229_s3 + $0x1b0] sm:$0xf] }
 0x24c   : > { %v2331_v55 = vsel %vm2236_vm1, %v2328_v53, %v2330_v30  ;;  %v10359_v47 = vor.u32 %v12442_v20, %v10356_v42 }
 0x24d   : > { %v1637_v58 = vrot.slane %v1191_v50, 1  ;;  %v2572_v5 = vmax.f32 %v13412_v0, %v2331_v55  ;;  %v12487_v0 = vld [vmem:[%s18229_s3 + $0x194] sm:$0xf0] }
 0x24e   : > { %v10523_v22 = vor.u32 %v12487_v0, %v10522_v17  ;;  %3346 = vmatmul.bf16.gmra.mxu2 %v10359_v47  ;;  %v10404_v47 = vld [vmem:[%s18229_s3 + $0xa8] sm:$0xf0] }
 0x24f   : > { %v1638_v59 = vsel %vm1533_vm0, %v1635_v34, %v1637_v58 }
 0x250   : > { %v13453_v29 = vmax.f32 %v1190_v38, %v1638_v59  ;;  %v1021_v6 = vpop.f32.mrf.mxu0  ;;  %3294 = vmatmul.bf16.gmra.mxu1 %v10523_v22  ;;  %v13505_v44 = vpop.f32.mrf.mxu1 }
 0x251   : > { %v1022_v62 = vadd.f32 %v13409_v4, %v1021_v6 }
 0x252   : > { %v2332_v1 = vrot.slane %v13453_v29, 4 }
 0x253   : > { %v1192_v7 = vmax.f32 %v1022_v62, 0.0 }
 0x254   : > { %v2333_v2 = vsel %vm2236_vm1, %v2330_v30, %v2332_v1 }
 0x255   : > { %v1639_v3 = vrot.slane %v1192_v7, 1  ;;  %v2573_v8 = vmax.f32 %v13416_v16, %v2333_v2 }
 0x257   : > { %v2645_v16 = vpack.c.bf16 %v2573_v8, %v2572_v5  ;;  %v1640_v23 = vsel %vm1533_vm0, %v1637_v58, %v1639_v3 }
 0x258   : > { %v1024_v25 = vpop.f32.mrf.mxu0  ;;  %v13482_v26 = vmax.f32 %v1191_v50, %v1640_v23 }
 0x259   : > { %v1025_v10 = vadd.f32 %v13409_v4, %v1024_v25  ;;  %3420 = vmatpush.bf16.msra.mxu3 %v2645_v16  ;;  %v10570_v16 = vld [vmem:[%s18229_s3 + $0x1e0] sm:$0xf] }
 0x25a   : > { %v2334_v28 = vrot.slane %v13482_v26, 4 }
 0x25b   : > { %v1193_v61 = vmax.f32 %v1025_v10, 0.0  ;;  %1063 = vmatmul.bf16.gmra.mxu0 %v12413_v19  ;;  %v12415_v19 = vld [vmem:[%s13073_s26 + $0x128] sm:$0xff] }
 0x25c   : > { %v2335_v43 = vsel %vm2236_vm1, %v2332_v1, %v2334_v28  ;;  %v13525_v1 = vpop.f32.mrf.mxu1 }
 0x25d   : > { %v1641_v35 = vrot.slane %v1193_v61, 1  ;;  %3421 = vmatpush.bf16.msra.mxu3 %v2644_v32  ;;  %v2574_v37 = vmax.f32 %v13449_v46, %v2335_v43 }
 0x25f   : > { %v1642_v38 = vsel %vm1533_vm0, %v1639_v3, %v1641_v35 }
 0x260   : > { %v1026_v33 = vpop.f32.mrf.mxu0  ;;  %v13492_v34 = vmax.f32 %v1192_v7, %v1642_v38 }
 0x261   : > { %v1027_v9 = vadd.f32 %v13409_v4, %v1026_v33  ;;  %3422 = vmatpush.bf16.msra.mxu3 %v13429_v27 }
 0x262   : > { %v2336_v24 = vrot.slane %v13492_v34, 4 }
 0x263   : > { %v1194_v40 = vmax.f32 %v1027_v9, 0.0 }
 0x264   : > { %v2337_v51 = vsel %vm2236_vm1, %v2334_v28, %v2336_v24 }
 0x265   : > { %v1643_v41 = vrot.slane %v1194_v40, 1  ;;  %3423 = vmatpush.bf16.msra.mxu3 %v13404_v56  ;;  %v2575_v27 = vmax.f32 %v13447_v57, %v2337_v51  ;;  %v12493_v56 = vld [vmem:[%s18229_s3 + $0x1c4] sm:$0xf0]  ;;  %v12446_v51 = vld [vmem:[%s18229_s3 + $0x4c] sm:$0xf0] }
 0x266   : > { %v10547_v50 = vor.u32 %v12493_v56, %v10546_v48 }
 0x267   : > { %v1644_v58 = vsel %vm1533_vm0, %v1641_v35, %v1643_v41  ;;  %v13516_v46 = vpack.c.bf16 %v2575_v27, %v2574_v37  ;;  %v12454_v27 = vld [vmem:[%s18229_s3 + $0x94] sm:$0xf] }
 0x268   : > { %v1029_v30 = vpop.f32.mrf.mxu0  ;;  %v13518_v59 = vmax.f32 %v1193_v61, %v1644_v58  ;;  %3299 = vmatmul.bf16.gmra.mxu1 %v10547_v50  ;;  %v10594_v50 = vld [vmem:[%s18229_s3 + $0x210] sm:$0xf]  ;;  %v12505_v58 = vld [vmem:[%s18229_s3 + $0x224] sm:$0xf0] }
 0x269   : > { %v1030_v57 = vadd.f32 %v13409_v4, %v1029_v30  ;;  %3424 = vmatpush.bf16.msra.mxu3 %v13381_v45  ;;  %v12416_v30 = vld [vmem:[%s13073_s26 + $0x130] sm:$0xff] }
 0x26a   : > { %v2338_v6 = vrot.slane %v13518_v59, 4 }
 0x26b   : > { %v1195_v53 = vmax.f32 %v1030_v57, 0.0  ;;  %1068 = vmatmul.bf16.gmra.mxu0 %v12414_v52  ;;  %v10407_v52 = vor.u32 %v12454_v27, %v10404_v47 }
 0x26c   : > { %v2339_v62 = vsel %vm2236_vm1, %v2336_v24, %v2338_v6 }
 0x26d   : > { %v1645_v55 = vrot.slane %v1195_v53, 1  ;;  %3425 = vmatpush.bf16.msra.mxu3 %v13361_v21  ;;  %v2576_v63 = vmax.f32 %v13444_v49, %v2339_v62  ;;  %v10338_v21 = vld [vmem:[%s18229_s3 + $0x8] sm:$0xf]  ;;  %v12440_v49 = vld [vmem:[%s18229_s3 + $0x1c] sm:$0xf0]  ;;  %v13548_v12 = vpop.f32.mrf.mxu1 }
 0x26e   : > { %v10339_v8 = vor.u32 %v12440_v49, %v10338_v21 }
 0x26f   : > { %v1646_v7 = vsel %vm1533_vm0, %v1643_v41, %v1645_v55 }
 0x270   : > { %v1031_v2 = vpop.f32.mrf.mxu0  ;;  %v13529_v18 = vmax.f32 %v1194_v40, %v1646_v7  ;;  %v10362_v40 = vld [vmem:[%s18229_s3 + $0x38] sm:$0xf] }
 0x271   : > { %v1032_v45 = vadd.f32 %v13409_v4, %v1031_v2  ;;  %3426 = vmatpush.bf16.msra.mxu3 %v13338_v60  ;;  %v12448_v60 = vld [vmem:[%s18229_s3 + $0x64] sm:$0xf]  ;;  %v10363_v20 = vor.u32 %v12446_v51, %v10362_v40 }
 0x272   : > { %v2340_v3 = vrot.slane %v13529_v18, 4  ;;  %v10383_v0 = vor.u32 %v12448_v60, %v10380_v15  ;;  %v10386_v60 = vld [vmem:[%s18229_s3 + $0x68] sm:$0xf] }
 0x273   : > { %v1196_v5 = vmax.f32 %v1032_v45, 0.0 }
 0x274   : > { %v2341_v13 = vsel %vm2236_vm1, %v2338_v6, %v2340_v3  ;;  %3351 = vmatmul.bf16.gmra.mxu2 %v10383_v0 }
 0x275   : > { %v1647_v31 = vrot.slane %v1196_v5, 1  ;;  %3427 = vmatpush.bf16.msra.mxu3 %v13311_v39  ;;  %v2577_v17 = vmax.f32 %v13453_v29, %v2341_v13  ;;  %v12499_v39 = vld [vmem:[%s18229_s3 + $0x1f4] sm:$0xf0]  ;;  %v13566_v43 = vpop.f32.mrf.mxu1 }
 0x276   : > { %v10571_v11 = vor.u32 %v12499_v39, %v10570_v16  ;;  %v12460_v39 = vld [vmem:[%s18229_s3 + $0xc4] sm:$0xf] }
 0x277   : > { %v1648_v22 = vsel %vm1533_vm0, %v1645_v55, %v1647_v31  ;;  %v13559_v23 = vpack.c.bf16 %v2577_v17, %v2576_v63 }
 0x278   : > { %v1034_v25 = vpop.f32.mrf.mxu0  ;;  %v13561_v10 = vmax.f32 %v1195_v53, %v1648_v22  ;;  %3428 = vmatmul.bf16.vlgmr.msra.gmra.mxu3 %v10339_v8  ;;  %3304 = vmatmul.bf16.gmra.mxu1 %v10571_v11  ;;  %v10595_v53 = vor.u32 %v12505_v58, %v10594_v50 }
 0x279   : > { %v1035_v29 = vadd.f32 %v13409_v4, %v1034_v25 }
 0x27a   : > { %v2342_v54 = vrot.slane %v13561_v10, 4 }
 0x27b   : > { %v1197_v28 = vmax.f32 %v1035_v29, 0.0  ;;  %1073 = vmatmul.bf16.gmra.mxu0 %v12415_v19  ;;  %v10428_v19 = vld [vmem:[%s18229_s3 + $0xd8] sm:$0xf0]  ;;  %v10618_v29 = vld [vmem:[%s18229_s3 + $0x240] sm:$0xf] }
 0x27c   : > { %v2343_v61 = vsel %vm2236_vm1, %v2340_v3, %v2342_v54  ;;  %v10431_v25 = vor.u32 %v12460_v39, %v10428_v19 }
 0x27d   : > { %v1649_v32 = vrot.slane %v1197_v28, 1  ;;  %v2578_v35 = vmax.f32 %v13482_v26, %v2343_v61  ;;  %v13588_v56 = vpop.f32.mrf.mxu1 }
 0x27f   : > { %v1650_v37 = vsel %vm1533_vm0, %v1647_v31, %v1649_v32 }
 0x280   : > { %v1036_v38 = vpop.f32.mrf.mxu0  ;;  %v13570_v33 = vmax.f32 %v1196_v5, %v1650_v37 }
 0x281   : > { %v1037_v9 = vadd.f32 %v13409_v4, %v1036_v38 }
 0x282   : > { %v2344_v24 = vrot.slane %v13570_v33, 4 }
 0x283   : > { %v1198_v41 = vmax.f32 %v1037_v9, 0.0 }
 0x284   : > { %v2345_v26 = vsel %vm2236_vm1, %v2342_v54, %v2344_v24  ;;  %3356 = vmatmul.bf16.gmra.mxu2 %v10407_v52  ;;  %v12511_v54 = vld [vmem:[%s18229_s3 + $0x254] sm:$0xf0] }
 0x285   : > { %v1651_v42 = vrot.slane %v1198_v41, 1  ;;  %v2579_v48 = vmax.f32 %v13492_v34, %v2345_v26  ;;  %v13606_v21 = vpop.f32.mrf.mxu1  ;;  %v10410_v52 = vld [vmem:[%s18229_s3 + $0x98] sm:$0xf] }
 0x287   : > { %v1652_v57 = vsel %vm1533_vm0, %v1649_v32, %v1651_v42  ;;  %v13598_v6 = vpack.c.bf16 %v2579_v48, %v2578_v35  ;;  %v10619_v35 = vor.u32 %v12511_v54, %v10618_v29  ;;  %v10434_v29 = vld [vmem:[%s18229_s3 + $0xc8] sm:$0xf]  ;;  %v12464_v54 = vld [vmem:[%s18229_s3 + $0xdc] sm:$0xf0] }
 0x288   : > { %v1039_v62 = vpop.f32.mrf.mxu0  ;;  %v13600_v34 = vmax.f32 %v1197_v28, %v1652_v57  ;;  %3433 = vmatmul.bf16.gmra.mxu3 %v10363_v20  ;;  %3309 = vmatmul.bf16.gmra.mxu1 %v10595_v53  ;;  %v12417_v28 = vld [vmem:[%s13073_s26 + $0x138] sm:$0xff]  ;;  %v12466_v53 = vld [vmem:[%s18229_s3 + $0xf4] sm:$0xf] }
 0x289   : > { %v1040_v55 = vadd.f32 %v13409_v4, %v1039_v62  ;;  %v10452_v62 = vld [vmem:[%s18229_s3 + $0x108] sm:$0xf0] }
 0x28a   : > { %v2346_v63 = vrot.slane %v13600_v34, 4 }
 0x28b   : > { %v1199_v7 = vmax.f32 %v1040_v55, 0.0  ;;  %1078 = vmatmul.bf16.gmra.mxu0 %v12416_v30 }
 0x28c   : > { %v2347_v2 = vsel %vm2236_vm1, %v2344_v24, %v2346_v63 }
 0x28d   : > { %v1653_v45 = vrot.slane %v1199_v7, 1  ;;  %v2580_v3 = vmax.f32 %v13518_v59, %v2347_v2  ;;  %v12452_v59 = vld [vmem:[%s18229_s3 + $0x7c] sm:$0xf0]  ;;  %v13627_v22 = vpop.f32.mrf.mxu1  ;;  %v10642_v2 = vld [vmem:[%s18229_s3 + $0x270] sm:$0xf] }
 0x28e   : > { %v10387_v0 = vor.u32 %v12452_v59, %v10386_v60 }
 0x28f   : > { %v1654_v49 = vsel %vm1533_vm0, %v1651_v42, %v1653_v45 }
 0x290   : > { %v1041_v5 = vpop.f32.mrf.mxu0  ;;  %v13609_v8 = vmax.f32 %v1198_v41, %v1654_v49 }
 0x291   : > { %v1042_v13 = vadd.f32 %v13409_v4, %v1041_v5 }
 0x292   : > { %v2348_v31 = vrot.slane %v13609_v8, 4 }
 0x293   : > { %v1200_v15 = vmax.f32 %v1042_v13, 0.0 }
 0x294   : > { %v2349_v17 = vsel %vm2236_vm1, %v2346_v63, %v2348_v31  ;;  %3361 = vmatmul.bf16.gmra.mxu2 %v10431_v25 }
 0x295   : > { %v1655_v16 = vrot.slane %v1200_v15, 1  ;;  %v2581_v11 = vmax.f32 %v13529_v18, %v2349_v17  ;;  %v13645_v26 = vpop.f32.mrf.mxu1 }
 0x297   : > { %v1656_v61 = vsel %vm1533_vm0, %v1653_v45, %v1655_v16  ;;  %v13637_v32 = vpack.c.bf16 %v2581_v11, %v2580_v3  ;;  %v12517_v45 = vld [vmem:[%s18229_s3 + $0x284] sm:$0xf0]  ;;  %v12418_v3 = vld [vmem:[%s13073_s26 + $0x140] sm:$0xff] }
 0x298   : > { %v1044_v37 = vpop.f32.mrf.mxu0  ;;  %v13639_v18 = vmax.f32 %v1199_v7, %v1656_v61  ;;  %3438 = vmatmul.bf16.gmra.mxu3 %v10387_v0  ;;  %3314 = vmatmul.bf16.gmra.mxu1 %v10619_v35  ;;  %v10455_v7 = vor.u32 %v12466_v53, %v10452_v62  ;;  %v10643_v13 = vor.u32 %v12517_v45, %v10642_v2  ;;  %v12472_v35 = vld [vmem:[%s18229_s3 + $0x124] sm:$0xf]  ;;  %v12478_v45 = vld [vmem:[%s18229_s3 + $0x154] sm:$0xf] }
 0x299   : > { %v1045_v38 = vadd.f32 %v13409_v4, %v1044_v37  ;;  %v10435_v61 = vor.u32 %v12464_v54, %v10434_v29  ;;  %v10476_v37 = vld [vmem:[%s18229_s3 + $0x138] sm:$0xf0] }
 0x29a   : > { %v2350_v9 = vrot.slane %v13639_v18, 4 }
 0x29b   : > { %v1201_v24 = vmax.f32 %v1045_v38, 0.0  ;;  %1083 = vmatmul.bf16.gmra.mxu0 %v12417_v28 }
 0x29c   : > { %v2351_v40 = vsel %vm2236_vm1, %v2348_v31, %v2350_v9 }
 0x29d   : > { %v1657_v51 = vrot.slane %v1201_v24, 1  ;;  %v2582_v41 = vmax.f32 %v13561_v10, %v2351_v40  ;;  %v12458_v10 = vld [vmem:[%s18229_s3 + $0xac] sm:$0xf0]  ;;  %v13666_v63 = vpop.f32.mrf.mxu1  ;;  %v10479_v40 = vor.u32 %v12472_v35, %v10476_v37 }
 0x29e   : > { %v10411_v30 = vor.u32 %v12458_v10, %v10410_v52 }
 0x29f   : > { %v1658_v20 = vsel %vm1533_vm0, %v1655_v16, %v1657_v51 }
 0x2a0   : > { %v1046_v42 = vpop.f32.mrf.mxu0  ;;  %v13648_v27 = vmax.f32 %v1200_v15, %v1658_v20  ;;  %v12419_v20 = vld [vmem:[%s13073_s26 + $0x148] sm:$0xff] }
 0x2a1   : > { %v1047_v47 = vadd.f32 %v13409_v4, %v1046_v42 }
 0x2a2   : > { %v2352_v48 = vrot.slane %v13648_v27, 4 }
 0x2a3   : > { %v1202_v50 = vmax.f32 %v1047_v47, 0.0 }
 0x2a4   : > { %v2353_v58 = vsel %vm2236_vm1, %v2350_v9, %v2352_v48  ;;  %3366 = vmatmul.bf16.gmra.mxu2 %v10455_v7 }
 0x2a5   : > { %v1659_v57 = vrot.slane %v1202_v50, 1  ;;  %v2583_v55 = vmax.f32 %v13570_v33, %v2353_v58  ;;  %v13686_v17 = vpop.f32.mrf.mxu1 }
 0x2a6   : > { %18312 = vst [vmem:[#allocation2_spill] sm:$0xff] %v13686_v17 }
 0x2a7   : > { %v1660_v49 = vsel %vm1533_vm0, %v1657_v51, %v1659_v57  ;;  %v13676_v5 = vpack.c.bf16 %v2583_v55, %v2582_v41  ;;  %v10666_v51 = vld [vmem:[%s18229_s3 + $0x2a0] sm:$0xf]  ;;  %v12523_v41 = vld [vmem:[%s18229_s3 + $0x2b4] sm:$0xf0] }
 0x2a8   : > { %v1049_v31 = vpop.f32.mrf.mxu0  ;;  %3443 = vmatmul.bf16.gmra.mxu3 %v10411_v30  ;;  %3319 = vmatmul.bf16.gmra.mxu1 %v10643_v13  ;;  %v13681_v60 = vmax.f32 %v1201_v24, %v1660_v49  ;;  %v10667_v47 = vor.u32 %v12523_v41, %v10666_v51  ;;  %v10458_v30 = vld [vmem:[%s18229_s3 + $0xf8] sm:$0xf] }
 0x2a9   : > { %v13679_v33 = vadd.f32 %v13409_v4, %v1049_v31  ;;  %v10690_v31 = vld [vmem:[%s18229_s3 + $0x2d0] sm:$0xf] }
 0x2aa   : > { %v2354_v0 = vrot.slane %v13681_v60, 4 }
 0x2ab   : > { %v1203_v59 = vmax.f32 %v13679_v33, 0.0  ;;  %1088 = vmatmul.bf16.gmra.mxu0 %v12418_v3  ;;  %v10500_v3 = vld [vmem:[%s18229_s3 + $0x168] sm:$0xf0]  ;;  %v10482_v33 = vld [vmem:[%s18229_s3 + $0x128] sm:$0xf] }
 0x2ac   : > { %v2355_v25 = vsel %vm2236_vm1, %v2352_v48, %v2354_v0  ;;  %v10503_v13 = vor.u32 %v12478_v45, %v10500_v3  ;;  %v12484_v45 = vld [vmem:[%s18229_s3 + $0x184] sm:$0xf]  ;;  %v10524_v3 = vld [vmem:[%s18229_s3 + $0x198] sm:$0xf0] }
 0x2ad   : > { %v1661_v15 = vrot.slane %v1203_v59, 1  ;;  %v2584_v38 = vmax.f32 %v13600_v34, %v2355_v25  ;;  %v13711_v24 = vpop.f32.mrf.mxu1  ;;  %v12420_v25 = vld [vmem:[%s13073_s26 + $0x150] sm:$0xff] }
 0x2af   : > { %v1662_v16 = vsel %vm1533_vm0, %v1659_v57, %v1661_v15  ;;  %v12470_v57 = vld [vmem:[%s18229_s3 + $0x10c] sm:$0xf0] }
 0x2b0   : > { %v1051_v39 = vpop.f32.mrf.mxu0  ;;  %v13690_v19 = vmax.f32 %v1202_v50, %v1662_v16  ;;  %v10459_v55 = vor.u32 %v12470_v57, %v10458_v30 }
 0x2b1   : > { %v1052_v52 = vadd.f32 %v13409_v4, %v1051_v39 }
 0x2b2   : > { %v2356_v11 = vrot.slane %v13690_v19, 4 }
 0x2b3   : > { %v1204_v53 = vmax.f32 %v1052_v52, 0.0 }
 0x2b4   : > { %v2357_v28 = vsel %vm2236_vm1, %v2354_v0, %v2356_v11  ;;  %3371 = vmatmul.bf16.gmra.mxu2 %v10479_v40  ;;  %v12529_v0 = vld [vmem:[%s18229_s3 + $0x2e4] sm:$0xf0] }
 0x2b5   : > { %v2585_v9 = vmax.f32 %v13609_v8, %v2357_v28  ;;  %v13723_v8 = vpop.f32.mrf.mxu1  ;;  %v1663_v16 = vrot.slane %v1204_v53, 1  ;;  %v10691_v29 = vor.u32 %v12529_v0, %v10690_v31  ;;  %v10527_v31 = vor.u32 %v12484_v45, %v10524_v3 }
 0x2b6   : > { %18313 = vst [vmem:[#allocation3_spill] sm:$0xff] %v13723_v8 }
 0x2b7   : > { %v13720_v42 = vpack.c.bf16 %v2585_v9, %v2584_v38  ;;  %v1664_v37 = vsel %vm1533_vm0, %v1661_v15, %v1663_v16 }
 0x2b8   : > { %v1054_v48 = vpop.f32.mrf.mxu0  ;;  %3448 = vmatmul.bf16.gmra.mxu3 %v10435_v61  ;;  %3324 = vmatmul.bf16.gmra.mxu1 %v10667_v47  ;;  %v13760_v41 = vmax.f32 %v1203_v59, %v1664_v37  ;;  %v12476_v59 = vld [vmem:[%s18229_s3 + $0x13c] sm:$0xf0] }
 0x2b9   : > { %v1055_v34 = vadd.f32 %v13409_v4, %v1054_v48 }
 0x2bb   : > { %1093 = vmatmul.bf16.gmra.mxu0 %v12419_v20  ;;  %v1205_v50 = vmax.f32 %v1055_v34, 0.0 }
 0x2bd   : > { %v1665_v7 = vrot.slane %v1205_v50, 1  ;;  %v13739_v49 = vpop.f32.mrf.mxu1 }
 0x2bf   : > { %v1666_v28 = vsel %vm1533_vm0, %v1663_v16, %v1665_v7 }
 0x2c0   : > { %v1056_v10 = vpop.f32.mrf.mxu0  ;;  %v13754_v9 = vmax.f32 %v1204_v53, %v1666_v28 }
 0x2c1   : > { %v1057_v58 = vadd.f32 %v13409_v4, %v1056_v10 }
 0x2c2   : > { %v2360_v15 = vrot.slane %v13754_v9, 4 }
 0x2c3   : > { %v1206_v62 = vmax.f32 %v1057_v58, 0.0  ;;  %v2358_v58 = vrot.slane %v13760_v41, 4 }
 0x2c4   : > { %3376 = vmatmul.bf16.gmra.mxu2 %v10503_v13 }
 0x2c5   : > { %v1667_v2 = vrot.slane %v1206_v62, 1  ;;  %v13756_v51 = vpop.f32.mrf.mxu1  ;;  %v2361_v53 = vsel %vm2236_vm1, %v2358_v58, %v2360_v15  ;;  %v2359_v13 = vsel %vm2236_vm1, %v2356_v11, %v2358_v58 }
 0x2c6   : > { %18314 = vst [vmem:[#allocation4_spill] sm:$0xff] %v13756_v51 }
 0x2c7   : > { %v1668_v39 = vsel %vm1533_vm0, %v1665_v7, %v1667_v2 }
 0x2c8   : > { %v1059_v54 = vpop.f32.mrf.mxu0  ;;  %3453 = vmatmul.bf16.gmra.mxu3 %v10459_v55  ;;  %3329 = vmatmul.bf16.gmra.mxu1 %v10691_v29  ;;  %v13751_v35 = vmax.f32 %v1205_v50, %v1668_v39  ;;  %v12421_v39 = vld [vmem:[%s13073_s26 + $0x158] sm:$0xff] }
 0x2c9   : > { %v1060_v61 = vadd.f32 %v13409_v4, %v1059_v54 }
 0x2ca   : > { %v2362_v20 = vrot.slane %v13751_v35, 4 }
 0x2cb   : > { %v1207_v38 = vmax.f32 %v1060_v61, 0.0  ;;  %1098 = vmatmul.bf16.gmra.mxu0 %v12420_v25 }
 0x2cc   : > { %v2363_v10 = vsel %vm2236_vm1, %v2360_v15, %v2362_v20 }
 0x2cd   : > { %v1669_v40 = vrot.slane %v1207_v38, 1  ;;  %v2588_v7 = vmax.f32 %v13681_v60, %v2363_v10  ;;  %v13790_v0 = vpop.f32.mrf.mxu1  ;;  %v2587_v60 = vmax.f32 %v13648_v27, %v2361_v53  ;;  %v10506_v10 = vld [vmem:[%s18229_s3 + $0x158] sm:$0xf]  ;;  %v10548_v53 = vld [vmem:[%s18229_s3 + $0x1c8] sm:$0xf0] }
 0x2cf   : > { %v1670_v47 = vsel %vm1533_vm0, %v1667_v2, %v1669_v40 }
 0x2d0   : > { %v13764_v48 = vmax.f32 %v1206_v62, %v1670_v47  ;;  %v1061_v34 = vpop.f32.mrf.mxu0  ;;  %v10483_v62 = vor.u32 %v12476_v59, %v10482_v33 }
 0x2d1   : > { %v1062_v52 = vadd.f32 %v13409_v4, %v1061_v34 }
 0x2d2   : > { %v2364_v50 = vrot.slane %v13764_v48, 4 }
 0x2d3   : > { %v1208_v30 = vmax.f32 %v1062_v52, 0.0 }
 0x2d4   : > { %v2365_v57 = vsel %vm2236_vm1, %v2362_v20, %v2364_v50  ;;  %3381 = vmatmul.bf16.gmra.mxu2 %v10527_v31  ;;  %v13800_v20 = vpop.f32.mrf.mxu2 }
 0x2d5   : > { %v1671_v55 = vrot.slane %v1208_v30, 1  ;;  %v2589_v2 = vmax.f32 %v13690_v19, %v2365_v57  ;;  %v2586_v19 = vmax.f32 %v13639_v18, %v2359_v13 }
 0x2d7   : > { %v2653_v16 = vpack.c.bf16 %v2589_v2, %v2588_v7  ;;  %v1672_v25 = vsel %vm1533_vm0, %v1669_v40, %v1671_v55  ;;  %v2652_v37 = vpack.c.bf16 %v2587_v60, %v2586_v19  ;;  %v12422_v2 = vld [vmem:[%s13073_s26 + $0x160] sm:$0xff] }
 0x2d8   : > { %v1064_v29 = vpop.f32.mrf.mxu0  ;;  %3458 = vmatmul.bf16.gmra.mxu3 %v10483_v62  ;;  %v13795_v54 = vmax.f32 %v1207_v38, %v1672_v25  ;;  %v13804_v38 = vpop.f32.mrf.mxu1 }
 0x2d9   : > { %v1065_v28 = vadd.f32 %v13409_v4, %v1064_v29  ;;  %3507 = vmatpush.bf16.msrb.mxu1 %v2653_v16  ;;  %18315 = vst [vmem:[#allocation5_spill] sm:$0xff] %v13804_v38 }
 0x2da   : > { %v2366_v11 = vrot.slane %v13795_v54, 4 }
 0x2db   : > { %v1209_v61 = vmax.f32 %v1065_v28, 0.0  ;;  %1103 = vmatmul.bf16.gmra.mxu0 %v12421_v39 }
 0x2dc   : > { %v2367_v27 = vsel %vm2236_vm1, %v2364_v50, %v2366_v11  ;;  %v13818_v33 = vpop.f32.mrf.mxu2 }
 0x2dd   : > { %v1673_v40 = vrot.slane %v1209_v61, 1  ;;  %3508 = vmatpush.bf16.msrb.mxu1 %v2652_v37  ;;  %v2590_v47 = vmax.f32 %v13760_v41, %v2367_v27  ;;  %v12482_v41 = vld [vmem:[%s18229_s3 + $0x16c] sm:$0xf0]  ;;  %v12437_v37 = vld [vmem:[%s18229_s3 + $0xc] sm:$0xf] }
 0x2de   : > { %v10507_v59 = vor.u32 %v12482_v41, %v10506_v10  ;;  %v10530_v27 = vld [vmem:[%s18229_s3 + $0x188] sm:$0xf]  ;;  %v12496_v10 = vld [vmem:[%s18229_s3 + $0x1e4] sm:$0xf]  ;;  %v10572_v41 = vld [vmem:[%s18229_s3 + $0x1f8] sm:$0xf0] }
 0x2df   : > { %v1674_v34 = vsel %vm1533_vm0, %v1671_v55, %v1673_v40 }
 0x2e0   : > { %v1066_v15 = vpop.f32.mrf.mxu0  ;;  %v13807_v52 = vmax.f32 %v1208_v30, %v1674_v34 }
 0x2e1   : > { %v1067_v18 = vadd.f32 %v13409_v4, %v1066_v15  ;;  %3509 = vmatpush.bf16.msrb.mxu1 %v13720_v42  ;;  %v12490_v42 = vld [vmem:[%s18229_s3 + $0x1b4] sm:$0xf] }
 0x2e2   : > { %v2368_v50 = vrot.slane %v13807_v52, 4  ;;  %v10551_v55 = vor.u32 %v12490_v42, %v10548_v53 }
 0x2e3   : > { %v1210_v58 = vmax.f32 %v1067_v18, 0.0 }
 0x2e4   : > { %v2369_v30 = vsel %vm2236_vm1, %v2366_v11, %v2368_v50  ;;  %3386 = vmatmul.bf16.gmra.mxu2 %v10551_v55  ;;  %v13840_v39 = vpop.f32.mrf.mxu2 }
 0x2e5   : > { %v1675_v57 = vrot.slane %v1210_v58, 1  ;;  %3510 = vmatpush.bf16.msrb.mxu1 %v13676_v5  ;;  %v2591_v62 = vmax.f32 %v13754_v9, %v2369_v30  ;;  %v13829_v7 = vpop.f32.mrf.mxu1 }
 0x2e7   : > { %v1676_v45 = vsel %vm1533_vm0, %v1673_v40, %v1675_v57  ;;  %v13833_v3 = vpack.c.bf16 %v2591_v62, %v2590_v47  ;;  %v12488_v40 = vld [vmem:[%s18229_s3 + $0x19c] sm:$0xf0] }
 0x2e8   : > { %v1069_v13 = vpop.f32.mrf.mxu0  ;;  %3463 = vmatmul.bf16.gmra.mxu3 %v10507_v59  ;;  %v13835_v5 = vmax.f32 %v1209_v61, %v1676_v45  ;;  %v10575_v59 = vor.u32 %v12496_v10, %v10572_v41  ;;  %v12502_v10 = vld [vmem:[%s18229_s3 + $0x214] sm:$0xf]  ;;  %v10596_v41 = vld [vmem:[%s18229_s3 + $0x228] sm:$0xf0] }
 0x2e9   : > { %v1070_v31 = vadd.f32 %v13409_v4, %v1069_v13  ;;  %3511 = vmatpush.bf16.msrb.mxu1 %v13637_v32 }
 0x2ea   : > { %v2370_v16 = vrot.slane %v13835_v5, 4 }
 0x2eb   : > { %v1211_v9 = vmax.f32 %v1070_v31, 0.0  ;;  %1108 = vmatmul.bf16.gmra.mxu0 %v12422_v2 }
 0x2ec   : > { %v2371_v60 = vsel %vm2236_vm1, %v2368_v50, %v2370_v16  ;;  %v13865_v47 = vpop.f32.mrf.mxu2  ;;  %v10531_v50 = vor.u32 %v12488_v40, %v10530_v27 }
 0x2ed   : > { %v1677_v25 = vrot.slane %v1211_v9, 1  ;;  %3512 = vmatpush.bf16.msrb.mxu1 %v13598_v6  ;;  %v2592_v29 = vmax.f32 %v13751_v35, %v2371_v60  ;;  %v13845_v28 = vpop.f32.mrf.mxu1  ;;  %v10340_v6 = vld [vmem:[%s18229_s3 + $0x20] sm:$0xf0]  ;;  %v3343_v60 = vadd.f32 %v13800_v20, %v13470_v14  ;;  %v10364_v14 = vld [vmem:[%s18229_s3 + $0x50] sm:$0xf0] }
 0x2ee   : > { %18316 = vst [vmem:[#allocation6_spill] sm:$0xff] %v13845_v28  ;;  %v10343_v34 = vor.u32 %v12437_v37, %v10340_v6  ;;  %v12443_v6 = vld [vmem:[%s18229_s3 + $0x3c] sm:$0xf] }
 0x2ef   : > { %v1678_v19 = vsel %vm1533_vm0, %v1675_v57, %v1677_v25  ;;  %v12423_v57 = vld [vmem:[%s13073_s26 + $0x168] sm:$0xff] }
 0x2f0   : > { %v1071_v11 = vpop.f32.mrf.mxu0  ;;  %v13848_v61 = vmax.f32 %v1210_v58, %v1678_v19 }
 0x2f1   : > { %v1072_v32 = vadd.f32 %v13409_v4, %v1071_v11  ;;  %3513 = vmatpush.bf16.msrb.mxu1 %v13559_v23  ;;  %v3345_v11 = vadd.f32 %v13818_v33, %v13488_v36  ;;  %v10554_v36 = vld [vmem:[%s18229_s3 + $0x1b8] sm:$0xf]  ;;  %v12494_v33 = vld [vmem:[%s18229_s3 + $0x1cc] sm:$0xf0] }
 0x2f2   : > { %v2372_v35 = vrot.slane %v13848_v61, 4 }
 0x2f3   : > { %v1212_v23 = vmax.f32 %v1072_v32, 0.0 }
 0x2f4   : > { %v2373_v15 = vsel %vm2236_vm1, %v2370_v16, %v2372_v35  ;;  %3391 = vmatmul.bf16.gmra.mxu2 %v10575_v59  ;;  %v10599_v59 = vor.u32 %v12502_v10, %v10596_v41 }
 0x2f5   : > { %v1679_v18 = vrot.slane %v1212_v23, 1  ;;  %3514 = vmatpush.bf16.msrb.mxu1 %v13516_v46  ;;  %v2593_v58 = vmax.f32 %v13764_v48, %v2373_v15  ;;  %v13876_v30 = vpop.f32.mrf.mxu1 }
 0x2f7   : > { %v1680_v42 = vsel %vm1533_vm0, %v1677_v25, %v1679_v18  ;;  %v13880_v53 = vpack.c.bf16 %v2593_v58, %v2592_v29  ;;  %v13886_v48 = vpop.f32.mrf.mxu2  ;;  %v10555_v58 = vor.u32 %v12494_v33, %v10554_v36  ;;  %v3350_v36 = vadd.f32 %v13865_v47, %v13525_v1  ;;  %v10578_v1 = vld [vmem:[%s18229_s3 + $0x1e8] sm:$0xf] }
 0x2f8   : > { %v1074_v46 = vpop.f32.mrf.mxu0  ;;  %3515 = vmatmul.bf16.vlgmr.msrb.gmra.mxu1 %v10343_v34  ;;  %v13882_v62 = vmax.f32 %v1211_v9, %v1680_v42  ;;  %3468 = vmatmul.bf16.gmra.mxu3 %v10531_v50  ;;  %v12424_v42 = vld [vmem:[%s13073_s26 + $0x170] sm:$0xff] }
 0x2f9   : > { %v1075_v55 = vadd.f32 %v13409_v4, %v1074_v46 }
 0x2fa   : > { %v2374_v2 = vrot.slane %v13882_v62, 4 }
 0x2fb   : > { %v1213_v45 = vmax.f32 %v1075_v55, 0.0  ;;  %1113 = vmatmul.bf16.gmra.mxu0 %v12423_v57  ;;  %v3429_v13 = vpop.f32.mrf.mxu3 }
 0x2fc   : > { %v2375_v31 = vsel %vm2236_vm1, %v2372_v35, %v2374_v2 }
 0x2fd   : > { %v1681_v16 = vrot.slane %v1213_v45, 1  ;;  %v2594_v25 = vmax.f32 %v13795_v54, %v2375_v31  ;;  %v13892_v9 = vpop.f32.mrf.mxu1  ;;  %v13906_v54 = vadd.f32 %v3429_v13, %v3343_v60 }
 0x2fe   : > { %18317 = vst [vmem:[#allocation7_spill] sm:$0xff] %v13892_v9 }
 0x2ff   : > { %v1682_v29 = vsel %vm1533_vm0, %v1679_v18, %v1681_v16  ;;  %v13915_v27 = vpop.f32.mrf.mxu2 }
 0x300   : > { %v1076_v19 = vpop.f32.mrf.mxu0  ;;  %v13897_v32 = vmax.f32 %v1212_v23, %v1682_v29  ;;  %v10367_v23 = vor.u32 %v12443_v6, %v10364_v14 }
 0x301   : > { %v1077_v37 = vadd.f32 %v13409_v4, %v1076_v19 }
 0x302   : > { %v2376_v20 = vrot.slane %v13897_v32, 4 }
 0x303   : > { %v1214_v35 = vmax.f32 %v1077_v37, 0.0  ;;  %v3431_v40 = vpop.f32.mrf.mxu3 }
 0x304   : > { %v2377_v34 = vsel %vm2236_vm1, %v2374_v2, %v2376_v20  ;;  %v13918_v15 = vadd.f32 %v3431_v40, %v3345_v11  ;;  %3396 = vmatmul.bf16.gmra.mxu2 %v10599_v59 }
 0x305   : > { %v1683_v18 = vrot.slane %v1214_v35, 1  ;;  %v2595_v50 = vmax.f32 %v13807_v52, %v2377_v34  ;;  %v13927_v57 = vpop.f32.mrf.mxu1 }
 0x307   : > { %v1684_v46 = vsel %vm1533_vm0, %v1681_v16, %v1683_v18  ;;  %v13931_v55 = vpack.c.bf16 %v2595_v50, %v2594_v25  ;;  %v13937_v29 = vpop.f32.mrf.mxu2  ;;  %v3348_v25 = vadd.f32 %v13840_v39, %v13505_v44  ;;  %v10388_v44 = vld [vmem:[%s18229_s3 + $0x80] sm:$0xf0] }
 0x308   : > { %v1079_v2 = vpop.f32.mrf.mxu0  ;;  %3520 = vmatmul.bf16.gmra.mxu1 %v10367_v23  ;;  %v13933_v13 = vmax.f32 %v1213_v45, %v1684_v46  ;;  %3473 = vmatmul.bf16.gmra.mxu3 %v10555_v58  ;;  %v12508_v50 = vld [vmem:[%s18229_s3 + $0x244] sm:$0xf]  ;;  %v10620_v58 = vld [vmem:[%s18229_s3 + $0x258] sm:$0xf0] }
 0x309   : > { %v1080_v31 = vadd.f32 %v13409_v4, %v1079_v2  ;;  %v10623_v46 = vor.u32 %v12508_v50, %v10620_v58 }
 0x30a   : > { %v2378_v60 = vrot.slane %v13933_v13, 4 }
 0x30b   : > { %v1215_v52 = vmax.f32 %v1080_v31, 0.0  ;;  %1118 = vmatmul.bf16.gmra.mxu0 %v12424_v42  ;;  %v3434_v19 = vpop.f32.mrf.mxu3  ;;  %v12425_v31 = vld [vmem:[%s13073_s26 + $0x178] sm:$0xff] }
 0x30c   : > { %v2379_v11 = vsel %vm2236_vm1, %v2376_v20, %v2378_v60  ;;  %v12449_v20 = vld [vmem:[%s18229_s3 + $0x6c] sm:$0xf] }
 0x30d   : > { %v1685_v16 = vrot.slane %v1215_v52, 1  ;;  %v2596_v37 = vmax.f32 %v13835_v5, %v2379_v11  ;;  %v13943_v45 = vpop.f32.mrf.mxu1  ;;  %v13957_v5 = vadd.f32 %v3434_v19, %v3348_v25  ;;  %v10391_v34 = vor.u32 %v12449_v20, %v10388_v44 }
 0x30e   : > { %18318 = vst [vmem:[#allocation8_spill] sm:$0xff] %v13943_v45  ;;  %v3353_v20 = vadd.f32 %v13886_v48, %v13548_v12  ;;  %v10412_v12 = vld [vmem:[%s18229_s3 + $0xb0] sm:$0xf0] }
 0x30f   : > { %v1686_v6 = vsel %vm1533_vm0, %v1683_v18, %v1685_v16 }
 0x310   : > { %v1081_v14 = vpop.f32.mrf.mxu0  ;;  %v13948_v33 = vmax.f32 %v1214_v35, %v1686_v6  ;;  %v13966_v35 = vpop.f32.mrf.mxu2  ;;  %v13989_v6 = vld [vmem:[%s18228_s2] ss:$0 sm:$0xff] }
 0x311   : > { %v1082_v40 = vadd.f32 %v13409_v4, %v1081_v14  ;;  %v12500_v4 = vld [vmem:[%s18229_s3 + $0x1fc] sm:$0xf0] }
 0x312   : > { %v2380_v39 = vrot.slane %v13948_v33, 4  ;;  %v10579_v42 = vor.u32 %v12500_v4, %v10578_v1 }
 0x313   : > { %v1216_v47 = vmax.f32 %v1082_v40, 0.0  ;;  %v3436_v23 = vpop.f32.mrf.mxu3 }
 0x314   : > { %v2381_v18 = vsel %vm2236_vm1, %v2378_v60, %v2380_v39  ;;  %v13969_v10 = vadd.f32 %v3436_v23, %v3350_v36  ;;  %3401 = vmatmul.bf16.gmra.mxu2 %v10623_v46 }
 0x315   : > { %v1687_v41 = vrot.slane %v1216_v47, 1  ;;  %v2597_v59 = vmax.f32 %v13848_v61, %v2381_v18  ;;  %v13978_v2 = vpop.f32.mrf.mxu1 }
 0x317   : > { %v1688_v60 = vsel %vm1533_vm0, %v1685_v16, %v1687_v41  ;;  %v13982_v19 = vpack.c.bf16 %v2597_v59, %v2596_v37 }
 0x318   : > { %v1084_v11 = vpop.f32.mrf.mxu0  ;;  %v13984_v25 = vmax.f32 %v1215_v52, %v1688_v60  ;;  %3525 = vmatmul.bf16.gmra.mxu1 %v10391_v34  ;;  %3478 = vmatmul.bf16.gmra.mxu3 %v10579_v42  ;;  %v13993_v16 = vpop.f32.mrf.mxu2  ;;  %v3355_v34 = vadd.f32 %v13915_v27, %v13566_v43  ;;  %v10602_v43 = vld [vmem:[%s18229_s3 + $0x218] sm:$0xf]  ;;  %v12506_v27 = vld [vmem:[%s18229_s3 + $0x22c] sm:$0xf0]  ;;  %v12514_v60 = vld [vmem:[%s18229_s3 + $0x274] sm:$0xf] }
 0x319   : > { %v1085_v61 = vadd.f32 %v13989_v6, %v1084_v11  ;;  %v10644_v11 = vld [vmem:[%s18229_s3 + $0x288] sm:$0xf0] }
 0x31a   : > { %v2382_v14 = vrot.slane %v13984_v25, 4 }
 0x31b   : > { %v1217_v36 = vmax.f32 %v1085_v61, 0.0  ;;  %1123 = vmatmul.bf16.gmra.mxu0 %v12425_v31  ;;  %v3439_v37 = vpop.f32.mrf.mxu3 }
 0x31c   : > { %v2383_v40 = vsel %vm2236_vm1, %v2380_v39, %v2382_v14  ;;  %v12455_v39 = vld [vmem:[%s18229_s3 + $0x9c] sm:$0xf] }
 0x31d   : > { %v1689_v52 = vrot.slane %v1217_v36, 1  ;;  %v2598_v44 = vmax.f32 %v13882_v62, %v2383_v40  ;;  %v13999_v1 = vpop.f32.mrf.mxu1  ;;  %v14013_v62 = vadd.f32 %v3439_v37, %v3353_v20  ;;  %v10415_v42 = vor.u32 %v12455_v39, %v10412_v12 }
 0x31e   : > { %18319 = vst [vmem:[#allocation9_spill] sm:$0xff] %v13999_v1  ;;  %v10603_v37 = vor.u32 %v12506_v27, %v10602_v43  ;;  %v10647_v40 = vor.u32 %v12514_v60, %v10644_v11  ;;  %v12461_v60 = vld [vmem:[%s18229_s3 + $0xcc] sm:$0xf]  ;;  %v10436_v11 = vld [vmem:[%s18229_s3 + $0xe0] sm:$0xf0] }
 0x31f   : > { %v1690_v4 = vsel %vm1533_vm0, %v1687_v41, %v1689_v52  ;;  %v12427_v1 = vld [vmem:[%s13073_s26 + $0x188] sm:$0xff] }
 0x320   : > { %v1086_v23 = vpop.f32.mrf.mxu0  ;;  %v14004_v18 = vmax.f32 %v1216_v47, %v1690_v4  ;;  %v14022_v41 = vpop.f32.mrf.mxu2  ;;  %v12426_v4 = vld [vmem:[%s13073_s26 + $0x180] sm:$0xff] }
 0x321   : > { %v1087_v50 = vadd.f32 %v13989_v6, %v1086_v23  ;;  %18320 = vst [vmem:[#allocation10_spill] sm:$0xff] %v14022_v41 }
 0x322   : > { %v2384_v48 = vrot.slane %v14004_v18, 4 }
 0x323   : > { %v1218_v47 = vmax.f32 %v1087_v50, 0.0  ;;  %v3441_v58 = vpop.f32.mrf.mxu3 }
 0x324   : > { %v2385_v59 = vsel %vm2236_vm1, %v2382_v14, %v2384_v48  ;;  %v14025_v46 = vadd.f32 %v3441_v58, %v3355_v34  ;;  %3406 = vmatmul.bf16.gmra.mxu2 %v10647_v40 }
 0x325   : > { %v1691_v31 = vrot.slane %v1218_v47, 1  ;;  %v2599_v61 = vmax.f32 %v13897_v32, %v2385_v59  ;;  %v14034_v20 = vpop.f32.mrf.mxu1 }
 0x327   : > { %v1692_v14 = vsel %vm1533_vm0, %v1689_v52, %v1691_v31  ;;  %v14038_v23 = vpack.c.bf16 %v2599_v61, %v2598_v44  ;;  %v3358_v44 = vadd.f32 %v13937_v29, %v13588_v56 }
 0x328   : > { %v1089_v34 = vpop.f32.mrf.mxu0  ;;  %3530 = vmatmul.bf16.gmra.mxu1 %v10415_v42  ;;  %3483 = vmatmul.bf16.gmra.mxu3 %v10603_v37  ;;  %v14043_v39 = vmax.f32 %v1217_v36, %v1692_v14  ;;  %v14046_v12 = vpop.f32.mrf.mxu2  ;;  %v10439_v14 = vor.u32 %v12461_v60, %v10436_v11 }
 0x329   : > { %v14041_v50 = vadd.f32 %v13989_v6, %v1089_v34  ;;  %v10668_v34 = vld [vmem:[%s18229_s3 + $0x2b8] sm:$0xf0] }
 0x32a   : > { %v2386_v27 = vrot.slane %v14043_v39, 4 }
 0x32b   : > { %v18239_v32 = vmax.f32 %v14041_v50, 0.0  ;;  %1128 = vmatmul.bf16.gmra.mxu0 %v12426_v4  ;;  %v3444_v43 = vpop.f32.mrf.mxu3 }
 0x32c   : > { %v14067_v61 = vadd.f32 %v3444_v43, %v3358_v44  ;;  %v2387_v29 = vsel %vm2236_vm1, %v2384_v48, %v2386_v27  ;;  %v12520_v48 = vld [vmem:[%s18229_s3 + $0x2a4] sm:$0xf] }
 0x32d   : > { %v14050_v52 = vrot.slane %v18239_v32, 1  ;;  %v14055_v58 = vpop.f32.mrf.mxu1  ;;  %v2600_v43 = vmax.f32 %v13933_v13, %v2387_v29  ;;  %v10671_v32 = vor.u32 %v12520_v48, %v10668_v34  ;;  %v3363_v13 = vadd.f32 %v13993_v16, %v13627_v22  ;;  %v10650_v22 = vld [vmem:[%s18229_s3 + $0x278] sm:$0xf]  ;;  %v12518_v16 = vld [vmem:[%s18229_s3 + $0x28c] sm:$0xf0] }
 0x32e   : > { %18321 = vst [vmem:[#allocation11_spill] sm:$0xff] %v14055_v58 }
 0x32f   : > { %v1694_v36 = vsel %vm1533_vm0, %v1691_v31, %v14050_v52  ;;  %v12512_v31 = vld [vmem:[%s18229_s3 + $0x25c] sm:$0xf0] }
 0x330   : > { %v1091_v59 = vpop.f32.mrf.mxu0  ;;  %v14059_v42 = vmax.f32 %v1218_v47, %v1694_v36  ;;  %v10626_v47 = vld [vmem:[%s18229_s3 + $0x248] sm:$0xf]  ;;  %v14077_v37 = vpop.f32.mrf.mxu2 }
 0x331   : > { %18322 = vst [vmem:[#allocation12_spill] sm:$0xff] %v14077_v37  ;;  %v10627_v36 = vor.u32 %v12512_v31, %v10626_v47  ;;  %v1092_v29 = vadd.f32 %v13989_v6, %v1091_v59 }
 0x332   : > { %v18240_v56 = vrot.slane %v14059_v42, 4  ;;  %v18329_v17 = vrot.slane %v14059_v42, 4 }
 0x333   : > { %v14079_v40 = vpop.f32.mrf.mxu3  ;;  %v1220_v59 = vmax.f32 %v1092_v29, 0.0 }
 0x334   : > { %v2389_v4 = vsel %vm2236_vm1, %v2386_v27, %v18240_v56  ;;  %3411 = vmatmul.bf16.gmra.mxu2 %v10671_v32  ;;  %v10460_v32 = vld [vmem:[%s18229_s3 + $0x110] sm:$0xf0] }
 0x335   : > { %v2601_v44 = vmax.f32 %v13948_v33, %v2389_v4  ;;  %v14092_v58 = vpop.f32.mrf.mxu1  ;;  %v1695_v29 = vrot.slane %v1220_v59, 1 }
 0x337   : > { %v14095_v45 = vpack.c.bf16 %v2601_v44, %v2600_v43  ;;  %v1696_v38 = vsel %vm1533_vm0, %v14050_v52, %v1695_v29 }
 0x338   : > { %v1094_v27 = vpop.f32.mrf.mxu0  ;;  %3535 = vmatmul.bf16.gmra.mxu1 %v10439_v14  ;;  %3488 = vmatmul.bf16.gmra.mxu3 %v10627_v36  ;;  %v14097_v60 = vpop.f32.mrf.mxu2 }
 0x339   : > { %v1095_v56 = vadd.f32 %v13989_v6, %v1094_v27  ;;  %v12526_v27 = vld [vmem:[%s18229_s3 + $0x2d4] sm:$0xf] }
 0x33b   : > { %1133 = vmatmul.bf16.gmra.mxu0 %v12427_v1  ;;  %v3449_v11 = vpop.f32.mrf.mxu3  ;;  %v1221_v31 = vmax.f32 %v1095_v56, 0.0  ;;  %v12467_v1 = vld [vmem:[%s18229_s3 + $0xfc] sm:$0xf] }
 0x33c   : > { %v14112_v14 = vadd.f32 %v3449_v11, %v3363_v13  ;;  %v10463_v43 = vor.u32 %v12467_v1, %v10460_v32  ;;  %v10692_v11 = vld [vmem:[%s18229_s3 + $0x2e8] sm:$0xf0]  ;;  %v10651_v13 = vor.u32 %v12518_v16, %v10650_v22 }
 0x33d   : > { %v14102_v33 = vpop.f32.mrf.mxu1  ;;  %v1697_v44 = vrot.slane %v1221_v31, 1 }
 0x33e   : > { %18323 = vst [vmem:[#allocation13_spill] sm:$0xff] %v14102_v33 }
 0x33f   : > { %v1698_v1 = vsel %vm1533_vm0, %v1695_v29, %v1697_v44 }
 0x340   : > { %v1096_v47 = vpop.f32.mrf.mxu0  ;;  %v14120_v48 = vpop.f32.mrf.mxu2  ;;  %v14139_v16 = vmax.f32 %v1220_v59, %v1698_v1  ;;  %v12524_v1 = vld [vmem:[%s18229_s3 + $0x2bc] sm:$0xf0] }
 0x341   : > { %v1097_v4 = vadd.f32 %v13989_v6, %v1096_v47  ;;  %18324 = vst [vmem:[#allocation14_spill] sm:$0xff] %v14120_v48  ;;  %v10695_v47 = vor.u32 %v12526_v27, %v10692_v11 }
 0x342   : > { %v2392_v29 = vrot.slane %v14139_v16, 4 }
 0x343   : > { %v1222_v56 = vmax.f32 %v1097_v4, 0.0  ;;  %v14122_v34 = vpop.f32.mrf.mxu3 }
 0x344   : > { %18325 = vst [vmem:[#allocation15_spill] sm:$0xff] %v14122_v34  ;;  %3416 = vmatmul.bf16.gmra.mxu2 %v10695_v47 }
 0x345   : > { %v1699_v36 = vrot.slane %v1222_v56, 1  ;;  %v3330_v33 = vpop.f32.mrf.mxu1 }
 0x347   : > { %v1700_v4 = vsel %vm1533_vm0, %v1697_v44, %v1699_v36  ;;  %v18326_v44 = vmax.f32 %v14041_v50, 0.0 }
 0x348   : > { %v1099_v9 = vpop.f32.mrf.mxu0  ;;  %3540 = vmatmul.bf16.gmra.mxu1 %v10463_v43  ;;  %3493 = vmatmul.bf16.gmra.mxu3 %v10651_v13  ;;  %v14133_v28 = vmax.f32 %v1221_v31, %v1700_v4  ;;  %v14137_v22 = vpop.f32.mrf.mxu2  ;;  %v3368_v43 = vadd.f32 %v14046_v12, %v13666_v63  ;;  %v12473_v63 = vld [vmem:[%s18229_s3 + $0x12c] sm:$0xf]  ;;  %v10674_v4 = vld [vmem:[%s18229_s3 + $0x2a8] sm:$0xf] }
 0x349   : > { %v1100_v32 = vadd.f32 %v13989_v6, %v1099_v9  ;;  %v14145_v11 = vmax.f32 %v18326_v44, %v1696_v38  ;;  %v10484_v38 = vld [vmem:[%s18229_s3 + $0x140] sm:$0xf0]  ;;  %v10675_v37 = vor.u32 %v12524_v1, %v10674_v4 }
 0x34a   : > { %v2394_v9 = vrot.slane %v14133_v28, 4 }
 0x34b   : > { %v1223_v51 = vmax.f32 %v1100_v32, 0.0  ;;  %v3454_v33 = vpop.f32.mrf.mxu3 }
 0x34c   : > { %v14159_v50 = vadd.f32 %v3454_v33, %v3368_v43  ;;  %v2395_v12 = vsel %vm2236_vm1, %v2392_v29, %v2394_v9 }
 0x34d   : > { %v1701_v27 = vrot.slane %v1223_v51, 1  ;;  %v3331_v31 = vpop.f32.mrf.mxu1  ;;  %v2604_v48 = vmax.f32 %v14043_v39, %v2395_v12  ;;  %v12479_v12 = vld [vmem:[%s18229_s3 + $0x15c] sm:$0xf] }
 0x34f   : > { %v1702_v13 = vsel %vm1533_vm0, %v1699_v36, %v1701_v27  ;;  %v2390_v36 = vrot.slane %v14145_v11, 4 }
 0x350   : > { %v14149_v52 = vmax.f32 %v1222_v56, %v1702_v13  ;;  %v1101_v47 = vpop.f32.mrf.mxu0  ;;  %v14170_v44 = vpop.f32.mrf.mxu2  ;;  %v10487_v13 = vor.u32 %v12473_v63, %v10484_v38 }
 0x351   : > { %v1102_v59 = vadd.f32 %v13989_v6, %v1101_v47  ;;  %18327 = vst [vmem:[#allocation16_spill] sm:$0xff] %v14170_v44  ;;  %v2393_v43 = vsel %vm2236_vm1, %v2390_v36, %v2392_v29  ;;  %v2391_v34 = vsel %vm2236_vm1, %v18329_v17, %v2390_v36 }
 0x352   : > { %v2396_v56 = vrot.slane %v14149_v52, 4  ;;  %v2603_v44 = vmax.f32 %v14004_v18, %v2393_v43  ;;  %v2602_v39 = vmax.f32 %v13984_v25, %v2391_v34 }
 0x353   : > { %v1224_v32 = vmax.f32 %v1102_v59, 0.0  ;;  %v14172_v31 = vpop.f32.mrf.mxu3 }
 0x354   : > { %18328 = vst [vmem:[#allocation17_spill] sm:$0xff] %v14172_v31  ;;  %v2397_v33 = vsel %vm2236_vm1, %v2394_v9, %v2396_v56  ;;  %v2660_v38 = vpack.c.bf16 %v2603_v44, %v2602_v39 }
 0x355   : > { %v1703_v47 = vrot.slane %v1224_v32, 1  ;;  %v2605_v8 = vmax.f32 %v14059_v42, %v2397_v33 }
 0x357   : > { %v2661_v59 = vpack.c.bf16 %v2605_v8, %v2604_v48  ;;  %v1704_v31 = vsel %vm1533_vm0, %v1701_v27, %v1703_v47 }
 0x358   : > { %v1104_v41 = vpop.f32.mrf.mxu0  ;;  %3545 = vmatmul.bf16.gmra.mxu1 %v10487_v13  ;;  %v14183_v9 = vmax.f32 %v1223_v51, %v1704_v31  ;;  %3498 = vmatmul.bf16.gmra.mxu3 %v10675_v37  ;;  %v14188_v17 = vpop.f32.mrf.mxu2  ;;  %v3373_v51 = vadd.f32 %v14097_v60, %v13711_v24  ;;  %v10508_v24 = vld [vmem:[%s18229_s3 + $0x170] sm:$0xf0] }
 0x359   : > { %v1105_v29 = vadd.f32 %v13989_v6, %v1104_v41  ;;  %3594 = vmatpush.bf16.msrb.mxu2 %v2661_v59  ;;  %v10511_v1 = vor.u32 %v12479_v12, %v10508_v24 }
 0x35a   : > { %v2398_v63 = vrot.slane %v14183_v9, 4 }
 0x35b   : > { %v1225_v42 = vmax.f32 %v1105_v29, 0.0  ;;  %v3459_v8 = vpop.f32.mrf.mxu3 }
 0x35c   : > { %v2399_v18 = vsel %vm2236_vm1, %v2396_v56, %v2398_v63  ;;  %v14205_v60 = vadd.f32 %v3459_v8, %v3373_v51 }
 0x35d   : > { %v1705_v48 = vrot.slane %v1225_v42, 1  ;;  %3595 = vmatpush.bf16.msrb.mxu2 %v2660_v38  ;;  %v2606_v41 = vmax.f32 %v14145_v11, %v2399_v18  ;;  %v3378_v38 = vadd.f32 %v14137_v22, %v13739_v49  ;;  %v12441_v49 = vld [vmem:[%s18229_s3 + $0x24] sm:$0xf0] }
 0x35f   : > { %v1706_v27 = vsel %vm1533_vm0, %v1703_v47, %v1705_v48 }
 0x360   : > { %v1106_v25 = vpop.f32.mrf.mxu0  ;;  %v14195_v37 = vmax.f32 %v1224_v32, %v1706_v27  ;;  %v14208_v36 = vpop.f32.mrf.mxu2 }
 0x361   : > { %v1107_v34 = vadd.f32 %v13989_v6, %v1106_v25  ;;  %3596 = vmatpush.bf16.msrb.mxu2 %v14095_v45  ;;  %18330 = vst [vmem:[#allocation18_spill] sm:$0xff] %v14208_v36 }
 0x362   : > { %v2400_v11 = vrot.slane %v14195_v37, 4 }
 0x363   : > { %v1226_v56 = vmax.f32 %v1107_v34, 0.0  ;;  %v14210_v4 = vpop.f32.mrf.mxu3 }
 0x364   : > { %18331 = vst [vmem:[#allocation19_spill] sm:$0xff] %v14210_v4  ;;  %v2401_v45 = vsel %vm2236_vm1, %v2398_v63, %v2400_v11 }
 0x365   : > { %v1707_v32 = vrot.slane %v1226_v56, 1  ;;  %3597 = vmatpush.bf16.msrb.mxu2 %v14038_v23  ;;  %v2607_v44 = vmax.f32 %v14139_v16, %v2401_v45 }
 0x367   : > { %v1708_v31 = vsel %vm1533_vm0, %v1705_v48, %v1707_v32  ;;  %v14216_v33 = vpack.c.bf16 %v2607_v44, %v2606_v41 }
 0x368   : > { %v1109_v43 = vpop.f32.mrf.mxu0  ;;  %3550 = vmatmul.bf16.gmra.mxu1 %v10511_v1  ;;  %v14218_v13 = vmax.f32 %v1225_v42, %v1708_v31  ;;  %v14223_v39 = vpop.f32.mrf.mxu2 }
 0x369   : > { %v1110_v47 = vadd.f32 %v13989_v6, %v1109_v43  ;;  %3598 = vmatpush.bf16.msrb.mxu2 %v13982_v19  ;;  %v10346_v19 = vld [vmem:[%s18229_s3 + $0x10] sm:$0xf] }
 0x36a   : > { %v2402_v59 = vrot.slane %v14218_v13, 4  ;;  %v10347_v34 = vor.u32 %v12441_v49, %v10346_v19  ;;  %v10370_v19 = vld [vmem:[%s18229_s3 + $0x40] sm:$0xf] }
 0x36b   : > { %v1227_v29 = vmax.f32 %v1110_v47, 0.0  ;;  %v3464_v23 = vpop.f32.mrf.mxu3 }
 0x36c   : > { %v2403_v16 = vsel %vm2236_vm1, %v2400_v11, %v2402_v59  ;;  %v14247_v22 = vadd.f32 %v3464_v23, %v3378_v38 }
 0x36d   : > { %v1709_v63 = vrot.slane %v1227_v29, 1  ;;  %3599 = vmatpush.bf16.msrb.mxu2 %v13931_v55  ;;  %v2608_v42 = vmax.f32 %v14133_v28, %v2403_v16  ;;  %v12485_v28 = vld [vmem:[%s18229_s3 + $0x18c] sm:$0xf]  ;;  %v10532_v55 = vld [vmem:[%s18229_s3 + $0x1a0] sm:$0xf0] }
 0x36e   : > { %v10535_v12 = vor.u32 %v12485_v28, %v10532_v55 }
 0x36f   : > { %v1710_v8 = vsel %vm1533_vm0, %v1707_v32, %v1709_v63 }
 0x370   : > { %v1111_v18 = vpop.f32.mrf.mxu0  ;;  %v14234_v48 = vmax.f32 %v1226_v56, %v1710_v8  ;;  %v14250_v25 = vpop.f32.mrf.mxu2 }
 0x371   : > { %v1112_v51 = vadd.f32 %v13989_v6, %v1111_v18  ;;  %3600 = vmatpush.bf16.msrb.mxu2 %v13880_v53  ;;  %18332 = vst [vmem:[#allocation20_spill] sm:$0xff] %v14250_v25 }
 0x372   : > { %v2404_v41 = vrot.slane %v14234_v48, 4 }
 0x373   : > { %v1228_v27 = vmax.f32 %v1112_v51, 0.0  ;;  %v14252_v53 = vpop.f32.mrf.mxu3 }
 0x374   : > { %18333 = vst [vmem:[#allocation21_spill] sm:$0xff] %v14252_v53  ;;  %v2405_v24 = vsel %vm2236_vm1, %v2402_v59, %v2404_v41 }
 0x375   : > { %v1711_v11 = vrot.slane %v1228_v27, 1  ;;  %3601 = vmatpush.bf16.msrb.mxu2 %v13833_v3  ;;  %v3516_v56 = vpop.f32.mrf.mxu1  ;;  %v2609_v1 = vmax.f32 %v14149_v52, %v2405_v24 }
 0x376   : > { %v14258_v45 = vadd.f32 %v3516_v56, %v13906_v54 }
 0x377   : > { %v1712_v32 = vsel %vm1533_vm0, %v1709_v63, %v1711_v11  ;;  %v14261_v44 = vpack.c.bf16 %v2609_v1, %v2608_v42  ;;  %v3383_v63 = vadd.f32 %v14188_v17, %v13790_v0  ;;  %v12447_v0 = vld [vmem:[%s18229_s3 + $0x54] sm:$0xf0] }
 0x378   : > { %v1114_v31 = vpop.f32.mrf.mxu0  ;;  %3602 = vmatmul.bf16.vlgmr.msrb.gmra.mxu2 %v10347_v34  ;;  %3555 = vmatmul.bf16.gmra.mxu1 %v10535_v12  ;;  %v14263_v43 = vmax.f32 %v1227_v29, %v1712_v32  ;;  %v14267_v23 = vpop.f32.mrf.mxu2 }
 0x379   : > { %v1115_v47 = vadd.f32 %v13989_v6, %v1114_v31 }
 0x37a   : > { %v2406_v59 = vrot.slane %v14263_v43, 4 }
 0x37b   : > { %v1229_v3 = vmax.f32 %v1115_v47, 0.0  ;;  %v3469_v54 = vpop.f32.mrf.mxu3 }
 0x37c   : > { %v2407_v52 = vsel %vm2236_vm1, %v2404_v41, %v2406_v59  ;;  %v14292_v17 = vadd.f32 %v3469_v54, %v3383_v63 }
 0x37d   : > { %v1713_v16 = vrot.slane %v1229_v3, 1  ;;  %v3518_v38 = vpop.f32.mrf.mxu1  ;;  %v2610_v42 = vmax.f32 %v14183_v9, %v2407_v52  ;;  %v10556_v9 = vld [vmem:[%s18229_s3 + $0x1d0] sm:$0xf0] }
 0x37e   : > { %v14274_v29 = vadd.f32 %v3518_v38, %v13918_v15  ;;  %v12491_v15 = vld [vmem:[%s18229_s3 + $0x1bc] sm:$0xf] }
 0x37f   : > { %v1714_v8 = vsel %vm1533_vm0, %v1711_v11, %v1713_v16  ;;  %v10559_v34 = vor.u32 %v12491_v15, %v10556_v9  ;;  %v10394_v15 = vld [vmem:[%s18229_s3 + $0x70] sm:$0xf] }
 0x380   : > { %v1116_v18 = vpop.f32.mrf.mxu0  ;;  %v14280_v51 = vmax.f32 %v1228_v27, %v1714_v8  ;;  %v14295_v41 = vpop.f32.mrf.mxu2  ;;  %v10371_v27 = vor.u32 %v12447_v0, %v10370_v19 }
 0x381   : > { %v1117_v49 = vadd.f32 %v13989_v6, %v1116_v18  ;;  %18334 = vst [vmem:[#allocation22_spill] sm:$0xff] %v14295_v41 }
 0x382   : > { %v2408_v28 = vrot.slane %v14280_v51, 4 }
 0x383   : > { %v1230_v55 = vmax.f32 %v1117_v49, 0.0  ;;  %v14298_v24 = vpop.f32.mrf.mxu3 }
 0x384   : > { %v2409_v12 = vsel %vm2236_vm1, %v2406_v59, %v2408_v28  ;;  %18335 = vst [vmem:[#allocation23_spill] sm:$0xff] %v14298_v24 }
 0x385   : > { %v1715_v11 = vrot.slane %v1230_v55, 1  ;;  %v3521_v56 = vpop.f32.mrf.mxu1  ;;  %v2611_v1 = vmax.f32 %v14195_v37, %v2409_v12 }
 0x386   : > { %v14302_v32 = vadd.f32 %v3521_v56, %v13957_v5 }
 0x387   : > { %v1716_v31 = vsel %vm1533_vm0, %v1713_v16, %v1715_v11  ;;  %v14305_v47 = vpack.c.bf16 %v2611_v1, %v2610_v42  ;;  %v3388_v16 = vadd.f32 %v14223_v39, %v13829_v7  ;;  %v12453_v7 = vld [vmem:[%s18229_s3 + $0x84] sm:$0xf0] }
 0x388   : > { %v1119_v52 = vpop.f32.mrf.mxu0  ;;  %3607 = vmatmul.bf16.gmra.mxu2 %v10371_v27  ;;  %3560 = vmatmul.bf16.gmra.mxu1 %v10559_v34  ;;  %v14307_v54 = vmax.f32 %v1229_v3, %v1716_v31  ;;  %v14311_v8 = vpop.f32.mrf.mxu2  ;;  %v10395_v12 = vor.u32 %v12453_v7, %v10394_v15 }
 0x389   : > { %v1120_v59 = vadd.f32 %v13989_v6, %v1119_v52 }
 0x38a   : > { %v2410_v63 = vrot.slane %v14307_v54, 4 }
 0x38b   : > { %v1231_v38 = vmax.f32 %v1120_v59, 0.0  ;;  %v3474_v5 = vpop.f32.mrf.mxu3 }
 0x38c   : > { %v2411_v37 = vsel %vm2236_vm1, %v2408_v28, %v2410_v63  ;;  %v14336_v39 = vadd.f32 %v3474_v5, %v3388_v16 }
 0x38d   : > { %v1717_v18 = vrot.slane %v1231_v38, 1  ;;  %v3523_v42 = vpop.f32.mrf.mxu1  ;;  %v2612_v19 = vmax.f32 %v14218_v13, %v2411_v37  ;;  %v10580_v13 = vld [vmem:[%s18229_s3 + $0x200] sm:$0xf0] }
 0x38e   : > { %v14318_v3 = vadd.f32 %v3523_v42, %v13969_v10  ;;  %v12497_v10 = vld [vmem:[%s18229_s3 + $0x1ec] sm:$0xf] }
 0x38f   : > { %v1718_v49 = vsel %vm1533_vm0, %v1715_v11, %v1717_v18  ;;  %v10583_v56 = vor.u32 %v12497_v10, %v10580_v13  ;;  %v10418_v13 = vld [vmem:[%s18229_s3 + $0xa0] sm:$0xf] }
 0x390   : > { %v1121_v0 = vpop.f32.mrf.mxu0  ;;  %v14324_v9 = vmax.f32 %v1230_v55, %v1718_v49  ;;  %v14339_v34 = vpop.f32.mrf.mxu2 }
 0x391   : > { %v1122_v28 = vadd.f32 %v13989_v6, %v1121_v0  ;;  %18336 = vst [vmem:[#allocation24_spill] sm:$0xff] %v14339_v34 }
 0x392   : > { %v2412_v27 = vrot.slane %v14324_v9, 4 }
 0x393   : > { %v1232_v55 = vmax.f32 %v1122_v28, 0.0  ;;  %v14342_v1 = vpop.f32.mrf.mxu3 }
 0x394   : > { %v2413_v11 = vsel %vm2236_vm1, %v2410_v63, %v2412_v27  ;;  %18337 = vst [vmem:[#allocation25_spill] sm:$0xff] %v14342_v1 }
 0x395   : > { %v1719_v31 = vrot.slane %v1232_v55, 1  ;;  %v3526_v52 = vpop.f32.mrf.mxu1  ;;  %v2613_v59 = vmax.f32 %v14234_v48, %v2413_v11 }
 0x396   : > { %v14346_v37 = vadd.f32 %v3526_v52, %v14013_v62 }
 0x397   : > { %v1720_v5 = vsel %vm1533_vm0, %v1717_v18, %v1719_v31  ;;  %v14349_v16 = vpack.c.bf16 %v2613_v59, %v2612_v19  ;;  %v3393_v18 = vadd.f32 %v14267_v23, %v13876_v30  ;;  %v12459_v30 = vld [vmem:[%s18229_s3 + $0xb4] sm:$0xf0]  ;;  %v12503_v23 = vld [vmem:[%s18229_s3 + $0x21c] sm:$0xf] }
 0x398   : > { %v1124_v42 = vpop.f32.mrf.mxu0  ;;  %3612 = vmatmul.bf16.gmra.mxu2 %v10395_v12  ;;  %3565 = vmatmul.bf16.gmra.mxu1 %v10583_v56  ;;  %v14354_v63 = vmax.f32 %v1231_v38, %v1720_v5  ;;  %v14357_v15 = vpop.f32.mrf.mxu2  ;;  %v10419_v52 = vor.u32 %v12459_v30, %v10418_v13 }
 0x399   : > { %v14352_v49 = vadd.f32 %v13989_v6, %v1124_v42 }
 0x39a   : > { %v2414_v28 = vrot.slane %v14354_v63, 4 }
 0x39b   : > { %v18241_v0 = vmax.f32 %v14352_v49, 0.0  ;;  %v3479_v48 = vpop.f32.mrf.mxu3 }
 0x39c   : > { %v14385_v11 = vadd.f32 %v3479_v48, %v3393_v18 }
 0x39d   : > { %v14361_v62 = vrot.slane %v18241_v0, 1  ;;  %v3528_v19 = vpop.f32.mrf.mxu1 }
 0x39e   : > { %v14367_v7 = vadd.f32 %v3528_v19, %v14025_v46  ;;  %v10604_v46 = vld [vmem:[%s18229_s3 + $0x230] sm:$0xf0] }
 0x39f   : > { %v1722_v38 = vsel %vm1533_vm0, %v1719_v31, %v14361_v62  ;;  %v2415_v31 = vsel %vm2236_vm1, %v2412_v27, %v2414_v28  ;;  %v10607_v5 = vor.u32 %v12503_v23, %v10604_v46  ;;  %v10442_v23 = vld [vmem:[%s18229_s3 + $0xd0] sm:$0xf]  ;;  %v12465_v46 = vld [vmem:[%s18229_s3 + $0xe4] sm:$0xf0] }
 0x3a0   : > { %v1126_v10 = vpop.f32.mrf.mxu0  ;;  %v14374_v12 = vmax.f32 %v1232_v55, %v1722_v38  ;;  %v14389_v55 = vpop.f32.mrf.mxu2  ;;  %v2614_v19 = vmax.f32 %v14263_v43, %v2415_v31  ;;  %v3398_v43 = vadd.f32 %v14311_v8, %v13927_v57  ;;  %v12509_v31 = vld [vmem:[%s18229_s3 + $0x24c] sm:$0xf] }
 0x3a1   : > { %18338 = vst [vmem:[#allocation26_spill] sm:$0xff] %v14389_v55 }
 0x3a2   : > { %v18242_v56 = vrot.slane %v14374_v12, 4 }
 0x3a3   : > { %v14394_v42 = vpop.f32.mrf.mxu3 }
 0x3a4   : > { %v2417_v59 = vsel %vm2236_vm1, %v2414_v28, %v18242_v56  ;;  %18339 = vst [vmem:[#allocation27_spill] sm:$0xff] %v14394_v42  ;;  %v12643_v28 = vld [vmem:[%s18230_s4 + $0x378] sm:$0xff] }
 0x3a5   : > { %v2615_v38 = vmax.f32 %v14280_v51, %v2417_v59  ;;  %v3531_v48 = vpop.f32.mrf.mxu1  ;;  %5063 = vmatpush.bf16.msrb.mxu0 %v12643_v28  ;;  %v10443_v59 = vor.u32 %v12465_v46, %v10442_v23  ;;  %v12530_v28 = vld [vmem:[%s18229_s3 + $0x2ec] sm:$0xf0] }
 0x3a6   : > { %v14399_v18 = vadd.f32 %v3531_v48, %v14067_v61  ;;  %v10698_v48 = vld [vmem:[%s18229_s3 + $0x2d8] sm:$0xf] }
 0x3a7   : > { %v14401_v0 = vpack.c.bf16 %v2615_v38, %v2614_v19 }
 0x3a8   : > { %v1129_v27 = vpop.f32.mrf.mxu0  ;;  %3617 = vmatmul.bf16.gmra.mxu2 %v10419_v52  ;;  %3570 = vmatmul.bf16.gmra.mxu1 %v10607_v5  ;;  %v14406_v13 = vpop.f32.mrf.mxu2  ;;  %v10628_v52 = vld [vmem:[%s18229_s3 + $0x260] sm:$0xf0] }
 0x3a9   : > { %v10631_v5 = vor.u32 %v12509_v31, %v10628_v52  ;;  %v1130_v23 = vadd.f32 %v13989_v6, %v1129_v27  ;;  %v1127_v31 = vadd.f32 %v13989_v6, %v1126_v10  ;;  %v12471_v10 = vld [vmem:[%s18229_s3 + $0x114] sm:$0xf0] }
 0x3ab   : > { %v3484_v30 = vpop.f32.mrf.mxu3 }
 0x3ac   : > { %v14424_v57 = vadd.f32 %v3484_v30, %v3398_v43  ;;  %v10699_v43 = vor.u32 %v12530_v28, %v10698_v48 }
 0x3ad   : > { %v14410_v51 = vpop.f32.mrf.mxu1 }
 0x3ae   : > { %3503 = vmatmul.bf16.gmra.mxu3 %v10699_v43 }
 0x3b0   : > { %v1131_v61 = vpop.f32.mrf.mxu0  ;;  %v14426_v8 = vpop.f32.mrf.mxu2 }
 0x3b1   : > { %18340 = vst [vmem:[#allocation28_spill] sm:$0xff] %v14426_v8  ;;  %v1132_v30 = vadd.f32 %v13989_v6, %v1131_v61  ;;  %v3403_v61 = vadd.f32 %v14357_v15, %v13978_v2  ;;  %v12515_v2 = vld [vmem:[%s18229_s3 + $0x27c] sm:$0xf]  ;;  %v10652_v15 = vld [vmem:[%s18229_s3 + $0x290] sm:$0xf0] }
 0x3b2   : > { %v10655_v24 = vor.u32 %v12515_v2, %v10652_v15 }
 0x3b3   : > { %v14428_v19 = vpop.f32.mrf.mxu3  ;;  %v1236_v52 = vmax.f32 %v1132_v30, 0.0 }
 0x3b4   : > { %18341 = vst [vmem:[#allocation29_spill] sm:$0xff] %v14428_v19 }
 0x3b5   : > { %v3536_v38 = vpop.f32.mrf.mxu1 }
 0x3b6   : > { %v14437_v56 = vadd.f32 %v3536_v38, %v14112_v14  ;;  %v1235_v14 = vmax.f32 %v1130_v23, 0.0 }
 0x3b8   : > { %v1134_v8 = vpop.f32.mrf.mxu0  ;;  %3622 = vmatmul.bf16.gmra.mxu2 %v10443_v59  ;;  %3575 = vmatmul.bf16.gmra.mxu1 %v10631_v5  ;;  %v14443_v19 = vpop.f32.mrf.mxu2  ;;  %v1234_v59 = vmax.f32 %v1127_v31, 0.0  ;;  %v2021_v5 = vrot.slane %v1236_v52, 1  ;;  %v1725_v28 = vrot.slane %v1235_v14, 1 }
 0x3b9   : > { %v1135_v46 = vadd.f32 %v13989_v6, %v1134_v8  ;;  %v10466_v8 = vld [vmem:[%s18229_s3 + $0x100] sm:$0xf] }
 0x3ba   : > { %v2022_v31 = vsel %vm1533_vm0, %v1725_v28, %v2021_v5  ;;  %v10467_v25 = vor.u32 %v12471_v10, %v10466_v8 }
 0x3bb   : > { %v1237_v55 = vmax.f32 %v1135_v46, 0.0  ;;  %v3489_v34 = vpop.f32.mrf.mxu3  ;;  %v1723_v46 = vrot.slane %v1234_v59, 1  ;;  %v2031_v4 = vmax.f32 %v1235_v14, %v2022_v31 }
 0x3bc   : > { %v14463_v23 = vadd.f32 %v3489_v34, %v3403_v61 }
 0x3bd   : > { %v2023_v38 = vrot.slane %v1237_v55, 1  ;;  %v14447_v48 = vpop.f32.mrf.mxu1  ;;  %v1726_v36 = vsel %vm1533_vm0, %v1723_v46, %v1725_v28  ;;  %v2422_v14 = vrot.slane %v2031_v4, 4 }
 0x3be   : > { %18342 = vst [vmem:[#allocation30_spill] sm:$0xff] %v14447_v48 }
 0x3bf   : > { %v2024_v30 = vsel %vm1533_vm0, %v2021_v5, %v2023_v38  ;;  %v1724_v5 = vsel %vm1533_vm0, %v14361_v62, %v1723_v46  ;;  %v10490_v46 = vld [vmem:[%s18229_s3 + $0x130] sm:$0xf] }
 0x3c0   : > { %v1136_v27 = vpop.f32.mrf.mxu0  ;;  %v14466_v41 = vpop.f32.mrf.mxu2  ;;  %v2032_v1 = vmax.f32 %v1236_v52, %v2024_v30  ;;  %v1918_v52 = vmax.f32 %v1234_v59, %v1726_v36  ;;  %v3408_v36 = vadd.f32 %v14406_v13, %v14034_v20  ;;  %v12477_v20 = vld [vmem:[%s18229_s3 + $0x144] sm:$0xf0]  ;;  %v12521_v13 = vld [vmem:[%s18229_s3 + $0x2ac] sm:$0xf] }
 0x3c1   : > { %v1137_v43 = vadd.f32 %v13989_v6, %v1136_v27 }
 0x3c2   : > { %v2424_v10 = vrot.slane %v2032_v1, 4 }
 0x3c3   : > { %v1238_v42 = vmax.f32 %v1137_v43, 0.0  ;;  %v14468_v6 = vpop.f32.mrf.mxu3  ;;  %v18343_v43 = vmax.f32 %v14352_v49, 0.0 }
 0x3c5   : > { %v2025_v27 = vrot.slane %v1238_v42, 1  ;;  %v3541_v53 = vpop.f32.mrf.mxu1  ;;  %v1917_v28 = vmax.f32 %v18343_v43, %v1724_v5  ;;  %v18344_v5 = vrot.slane %v14374_v12, 4 }
 0x3c6   : > { %v14472_v48 = vadd.f32 %v3541_v53, %v14159_v50  ;;  %v2420_v50 = vrot.slane %v1918_v52, 4 }
 0x3c7   : > { %v2026_v34 = vsel %vm1533_vm0, %v2023_v38, %v2025_v27  ;;  %v2034_v61 = vmax.f32 %v1238_v42, %v2025_v27  ;;  %v2425_v38 = vsel %vm2236_vm1, %v2422_v14, %v2424_v10  ;;  %v2418_v49 = vrot.slane %v1917_v28, 4 }
 0x3c8   : > { %3627 = vmatmul.bf16.gmra.mxu2 %v10467_v25  ;;  %v2033_v8 = vmax.f32 %v1237_v55, %v2026_v34  ;;  %3580 = vmatmul.bf16.gmra.mxu1 %v10655_v24  ;;  %v3417_v15 = vpop.f32.mrf.mxu2  ;;  %v2423_v55 = vsel %vm2236_vm1, %v2420_v50, %v2422_v14  ;;  %v2619_v59 = vmax.f32 %v14374_v12, %v2425_v38  ;;  %v10676_v34 = vld [vmem:[%s18229_s3 + $0x2c0] sm:$0xf0] }
 0x3c9   : > { %v2428_v30 = vrot.slane %v2034_v61, 4  ;;  %v2421_v31 = vsel %vm2236_vm1, %v2418_v49, %v2420_v50  ;;  %v2618_v27 = vmax.f32 %v14354_v63, %v2423_v55  ;;  %v10679_v43 = vor.u32 %v12521_v13, %v10676_v34 }
 0x3ca   : > { %v2426_v2 = vrot.slane %v2033_v8, 4  ;;  %v2617_v63 = vmax.f32 %v14324_v9, %v2421_v31  ;;  %v3413_v12 = vadd.f32 %v14443_v19, %v14092_v58  ;;  %v10348_v19 = vld [vmem:[%s18229_s3 + $0x28] sm:$0xf0]  ;;  %v12495_v31 = vld [vmem:[%s18229_s3 + $0x1d4] sm:$0xf0] }
 0x3cb   : > { %v3494_v62 = vpop.f32.mrf.mxu3  ;;  %v2668_v8 = vpack.c.bf16 %v2619_v59, %v2618_v27 }
 0x3cc   : > { %v2427_v53 = vsel %vm2236_vm1, %v2424_v10, %v2426_v2  ;;  %v2429_v42 = vsel %vm2236_vm1, %v2426_v2, %v2428_v30  ;;  %v14502_v61 = vadd.f32 %v3494_v62, %v3408_v36  ;;  %v10491_v30 = vor.u32 %v12477_v20, %v10490_v46 }
 0x3cd   : > { %v2620_v25 = vmax.f32 %v1917_v28, %v2427_v53  ;;  %v2621_v24 = vmax.f32 %v1918_v52, %v2429_v42  ;;  %v14484_v1 = vpop.f32.mrf.mxu1  ;;  %v2419_v52 = vsel %vm2236_vm1, %v18344_v5, %v2418_v49  ;;  %v10372_v49 = vld [vmem:[%s18229_s3 + $0x58] sm:$0xf0] }
 0x3ce   : > { %v2616_v28 = vmax.f32 %v14307_v54, %v2419_v52  ;;  %v12483_v54 = vld [vmem:[%s18229_s3 + $0x174] sm:$0xf0]  ;;  %v12450_v52 = vld [vmem:[%s18229_s3 + $0x74] sm:$0xf] }
 0x3cf   : > { %v2669_v4 = vpack.c.bf16 %v2621_v24, %v2620_v25 }
 0x3d0   : > { %v3418_v10 = vpop.f32.mrf.mxu2  ;;  %v2667_v50 = vpack.c.bf16 %v2617_v63, %v2616_v28 }
 0x3d1   : > { %3681 = vmatpush.bf16.msrb.mxu3 %v2669_v4 }
 0x3d3   : > { %v14512_v15 = vpop.f32.mrf.mxu3 }
 0x3d5   : > { %3682 = vmatpush.bf16.msrb.mxu3 %v2668_v8  ;;  %v3546_v2 = vpop.f32.mrf.mxu1 }
 0x3d6   : > { %v14510_v14 = vadd.f32 %v3546_v2, %v14205_v60  ;;  %v10514_v60 = vld [vmem:[%s18229_s3 + $0x160] sm:$0xf] }
 0x3d7   : > { %v10515_v38 = vor.u32 %v12483_v54, %v10514_v60  ;;  %v10420_v60 = vld [vmem:[%s18229_s3 + $0xb8] sm:$0xf0] }
 0x3d8   : > { %3632 = vmatmul.bf16.gmra.mxu2 %v10491_v30  ;;  %3585 = vmatmul.bf16.gmra.mxu1 %v10679_v43  ;;  %v12501_v43 = vld [vmem:[%s18229_s3 + $0x204] sm:$0xf0] }
 0x3d9   : > { %3683 = vmatpush.bf16.msrb.mxu3 %v2667_v50 }
 0x3db   : > { %v3499_v53 = vpop.f32.mrf.mxu3 }
 0x3dc   : > { %v14526_v42 = vadd.f32 %v3499_v53, %v3413_v12  ;;  %v12456_v53 = vld [vmem:[%s18229_s3 + $0xa4] sm:$0xf] }
 0x3dd   : > { %3684 = vmatpush.bf16.msrb.mxu3 %v14401_v0  ;;  %v14517_v9 = vpop.f32.mrf.mxu1 }
 0x3e1   : > { %3685 = vmatpush.bf16.msrb.mxu3 %v14349_v16  ;;  %v12438_v16 = vld [vmem:[%s18229_s3 + $0x14] sm:$0xf] }
 0x3e2   : > { %v10351_v62 = vor.u32 %v12438_v16, %v10348_v19  ;;  %v12507_v16 = vld [vmem:[%s18229_s3 + $0x234] sm:$0xf0] }
 0x3e5   : > { %3686 = vmatpush.bf16.msrb.mxu3 %v14305_v47  ;;  %v3551_v58 = vpop.f32.mrf.mxu1 }
 0x3e6   : > { %v14530_v0 = vadd.f32 %v3551_v58, %v14247_v22  ;;  %v10538_v22 = vld [vmem:[%s18229_s3 + $0x190] sm:$0xf] }
 0x3e8   : > { %3637 = vmatmul.bf16.gmra.mxu2 %v10515_v38 }
 0x3e9   : > { %3687 = vmatpush.bf16.msrb.mxu3 %v14261_v44  ;;  %v12489_v44 = vld [vmem:[%s18229_s3 + $0x1a4] sm:$0xf0] }
 0x3ea   : > { %v10539_v47 = vor.u32 %v12489_v44, %v10538_v22 }
 0x3ed   : > { %3688 = vmatpush.bf16.msrb.mxu3 %v14216_v33  ;;  %v14540_v36 = vpop.f32.mrf.mxu1  ;;  %v12444_v33 = vld [vmem:[%s18229_s3 + $0x44] sm:$0xf] }
 0x3ee   : > { %v10375_v59 = vor.u32 %v12444_v33, %v10372_v49  ;;  %v3360_v49 = vadd.f32 %v13966_v35, %v13606_v21 }
 0x3f0   : > { %3689 = vmatmul.bf16.vlgmr.msrb.gmra.mxu3 %v10351_v62 }
 0x3f5   : > { %v3556_v25 = vpop.f32.mrf.mxu1 }
 0x3f6   : > { %v14549_v24 = vadd.f32 %v3556_v25, %v14292_v17  ;;  %v10562_v17 = vld [vmem:[%s18229_s3 + $0x1c0] sm:$0xf]  ;;  %v10444_v25 = vld [vmem:[%s18229_s3 + $0xe8] sm:$0xf0] }
 0x3f7   : > { %v10563_v13 = vor.u32 %v12495_v31, %v10562_v17  ;;  %v10634_v17 = vld [vmem:[%s18229_s3 + $0x250] sm:$0xf]  ;;  %v12513_v31 = vld [vmem:[%s18229_s3 + $0x264] sm:$0xf0] }
 0x3f8   : > { %3642 = vmatmul.bf16.gmra.mxu2 %v10539_v47  ;;  %v12462_v47 = vld [vmem:[%s18229_s3 + $0xd4] sm:$0xf] }
 0x3fb   : > { %v3603_v55 = vpop.f32.mrf.mxu2 }
 0x3fc   : > { %v14558_v4 = vadd.f32 %v3603_v55, %v14258_v45  ;;  %v12642_v45 = vld [vmem:[%s18230_s4 + $0x370] sm:$0xff]  ;;  %v10447_v55 = vor.u32 %v12462_v47, %v10444_v25 }
 0x3fd   : > { %v14560_v46 = vpop.f32.mrf.mxu1  ;;  %5064 = vmatpush.bf16.msrb.mxu0 %v12642_v45 }
 0x400   : > { %3694 = vmatmul.bf16.gmra.mxu3 %v10375_v59 }
 0x403   : > { %v3605_v27 = vpop.f32.mrf.mxu2 }
 0x404   : > { %v14569_v20 = vadd.f32 %v3605_v27, %v14274_v29  ;;  %v10396_v29 = vld [vmem:[%s18229_s3 + $0x88] sm:$0xf0] }
 0x405   : > { %v3561_v34 = vpop.f32.mrf.mxu1  ;;  %v10399_v10 = vor.u32 %v12450_v52, %v10396_v29  ;;  %v10468_v52 = vld [vmem:[%s18229_s3 + $0x118] sm:$0xf0] }
 0x406   : > { %v14575_v5 = vadd.f32 %v3561_v34, %v14336_v39  ;;  %v10586_v39 = vld [vmem:[%s18229_s3 + $0x1f0] sm:$0xf]  ;;  %v12468_v34 = vld [vmem:[%s18229_s3 + $0x104] sm:$0xf] }
 0x407   : > { %v10587_v50 = vor.u32 %v12501_v43, %v10586_v39  ;;  %v12519_v43 = vld [vmem:[%s18229_s3 + $0x294] sm:$0xf0] }
 0x408   : > { %3647 = vmatmul.bf16.gmra.mxu2 %v10563_v13  ;;  %v14646_v13 = vpop.f32.mrf.mxu3 }
 0x40b   : > { %v3608_v8 = vpop.f32.mrf.mxu2 }
 0x40c   : > { %v14584_v63 = vadd.f32 %v3608_v8, %v14302_v32  ;;  %v10471_v8 = vor.u32 %v12468_v34, %v10468_v52  ;;  %v12531_v34 = vld [vmem:[%s18229_s3 + $0x2f4] sm:$0xf0] }
 0x40d   : > { %v14586_v30 = vpop.f32.mrf.mxu1 }
 0x410   : > { %3699 = vmatmul.bf16.gmra.mxu3 %v10399_v10 }
 0x413   : > { %v3610_v28 = vpop.f32.mrf.mxu2 }
 0x414   : > { %v14595_v2 = vadd.f32 %v3610_v28, %v14318_v3  ;;  %v10423_v3 = vor.u32 %v12456_v53, %v10420_v60  ;;  %v12474_v60 = vld [vmem:[%s18229_s3 + $0x134] sm:$0xf] }
 0x415   : > { %v3566_v12 = vpop.f32.mrf.mxu1 }
 0x416   : > { %v14598_v32 = vadd.f32 %v3566_v12, %v14385_v11  ;;  %v10610_v11 = vld [vmem:[%s18229_s3 + $0x220] sm:$0xf] }
 0x417   : > { %v10611_v22 = vor.u32 %v12507_v16, %v10610_v11 }
 0x418   : > { %3652 = vmatmul.bf16.gmra.mxu2 %v10587_v50 }
 0x41b   : > { %v3613_v54 = vpop.f32.mrf.mxu2 }
 0x41c   : > { %v14607_v38 = vadd.f32 %v3613_v54, %v14346_v37  ;;  %v10492_v54 = vld [vmem:[%s18229_s3 + $0x148] sm:$0xf0] }
 0x41d   : > { %v14609_v58 = vpop.f32.mrf.mxu1  ;;  %v10495_v16 = vor.u32 %v12474_v60, %v10492_v54  ;;  %v12486_v60 = vld [vmem:[%s18229_s3 + $0x194] sm:$0xf]  ;;  %v10540_v54 = vld [vmem:[%s18229_s3 + $0x1a8] sm:$0xf0] }
 0x420   : > { %3704 = vmatmul.bf16.gmra.mxu3 %v10423_v3 }
 0x423   : > { %v3615_v19 = vpop.f32.mrf.mxu2 }
 0x424   : > { %v14618_v62 = vadd.f32 %v3615_v19, %v14367_v7 }
 0x425   : > { %v3571_v44 = vpop.f32.mrf.mxu1 }
 0x426   : > { %v14621_v37 = vadd.f32 %v3571_v44, %v14424_v57  ;;  %v3447_v57 = vadd.f32 %v14079_v40, %v3360_v49  ;;  %v12480_v49 = vld [vmem:[%s18229_s3 + $0x164] sm:$0xf] }
 0x428   : > { %3657 = vmatmul.bf16.gmra.mxu2 %v10611_v22  ;;  %v3534_v27 = vadd.f32 %v14410_v51, %v3447_v57  ;;  %v12525_v22 = vld [vmem:[%s18229_s3 + $0x2c4] sm:$0xf0]  ;;  %v12563_v57 = vld [vmem:[%s18230_s4 + $0xf8] sm:$0xff] }
 0x429   : > { %4230 = vmatpush.bf16.msra.mxu2 %v12563_v57  ;;  %v12540_v57 = vld [vmem:[%s18230_s4 + $0x40] sm:$0xff] }
 0x42b   : > { %v3618_v33 = vpop.f32.mrf.mxu2 }
 0x42c   : > { %v14632_v7 = vadd.f32 %v3618_v33, %v14399_v18  ;;  %v10635_v18 = vor.u32 %v12513_v31, %v10634_v17 }
 0x42d   : > { %v14634_v59 = vpop.f32.mrf.mxu1 }
 0x430   : > { %3709 = vmatmul.bf16.gmra.mxu3 %v10447_v55  ;;  %v10516_v55 = vld [vmem:[%s18229_s3 + $0x178] sm:$0xf0] }
 0x431   : > { %v3504_v10 = vpop.f32.mrf.mxu3  ;;  %v10519_v31 = vor.u32 %v12480_v49, %v10516_v55 }
 0x432   : > { %v12560_v10 = vld [vmem:[%s18230_s4 + $0xe0] sm:$0xff] }
 0x433   : > { %v3620_v21 = vpop.f32.mrf.mxu2 }
 0x434   : > { %v14644_v35 = vadd.f32 %v3620_v21, %v3534_v27  ;;  %v12546_v27 = vld [vmem:[%s18230_s4 + $0x70] sm:$0xff] }
 0x435   : > { %v3576_v45 = vpop.f32.mrf.mxu1  ;;  %v12562_v21 = vld [vmem:[%s18230_s4 + $0xf0] sm:$0xff] }
 0x436   : > { %v14649_v40 = vadd.f32 %v3576_v45, %v14463_v23  ;;  %v10658_v23 = vld [vmem:[%s18229_s3 + $0x280] sm:$0xf]  ;;  %4231 = vmatpush.bf16.msra.mxu2 %v12562_v21  ;;  %v10564_v21 = vld [vmem:[%s18229_s3 + $0x1d8] sm:$0xf0] }
 0x437   : > { %v10659_v50 = vor.u32 %v12519_v43, %v10658_v23  ;;  %v10706_v45 = vld [vmem:[%s18229_s3 + $0x2e0] sm:$0xf]  ;;  %v12527_v23 = vld [vmem:[%s18229_s3 + $0x2dc] sm:$0xf]  ;;  %v10700_v43 = vld [vmem:[%s18229_s3 + $0x2f0] sm:$0xf0] }
 0x438   : > { %3662 = vmatmul.bf16.gmra.mxu2 %v10635_v18  ;;  %v12545_v18 = vld [vmem:[%s18230_s4 + $0x68] sm:$0xff] }
 0x439   : > { %v3505_v12 = vpop.f32.mrf.mxu3 }
 0x43a   : > { %v12543_v12 = vld [vmem:[%s18230_s4 + $0x58] sm:$0xff] }
 0x43b   : > { %v3623_v51 = vpop.f32.mrf.mxu2 }
 0x43c   : > { %v14658_v29 = vadd.f32 %v3623_v51, %v14437_v56  ;;  %v12544_v51 = vld [vmem:[%s18230_s4 + $0x60] sm:$0xff] }
 0x43d   : > { %v14660_v39 = vpop.f32.mrf.mxu1 }
 0x440   : > { %3714 = vmatmul.bf16.gmra.mxu3 %v10471_v8  ;;  %v10707_v8 = vor.u32 %v12531_v34, %v10706_v45 }
 0x443   : > { %v14668_v28 = vpop.f32.mrf.mxu2 }
 0x445   : > { %v3581_v53 = vpop.f32.mrf.mxu1 }
 0x446   : > { %v14671_v56 = vadd.f32 %v3581_v53, %v14502_v61  ;;  %v10682_v61 = vld [vmem:[%s18229_s3 + $0x2b0] sm:$0xf]  ;;  %v12641_v53 = vld [vmem:[%s18230_s4 + $0x368] sm:$0xff] }
 0x447   : > { %v10683_v47 = vor.u32 %v12525_v22, %v10682_v61  ;;  %5065 = vmatpush.bf16.msrb.mxu0 %v12641_v53  ;;  %v10543_v22 = vor.u32 %v12486_v60, %v10540_v54  ;;  %v12640_v53 = vld [vmem:[%s18230_s4 + $0x360] sm:$0xff]  ;;  %v12639_v54 = vld [vmem:[%s18230_s4 + $0x358] sm:$0xff] }
 0x448   : > { %3667 = vmatmul.bf16.gmra.mxu2 %v10659_v50  ;;  %v10703_v50 = vor.u32 %v12527_v23, %v10700_v43 }
 0x44a   : > { %3590 = vmatmul.bf16.gmra.mxu1 %v10703_v50 }
 0x44b   : > { %v3628_v3 = vpop.f32.mrf.mxu2  ;;  %5066 = vmatpush.bf16.msrb.mxu0 %v12640_v53  ;;  %v12636_v53 = vld [vmem:[%s18230_s4 + $0x340] sm:$0xff] }
 0x44c   : > { %v14680_v11 = vadd.f32 %v3628_v3, %v14472_v48  ;;  %v12547_v48 = vld [vmem:[%s18230_s4 + $0x78] sm:$0xff] }
 0x44d   : > { %v14682_v19 = vpop.f32.mrf.mxu1  ;;  %4032 = vmatpush.bf16.msra.mxu1 %v12547_v48  ;;  %v12559_v3 = vld [vmem:[%s18230_s4 + $0xd8] sm:$0xff]  ;;  %v12541_v48 = vld [vmem:[%s18230_s4 + $0x48] sm:$0xff] }
 0x44f   : > { %5067 = vmatpush.bf16.msrb.mxu0 %v12639_v54 }
 0x450   : > { %3719 = vmatmul.bf16.gmra.mxu3 %v10495_v16 }
 0x451   : > { %4033 = vmatpush.bf16.msra.mxu1 %v12546_v27  ;;  %v12492_v27 = vld [vmem:[%s18229_s3 + $0x1c4] sm:$0xf] }
 0x453   : > { %v14690_v44 = vpop.f32.mrf.mxu2 }
 0x455   : > { %v3586_v25 = vpop.f32.mrf.mxu1  ;;  %4034 = vmatpush.bf16.msra.mxu1 %v12545_v18 }
 0x456   : > { %v14693_v33 = vadd.f32 %v3586_v25, %v14526_v42  ;;  %v12558_v25 = vld [vmem:[%s18230_s4 + $0xd0] sm:$0xff] }
 0x458   : > { %3672 = vmatmul.bf16.gmra.mxu2 %v10683_v47  ;;  %v12542_v47 = vld [vmem:[%s18230_s4 + $0x50] sm:$0xff] }
 0x459   : > { %4035 = vmatpush.bf16.msra.mxu1 %v12544_v51 }
 0x45b   : > { %v3633_v42 = vpop.f32.mrf.mxu2 }
 0x45c   : > { %v14708_v17 = vadd.f32 %v3633_v42, %v14510_v14  ;;  %v12561_v14 = vld [vmem:[%s18230_s4 + $0xe8] sm:$0xff]  ;;  %v12556_v42 = vld [vmem:[%s18230_s4 + $0xc0] sm:$0xff] }
 0x45d   : > { %4232 = vmatpush.bf16.msra.mxu2 %v12561_v14  ;;  %4036 = vmatpush.bf16.msra.mxu1 %v12543_v12 }
 0x460   : > { %3724 = vmatmul.bf16.gmra.mxu3 %v10519_v31 }
 0x461   : > { %4233 = vmatpush.bf16.msra.mxu2 %v12560_v10  ;;  %4037 = vmatpush.bf16.msra.mxu1 %v12542_v47 }
 0x463   : > { %v14728_v52 = vpop.f32.mrf.mxu2 }
 0x465   : > { %4234 = vmatpush.bf16.msra.mxu2 %v12559_v3  ;;  %4038 = vmatpush.bf16.msra.mxu1 %v12541_v48 }
 0x468   : > { %3677 = vmatmul.bf16.gmra.mxu2 %v10707_v8  ;;  %v10567_v8 = vor.u32 %v12492_v27, %v10564_v21 }
 0x469   : > { %4235 = vmatpush.bf16.msra.mxu2 %v12558_v25  ;;  %4039 = vmatpush.bf16.msra.mxu1 %v12540_v57 }
 0x46b   : > { %v3638_v16 = vpop.f32.mrf.mxu2 }
 0x46c   : > { %v14758_v61 = vadd.f32 %v3638_v16, %v14530_v0  ;;  %v12557_v0 = vld [vmem:[%s18230_s4 + $0xc8] sm:$0xff] }
 0x46d   : > { %4236 = vmatpush.bf16.msra.mxu2 %v12557_v0 }
 0x470   : > { %3729 = vmatmul.bf16.gmra.mxu3 %v10543_v22 }
 0x471   : > { %4237 = vmatpush.bf16.msra.mxu2 %v12556_v42 }
 0x473   : > { %v14772_v49 = vpop.f32.mrf.mxu2  ;;  %v3690_v55 = vpop.f32.mrf.mxu3 }
 0x474   : > { %v3691_v31 = vadd.f32 %v3690_v55, %v14558_v4  ;;  %v12638_v55 = vld [vmem:[%s18230_s4 + $0x350] sm:$0xff] }
 0x475   : > { %5068 = vmatpush.bf16.msrb.mxu0 %v12638_v55 }
 0x476   : > { %v3768_v45 = vpack.c.bf16 %v3691_v31, %v3691_v31 }
 0x478   : > { %v3852_v4 = vunpack.c.l.b16 %v3768_v45 }
 0x47b   : > { %v3643_v18 = vpop.f32.mrf.mxu2  ;;  %v3692_v14 = vpop.f32.mrf.mxu3 }
 0x47c   : > { %v14788_v34 = vadd.f32 %v3643_v18, %v14549_v24  ;;  %v3693_v51 = vadd.f32 %v3692_v14, %v14569_v20  ;;  %v12498_v24 = vld [vmem:[%s18229_s3 + $0x1f4] sm:$0xf]  ;;  %v10588_v20 = vld [vmem:[%s18229_s3 + $0x208] sm:$0xf0] }
 0x47d   : > { %v10591_v25 = vor.u32 %v12498_v24, %v10588_v20 }
 0x47e   : > { %v3769_v10 = vpack.c.bf16 %v3693_v51, %v3693_v51 }
 0x480   : > { %v3853_v23 = vunpack.c.l.b16 %v3769_v10  ;;  %3734 = vmatmul.bf16.gmra.mxu3 %v10567_v8 }
 0x482   : > { %v14791_v43 = vpack.c.b16 %v3853_v23, %v3852_v4 }
 0x483   : > { %v14793_v50 = vpop.f32.mrf.mxu2  ;;  %v3695_v12 = vpop.f32.mrf.mxu3 }
 0x484   : > { %v3696_v60 = vadd.f32 %v3695_v12, %v14584_v63  ;;  %v3889_v0 = vshll.u32 %v14791_v43, 16  ;;  %v3887_v31 = vshrl.u32 %v14791_v43, 16 }
 0x486   : > { %v3770_v22 = vpack.c.bf16 %v3696_v60, %v3696_v60  ;;  %v4128_v51 = vrot.slane %v3887_v31, 1  ;;  %v4129_v8 = vrot.slane %v3889_v0, 2 }
 0x488   : > { %v3854_v57 = vunpack.c.l.b16 %v3770_v22  ;;  %v4130_v20 = vor.u32 %v4129_v8, %v4128_v51 }
 0x48b   : > { %v3648_v3 = vpop.f32.mrf.mxu2  ;;  %v3697_v16 = vpop.f32.mrf.mxu3 }
 0x48c   : > { %v14809_v47 = vadd.f32 %v3648_v3, %v14575_v5  ;;  %v3698_v63 = vadd.f32 %v3697_v16, %v14595_v2  ;;  %v3891_v5 = vrot.slane %v3889_v0, 1  ;;  %v12637_v2 = vld [vmem:[%s18230_s4 + $0x348] sm:$0xff]  ;;  %v12504_v3 = vld [vmem:[%s18229_s3 + $0x224] sm:$0xf]  ;;  %v10612_v16 = vld [vmem:[%s18229_s3 + $0x238] sm:$0xf0] }
 0x48d   : > { %5069 = vmatpush.bf16.msrb.mxu0 %v12637_v2  ;;  %v10615_v55 = vor.u32 %v12504_v3, %v10612_v16 }
 0x48e   : > { %v3771_v48 = vpack.c.bf16 %v3698_v63, %v3698_v63  ;;  %v3892_v10 = vor.u32 %v3891_v5, %v3887_v31 }
 0x490   : > { %v3855_v42 = vunpack.c.l.b16 %v3771_v48  ;;  %3739 = vmatmul.bf16.gmra.mxu3 %v10591_v25 }
 0x491   : > { %5070 = vmatpush.bf16.msrb.mxu0 %v12636_v53 }
 0x492   : > { %v14817_v27 = vpack.c.b16 %v3855_v42, %v3854_v57 }
 0x493   : > { %v14822_v21 = vpop.f32.mrf.mxu2  ;;  %v3700_v18 = vpop.f32.mrf.mxu3 }
 0x494   : > { %v3894_v14 = vshll.u32 %v14817_v27, 16  ;;  %v3898_v45 = vshrl.u32 %v14817_v27, 16  ;;  %v3701_v60 = vadd.f32 %v3700_v18, %v14607_v38 }
 0x496   : > { %v3896_v4 = vrot.slane %v3894_v14, 1  ;;  %v4131_v23 = vrot.slane %v3898_v45, 1  ;;  %v4132_v12 = vrot.slane %v3894_v14, 2  ;;  %v3772_v38 = vpack.c.bf16 %v3701_v60, %v3701_v60  ;;  %v12510_v60 = vld [vmem:[%s18229_s3 + $0x254] sm:$0xf] }
 0x498   : > { %v3897_v24 = vsel %vm3885_vm2, %v3892_v10, %v3896_v4  ;;  %v4133_v54 = vor.u32 %v4132_v12, %v4131_v23  ;;  %v3856_v42 = vunpack.c.l.b16 %v3772_v38  ;;  %v3900_v8 = vor.u32 %v3898_v45, %v3896_v4 }
 0x499   : > { %4040 = vmatmul.bf16.vlgmr.msra.gmra.mxu1 %v3897_v24  ;;  %v10636_v24 = vld [vmem:[%s18229_s3 + $0x268] sm:$0xf0] }
 0x49a   : > { %v4134_v22 = vsel %vm4127_vm3, %v4130_v20, %v4133_v54 }
 0x49b   : > { %v3653_v63 = vpop.f32.mrf.mxu2  ;;  %v3702_v25 = vpop.f32.mrf.mxu3  ;;  %4238 = vmatmul.bf16.vlgmr.msra.gmra.mxu2 %v4134_v22  ;;  %v10639_v22 = vor.u32 %v12510_v60, %v10636_v24  ;;  %v12577_v60 = vld [vmem:[%s18230_s4 + $0x168] sm:$0xff]  ;;  %v18348_v24 = vld [vmem:[#allocation30_spill] sm:$0xff] }
 0x49c   : > { %v14839_v48 = vadd.f32 %v3653_v63, %v14598_v32  ;;  %v3703_v0 = vadd.f32 %v3702_v25, %v14618_v62  ;;  %v12579_v25 = vld [vmem:[%s18230_s4 + $0x178] sm:$0xff] }
 0x49d   : > { %4387 = vmatpush.bf16.msra.mxu3 %v12579_v25 }
 0x49e   : > { %v3773_v57 = vpack.c.bf16 %v3703_v0, %v3703_v0 }
 0x4a0   : > { %v3857_v31 = vunpack.c.l.b16 %v3773_v57  ;;  %3744 = vmatmul.bf16.gmra.mxu3 %v10615_v55 }
 0x4a2   : > { %v14842_v5 = vpack.c.b16 %v3857_v31, %v3856_v42 }
 0x4a3   : > { %v14844_v2 = vpop.f32.mrf.mxu2  ;;  %v3705_v18 = vpop.f32.mrf.mxu3 }
 0x4a4   : > { %v3902_v14 = vshll.u32 %v14842_v5, 16  ;;  %v3906_v51 = vshrl.u32 %v14842_v5, 16  ;;  %v3706_v62 = vadd.f32 %v3705_v18, %v14632_v7 }
 0x4a6   : > { %v3904_v10 = vrot.slane %v3902_v14, 1  ;;  %v4135_v32 = vrot.slane %v3906_v51, 1  ;;  %v4136_v23 = vrot.slane %v3902_v14, 2  ;;  %v3774_v7 = vpack.c.bf16 %v3706_v62, %v3706_v62  ;;  %v18347_v14 = vld [vmem:[#allocation15_spill] sm:$0xff] }
 0x4a8   : > { %v14850_v12 = vsel %vm3885_vm2, %v3900_v8, %v3904_v10  ;;  %v4137_v53 = vor.u32 %v4136_v23, %v4135_v32  ;;  %v3858_v38 = vunpack.c.l.b16 %v3774_v7  ;;  %v3908_v32 = vor.u32 %v3906_v51, %v3904_v10  ;;  %v12516_v51 = vld [vmem:[%s18229_s3 + $0x284] sm:$0xf]  ;;  %v10660_v10 = vld [vmem:[%s18229_s3 + $0x298] sm:$0xf0] }
 0x4a9   : > { %4045 = vmatmul.bf16.gmra.mxu1 %v14850_v12 }
 0x4aa   : > { %v14860_v45 = vsel %vm4127_vm3, %v4133_v54, %v4137_v53  ;;  %v18346_v54 = vld [vmem:[#allocation10_spill] sm:$0xff] }
 0x4ab   : > { %18345 = vst [vmem:[#allocation31_spill] sm:$0xff] %v14860_v45  ;;  %v3658_v4 = vpop.f32.mrf.mxu2  ;;  %v3707_v20 = vpop.f32.mrf.mxu3  ;;  %4243 = vmatmul.bf16.gmra.mxu2 %v14860_v45  ;;  %v3365_v55 = vadd.f32 %v18346_v54, %v13645_v26 }
 0x4ac   : > { %v14864_v3 = vadd.f32 %v3658_v4, %v14621_v37  ;;  %v3708_v16 = vadd.f32 %v3707_v20, %v14644_v35  ;;  %v12578_v35 = vld [vmem:[%s18230_s4 + $0x170] sm:$0xff] }
 0x4ad   : > { %v3452_v8 = vadd.f32 %v18347_v14, %v3365_v55  ;;  %4388 = vmatpush.bf16.msra.mxu3 %v12578_v35  ;;  %v18351_v14 = vld [vmem:[#allocation2_spill] sm:$0xff] }
 0x4ae   : > { %v3775_v63 = vpack.c.bf16 %v3708_v16, %v3708_v16 }
 0x4af   : > { %v3539_v4 = vadd.f32 %v18348_v24, %v3452_v8  ;;  %v18352_v8 = vld [vmem:[#allocation12_spill] sm:$0xff] }
 0x4b0   : > { %v3859_v0 = vunpack.c.l.b16 %v3775_v63  ;;  %3749 = vmatmul.bf16.gmra.mxu3 %v10639_v22 }
 0x4b1   : > { %4389 = vmatpush.bf16.msra.mxu3 %v12577_v60  ;;  %v3626_v22 = vadd.f32 %v14668_v28, %v3539_v4  ;;  %v12574_v60 = vld [vmem:[%s18230_s4 + $0x150] sm:$0xff] }
 0x4b2   : > { %v14872_v57 = vpack.c.b16 %v3859_v0, %v3858_v38  ;;  %v12576_v38 = vld [vmem:[%s18230_s4 + $0x160] sm:$0xff] }
 0x4b3   : > { %v14874_v42 = vpop.f32.mrf.mxu2  ;;  %v3710_v37 = vpop.f32.mrf.mxu3 }
 0x4b4   : > { %v3910_v31 = vshll.u32 %v14872_v57, 16  ;;  %v3914_v18 = vshrl.u32 %v14872_v57, 16  ;;  %v3711_v20 = vadd.f32 %v3710_v37, %v14658_v29  ;;  %v10663_v37 = vor.u32 %v12516_v51, %v10660_v10 }
 0x4b5   : > { %4390 = vmatpush.bf16.msra.mxu3 %v12576_v38  ;;  %v12573_v38 = vld [vmem:[%s18230_s4 + $0x148] sm:$0xff] }
 0x4b6   : > { %v3912_v23 = vrot.slane %v3910_v31, 1  ;;  %v4139_v26 = vrot.slane %v3914_v18, 1  ;;  %v4140_v62 = vrot.slane %v3910_v31, 2  ;;  %v3776_v0 = vpack.c.bf16 %v3711_v20, %v3711_v20  ;;  %v18354_v20 = vld [vmem:[#allocation17_spill] sm:$0xff] }
 0x4b8   : > { %v14888_v7 = vsel %vm3885_vm2, %v3908_v32, %v3912_v23  ;;  %v4141_v16 = vor.u32 %v4140_v62, %v4139_v26  ;;  %v3860_v35 = vunpack.c.l.b16 %v3776_v0  ;;  %v3370_v32 = vadd.f32 %v18352_v8, %v18351_v14 }
 0x4b9   : > { %18349 = vst [vmem:[#allocation10_spill] sm:$0xff] %v14888_v7  ;;  %4050 = vmatmul.bf16.gmra.mxu1 %v14888_v7  ;;  %v3916_v10 = vor.u32 %v3914_v18, %v3912_v23  ;;  %v12522_v18 = vld [vmem:[%s18229_s3 + $0x2b4] sm:$0xf]  ;;  %v10684_v23 = vld [vmem:[%s18229_s3 + $0x2c8] sm:$0xf0] }
 0x4ba   : > { %v14899_v63 = vsel %vm4127_vm3, %v4137_v53, %v4141_v16  ;;  %v12575_v53 = vld [vmem:[%s18230_s4 + $0x158] sm:$0xff]  ;;  %v3457_v51 = vadd.f32 %v18354_v20, %v3370_v32  ;;  %v18358_v20 = vld [vmem:[#allocation14_spill] sm:$0xff] }
 0x4bb   : > { %18350 = vst [vmem:[#allocation15_spill] sm:$0xff] %v14899_v63  ;;  %v3663_v29 = vpop.f32.mrf.mxu2  ;;  %v3712_v25 = vpop.f32.mrf.mxu3  ;;  %4248 = vmatmul.bf16.gmra.mxu2 %v14899_v63  ;;  %5071 = vmatmul.bf16.vlgmr.msrb.gmra.mxu0 %v14899_v63  ;;  %v12604_v63 = vld [vmem:[%s18230_s4 + $0x240] sm:$0xff] }
 0x4bc   : > { %v14907_v54 = vadd.f32 %v3663_v29, %v14649_v40  ;;  %v3713_v55 = vadd.f32 %v3712_v25, %v3626_v22  ;;  %4391 = vmatpush.bf16.msra.mxu3 %v12575_v53  ;;  %v3544_v0 = vadd.f32 %v14484_v1, %v3457_v51 }
 0x4be   : > { %v3777_v28 = vpack.c.bf16 %v3713_v55, %v3713_v55  ;;  %v3631_v53 = vadd.f32 %v14690_v44, %v3544_v0  ;;  %v18360_v0 = vld [vmem:[#allocation19_spill] sm:$0xff] }
 0x4c0   : > { %v3861_v31 = vunpack.c.l.b16 %v3777_v28  ;;  %3754 = vmatmul.bf16.gmra.mxu3 %v10663_v37 }
 0x4c1   : > { %4392 = vmatpush.bf16.msra.mxu3 %v12574_v60 }
 0x4c2   : > { %v14914_v26 = vpack.c.b16 %v3861_v31, %v3860_v35  ;;  %v12572_v31 = vld [vmem:[%s18230_s4 + $0x140] sm:$0xff] }
 0x4c3   : > { %v14916_v62 = vpop.f32.mrf.mxu2  ;;  %v3715_v40 = vpop.f32.mrf.mxu3 }
 0x4c4   : > { %18353 = vst [vmem:[#allocation30_spill] sm:$0xff] %v14914_v26  ;;  %v3918_v24 = vshll.u32 %v14914_v26, 16  ;;  %v3922_v4 = vshrl.u32 %v14914_v26, 16  ;;  %v3716_v55 = vadd.f32 %v3715_v40, %v14680_v11  ;;  %v10687_v40 = vor.u32 %v12522_v18, %v10684_v23 }
 0x4c5   : > { %4393 = vmatpush.bf16.msra.mxu3 %v12573_v38 }
 0x4c6   : > { %v3920_v22 = vrot.slane %v3918_v24, 1  ;;  %v4143_v29 = vrot.slane %v3922_v4, 1  ;;  %v4144_v25 = vrot.slane %v3918_v24, 2  ;;  %v3778_v14 = vpack.c.bf16 %v3716_v55, %v3716_v55  ;;  %v18357_v24 = vld [vmem:[#allocation3_spill] sm:$0xff] }
 0x4c7   : > { %v3375_v51 = vadd.f32 %v18358_v20, %v18357_v24 }
 0x4c8   : > { %v14930_v37 = vsel %vm3885_vm2, %v3916_v10, %v3920_v22  ;;  %v4145_v28 = vor.u32 %v4144_v25, %v4143_v29  ;;  %v3924_v18 = vor.u32 %v3922_v4, %v3920_v22  ;;  %v10708_v4 = vld [vmem:[%s18229_s3 + $0x2f8] sm:$0xf0] }
 0x4c9   : > { %18355 = vst [vmem:[#allocation2_spill] sm:$0xff] %v14930_v37  ;;  %4055 = vmatmul.bf16.gmra.mxu1 %v14930_v37  ;;  %4394 = vmatpush.bf16.msra.mxu3 %v12572_v31  ;;  %v3462_v55 = vadd.f32 %v18360_v0, %v3375_v51  ;;  %v14981_v51 = vpop.f32.mrf.mxu1  ;;  %v18363_v0 = vld [vmem:[#allocation16_spill] sm:$0xff] }
 0x4ca   : > { %v14941_v1 = vsel %vm4127_vm3, %v4141_v16, %v4145_v28  ;;  %v3862_v16 = vunpack.c.l.b16 %v3778_v14 }
 0x4cb   : > { %18356 = vst [vmem:[#allocation12_spill] sm:$0xff] %v14941_v1  ;;  %v3668_v11 = vpop.f32.mrf.mxu2  ;;  %v3717_v35 = vpop.f32.mrf.mxu3  ;;  %4253 = vmatmul.bf16.gmra.mxu2 %v14941_v1  ;;  %5076 = vmatmul.bf16.gmra.mxu0 %v14941_v1 }
 0x4cc   : > { %v14949_v8 = vadd.f32 %v3668_v11, %v14671_v56  ;;  %v3718_v32 = vadd.f32 %v3717_v35, %v3631_v53  ;;  %v3549_v35 = vadd.f32 %v14517_v9, %v3462_v55 }
 0x4ce   : > { %v3779_v44 = vpack.c.bf16 %v3718_v32, %v3718_v32  ;;  %v3636_v22 = vadd.f32 %v14728_v52, %v3549_v35 }
 0x4d0   : > { %v3863_v60 = vunpack.c.l.b16 %v3779_v44  ;;  %3759 = vmatmul.bf16.gmra.mxu3 %v10687_v40  ;;  %v12528_v40 = vld [vmem:[%s18229_s3 + $0x2e4] sm:$0xf] }
 0x4d1   : > { %v10711_v20 = vor.u32 %v12528_v40, %v10708_v4 }
 0x4d2   : > { %v14953_v10 = vpack.c.b16 %v3863_v60, %v3862_v16 }
 0x4d3   : > { %v14955_v29 = vpop.f32.mrf.mxu2  ;;  %v3720_v25 = vpop.f32.mrf.mxu3 }
 0x4d4   : > { %18359 = vst [vmem:[#allocation17_spill] sm:$0xff] %v14953_v10  ;;  %v3926_v38 = vshll.u32 %v14953_v10, 16  ;;  %v3930_v56 = vshrl.u32 %v14953_v10, 16  ;;  %v3721_v31 = vadd.f32 %v3720_v25, %v14708_v17 }
 0x4d6   : > { %v3928_v23 = vrot.slane %v3926_v38, 1  ;;  %v4147_v53 = vrot.slane %v3930_v56, 1  ;;  %v4148_v11 = vrot.slane %v3926_v38, 2  ;;  %v3780_v16 = vpack.c.bf16 %v3721_v31, %v3721_v31  ;;  %v18365_v31 = vld [vmem:[#allocation21_spill] sm:$0xff] }
 0x4d8   : > { %v14963_v14 = vsel %vm3885_vm2, %v3924_v18, %v3928_v23  ;;  %v4149_v32 = vor.u32 %v4148_v11, %v4147_v53  ;;  %v3864_v38 = vunpack.c.l.b16 %v3780_v16  ;;  %v3932_v4 = vor.u32 %v3930_v56, %v3928_v23  ;;  %v3591_v16 = vpop.f32.mrf.mxu1 }
 0x4d9   : > { %18361 = vst [vmem:[#allocation3_spill] sm:$0xff] %v14963_v14  ;;  %4060 = vmatmul.bf16.gmra.mxu1 %v14963_v14 }
 0x4da   : > { %v14974_v9 = vsel %vm4127_vm3, %v4145_v28, %v4149_v32  ;;  %v18362_v28 = vld [vmem:[#allocation4_spill] sm:$0xff] }
 0x4db   : > { %v3673_v17 = vpop.f32.mrf.mxu2  ;;  %v3722_v44 = vpop.f32.mrf.mxu3  ;;  %4258 = vmatmul.bf16.gmra.mxu2 %v14974_v9  ;;  %5081 = vmatmul.bf16.gmra.mxu0 %v14974_v9  ;;  %v3380_v55 = vadd.f32 %v18363_v0, %v18362_v28 }
 0x4dc   : > { %v14979_v60 = vadd.f32 %v3673_v17, %v14693_v33  ;;  %v3723_v24 = vadd.f32 %v3722_v44, %v3636_v22 }
 0x4dd   : > { %v3467_v40 = vadd.f32 %v18365_v31, %v3380_v55  ;;  %v18367_v31 = vld [vmem:[#allocation5_spill] sm:$0xff] }
 0x4de   : > { %v3781_v25 = vpack.c.bf16 %v3723_v24, %v3723_v24 }
 0x4df   : > { %v3554_v24 = vadd.f32 %v14540_v36, %v3467_v40  ;;  %v18368_v40 = vld [vmem:[#allocation18_spill] sm:$0xff] }
 0x4e0   : > { %v3865_v52 = vunpack.c.l.b16 %v3781_v25  ;;  %3764 = vmatmul.bf16.gmra.mxu3 %v10711_v20  ;;  %v3592_v55 = vpop.f32.mrf.mxu1 }
 0x4e2   : > { %v14985_v18 = vpack.c.b16 %v3865_v52, %v3864_v38  ;;  %v3641_v52 = vadd.f32 %v14772_v49, %v3554_v24  ;;  %v3385_v49 = vadd.f32 %v18368_v40, %v18367_v31  ;;  %v18370_v24 = vld [vmem:[#allocation23_spill] sm:$0xff] }
 0x4e3   : > { %v3725_v53 = vpop.f32.mrf.mxu3  ;;  %v14987_v11 = vpop.f32.mrf.mxu2 }
 0x4e4   : > { %18364 = vst [vmem:[#allocation14_spill] sm:$0xff] %v14985_v18  ;;  %v3934_v35 = vshll.u32 %v14985_v18, 16  ;;  %v3938_v33 = vshrl.u32 %v14985_v18, 16  ;;  %v3726_v20 = vadd.f32 %v3725_v53, %v14758_v61 }
 0x4e6   : > { %v3936_v22 = vrot.slane %v3934_v35, 1  ;;  %v4151_v17 = vrot.slane %v3938_v33, 1  ;;  %v4152_v44 = vrot.slane %v3934_v35, 2  ;;  %v3782_v23 = vpack.c.bf16 %v3726_v20, %v3726_v20 }
 0x4e7   : > { %v3472_v20 = vadd.f32 %v18370_v24, %v3385_v49 }
 0x4e8   : > { %v14995_v25 = vsel %vm3885_vm2, %v3932_v4, %v3936_v22  ;;  %v4153_v38 = vor.u32 %v4152_v44, %v4151_v17  ;;  %v3866_v53 = vunpack.c.l.b16 %v3782_v23 }
 0x4e9   : > { %18366 = vst [vmem:[#allocation19_spill] sm:$0xff] %v14995_v25  ;;  %4065 = vmatmul.bf16.gmra.mxu1 %v14995_v25 }
 0x4ea   : > { %v15000_v28 = vsel %vm4127_vm3, %v4149_v32, %v4153_v38 }
 0x4eb   : > { %v3727_v56 = vpop.f32.mrf.mxu3  ;;  %4263 = vmatmul.bf16.gmra.mxu2 %v15000_v28  ;;  %5086 = vmatmul.bf16.gmra.mxu0 %v15000_v28  ;;  %v3678_v0 = vpop.f32.mrf.mxu2 }
 0x4ec   : > { %v3728_v36 = vadd.f32 %v3727_v56, %v3641_v52  ;;  %v3940_v52 = vor.u32 %v3938_v33, %v3936_v22  ;;  %v3559_v0 = vadd.f32 %v14560_v46, %v3472_v20 }
 0x4ee   : > { %v3783_v61 = vpack.c.bf16 %v3728_v36, %v3728_v36 }
 0x4f0   : > { %v3867_v35 = vunpack.c.l.b16 %v3783_v61  ;;  %4395 = vmatmul.bf16.vlgmr.msra.gmra.mxu3 %v14817_v27 }
 0x4f2   : > { %v15007_v4 = vpack.c.b16 %v3867_v35, %v3866_v53  ;;  %v3646_v35 = vadd.f32 %v14793_v50, %v3559_v0 }
 0x4f3   : > { %v3730_v32 = vpop.f32.mrf.mxu3  ;;  %v3679_v16 = vpop.f32.mrf.mxu2 }
 0x4f4   : > { %18369 = vst [vmem:[#allocation4_spill] sm:$0xff] %v15007_v4  ;;  %v3942_v17 = vshll.u32 %v15007_v4, 16  ;;  %v3946_v44 = vshrl.u32 %v15007_v4, 16  ;;  %v3731_v61 = vadd.f32 %v3730_v32, %v14788_v34  ;;  %v18372_v32 = vld [vmem:[#allocation6_spill] sm:$0xff] }
 0x4f6   : > { %v3944_v56 = vrot.slane %v3942_v17, 1  ;;  %v4155_v36 = vrot.slane %v3946_v44, 1  ;;  %v4156_v23 = vrot.slane %v3942_v17, 2  ;;  %v3784_v33 = vpack.c.bf16 %v3731_v61, %v3731_v61  ;;  %v18373_v17 = vld [vmem:[#allocation20_spill] sm:$0xff] }
 0x4f7   : > { %v3390_v16 = vadd.f32 %v18373_v17, %v18372_v32 }
 0x4f8   : > { %v15015_v55 = vsel %vm3885_vm2, %v3940_v52, %v3944_v56  ;;  %v4157_v53 = vor.u32 %v4156_v23, %v4155_v36  ;;  %v3868_v34 = vunpack.c.l.b16 %v3784_v33  ;;  %v18375_v52 = vld [vmem:[#allocation25_spill] sm:$0xff]  ;;  %v3948_v23 = vor.u32 %v3946_v44, %v3944_v56 }
 0x4f9   : > { %18371 = vst [vmem:[#allocation16_spill] sm:$0xff] %v15015_v55  ;;  %4070 = vmatmul.bf16.gmra.mxu1 %v15015_v55  ;;  %v3477_v36 = vadd.f32 %v18375_v52, %v3390_v16  ;;  %v18377_v52 = vld [vmem:[#allocation7_spill] sm:$0xff] }
 0x4fa   : > { %v15020_v31 = vsel %vm4127_vm3, %v4153_v38, %v4157_v53 }
 0x4fb   : > { %v3732_v40 = vpop.f32.mrf.mxu3  ;;  %4268 = vmatmul.bf16.gmra.mxu2 %v15020_v31  ;;  %5091 = vmatmul.bf16.gmra.mxu0 %v15020_v31 }
 0x4fc   : > { %v3733_v46 = vadd.f32 %v3732_v40, %v3646_v35  ;;  %v3564_v40 = vadd.f32 %v14586_v30, %v3477_v36  ;;  %v12611_v30 = vld [vmem:[%s18230_s4 + $0x278] sm:$0xff]  ;;  %v18378_v36 = vld [vmem:[#allocation22_spill] sm:$0xff] }
 0x4fd   : > { %4742 = vmatpush.bf16.msrb.mxu2 %v12611_v30  ;;  %v18380_v30 = vld [vmem:[#allocation27_spill] sm:$0xff] }
 0x4fe   : > { %v3785_v22 = vpack.c.bf16 %v3733_v46, %v3733_v46 }
 0x500   : > { %v3869_v49 = vunpack.c.l.b16 %v3785_v22  ;;  %4400 = vmatmul.bf16.gmra.mxu3 %v14842_v5 }
 0x502   : > { %v15027_v24 = vpack.c.b16 %v3869_v49, %v3868_v34  ;;  %v12595_v34 = vld [vmem:[%s18230_s4 + $0x1f8] sm:$0xff]  ;;  %v3651_v49 = vadd.f32 %v14822_v21, %v3564_v40  ;;  %v12594_v21 = vld [vmem:[%s18230_s4 + $0x1f0] sm:$0xff] }
 0x503   : > { %v3735_v50 = vpop.f32.mrf.mxu3  ;;  %4566 = vmatpush.bf16.msrb.mxu1 %v12595_v34 }
 0x504   : > { %18374 = vst [vmem:[#allocation21_spill] sm:$0xff] %v15027_v24  ;;  %v3950_v38 = vshll.u32 %v15027_v24, 16  ;;  %v3954_v20 = vshrl.u32 %v15027_v24, 16  ;;  %v3736_v33 = vadd.f32 %v3735_v50, %v14809_v47 }
 0x506   : > { %v3952_v0 = vrot.slane %v3950_v38, 1  ;;  %v4159_v61 = vrot.slane %v3954_v20, 1  ;;  %v4160_v35 = vrot.slane %v3950_v38, 2  ;;  %v3786_v56 = vpack.c.bf16 %v3736_v33, %v3736_v33  ;;  %v12593_v38 = vld [vmem:[%s18230_s4 + $0x1e8] sm:$0xff] }
 0x507   : > { %4567 = vmatpush.bf16.msrb.mxu1 %v12594_v21 }
 0x508   : > { %v15035_v46 = vsel %vm3885_vm2, %v3948_v23, %v3952_v0  ;;  %v4161_v22 = vor.u32 %v4160_v35, %v4159_v61  ;;  %v3870_v16 = vunpack.c.l.b16 %v3786_v56  ;;  %v3395_v23 = vadd.f32 %v18378_v36, %v18377_v52  ;;  %v12609_v35 = vld [vmem:[%s18230_s4 + $0x268] sm:$0xff] }
 0x509   : > { %18376 = vst [vmem:[#allocation5_spill] sm:$0xff] %v15035_v46  ;;  %4075 = vmatmul.bf16.gmra.mxu1 %v15035_v46 }
 0x50a   : > { %v15043_v44 = vsel %vm4127_vm3, %v4157_v53, %v4161_v22  ;;  %v12610_v53 = vld [vmem:[%s18230_s4 + $0x270] sm:$0xff] }
 0x50b   : > { %v3737_v47 = vpop.f32.mrf.mxu3  ;;  %4273 = vmatmul.bf16.gmra.mxu2 %v15043_v44  ;;  %5096 = vmatmul.bf16.gmra.mxu0 %v15043_v44 }
 0x50c   : > { %v3738_v32 = vadd.f32 %v3737_v47, %v3651_v49  ;;  %4743 = vmatpush.bf16.msrb.mxu2 %v12610_v53  ;;  %4568 = vmatpush.bf16.msrb.mxu1 %v12593_v38  ;;  %v12592_v49 = vld [vmem:[%s18230_s4 + $0x1e0] sm:$0xff]  ;;  %v3482_v47 = vadd.f32 %v18380_v30, %v3395_v23  ;;  %v12606_v30 = vld [vmem:[%s18230_s4 + $0x250] sm:$0xff] }
 0x50e   : > { %v3787_v17 = vpack.c.bf16 %v3738_v32, %v3738_v32  ;;  %v3956_v32 = vor.u32 %v3954_v20, %v3952_v0  ;;  %v12591_v20 = vld [vmem:[%s18230_s4 + $0x1d8] sm:$0xff] }
 0x510   : > { %v3871_v50 = vunpack.c.l.b16 %v3787_v17  ;;  %4405 = vmatmul.bf16.gmra.mxu3 %v14872_v57  ;;  %4744 = vmatpush.bf16.msrb.mxu2 %v12609_v35 }
 0x511   : > { %4569 = vmatpush.bf16.msrb.mxu1 %v12592_v49 }
 0x512   : > { %v15062_v61 = vpack.c.b16 %v3871_v50, %v3870_v16  ;;  %v12608_v16 = vld [vmem:[%s18230_s4 + $0x260] sm:$0xff]  ;;  %v3569_v50 = vadd.f32 %v14609_v58, %v3482_v47  ;;  %v12607_v58 = vld [vmem:[%s18230_s4 + $0x258] sm:$0xff] }
 0x513   : > { %v3740_v40 = vpop.f32.mrf.mxu3 }
 0x514   : > { %18379 = vst [vmem:[#allocation18_spill] sm:$0xff] %v15062_v61  ;;  %v3958_v33 = vshll.u32 %v15062_v61, 16  ;;  %v3962_v34 = vshrl.u32 %v15062_v61, 16  ;;  %v3741_v38 = vadd.f32 %v3740_v40, %v14839_v48  ;;  %4745 = vmatpush.bf16.msrb.mxu2 %v12608_v16  ;;  %v3656_v0 = vadd.f32 %v14844_v2, %v3569_v50  ;;  %v12590_v2 = vld [vmem:[%s18230_s4 + $0x1d0] sm:$0xff] }
 0x515   : > { %4570 = vmatpush.bf16.msrb.mxu1 %v12591_v20  ;;  %v18386_v16 = vld [vmem:[#allocation24_spill] sm:$0xff]  ;;  %v12605_v20 = vld [vmem:[%s18230_s4 + $0x248] sm:$0xff] }
 0x516   : > { %v15073_v56 = vpop.f32.mrf.mxu1  ;;  %v3960_v21 = vrot.slane %v3958_v33, 1  ;;  %v4163_v17 = vrot.slane %v3962_v34, 1  ;;  %v4164_v53 = vrot.slane %v3958_v33, 2  ;;  %v3788_v35 = vpack.c.bf16 %v3741_v38, %v3741_v38 }
 0x517   : > { %18381 = vst [vmem:[#allocation23_spill] sm:$0xff] %v15073_v56 }
 0x518   : > { %v15081_v52 = vsel %vm3885_vm2, %v3956_v32, %v3960_v21  ;;  %v4165_v36 = vor.u32 %v4164_v53, %v4163_v17  ;;  %4746 = vmatpush.bf16.msrb.mxu2 %v12607_v58  ;;  %v15106_v47 = vunpack.c.l.b16 %v3788_v35  ;;  %v12589_v17 = vld [vmem:[%s18230_s4 + $0x1c8] sm:$0xff]  ;;  %v18385_v53 = vld [vmem:[#allocation8_spill] sm:$0xff]  ;;  %v12588_v35 = vld [vmem:[%s18230_s4 + $0x1c0] sm:$0xff] }
 0x519   : > { %4080 = vmatmul.bf16.gmra.mxu1 %v15081_v52  ;;  %v3400_v50 = vadd.f32 %v18386_v16, %v18385_v53 }
 0x51a   : > { %v15089_v23 = vsel %vm4127_vm3, %v4161_v22, %v4165_v36  ;;  %4571 = vmatpush.bf16.msrb.mxu1 %v12590_v2  ;;  %18384 = vst [vmem:[#allocation25_spill] sm:$0xff] %v15106_v47 }
 0x51b   : > { %v3742_v48 = vpop.f32.mrf.mxu3  ;;  %4278 = vmatmul.bf16.gmra.mxu2 %v15089_v23  ;;  %5101 = vmatmul.bf16.gmra.mxu0 %v15089_v23 }
 0x51c   : > { %v3743_v40 = vadd.f32 %v3742_v48, %v3656_v0  ;;  %4747 = vmatpush.bf16.msrb.mxu2 %v12606_v30 }
 0x51e   : > { %v3789_v33 = vpack.c.bf16 %v3743_v40, %v3743_v40  ;;  %v15099_v22 = vpop.f32.mrf.mxu1  ;;  %v15101_v49 = vpop.f32.mrf.mxu2  ;;  %4572 = vmatpush.bf16.msrb.mxu1 %v12589_v17  ;;  %v18388_v40 = vld [vmem:[#allocation29_spill] sm:$0xff] }
 0x51f   : > { %18382 = vst [vmem:[#allocation6_spill] sm:$0xff] %v15099_v22  ;;  %v3487_v2 = vadd.f32 %v18388_v40, %v3400_v50 }
 0x520   : > { %18383 = vst [vmem:[#allocation20_spill] sm:$0xff] %v15101_v49  ;;  %v3873_v32 = vunpack.c.l.b16 %v3789_v33  ;;  %4410 = vmatmul.bf16.gmra.mxu3 %v14914_v26  ;;  %4748 = vmatpush.bf16.msrb.mxu2 %v12605_v20  ;;  %v4673_v49 = vrot.slane %v15007_v4, 2 }
 0x521   : > { %v3574_v20 = vadd.f32 %v14634_v59, %v3487_v2  ;;  %v12707_v59 = vld [vmem:[%s18230_s4 + $0x578] sm:$0xff] }
 0x522   : > { %v15115_v38 = vpack.c.b16 %v3873_v32, %v15106_v47  ;;  %v3964_v32 = vor.u32 %v3962_v34, %v3960_v21  ;;  %4573 = vmatpush.bf16.msrb.mxu1 %v12588_v35  ;;  %5682 = vmatpush.bf16.msra.mxu0 %v12707_v59 }
 0x523   : > { %v3745_v0 = vpop.f32.mrf.mxu3  ;;  %v3661_v34 = vadd.f32 %v14874_v42, %v3574_v20  ;;  %v12706_v42 = vld [vmem:[%s18230_s4 + $0x570] sm:$0xff] }
 0x524   : > { %18387 = vst [vmem:[#allocation7_spill] sm:$0xff] %v15115_v38  ;;  %v3966_v58 = vshll.u32 %v15115_v38, 16  ;;  %v3970_v48 = vshrl.u32 %v15115_v38, 16  ;;  %v3746_v45 = vadd.f32 %v3745_v0, %v14864_v3  ;;  %4749 = vmatpush.bf16.msrb.mxu2 %v12604_v63 }
 0x526   : > { %v15126_v33 = vpop.f32.mrf.mxu1  ;;  %v15128_v30 = vpop.f32.mrf.mxu2  ;;  %v3968_v17 = vrot.slane %v3966_v58, 1  ;;  %v4167_v53 = vrot.slane %v3970_v48, 1  ;;  %v4168_v16 = vrot.slane %v3966_v58, 2  ;;  %v3790_v3 = vpack.c.bf16 %v3746_v45, %v3746_v45  ;;  %5683 = vmatpush.bf16.msra.mxu0 %v12706_v42 }
 0x527   : > { %18389 = vst [vmem:[#allocation22_spill] sm:$0xff] %v15126_v33  ;;  %v12704_v33 = vld [vmem:[%s18230_s4 + $0x560] sm:$0xff] }
 0x528   : > { %18390 = vst [vmem:[#allocation27_spill] sm:$0xff] %v15128_v30  ;;  %v15136_v47 = vsel %vm3885_vm2, %v3964_v32, %v3968_v17  ;;  %v4169_v50 = vor.u32 %v4168_v16, %v4167_v53  ;;  %v18394_v32 = vld [vmem:[#allocation9_spill] sm:$0xff]  ;;  %v18395_v53 = vld [vmem:[#allocation26_spill] sm:$0xff]  ;;  %v3972_v42 = vor.u32 %v3970_v48, %v3968_v17  ;;  %v4671_v30 = vrot.slane %v14985_v18, 2 }
 0x529   : > { %18391 = vst [vmem:[#allocation8_spill] sm:$0xff] %v15136_v47  ;;  %4085 = vmatmul.bf16.gmra.mxu1 %v15136_v47  ;;  %v3405_v16 = vadd.f32 %v18395_v53, %v18394_v32 }
 0x52a   : > { %v15141_v21 = vsel %vm4127_vm3, %v4165_v36, %v4169_v50  ;;  %v15155_v36 = vunpack.c.l.b16 %v3790_v3 }
 0x52b   : > { %v3747_v58 = vpop.f32.mrf.mxu3  ;;  %4283 = vmatmul.bf16.gmra.mxu2 %v15141_v21  ;;  %5106 = vmatmul.bf16.gmra.mxu0 %v15141_v21  ;;  %v3492_v3 = vadd.f32 %v14468_v6, %v3405_v16 }
 0x52c   : > { %v3748_v0 = vadd.f32 %v3747_v58, %v3661_v34  ;;  %v12705_v34 = vld [vmem:[%s18230_s4 + $0x568] sm:$0xff] }
 0x52d   : > { %5684 = vmatpush.bf16.msra.mxu0 %v12705_v34 }
 0x52e   : > { %v3791_v63 = vpack.c.bf16 %v3748_v0, %v3748_v0  ;;  %v15148_v35 = vpop.f32.mrf.mxu1  ;;  %v15150_v40 = vpop.f32.mrf.mxu2 }
 0x52f   : > { %18392 = vst [vmem:[#allocation24_spill] sm:$0xff] %v15148_v35  ;;  %v3579_v35 = vadd.f32 %v14660_v39, %v3492_v3 }
 0x530   : > { %18393 = vst [vmem:[#allocation29_spill] sm:$0xff] %v15150_v40  ;;  %v4483_v2 = vunpack.c.l.b16 %v3791_v63  ;;  %4415 = vmatmul.bf16.gmra.mxu3 %v14953_v10 }
 0x531   : > { %5685 = vmatpush.bf16.msra.mxu0 %v12704_v33  ;;  %v3666_v48 = vadd.f32 %v14916_v62, %v3579_v35  ;;  %v12702_v62 = vld [vmem:[%s18230_s4 + $0x550] sm:$0xff] }
 0x532   : > { %v15161_v45 = vpack.c.b16 %v4483_v2, %v15155_v36 }
 0x533   : > { %v3750_v20 = vpop.f32.mrf.mxu3 }
 0x534   : > { %18396 = vst [vmem:[#allocation9_spill] sm:$0xff] %v15161_v45  ;;  %v4843_v58 = vshll.u32 %v15161_v45, 16  ;;  %v4847_v59 = vshrl.u32 %v15161_v45, 16  ;;  %v3751_v40 = vadd.f32 %v3750_v20, %v14907_v54  ;;  %v12703_v54 = vld [vmem:[%s18230_s4 + $0x558] sm:$0xff] }
 0x535   : > { %5686 = vmatpush.bf16.msra.mxu0 %v12703_v54 }
 0x536   : > { %v15169_v0 = vpop.f32.mrf.mxu1  ;;  %v15171_v63 = vpop.f32.mrf.mxu2  ;;  %v5004_v32 = vrot.slane %v4847_v59, 1  ;;  %v5005_v2 = vrot.slane %v4843_v58, 2  ;;  %v4845_v53 = vrot.slane %v4843_v58, 1  ;;  %v3792_v20 = vpack.c.bf16 %v3751_v40, %v3751_v40  ;;  %v18408_v40 = vld [vmem:[#allocation28_spill] sm:$0xff] }
 0x537   : > { %18397 = vst [vmem:[#allocation26_spill] sm:$0xff] %v15169_v0  ;;  %v12700_v0 = vld [vmem:[%s18230_s4 + $0x540] sm:$0xff] }
 0x538   : > { %18398 = vst [vmem:[#allocation32_spill] sm:$0xff] %v15171_v63  ;;  %v15178_v22 = vpop.f32.mrf.mxu0  ;;  %v15180_v6 = vor.u32 %v5005_v2, %v5004_v32  ;;  %v15183_v16 = vsel %vm3885_vm2, %v3972_v42, %v4845_v53  ;;  %v15185_v34 = vor.u32 %v4847_v59, %v4845_v53  ;;  %v15203_v35 = vunpack.c.l.b16 %v3792_v20  ;;  %v18407_v32 = vld [vmem:[#allocation11_spill] sm:$0xff] }
 0x539   : > { %18399 = vst [vmem:[#allocation33_spill] sm:$0xff] %v15178_v22  ;;  %4090 = vmatmul.bf16.gmra.mxu1 %v3972_v42  ;;  %v3410_v2 = vadd.f32 %v18408_v40, %v18407_v32  ;;  %5687 = vmatpush.bf16.msra.mxu0 %v12702_v62  ;;  %v4487_v20 = vrot.slane %v14842_v5, 1  ;;  %v18246_v62 = vrot.slane %v14817_v27, 1  ;;  %v4663_v40 = vrot.slane %v14842_v5, 2 }
 0x53a   : > { %18400 = vst [vmem:[#allocation34_spill] sm:$0xff] %v15180_v6  ;;  %v15190_v39 = vsel %vm4127_vm3, %v4169_v50, %v15180_v6 }
 0x53b   : > { %18401 = vst [vmem:[#allocation35_spill] sm:$0xff] %v15183_v16  ;;  %v3752_v17 = vpop.f32.mrf.mxu3  ;;  %4288 = vmatmul.bf16.gmra.mxu2 %v4169_v50  ;;  %5111 = vmatmul.bf16.gmra.mxu0 %v15190_v39 }
 0x53c   : > { %18402 = vst [vmem:[#allocation36_spill] sm:$0xff] %v15185_v34  ;;  %v3753_v58 = vadd.f32 %v3752_v17, %v3666_v48  ;;  %v12701_v17 = vld [vmem:[%s18230_s4 + $0x548] sm:$0xff] }
 0x53d   : > { %18405 = vst [vmem:[#allocation39_spill] sm:$0xff] %v15203_v35  ;;  %5688 = vmatpush.bf16.msra.mxu0 %v12701_v17  ;;  %v18247_v17 = vrot.slane %v14817_v27, 2 }
 0x53e   : > { %v3793_v59 = vpack.c.bf16 %v3753_v58, %v3753_v58  ;;  %v15196_v3 = vpop.f32.mrf.mxu1  ;;  %v15198_v33 = vpop.f32.mrf.mxu2 }
 0x53f   : > { %18403 = vst [vmem:[#allocation37_spill] sm:$0xff] %v15196_v3 }
 0x540   : > { %18404 = vst [vmem:[#allocation38_spill] sm:$0xff] %v15198_v33  ;;  %v4840_v50 = vunpack.c.l.b16 %v3793_v59  ;;  %4420 = vmatmul.bf16.gmra.mxu3 %v14985_v18  ;;  %v15206_v42 = vpop.f32.mrf.mxu0 }
 0x541   : > { %18406 = vst [vmem:[#allocation40_spill] sm:$0xff] %v15206_v42  ;;  %v3497_v42 = vadd.f32 %v14512_v15, %v3410_v2  ;;  %v15238_v2 = vsel %vm1533_vm0, %v18246_v62, %v4487_v20  ;;  %5689 = vmatpush.bf16.msra.mxu0 %v12700_v0 }
 0x542   : > { %v15211_v53 = vpack.c.b16 %v4840_v50, %v15203_v35 }
 0x543   : > { %v3755_v48 = vpop.f32.mrf.mxu3 }
 0x544   : > { %18409 = vst [vmem:[#allocation11_spill] sm:$0xff] %v15211_v53  ;;  %v3756_v54 = vadd.f32 %v3755_v48, %v14949_v8  ;;  %v4851_v58 = vshll.u32 %v15211_v53, 16  ;;  %v4855_v59 = vshrl.u32 %v15211_v53, 16  ;;  %v3584_v48 = vadd.f32 %v14682_v19, %v3497_v42 }
 0x545   : > { %v15251_v42 = vsel %vm4661_vm4, %v18247_v17, %v4663_v40 }
 0x546   : > { %v15222_v50 = vpop.f32.mrf.mxu1  ;;  %v15224_v32 = vpop.f32.mrf.mxu2  ;;  %v5008_v22 = vrot.slane %v4855_v59, 1  ;;  %v5009_v3 = vrot.slane %v4851_v58, 2  ;;  %v15227_v8 = vrot.slane %v4851_v58, 1  ;;  %v3671_v19 = vadd.f32 %v14955_v29, %v3584_v48  ;;  %18413 = vst [vmem:[#allocation43_spill] sm:$0xff] %v15251_v42 }
 0x547   : > { %18410 = vst [vmem:[#allocation28_spill] sm:$0xff] %v15222_v50 }
 0x548   : > { %18411 = vst [vmem:[#allocation41_spill] sm:$0xff] %v15224_v32  ;;  %v15233_v15 = vpop.f32.mrf.mxu0  ;;  %v15241_v50 = vor.u32 %v5009_v3, %v5008_v22  ;;  %v15244_v58 = vor.u32 %v4855_v59, %v15227_v8  ;;  %v3794_v3 = vpack.c.bf16 %v3756_v54, %v3756_v54 }
 0x549   : > { %18412 = vst [vmem:[#allocation42_spill] sm:$0xff] %v15233_v15  ;;  %4574 = vmatmul.bf16.vlgmr.msrb.gmra.mxu1 %v15238_v2 }
 0x54a   : > { %v15256_v62 = vsel %vm4127_vm3, %v15180_v6, %v15241_v50  ;;  %v15264_v48 = vunpack.c.l.b16 %v3794_v3  ;;  %v18417_v6 = vld [vmem:[#allocation13_spill] sm:$0xff] }
 0x54b   : > { %v3757_v22 = vpop.f32.mrf.mxu3  ;;  %4750 = vmatmul.bf16.vlgmr.msrb.gmra.mxu2 %v15251_v42  ;;  %5116 = vmatmul.bf16.gmra.mxu0 %v15256_v62  ;;  %v3415_v33 = vadd.f32 %v14466_v41, %v18417_v6  ;;  %v4665_v41 = vrot.slane %v14872_v57, 2 }
 0x54c   : > { %v3758_v59 = vadd.f32 %v3757_v22, %v3671_v19  ;;  %v4489_v22 = vrot.slane %v14872_v57, 1 }
 0x54e   : > { %v3795_v0 = vpack.c.bf16 %v3758_v59, %v3758_v59  ;;  %v15260_v15 = vpop.f32.mrf.mxu1  ;;  %v15262_v29 = vpop.f32.mrf.mxu2 }
 0x54f   : > { %18414 = vst [vmem:[#allocation44_spill] sm:$0xff] %v15260_v15 }
 0x550   : > { %18415 = vst [vmem:[#allocation45_spill] sm:$0xff] %v15262_v29  ;;  %v5308_v17 = vunpack.c.l.b16 %v3795_v0  ;;  %4425 = vmatmul.bf16.gmra.mxu3 %v15007_v4  ;;  %v15267_v32 = vpop.f32.mrf.mxu0  ;;  %v3502_v0 = vadd.f32 %v14646_v13, %v3415_v33  ;;  %v15292_v29 = vsel %vm1533_vm0, %v4487_v20, %v4489_v22 }
 0x551   : > { %18416 = vst [vmem:[#allocation46_spill] sm:$0xff] %v15267_v32 }
 0x552   : > { %v15272_v63 = vpack.c.b16 %v5308_v17, %v15264_v48  ;;  %v3589_v17 = vadd.f32 %v14981_v51, %v3502_v0 }
 0x553   : > { %v3760_v54 = vpop.f32.mrf.mxu3 }
 0x554   : > { %18418 = vst [vmem:[#allocation13_spill] sm:$0xff] %v15272_v63  ;;  %v3761_v19 = vadd.f32 %v3760_v54, %v14979_v60  ;;  %v18250_v59 = vshll.u32 %v15272_v63, 16  ;;  %v18249_v3 = vshrl.u32 %v15272_v63, 16  ;;  %v3676_v33 = vadd.f32 %v14987_v11, %v3589_v17 }
 0x555   : > { %v4491_v17 = vrot.slane %v14914_v26, 1 }
 0x556   : > { %v15279_v15 = vpop.f32.mrf.mxu1  ;;  %v15281_v32 = vpop.f32.mrf.mxu2  ;;  %v5777_v6 = vrot.slane %v18249_v3, 1  ;;  %v5778_v60 = vrot.slane %v18250_v59, 2  ;;  %v3796_v51 = vpack.c.bf16 %v3761_v19, %v3761_v19 }
 0x557   : > { %18419 = vst [vmem:[#allocation47_spill] sm:$0xff] %v15279_v15  ;;  %v15299_v15 = vsel %vm4661_vm4, %v4663_v40, %v4665_v41  ;;  %v12627_v40 = vld [vmem:[%s18230_s4 + $0x2f8] sm:$0xff] }
 0x558   : > { %18420 = vst [vmem:[#allocation48_spill] sm:$0xff] %v15281_v32  ;;  %v15289_v54 = vpop.f32.mrf.mxu0  ;;  %v15295_v13 = vor.u32 %v5778_v60, %v5777_v6  ;;  %v15307_v32 = vunpack.c.l.b16 %v3796_v51  ;;  %4909 = vmatpush.bf16.msrb.mxu3 %v12627_v40 }
 0x559   : > { %18421 = vst [vmem:[#allocation49_spill] sm:$0xff] %v15289_v54  ;;  %4579 = vmatmul.bf16.gmra.mxu1 %v15292_v29 }
 0x55a   : > { %18422 = vst [vmem:[#allocation50_spill] sm:$0xff] %v15299_v15 }
 0x55b   : > { %v3762_v3 = vpop.f32.mrf.mxu3  ;;  %4755 = vmatmul.bf16.gmra.mxu2 %v15299_v15  ;;  %5121 = vmatmul.bf16.gmra.mxu0 %v15241_v50  ;;  %18425 = vst [vmem:[#allocation53_spill] sm:$0xff] %v15307_v32 }
 0x55c   : > { %v3763_v0 = vadd.f32 %v3762_v3, %v3676_v33  ;;  %v12626_v3 = vld [vmem:[%s18230_s4 + $0x2f0] sm:$0xff] }
 0x55d   : > { %4910 = vmatpush.bf16.msrb.mxu3 %v12626_v3 }
 0x55e   : > { %v3797_v59 = vpack.c.bf16 %v3763_v0, %v3763_v0  ;;  %v15303_v54 = vpop.f32.mrf.mxu1  ;;  %v15305_v20 = vpop.f32.mrf.mxu2 }
 0x55f   : > { %18423 = vst [vmem:[#allocation51_spill] sm:$0xff] %v15303_v54 }
 0x560   : > { %18424 = vst [vmem:[#allocation52_spill] sm:$0xff] %v15305_v20  ;;  %v5613_v6 = vunpack.c.l.b16 %v3797_v59  ;;  %4430 = vmatmul.bf16.gmra.mxu3 %v15027_v24  ;;  %v15310_v11 = vpop.f32.mrf.mxu0 }
 0x561   : > { %18426 = vst [vmem:[#allocation54_spill] sm:$0xff] %v15310_v11  ;;  %v4667_v11 = vrot.slane %v14914_v26, 2 }
 0x562   : > { %v15316_v60 = vpack.c.b16 %v5613_v6, %v15307_v32  ;;  %v15336_v32 = vsel %vm1533_vm0, %v4489_v22, %v4491_v17  ;;  %v12624_v22 = vld [vmem:[%s18230_s4 + $0x2e0] sm:$0xff] }
 0x563   : > { %v3765_v19 = vpop.f32.mrf.mxu3  ;;  %v15345_v3 = vsel %vm4661_vm4, %v4665_v41, %v4667_v11  ;;  %v12623_v41 = vld [vmem:[%s18230_s4 + $0x2d8] sm:$0xff] }
 0x564   : > { %18427 = vst [vmem:[#allocation55_spill] sm:$0xff] %v15316_v60  ;;  %v18253_v59 = vshll.u32 %v15316_v60, 16  ;;  %v18252_v33 = vshrl.u32 %v15316_v60, 16 }
 0x566   : > { %v15324_v51 = vpop.f32.mrf.mxu1  ;;  %v15326_v0 = vpop.f32.mrf.mxu2  ;;  %v5781_v6 = vrot.slane %v18252_v33, 1  ;;  %v5782_v40 = vrot.slane %v18253_v59, 2 }
 0x567   : > { %18428 = vst [vmem:[#allocation56_spill] sm:$0xff] %v15324_v51  ;;  %v12625_v51 = vld [vmem:[%s18230_s4 + $0x2e8] sm:$0xff] }
 0x568   : > { %18429 = vst [vmem:[#allocation57_spill] sm:$0xff] %v15326_v0  ;;  %v15333_v19 = vpop.f32.mrf.mxu0  ;;  %v15341_v54 = vor.u32 %v5782_v40, %v5781_v6  ;;  %4911 = vmatpush.bf16.msrb.mxu3 %v12625_v51  ;;  %v12622_v51 = vld [vmem:[%s18230_s4 + $0x2d0] sm:$0xff]  ;;  %v4493_v40 = vrot.slane %v14953_v10, 1 }
 0x569   : > { %18430 = vst [vmem:[#allocation58_spill] sm:$0xff] %v15333_v19  ;;  %4584 = vmatmul.bf16.gmra.mxu1 %v15336_v32 }
 0x56a   : > { %v15376_v0 = vsel %vm1533_vm0, %v4491_v17, %v4493_v40  ;;  %v12620_v17 = vld [vmem:[%s18230_s4 + $0x2c0] sm:$0xff] }
 0x56b   : > { %v3766_v33 = vpop.f32.mrf.mxu3  ;;  %4760 = vmatmul.bf16.gmra.mxu2 %v15345_v3  ;;  %5690 = vmatmul.bf16.vlgmr.msra.gmra.mxu0 %v14963_v14  ;;  %18438 = vst [vmem:[#allocation66_spill] sm:$0xff] %v15376_v0 }
 0x56c   : > { %4912 = vmatpush.bf16.msrb.mxu3 %v12624_v22 }
 0x56e   : > { %v15352_v59 = vpop.f32.mrf.mxu1  ;;  %v15354_v19 = vpop.f32.mrf.mxu2 }
 0x56f   : > { %18431 = vst [vmem:[#allocation59_spill] sm:$0xff] %v15352_v59 }
 0x570   : > { %18432 = vst [vmem:[#allocation60_spill] sm:$0xff] %v15354_v19  ;;  %4435 = vmatmul.bf16.gmra.mxu3 %v15062_v61  ;;  %v15357_v6 = vpop.f32.mrf.mxu0  ;;  %v4669_v19 = vrot.slane %v14953_v10, 2 }
 0x571   : > { %18433 = vst [vmem:[#allocation61_spill] sm:$0xff] %v15357_v6  ;;  %4913 = vmatpush.bf16.msrb.mxu3 %v12623_v41  ;;  %v12621_v41 = vld [vmem:[%s18230_s4 + $0x2c8] sm:$0xff] }
 0x573   : > { %v15362_v33 = vpop.f32.mrf.mxu3 }
 0x574   : > { %18434 = vst [vmem:[#allocation62_spill] sm:$0xff] %v15362_v33  ;;  %v15383_v33 = vsel %vm4661_vm4, %v4667_v11, %v4669_v19 }
 0x575   : > { %4914 = vmatpush.bf16.msrb.mxu3 %v12622_v51 }
 0x576   : > { %v15368_v59 = vpop.f32.mrf.mxu1  ;;  %v15370_v22 = vpop.f32.mrf.mxu2 }
 0x577   : > { %18435 = vst [vmem:[#allocation63_spill] sm:$0xff] %v15368_v59 }
 0x578   : > { %18436 = vst [vmem:[#allocation64_spill] sm:$0xff] %v15370_v22  ;;  %v15373_v6 = vpop.f32.mrf.mxu0 }
 0x579   : > { %18437 = vst [vmem:[#allocation65_spill] sm:$0xff] %v15373_v6  ;;  %4589 = vmatmul.bf16.gmra.mxu1 %v15376_v0  ;;  %4915 = vmatpush.bf16.msrb.mxu3 %v12621_v41 }
 0x57b   : > { %v15385_v59 = vpop.f32.mrf.mxu3  ;;  %4765 = vmatmul.bf16.gmra.mxu2 %v15383_v33  ;;  %5695 = vmatmul.bf16.gmra.mxu0 %v14995_v25 }
 0x57c   : > { %18439 = vst [vmem:[#allocation67_spill] sm:$0xff] %v15385_v59  ;;  %v4495_v59 = vrot.slane %v14985_v18, 1 }
 0x57d   : > { %4916 = vmatpush.bf16.msrb.mxu3 %v12620_v17  ;;  %v15414_v17 = vsel %vm4661_vm4, %v4669_v19, %v4671_v30  ;;  %v4497_v19 = vrot.slane %v15007_v4, 1 }
 0x57e   : > { %v15392_v51 = vpop.f32.mrf.mxu1  ;;  %v15394_v6 = vpop.f32.mrf.mxu2 }
 0x57f   : > { %18440 = vst [vmem:[#allocation68_spill] sm:$0xff] %v15392_v51  ;;  %v15410_v51 = vsel %vm1533_vm0, %v4493_v40, %v4495_v59 }
 0x580   : > { %18441 = vst [vmem:[#allocation69_spill] sm:$0xff] %v15394_v6  ;;  %4440 = vmatmul.bf16.gmra.mxu3 %v15115_v38  ;;  %v15397_v11 = vpop.f32.mrf.mxu0 }
 0x581   : > { %18442 = vst [vmem:[#allocation70_spill] sm:$0xff] %v15397_v11 }
 0x582   : > { %18447 = vst [vmem:[#allocation75_spill] sm:$0xff] %v15410_v51 }
 0x583   : > { %v15399_v41 = vpop.f32.mrf.mxu3 }
 0x584   : > { %18443 = vst [vmem:[#allocation71_spill] sm:$0xff] %v15399_v41 }
 0x586   : > { %v15402_v22 = vpop.f32.mrf.mxu1  ;;  %v15404_v20 = vpop.f32.mrf.mxu2 }
 0x587   : > { %18444 = vst [vmem:[#allocation72_spill] sm:$0xff] %v15402_v22  ;;  %v4327_v22 = vpack.c.b16 %v15155_v36, %v15155_v36  ;;  %v15439_v36 = vsel %vm1533_vm0, %v4495_v59, %v4497_v19 }
 0x588   : > { %18445 = vst [vmem:[#allocation73_spill] sm:$0xff] %v15404_v20  ;;  %v15407_v56 = vpop.f32.mrf.mxu0 }
 0x589   : > { %18446 = vst [vmem:[#allocation74_spill] sm:$0xff] %v15407_v56  ;;  %4594 = vmatmul.bf16.gmra.mxu1 %v15410_v51 }
 0x58a   : > { %18456 = vst [vmem:[#allocation84_spill] sm:$0xff] %v15439_v36 }
 0x58b   : > { %v15416_v11 = vpop.f32.mrf.mxu3  ;;  %4770 = vmatmul.bf16.gmra.mxu2 %v15414_v17  ;;  %5700 = vmatmul.bf16.gmra.mxu0 %v15015_v55 }
 0x58c   : > { %18448 = vst [vmem:[#allocation76_spill] sm:$0xff] %v15416_v11 }
 0x58e   : > { %v15422_v41 = vpop.f32.mrf.mxu1  ;;  %v15424_v56 = vpop.f32.mrf.mxu2 }
 0x58f   : > { %18449 = vst [vmem:[#allocation77_spill] sm:$0xff] %v15422_v41  ;;  %v4499_v41 = vrot.slane %v15027_v24, 1 }
 0x590   : > { %18450 = vst [vmem:[#allocation78_spill] sm:$0xff] %v15424_v56  ;;  %4445 = vmatmul.bf16.gmra.mxu3 %v4327_v22  ;;  %v15426_v40 = vpop.f32.mrf.mxu0  ;;  %v15443_v22 = vsel %vm4661_vm4, %v4671_v30, %v4673_v49 }
 0x591   : > { %18451 = vst [vmem:[#allocation79_spill] sm:$0xff] %v15426_v40 }
 0x593   : > { %v15428_v20 = vpop.f32.mrf.mxu3 }
 0x594   : > { %18452 = vst [vmem:[#allocation80_spill] sm:$0xff] %v15428_v20 }
 0x596   : > { %v15431_v6 = vpop.f32.mrf.mxu1  ;;  %v15433_v11 = vpop.f32.mrf.mxu2 }
 0x597   : > { %18453 = vst [vmem:[#allocation81_spill] sm:$0xff] %v15431_v6 }
 0x598   : > { %18454 = vst [vmem:[#allocation82_spill] sm:$0xff] %v15433_v11  ;;  %v15436_v1 = vpop.f32.mrf.mxu0 }
 0x599   : > { %18455 = vst [vmem:[#allocation83_spill] sm:$0xff] %v15436_v1  ;;  %4599 = vmatmul.bf16.gmra.mxu1 %v15439_v36 }
 0x59b   : > { %v15445_v40 = vpop.f32.mrf.mxu3  ;;  %4775 = vmatmul.bf16.gmra.mxu2 %v15443_v22  ;;  %5705 = vmatmul.bf16.gmra.mxu0 %v15035_v46 }
 0x59c   : > { %18457 = vst [vmem:[#allocation85_spill] sm:$0xff] %v15445_v40  ;;  %v4675_v40 = vrot.slane %v15027_v24, 2 }
 0x59e   : > { %v15449_v6 = vpop.f32.mrf.mxu1  ;;  %v15451_v20 = vpop.f32.mrf.mxu2 }
 0x59f   : > { %18458 = vst [vmem:[#allocation86_spill] sm:$0xff] %v15449_v6  ;;  %v15467_v6 = vsel %vm1533_vm0, %v4497_v19, %v4499_v41 }
 0x5a0   : > { %18459 = vst [vmem:[#allocation87_spill] sm:$0xff] %v15451_v20  ;;  %4917 = vmatmul.bf16.vlgmr.msrb.gmra.mxu3 %v14888_v7  ;;  %v15454_v1 = vpop.f32.mrf.mxu0  ;;  %v15471_v20 = vsel %vm4661_vm4, %v4673_v49, %v4675_v40 }
 0x5a1   : > { %18460 = vst [vmem:[#allocation88_spill] sm:$0xff] %v15454_v1 }
 0x5a2   : > { %18465 = vst [vmem:[#allocation93_spill] sm:$0xff] %v15467_v6 }
 0x5a3   : > { %v15456_v59 = vpop.f32.mrf.mxu3 }
 0x5a4   : > { %18461 = vst [vmem:[#allocation89_spill] sm:$0xff] %v15456_v59 }
 0x5a6   : > { %v15459_v30 = vpop.f32.mrf.mxu1  ;;  %v15461_v11 = vpop.f32.mrf.mxu2 }
 0x5a7   : > { %18462 = vst [vmem:[#allocation90_spill] sm:$0xff] %v15459_v30 }
 0x5a8   : > { %18463 = vst [vmem:[#allocation91_spill] sm:$0xff] %v15461_v11  ;;  %v15464_v56 = vpop.f32.mrf.mxu0  ;;  %v4501_v11 = vrot.slane %v15062_v61, 1 }
 0x5a9   : > { %18464 = vst [vmem:[#allocation92_spill] sm:$0xff] %v15464_v56  ;;  %4604 = vmatmul.bf16.gmra.mxu1 %v15467_v6 }
 0x5ab   : > { %v15473_v1 = vpop.f32.mrf.mxu3  ;;  %4780 = vmatmul.bf16.gmra.mxu2 %v15471_v20  ;;  %5710 = vmatmul.bf16.gmra.mxu0 %v15081_v52 }
 0x5ac   : > { %18466 = vst [vmem:[#allocation94_spill] sm:$0xff] %v15473_v1  ;;  %v4677_v1 = vrot.slane %v15062_v61, 2 }
 0x5ae   : > { %v15477_v30 = vpop.f32.mrf.mxu1  ;;  %v15479_v59 = vpop.f32.mrf.mxu2 }
 0x5af   : > { %18467 = vst [vmem:[#allocation95_spill] sm:$0xff] %v15477_v30  ;;  %v15495_v30 = vsel %vm1533_vm0, %v4499_v41, %v4501_v11  ;;  %v12675_v41 = vld [vmem:[%s18230_s4 + $0x478] sm:$0xff] }
 0x5b0   : > { %18468 = vst [vmem:[#allocation96_spill] sm:$0xff] %v15479_v59  ;;  %4922 = vmatmul.bf16.gmra.mxu3 %v14930_v37  ;;  %v15482_v56 = vpop.f32.mrf.mxu0  ;;  %5365 = vmatpush.bf16.msra.mxu2 %v12675_v41 }
 0x5b1   : > { %18469 = vst [vmem:[#allocation97_spill] sm:$0xff] %v15482_v56  ;;  %v12659_v56 = vld [vmem:[%s18230_s4 + $0x3f8] sm:$0xff] }
 0x5b2   : > { %18474 = vst [vmem:[#allocation102_spill] sm:$0xff] %v15495_v30  ;;  %5212 = vmatpush.bf16.msra.mxu1 %v12659_v56  ;;  %v12657_v56 = vld [vmem:[%s18230_s4 + $0x3e8] sm:$0xff] }
 0x5b3   : > { %v15484_v19 = vpop.f32.mrf.mxu3 }
 0x5b4   : > { %18470 = vst [vmem:[#allocation98_spill] sm:$0xff] %v15484_v19  ;;  %v15502_v19 = vsel %vm4661_vm4, %v4675_v40, %v4677_v1  ;;  %v12674_v40 = vld [vmem:[%s18230_s4 + $0x470] sm:$0xff] }
 0x5b5   : > { %5366 = vmatpush.bf16.msra.mxu2 %v12674_v40  ;;  %v15539_v40 = vrot.slane %v15115_v38, 2 }
 0x5b6   : > { %v15487_v49 = vpop.f32.mrf.mxu1  ;;  %v15489_v15 = vpop.f32.mrf.mxu2 }
 0x5b7   : > { %18471 = vst [vmem:[#allocation99_spill] sm:$0xff] %v15487_v49 }
 0x5b8   : > { %18472 = vst [vmem:[#allocation100_spill] sm:$0xff] %v15489_v15  ;;  %v15492_v7 = vpop.f32.mrf.mxu0 }
 0x5b9   : > { %18473 = vst [vmem:[#allocation101_spill] sm:$0xff] %v15492_v7  ;;  %4609 = vmatmul.bf16.gmra.mxu1 %v15495_v30  ;;  %v12658_v7 = vld [vmem:[%s18230_s4 + $0x3f0] sm:$0xff] }
 0x5ba   : > { %5213 = vmatpush.bf16.msra.mxu1 %v12658_v7  ;;  %v12656_v7 = vld [vmem:[%s18230_s4 + $0x3e0] sm:$0xff]  ;;  %18480 = vst [vmem:[#allocation108_spill] sm:$0xff] %v15539_v40 }
 0x5bb   : > { %v15504_v59 = vpop.f32.mrf.mxu3  ;;  %4785 = vmatmul.bf16.gmra.mxu2 %v15502_v19  ;;  %5715 = vmatmul.bf16.gmra.mxu0 %v15136_v47 }
 0x5bc   : > { %18475 = vst [vmem:[#allocation103_spill] sm:$0xff] %v15504_v59 }
 0x5be   : > { %v4093_v49 = vpop.f32.mrf.mxu1  ;;  %v15514_v15 = vpop.f32.mrf.mxu2  ;;  %5214 = vmatpush.bf16.msra.mxu1 %v12657_v56 }
 0x5bf   : > { %18476 = vst [vmem:[#allocation104_spill] sm:$0xff] %v15514_v15  ;;  %v12673_v49 = vld [vmem:[%s18230_s4 + $0x468] sm:$0xff]  ;;  %v15531_v15 = vrot.slane %v15115_v38, 1 }
 0x5c0   : > { %4927 = vmatmul.bf16.gmra.mxu3 %v14963_v14  ;;  %v15520_v59 = vpop.f32.mrf.mxu0  ;;  %5367 = vmatpush.bf16.msra.mxu2 %v12673_v49  ;;  %v15556_v49 = vsel %vm4661_vm4, %v4677_v1, %v15539_v40 }
 0x5c1   : > { %18477 = vst [vmem:[#allocation105_spill] sm:$0xff] %v15520_v59  ;;  %v15548_v56 = vsel %vm1533_vm0, %v4501_v11, %v15531_v15  ;;  %v12671_v11 = vld [vmem:[%s18230_s4 + $0x458] sm:$0xff] }
 0x5c2   : > { %18482 = vst [vmem:[#allocation110_spill] sm:$0xff] %v15548_v56  ;;  %5215 = vmatpush.bf16.msra.mxu1 %v12656_v7 }
 0x5c3   : > { %v15525_v41 = vpop.f32.mrf.mxu3 }
 0x5c4   : > { %18478 = vst [vmem:[#allocation106_spill] sm:$0xff] %v15525_v41  ;;  %v12672_v41 = vld [vmem:[%s18230_s4 + $0x460] sm:$0xff] }
 0x5c5   : > { %5368 = vmatpush.bf16.msra.mxu2 %v12672_v41  ;;  %v12654_v41 = vld [vmem:[%s18230_s4 + $0x3d0] sm:$0xff] }
 0x5c6   : > { %v4291_v59 = vpop.f32.mrf.mxu2  ;;  %v15536_v14 = vpop.f32.mrf.mxu1 }
 0x5c7   : > { %18479 = vst [vmem:[#allocation107_spill] sm:$0xff] %v15536_v14  ;;  %v12655_v59 = vld [vmem:[%s18230_s4 + $0x3d8] sm:$0xff] }
 0x5c8   : > { %v15544_v37 = vpop.f32.mrf.mxu0  ;;  %5216 = vmatpush.bf16.msra.mxu1 %v12655_v59  ;;  %v12653_v59 = vld [vmem:[%s18230_s4 + $0x3c8] sm:$0xff] }
 0x5c9   : > { %18481 = vst [vmem:[#allocation109_spill] sm:$0xff] %v15544_v37  ;;  %4614 = vmatmul.bf16.gmra.mxu1 %v15548_v56  ;;  %5369 = vmatpush.bf16.msra.mxu2 %v12671_v11  ;;  %v12670_v37 = vld [vmem:[%s18230_s4 + $0x450] sm:$0xff] }
 0x5cb   : > { %v15558_v14 = vpop.f32.mrf.mxu3  ;;  %4790 = vmatmul.bf16.gmra.mxu2 %v15556_v49  ;;  %5720 = vmatmul.bf16.gmra.mxu0 %v15183_v16 }
 0x5cc   : > { %18483 = vst [vmem:[#allocation111_spill] sm:$0xff] %v15558_v14  ;;  %5217 = vmatpush.bf16.msra.mxu1 %v12654_v41  ;;  %v12652_v41 = vld [vmem:[%s18230_s4 + $0x3c0] sm:$0xff] }
 0x5cd   : > { %5370 = vmatpush.bf16.msra.mxu2 %v12670_v37  ;;  %v15597_v37 = vrot.slane %v15161_v45, 2 }
 0x5ce   : > { %v15568_v7 = vpop.f32.mrf.mxu1  ;;  %v15570_v1 = vpop.f32.mrf.mxu2 }
 0x5cf   : > { %18484 = vst [vmem:[#allocation112_spill] sm:$0xff] %v15568_v7  ;;  %v15587_v7 = vrot.slane %v15161_v45, 1 }
 0x5d0   : > { %18485 = vst [vmem:[#allocation113_spill] sm:$0xff] %v15570_v1  ;;  %4932 = vmatmul.bf16.gmra.mxu3 %v14995_v25  ;;  %v15576_v14 = vpop.f32.mrf.mxu0  ;;  %v12669_v1 = vld [vmem:[%s18230_s4 + $0x448] sm:$0xff]  ;;  %5218 = vmatpush.bf16.msra.mxu1 %v12653_v59  ;;  %v15613_v59 = vsel %vm4661_vm4, %v15539_v40, %v15597_v37 }
 0x5d1   : > { %18486 = vst [vmem:[#allocation114_spill] sm:$0xff] %v15576_v14  ;;  %5371 = vmatpush.bf16.msra.mxu2 %v12669_v1  ;;  %v15607_v1 = vsel %vm1533_vm0, %v15531_v15, %v15587_v7 }
 0x5d2   : > { %18491 = vst [vmem:[#allocation119_spill] sm:$0xff] %v15607_v1 }
 0x5d3   : > { %v15581_v11 = vpop.f32.mrf.mxu3  ;;  %18492 = vst [vmem:[#allocation120_spill] sm:$0xff] %v15613_v59 }
 0x5d4   : > { %18487 = vst [vmem:[#allocation115_spill] sm:$0xff] %v15581_v11  ;;  %v12668_v11 = vld [vmem:[%s18230_s4 + $0x440] sm:$0xff]  ;;  %5219 = vmatpush.bf16.msra.mxu1 %v12652_v41 }
 0x5d5   : > { %5372 = vmatpush.bf16.msra.mxu2 %v12668_v11  ;;  %v12555_v11 = vld [vmem:[%s18230_s4 + $0xb8] sm:$0xff] }
 0x5d6   : > { %v15592_v14 = vpop.f32.mrf.mxu1  ;;  %v15594_v25 = vpop.f32.mrf.mxu2  ;;  %6196 = vmatpush.bf16.msrb.mxu0 %v12555_v11 }
 0x5d7   : > { %18488 = vst [vmem:[#allocation116_spill] sm:$0xff] %v15592_v14  ;;  %v12553_v14 = vld [vmem:[%s18230_s4 + $0xa8] sm:$0xff] }
 0x5d8   : > { %18489 = vst [vmem:[#allocation117_spill] sm:$0xff] %v15594_v25  ;;  %v15602_v42 = vpop.f32.mrf.mxu0  ;;  %v15618_v25 = vsel %vm3885_vm2, %v15185_v34, %v15227_v8  ;;  %v12554_v8 = vld [vmem:[%s18230_s4 + $0xb0] sm:$0xff] }
 0x5d9   : > { %18490 = vst [vmem:[#allocation118_spill] sm:$0xff] %v15602_v42  ;;  %4619 = vmatmul.bf16.gmra.mxu1 %v15607_v1 }
 0x5da   : > { %18493 = vst [vmem:[#allocation121_spill] sm:$0xff] %v15618_v25  ;;  %6197 = vmatpush.bf16.msrb.mxu0 %v12554_v8 }
 0x5db   : > { %v15620_v42 = vpop.f32.mrf.mxu3  ;;  %4795 = vmatmul.bf16.gmra.mxu2 %v15613_v59  ;;  %5725 = vmatmul.bf16.gmra.mxu0 %v15618_v25 }
 0x5dc   : > { %18494 = vst [vmem:[#allocation122_spill] sm:$0xff] %v15620_v42 }
 0x5de   : > { %v15627_v41 = vpop.f32.mrf.mxu1  ;;  %v15629_v40 = vpop.f32.mrf.mxu2  ;;  %6198 = vmatpush.bf16.msrb.mxu0 %v12553_v14 }
 0x5df   : > { %18495 = vst [vmem:[#allocation123_spill] sm:$0xff] %v15627_v41 }
 0x5e0   : > { %18496 = vst [vmem:[#allocation124_spill] sm:$0xff] %v15629_v40  ;;  %4937 = vmatmul.bf16.gmra.mxu3 %v15015_v55  ;;  %v5124_v42 = vpop.f32.mrf.mxu0  ;;  %v18500_v40 = vshll.u32 %v15272_v63, 16  ;;  %v12552_v55 = vld [vmem:[%s18230_s4 + $0xa0] sm:$0xff] }
 0x5e2   : > { %v5618_v35 = vrot.slane %v18500_v40, 1  ;;  %6199 = vmatpush.bf16.msrb.mxu0 %v12552_v55  ;;  %v12551_v40 = vld [vmem:[%s18230_s4 + $0x98] sm:$0xff]  ;;  %v12550_v55 = vld [vmem:[%s18230_s4 + $0x90] sm:$0xff] }
 0x5e3   : > { %v15635_v34 = vpop.f32.mrf.mxu3 }
 0x5e4   : > { %18497 = vst [vmem:[#allocation125_spill] sm:$0xff] %v15635_v34  ;;  %v15654_v8 = vsel %vm3885_vm2, %v15244_v58, %v5618_v35 }
 0x5e5   : > { %18502 = vst [vmem:[#allocation129_spill] sm:$0xff] %v15654_v8 }
 0x5e6   : > { %v15640_v11 = vpop.f32.mrf.mxu1  ;;  %v15642_v41 = vpop.f32.mrf.mxu2  ;;  %6200 = vmatpush.bf16.msrb.mxu0 %v12551_v40 }
 0x5e7   : > { %18498 = vst [vmem:[#allocation126_spill] sm:$0xff] %v15640_v11 }
 0x5e8   : > { %18499 = vst [vmem:[#allocation127_spill] sm:$0xff] %v15642_v41  ;;  %v15649_v42 = vpop.f32.mrf.mxu0 }
 0x5e9   : > { %18501 = vst [vmem:[#allocation128_spill] sm:$0xff] %v15649_v42  ;;  %4624 = vmatmul.bf16.gmra.mxu1 %v15587_v7 }
 0x5ea   : > { %6201 = vmatpush.bf16.msrb.mxu0 %v12550_v55  ;;  %v18512_v55 = vshrl.u32 %v15272_v63, 16 }
 0x5eb   : > { %v15656_v14 = vpop.f32.mrf.mxu3  ;;  %4800 = vmatmul.bf16.gmra.mxu2 %v15597_v37  ;;  %5730 = vmatmul.bf16.gmra.mxu0 %v15654_v8  ;;  %v12549_v8 = vld [vmem:[%s18230_s4 + $0x88] sm:$0xff] }
 0x5ec   : > { %18503 = vst [vmem:[#allocation130_spill] sm:$0xff] %v15656_v14 }
 0x5ee   : > { %v15663_v34 = vpop.f32.mrf.mxu1  ;;  %v15665_v42 = vpop.f32.mrf.mxu2  ;;  %6202 = vmatpush.bf16.msrb.mxu0 %v12549_v8 }
 0x5ef   : > { %18504 = vst [vmem:[#allocation131_spill] sm:$0xff] %v15663_v34 }
 0x5f0   : > { %18505 = vst [vmem:[#allocation132_spill] sm:$0xff] %v15665_v42  ;;  %4942 = vmatmul.bf16.gmra.mxu3 %v15035_v46  ;;  %v15671_v14 = vpop.f32.mrf.mxu0  ;;  %v18510_v42 = vshll.u32 %v15316_v60, 16  ;;  %v12548_v46 = vld [vmem:[%s18230_s4 + $0x80] sm:$0xff] }
 0x5f1   : > { %18506 = vst [vmem:[#allocation133_spill] sm:$0xff] %v15671_v14 }
 0x5f2   : > { %v5626_v11 = vrot.slane %v18510_v42, 1  ;;  %6203 = vmatpush.bf16.msrb.mxu0 %v12548_v46 }
 0x5f3   : > { %v15673_v41 = vpop.f32.mrf.mxu3 }
 0x5f4   : > { %18507 = vst [vmem:[#allocation134_spill] sm:$0xff] %v15673_v41  ;;  %v15691_v41 = vor.u32 %v18512_v55, %v5618_v35 }
 0x5f6   : > { %v15678_v40 = vpop.f32.mrf.mxu1  ;;  %v15680_v34 = vpop.f32.mrf.mxu2  ;;  %18513 = vst [vmem:[#allocation138_spill] sm:$0xff] %v15691_v41  ;;  %v5627_v8 = vsel %vm3885_vm2, %v15691_v41, %v5626_v11 }
 0x5f7   : > { %18508 = vst [vmem:[#allocation135_spill] sm:$0xff] %v15678_v40 }
 0x5f8   : > { %18509 = vst [vmem:[#allocation136_spill] sm:$0xff] %v15680_v34  ;;  %v15687_v14 = vpop.f32.mrf.mxu0 }
 0x5f9   : > { %18511 = vst [vmem:[#allocation137_spill] sm:$0xff] %v15687_v14  ;;  %5220 = vmatmul.bf16.vlgmr.msra.gmra.mxu1 %v14872_v57 }
 0x5fb   : > { %v15696_v34 = vpop.f32.mrf.mxu3  ;;  %5373 = vmatmul.bf16.vlgmr.msra.gmra.mxu2 %v15336_v32  ;;  %5735 = vmatmul.bf16.gmra.mxu0 %v5627_v8  ;;  %v18522_v8 = vshrl.u32 %v15316_v60, 16 }
 0x5fc   : > { %18514 = vst [vmem:[#allocation139_spill] sm:$0xff] %v15696_v34 }
 0x5fd   : > { %v5630_v34 = vor.u32 %v18522_v8, %v5626_v11  ;;  %v12690_v11 = vld [vmem:[%s18230_s4 + $0x4f0] sm:$0xff] }
 0x5fe   : > { %v15699_v42 = vpop.f32.mrf.mxu1  ;;  %v15701_v40 = vpop.f32.mrf.mxu2 }
 0x5ff   : > { %18515 = vst [vmem:[#allocation140_spill] sm:$0xff] %v15699_v42 }
 0x600   : > { %18516 = vst [vmem:[#allocation141_spill] sm:$0xff] %v15701_v40  ;;  %4947 = vmatmul.bf16.gmra.mxu3 %v15081_v52  ;;  %v15704_v14 = vpop.f32.mrf.mxu0 }
 0x601   : > { %18517 = vst [vmem:[#allocation142_spill] sm:$0xff] %v15704_v14 }
 0x603   : > { %v15706_v35 = vpop.f32.mrf.mxu3 }
 0x604   : > { %18518 = vst [vmem:[#allocation143_spill] sm:$0xff] %v15706_v35 }
 0x606   : > { %v15708_v55 = vpop.f32.mrf.mxu1  ;;  %v15710_v46 = vpop.f32.mrf.mxu2 }
 0x607   : > { %18519 = vst [vmem:[#allocation144_spill] sm:$0xff] %v15708_v55 }
 0x608   : > { %18520 = vst [vmem:[#allocation145_spill] sm:$0xff] %v15710_v46  ;;  %v15712_v41 = vpop.f32.mrf.mxu0 }
 0x609   : > { %18521 = vst [vmem:[#allocation146_spill] sm:$0xff] %v15712_v41  ;;  %5225 = vmatmul.bf16.gmra.mxu1 %v14914_v26  ;;  %v12691_v41 = vld [vmem:[%s18230_s4 + $0x4f8] sm:$0xff] }
 0x60a   : > { %5515 = vmatpush.bf16.msra.mxu3 %v12691_v41  ;;  %v18531_v41 = vrot.slane %v14817_v27, 1 }
 0x60b   : > { %v15717_v42 = vpop.f32.mrf.mxu3  ;;  %5378 = vmatmul.bf16.gmra.mxu2 %v15376_v0  ;;  %5740 = vmatmul.bf16.gmra.mxu0 %v5630_v34 }
 0x60c   : > { %18523 = vst [vmem:[#allocation147_spill] sm:$0xff] %v15717_v42 }
 0x60e   : > { %v15720_v40 = vpop.f32.mrf.mxu1  ;;  %v15722_v14 = vpop.f32.mrf.mxu2  ;;  %5516 = vmatpush.bf16.msra.mxu3 %v12690_v11  ;;  %v12688_v11 = vld [vmem:[%s18230_s4 + $0x4e0] sm:$0xff] }
 0x60f   : > { %18524 = vst [vmem:[#allocation148_spill] sm:$0xff] %v15720_v40 }
 0x610   : > { %18525 = vst [vmem:[#allocation149_spill] sm:$0xff] %v15722_v14  ;;  %4952 = vmatmul.bf16.gmra.mxu3 %v15136_v47  ;;  %v15725_v35 = vpop.f32.mrf.mxu0  ;;  %v12689_v14 = vld [vmem:[%s18230_s4 + $0x4e8] sm:$0xff] }
 0x611   : > { %18526 = vst [vmem:[#allocation150_spill] sm:$0xff] %v15725_v35  ;;  %v6144_v35 = vrot.slane %v14791_v43, 1 }
 0x612   : > { %5517 = vmatpush.bf16.msra.mxu3 %v12689_v14  ;;  %v12687_v14 = vld [vmem:[%s18230_s4 + $0x4d8] sm:$0xff] }
 0x613   : > { %v15730_v46 = vpop.f32.mrf.mxu3 }
 0x614   : > { %18527 = vst [vmem:[#allocation151_spill] sm:$0xff] %v15730_v46  ;;  %v6145_v46 = vsel %vm1533_vm0, %v6144_v35, %v18531_v41  ;;  %v12686_v35 = vld [vmem:[%s18230_s4 + $0x4d0] sm:$0xff] }
 0x616   : > { %v15735_v34 = vpop.f32.mrf.mxu1  ;;  %v15737_v8 = vpop.f32.mrf.mxu2  ;;  %5518 = vmatpush.bf16.msra.mxu3 %v12688_v11 }
 0x617   : > { %18528 = vst [vmem:[#allocation152_spill] sm:$0xff] %v15735_v34 }
 0x618   : > { %18529 = vst [vmem:[#allocation153_spill] sm:$0xff] %v15737_v8  ;;  %v15739_v42 = vpop.f32.mrf.mxu0 }
 0x619   : > { %18530 = vst [vmem:[#allocation154_spill] sm:$0xff] %v15739_v42  ;;  %5230 = vmatmul.bf16.gmra.mxu1 %v14953_v10 }
 0x61a   : > { %5519 = vmatpush.bf16.msra.mxu3 %v12687_v14 }
 0x61b   : > { %v4448_v40 = vpop.f32.mrf.mxu3  ;;  %5383 = vmatmul.bf16.gmra.mxu2 %v15410_v51  ;;  %6204 = vmatmul.bf16.vlgmr.msrb.gmra.mxu0 %v6145_v46 }
 0x61e   : > { %v15753_v42 = vpop.f32.mrf.mxu1  ;;  %v15755_v8 = vpop.f32.mrf.mxu2  ;;  %5520 = vmatpush.bf16.msra.mxu3 %v12686_v35 }
 0x61f   : > { %18532 = vst [vmem:[#allocation155_spill] sm:$0xff] %v15753_v42 }
 0x620   : > { %18533 = vst [vmem:[#allocation156_spill] sm:$0xff] %v15755_v8  ;;  %4957 = vmatmul.bf16.gmra.mxu3 %v15183_v16  ;;  %v15758_v34 = vpop.f32.mrf.mxu0 }
 0x621   : > { %18534 = vst [vmem:[#allocation157_spill] sm:$0xff] %v15758_v34  ;;  %v12685_v34 = vld [vmem:[%s18230_s4 + $0x4c8] sm:$0xff] }
 0x622   : > { %5521 = vmatpush.bf16.msra.mxu3 %v12685_v34 }
 0x623   : > { %v15763_v40 = vpop.f32.mrf.mxu3 }
 0x624   : > { %18535 = vst [vmem:[#allocation158_spill] sm:$0xff] %v15763_v40 }
 0x626   : > { %v15768_v46 = vpop.f32.mrf.mxu1  ;;  %v15770_v41 = vpop.f32.mrf.mxu2 }
 0x627   : > { %18536 = vst [vmem:[#allocation159_spill] sm:$0xff] %v15768_v46 }
 0x628   : > { %18537 = vst [vmem:[#allocation160_spill] sm:$0xff] %v15770_v41  ;;  %v15772_v11 = vpop.f32.mrf.mxu0  ;;  %v12684_v41 = vld [vmem:[%s18230_s4 + $0x4c0] sm:$0xff] }
 0x629   : > { %18538 = vst [vmem:[#allocation161_spill] sm:$0xff] %v15772_v11  ;;  %5235 = vmatmul.bf16.gmra.mxu1 %v14985_v18  ;;  %5522 = vmatpush.bf16.msra.mxu3 %v12684_v41 }
 0x62b   : > { %v15778_v14 = vpop.f32.mrf.mxu3  ;;  %5388 = vmatmul.bf16.gmra.mxu2 %v15439_v36  ;;  %6209 = vmatmul.bf16.gmra.mxu0 %v15238_v2 }
 0x62c   : > { %18539 = vst [vmem:[#allocation162_spill] sm:$0xff] %v15778_v14 }
 0x62e   : > { %v15785_v35 = vpop.f32.mrf.mxu1  ;;  %v15787_v11 = vpop.f32.mrf.mxu2 }
 0x62f   : > { %18540 = vst [vmem:[#allocation163_spill] sm:$0xff] %v15785_v35 }
 0x630   : > { %18541 = vst [vmem:[#allocation164_spill] sm:$0xff] %v15787_v11  ;;  %4962 = vmatmul.bf16.gmra.mxu3 %v15618_v25  ;;  %v15790_v8 = vpop.f32.mrf.mxu0 }
 0x631   : > { %18542 = vst [vmem:[#allocation165_spill] sm:$0xff] %v15790_v8 }
 0x633   : > { %v15792_v34 = vpop.f32.mrf.mxu3 }
 0x634   : > { %18543 = vst [vmem:[#allocation166_spill] sm:$0xff] %v15792_v34 }
 0x636   : > { %v15794_v46 = vpop.f32.mrf.mxu1  ;;  %v15796_v14 = vpop.f32.mrf.mxu2 }
 0x637   : > { %18544 = vst [vmem:[#allocation167_spill] sm:$0xff] %v15794_v46 }
 0x638   : > { %18545 = vst [vmem:[#allocation168_spill] sm:$0xff] %v15796_v14  ;;  %v15798_v2 = vpop.f32.mrf.mxu0 }
 0x639   : > { %18546 = vst [vmem:[#allocation169_spill] sm:$0xff] %v15798_v2  ;;  %5240 = vmatmul.bf16.gmra.mxu1 %v15007_v4 }
 0x63b   : > { %v15801_v42 = vpop.f32.mrf.mxu3  ;;  %5393 = vmatmul.bf16.gmra.mxu2 %v15467_v6  ;;  %6214 = vmatmul.bf16.gmra.mxu0 %v15292_v29 }
 0x63c   : > { %18547 = vst [vmem:[#allocation170_spill] sm:$0xff] %v15801_v42 }
 0x63e   : > { %v15805_v41 = vpop.f32.mrf.mxu1  ;;  %v15807_v25 = vpop.f32.mrf.mxu2 }
 0x63f   : > { %18548 = vst [vmem:[#allocation171_spill] sm:$0xff] %v15805_v41 }
 0x640   : > { %18549 = vst [vmem:[#allocation172_spill] sm:$0xff] %v15807_v25  ;;  %4967 = vmatmul.bf16.gmra.mxu3 %v15244_v58  ;;  %v15810_v8 = vpop.f32.mrf.mxu0 }
 0x641   : > { %18550 = vst [vmem:[#allocation173_spill] sm:$0xff] %v15810_v8 }
 0x643   : > { %v15812_v11 = vpop.f32.mrf.mxu3 }
 0x644   : > { %18551 = vst [vmem:[#allocation174_spill] sm:$0xff] %v15812_v11 }
 0x646   : > { %v15814_v14 = vpop.f32.mrf.mxu1  ;;  %v15816_v2 = vpop.f32.mrf.mxu2 }
 0x647   : > { %18552 = vst [vmem:[#allocation175_spill] sm:$0xff] %v15814_v14 }
 0x648   : > { %18553 = vst [vmem:[#allocation176_spill] sm:$0xff] %v15816_v2  ;;  %v15818_v46 = vpop.f32.mrf.mxu0 }
 0x649   : > { %18554 = vst [vmem:[#allocation177_spill] sm:$0xff] %v15818_v46  ;;  %5245 = vmatmul.bf16.gmra.mxu1 %v15027_v24 }
 0x64b   : > { %v15821_v42 = vpop.f32.mrf.mxu3  ;;  %5398 = vmatmul.bf16.gmra.mxu2 %v15495_v30  ;;  %6219 = vmatmul.bf16.gmra.mxu0 %v15336_v32 }
 0x64c   : > { %18555 = vst [vmem:[#allocation178_spill] sm:$0xff] %v15821_v42 }
 0x64e   : > { %v15825_v25 = vpop.f32.mrf.mxu1  ;;  %v15827_v58 = vpop.f32.mrf.mxu2 }
 0x64f   : > { %18556 = vst [vmem:[#allocation179_spill] sm:$0xff] %v15825_v25 }
 0x650   : > { %18557 = vst [vmem:[#allocation180_spill] sm:$0xff] %v15827_v58  ;;  %5523 = vmatmul.bf16.vlgmr.msra.gmra.mxu3 %v15345_v3  ;;  %v15830_v8 = vpop.f32.mrf.mxu0 }
 0x651   : > { %18558 = vst [vmem:[#allocation181_spill] sm:$0xff] %v15830_v8 }
 0x653   : > { %v15832_v14 = vpop.f32.mrf.mxu3 }
 0x654   : > { %18559 = vst [vmem:[#allocation182_spill] sm:$0xff] %v15832_v14 }
 0x656   : > { %v15834_v2 = vpop.f32.mrf.mxu1  ;;  %v15836_v46 = vpop.f32.mrf.mxu2 }
 0x657   : > { %18560 = vst [vmem:[#allocation183_spill] sm:$0xff] %v15834_v2 }
 0x658   : > { %18561 = vst [vmem:[#allocation184_spill] sm:$0xff] %v15836_v46  ;;  %v15838_v41 = vpop.f32.mrf.mxu0 }
 0x659   : > { %18562 = vst [vmem:[#allocation185_spill] sm:$0xff] %v15838_v41  ;;  %5250 = vmatmul.bf16.gmra.mxu1 %v15062_v61 }
 0x65b   : > { %v15841_v42 = vpop.f32.mrf.mxu3  ;;  %5403 = vmatmul.bf16.gmra.mxu2 %v15548_v56  ;;  %6224 = vmatmul.bf16.gmra.mxu0 %v15376_v0 }
 0x65c   : > { %18563 = vst [vmem:[#allocation186_spill] sm:$0xff] %v15841_v42 }
 0x65e   : > { %v15845_v58 = vpop.f32.mrf.mxu1  ;;  %v15847_v25 = vpop.f32.mrf.mxu2 }
 0x65f   : > { %18564 = vst [vmem:[#allocation187_spill] sm:$0xff] %v15845_v58  ;;  %v12723_v58 = vld [vmem:[%s18230_s4 + $0x5f8] sm:$0xff] }
 0x660   : > { %18565 = vst [vmem:[#allocation188_spill] sm:$0xff] %v15847_v25  ;;  %5528 = vmatmul.bf16.gmra.mxu3 %v15383_v33  ;;  %v15850_v8 = vpop.f32.mrf.mxu0  ;;  %5836 = vmatpush.bf16.msrb.mxu1 %v12723_v58 }
 0x661   : > { %18566 = vst [vmem:[#allocation189_spill] sm:$0xff] %v15850_v8  ;;  %v12731_v8 = vld [vmem:[%s18230_s4 + $0x638] sm:$0xff] }
 0x662   : > { %5967 = vmatpush.bf16.msrb.mxu2 %v12731_v8  ;;  %v12721_v8 = vld [vmem:[%s18230_s4 + $0x5e8] sm:$0xff] }
 0x663   : > { %v15852_v2 = vpop.f32.mrf.mxu3 }
 0x664   : > { %18567 = vst [vmem:[#allocation190_spill] sm:$0xff] %v15852_v2 }
 0x666   : > { %v15854_v46 = vpop.f32.mrf.mxu1  ;;  %v15856_v41 = vpop.f32.mrf.mxu2 }
 0x667   : > { %18568 = vst [vmem:[#allocation191_spill] sm:$0xff] %v15854_v46  ;;  %v12730_v46 = vld [vmem:[%s18230_s4 + $0x630] sm:$0xff] }
 0x668   : > { %18569 = vst [vmem:[#allocation192_spill] sm:$0xff] %v15856_v41  ;;  %v15858_v14 = vpop.f32.mrf.mxu0  ;;  %5968 = vmatpush.bf16.msrb.mxu2 %v12730_v46  ;;  %v12728_v46 = vld [vmem:[%s18230_s4 + $0x620] sm:$0xff] }
 0x669   : > { %18570 = vst [vmem:[#allocation193_spill] sm:$0xff] %v15858_v14  ;;  %5255 = vmatmul.bf16.gmra.mxu1 %v15115_v38  ;;  %v12722_v14 = vld [vmem:[%s18230_s4 + $0x5f0] sm:$0xff] }
 0x66a   : > { %5837 = vmatpush.bf16.msrb.mxu1 %v12722_v14  ;;  %v15896_v14 = vrot.slane %v15211_v53, 1 }
 0x66b   : > { %v15864_v42 = vpop.f32.mrf.mxu3  ;;  %5408 = vmatmul.bf16.gmra.mxu2 %v15607_v1  ;;  %6229 = vmatmul.bf16.gmra.mxu0 %v15410_v51 }
 0x66c   : > { %18571 = vst [vmem:[#allocation194_spill] sm:$0xff] %v15864_v42 }
 0x66d   : > { %18576 = vst [vmem:[#allocation199_spill] sm:$0xff] %v15896_v14 }
 0x66e   : > { %v4627_v41 = vpop.f32.mrf.mxu1  ;;  %v15874_v25 = vpop.f32.mrf.mxu2  ;;  %5838 = vmatpush.bf16.msrb.mxu1 %v12721_v8  ;;  %v12719_v8 = vld [vmem:[%s18230_s4 + $0x5d8] sm:$0xff] }
 0x66f   : > { %18572 = vst [vmem:[#allocation195_spill] sm:$0xff] %v15874_v25  ;;  %v12729_v41 = vld [vmem:[%s18230_s4 + $0x628] sm:$0xff]  ;;  %v12720_v25 = vld [vmem:[%s18230_s4 + $0x5e0] sm:$0xff] }
 0x670   : > { %5533 = vmatmul.bf16.gmra.mxu3 %v15414_v17  ;;  %v15880_v1 = vpop.f32.mrf.mxu0  ;;  %5969 = vmatpush.bf16.msrb.mxu2 %v12729_v41 }
 0x671   : > { %18573 = vst [vmem:[#allocation196_spill] sm:$0xff] %v15880_v1 }
 0x672   : > { %5839 = vmatpush.bf16.msrb.mxu1 %v12720_v25  ;;  %v12727_v25 = vld [vmem:[%s18230_s4 + $0x618] sm:$0xff] }
 0x673   : > { %v15885_v58 = vpop.f32.mrf.mxu3 }
 0x674   : > { %18574 = vst [vmem:[#allocation197_spill] sm:$0xff] %v15885_v58  ;;  %5970 = vmatpush.bf16.msrb.mxu2 %v12728_v46  ;;  %v12718_v46 = vld [vmem:[%s18230_s4 + $0x5d0] sm:$0xff] }
 0x676   : > { %v4803_v42 = vpop.f32.mrf.mxu2  ;;  %v15893_v1 = vpop.f32.mrf.mxu1  ;;  %5840 = vmatpush.bf16.msrb.mxu1 %v12719_v8  ;;  %v12717_v8 = vld [vmem:[%s18230_s4 + $0x5c8] sm:$0xff] }
 0x677   : > { %18575 = vst [vmem:[#allocation198_spill] sm:$0xff] %v15893_v1  ;;  %v15910_v42 = vsel %vm1533_vm0, %v15587_v7, %v15896_v14 }
 0x678   : > { %v15901_v58 = vpop.f32.mrf.mxu0  ;;  %18578 = vst [vmem:[#allocation201_spill] sm:$0xff] %v15910_v42  ;;  %5971 = vmatpush.bf16.msrb.mxu2 %v12727_v25 }
 0x679   : > { %18577 = vst [vmem:[#allocation200_spill] sm:$0xff] %v15901_v58  ;;  %5260 = vmatmul.bf16.gmra.mxu1 %v15161_v45 }
 0x67a   : > { %5841 = vmatpush.bf16.msrb.mxu1 %v12718_v46 }
 0x67b   : > { %v15912_v41 = vpop.f32.mrf.mxu3  ;;  %5413 = vmatmul.bf16.gmra.mxu2 %v15910_v42  ;;  %6234 = vmatmul.bf16.gmra.mxu0 %v15439_v36  ;;  %v12726_v42 = vld [vmem:[%s18230_s4 + $0x610] sm:$0xff] }
 0x67c   : > { %18579 = vst [vmem:[#allocation202_spill] sm:$0xff] %v15912_v41  ;;  %5972 = vmatpush.bf16.msrb.mxu2 %v12726_v42  ;;  %v15948_v42 = vrot.slane %v15272_v63, 1 }
 0x67e   : > { %v15922_v58 = vpop.f32.mrf.mxu1  ;;  %v15924_v7 = vpop.f32.mrf.mxu2  ;;  %5842 = vmatpush.bf16.msrb.mxu1 %v12717_v8  ;;  %18586 = vst [vmem:[#allocation209_spill] sm:$0xff] %v15948_v42 }
 0x67f   : > { %18580 = vst [vmem:[#allocation203_spill] sm:$0xff] %v15922_v58  ;;  %v12716_v58 = vld [vmem:[%s18230_s4 + $0x5c0] sm:$0xff] }
 0x680   : > { %18581 = vst [vmem:[#allocation204_spill] sm:$0xff] %v15924_v7  ;;  %5538 = vmatmul.bf16.gmra.mxu3 %v15443_v22  ;;  %v15930_v1 = vpop.f32.mrf.mxu0  ;;  %v12725_v7 = vld [vmem:[%s18230_s4 + $0x608] sm:$0xff] }
 0x681   : > { %18582 = vst [vmem:[#allocation205_spill] sm:$0xff] %v15930_v1  ;;  %5973 = vmatpush.bf16.msrb.mxu2 %v12725_v7  ;;  %v12724_v1 = vld [vmem:[%s18230_s4 + $0x600] sm:$0xff]  ;;  %v15959_v7 = vsel %vm1533_vm0, %v15896_v14, %v15948_v42 }
 0x682   : > { %5843 = vmatpush.bf16.msrb.mxu1 %v12716_v58  ;;  %18588 = vst [vmem:[#allocation211_spill] sm:$0xff] %v15959_v7 }
 0x683   : > { %v15935_v25 = vpop.f32.mrf.mxu3 }
 0x684   : > { %18583 = vst [vmem:[#allocation206_spill] sm:$0xff] %v15935_v25 }
 0x685   : > { %5974 = vmatpush.bf16.msrb.mxu2 %v12724_v1  ;;  %v12618_v1 = vld [vmem:[%s18230_s4 + $0x2b0] sm:$0xff] }
 0x686   : > { %v15943_v41 = vpop.f32.mrf.mxu1  ;;  %v15945_v46 = vpop.f32.mrf.mxu2 }
 0x687   : > { %18584 = vst [vmem:[#allocation207_spill] sm:$0xff] %v15943_v41  ;;  %v12617_v41 = vld [vmem:[%s18230_s4 + $0x2a8] sm:$0xff] }
 0x688   : > { %18585 = vst [vmem:[#allocation208_spill] sm:$0xff] %v15945_v46  ;;  %v15953_v25 = vpop.f32.mrf.mxu0  ;;  %v12619_v46 = vld [vmem:[%s18230_s4 + $0x2b8] sm:$0xff] }
 0x689   : > { %18587 = vst [vmem:[#allocation210_spill] sm:$0xff] %v15953_v25  ;;  %5265 = vmatmul.bf16.gmra.mxu1 %v15211_v53  ;;  %6648 = vmatpush.bf16.msra.mxu0 %v12619_v46 }
 0x68b   : > { %v15961_v8 = vpop.f32.mrf.mxu3  ;;  %5418 = vmatmul.bf16.gmra.mxu2 %v15959_v7  ;;  %6239 = vmatmul.bf16.gmra.mxu0 %v15467_v6  ;;  %v12533_v6 = vld [vmem:[%s18230_s4 + $0x8] sm:$0xff] }
 0x68c   : > { %18589 = vst [vmem:[#allocation212_spill] sm:$0xff] %v15961_v8  ;;  %v12616_v8 = vld [vmem:[%s18230_s4 + $0x2a0] sm:$0xff] }
 0x68d   : > { %6649 = vmatpush.bf16.msra.mxu0 %v12618_v1 }
 0x68e   : > { %v15968_v58 = vpop.f32.mrf.mxu1  ;;  %v15970_v25 = vpop.f32.mrf.mxu2 }
 0x68f   : > { %18590 = vst [vmem:[#allocation213_spill] sm:$0xff] %v15968_v58 }
 0x690   : > { %18591 = vst [vmem:[#allocation214_spill] sm:$0xff] %v15970_v25  ;;  %5543 = vmatmul.bf16.gmra.mxu3 %v15471_v20  ;;  %v5743_v14 = vpop.f32.mrf.mxu0  ;;  %v5160_v25 = vpack.c.b16 %v15264_v48, %v15264_v48 }
 0x691   : > { %6650 = vmatpush.bf16.msra.mxu0 %v12617_v41  ;;  %v12615_v41 = vld [vmem:[%s18230_s4 + $0x298] sm:$0xff] }
 0x693   : > { %v15976_v7 = vpop.f32.mrf.mxu3 }
 0x694   : > { %18592 = vst [vmem:[#allocation215_spill] sm:$0xff] %v15976_v7 }
 0x695   : > { %6651 = vmatpush.bf16.msra.mxu0 %v12616_v8 }
 0x696   : > { %v15981_v46 = vpop.f32.mrf.mxu1  ;;  %v15983_v58 = vpop.f32.mrf.mxu2 }
 0x697   : > { %18593 = vst [vmem:[#allocation216_spill] sm:$0xff] %v15981_v46  ;;  %v12613_v46 = vld [vmem:[%s18230_s4 + $0x288] sm:$0xff] }
 0x698   : > { %18594 = vst [vmem:[#allocation217_spill] sm:$0xff] %v15983_v58  ;;  %v15990_v14 = vpop.f32.mrf.mxu0 }
 0x699   : > { %5270 = vmatmul.bf16.gmra.mxu1 %v5160_v25  ;;  %6652 = vmatpush.bf16.msra.mxu0 %v12615_v41  ;;  %v12614_v25 = vld [vmem:[%s18230_s4 + $0x290] sm:$0xff] }
 0x69b   : > { %v15992_v1 = vpop.f32.mrf.mxu3  ;;  %5423 = vmatmul.bf16.gmra.mxu2 %v15948_v42  ;;  %6244 = vmatmul.bf16.gmra.mxu0 %v15495_v30 }
 0x69c   : > { %18595 = vst [vmem:[#allocation218_spill] sm:$0xff] %v15992_v1 }
 0x69d   : > { %6653 = vmatpush.bf16.msra.mxu0 %v12614_v25 }
 0x69e   : > { %v15999_v48 = vpop.f32.mrf.mxu1  ;;  %v16001_v58 = vpop.f32.mrf.mxu2 }
 0x69f   : > { %18596 = vst [vmem:[#allocation219_spill] sm:$0xff] %v15999_v48 }
 0x6a0   : > { %18597 = vst [vmem:[#allocation220_spill] sm:$0xff] %v16001_v58  ;;  %5548 = vmatmul.bf16.gmra.mxu3 %v15502_v19  ;;  %v16007_v8 = vpop.f32.mrf.mxu0  ;;  %v12612_v58 = vld [vmem:[%s18230_s4 + $0x280] sm:$0xff] }
 0x6a1   : > { %6654 = vmatpush.bf16.msra.mxu0 %v12613_v46 }
 0x6a3   : > { %v16009_v42 = vpop.f32.mrf.mxu3 }
 0x6a4   : > { %18598 = vst [vmem:[#allocation221_spill] sm:$0xff] %v16009_v42 }
 0x6a5   : > { %6655 = vmatpush.bf16.msra.mxu0 %v12612_v58 }
 0x6a6   : > { %v16014_v41 = vpop.f32.mrf.mxu1  ;;  %v16016_v48 = vpop.f32.mrf.mxu2 }
 0x6a7   : > { %18599 = vst [vmem:[#allocation222_spill] sm:$0xff] %v16014_v41 }
 0x6a8   : > { %18600 = vst [vmem:[#allocation223_spill] sm:$0xff] %v16016_v48  ;;  %v16021_v1 = vpop.f32.mrf.mxu0 }
 0x6a9   : > { %5844 = vmatmul.bf16.vlgmr.msrb.gmra.mxu1 %v14974_v9 }
 0x6ab   : > { %v16024_v25 = vpop.f32.mrf.mxu3  ;;  %5975 = vmatmul.bf16.vlgmr.msrb.gmra.mxu2 %v15383_v33  ;;  %6249 = vmatmul.bf16.gmra.mxu0 %v15548_v56  ;;  %v12537_v56 = vld [vmem:[%s18230_s4 + $0x28] sm:$0xff] }
 0x6ac   : > { %18601 = vst [vmem:[#allocation224_spill] sm:$0xff] %v16024_v25 }
 0x6ae   : > { %v16028_v46 = vpop.f32.mrf.mxu1  ;;  %v16030_v41 = vpop.f32.mrf.mxu2 }
 0x6af   : > { %18602 = vst [vmem:[#allocation225_spill] sm:$0xff] %v16028_v46 }
 0x6b0   : > { %18603 = vst [vmem:[#allocation226_spill] sm:$0xff] %v16030_v41  ;;  %5553 = vmatmul.bf16.gmra.mxu3 %v15556_v49  ;;  %v16033_v48 = vpop.f32.mrf.mxu0 }
 0x6b3   : > { %v16035_v42 = vpop.f32.mrf.mxu3 }
 0x6b4   : > { %18604 = vst [vmem:[#allocation227_spill] sm:$0xff] %v16035_v42 }
 0x6b6   : > { %v16037_v7 = vpop.f32.mrf.mxu1  ;;  %v16039_v2 = vpop.f32.mrf.mxu2 }
 0x6b7   : > { %18605 = vst [vmem:[#allocation228_spill] sm:$0xff] %v16037_v7 }
 0x6b8   : > { %18606 = vst [vmem:[#allocation229_spill] sm:$0xff] %v16039_v2  ;;  %v16041_v58 = vpop.f32.mrf.mxu0  ;;  %v12539_v2 = vld [vmem:[%s18230_s4 + $0x38] sm:$0xff] }
 0x6b9   : > { %5849 = vmatmul.bf16.gmra.mxu1 %v15000_v28  ;;  %6081 = vmatpush.bf16.msrb.mxu3 %v12539_v2 }
 0x6bb   : > { %v16044_v25 = vpop.f32.mrf.mxu3  ;;  %5980 = vmatmul.bf16.gmra.mxu2 %v15414_v17  ;;  %6254 = vmatmul.bf16.gmra.mxu0 %v15531_v15 }
 0x6bc   : > { %18607 = vst [vmem:[#allocation230_spill] sm:$0xff] %v16044_v25  ;;  %v12538_v25 = vld [vmem:[%s18230_s4 + $0x30] sm:$0xff] }
 0x6bd   : > { %6082 = vmatpush.bf16.msrb.mxu3 %v12538_v25  ;;  %v12536_v25 = vld [vmem:[%s18230_s4 + $0x20] sm:$0xff] }
 0x6be   : > { %v16048_v41 = vpop.f32.mrf.mxu1  ;;  %v16050_v46 = vpop.f32.mrf.mxu2 }
 0x6bf   : > { %18608 = vst [vmem:[#allocation231_spill] sm:$0xff] %v16048_v41 }
 0x6c0   : > { %18609 = vst [vmem:[#allocation232_spill] sm:$0xff] %v16050_v46  ;;  %5558 = vmatmul.bf16.gmra.mxu3 %v15613_v59  ;;  %v16053_v42 = vpop.f32.mrf.mxu0 }
 0x6c1   : > { %6083 = vmatpush.bf16.msrb.mxu3 %v12537_v56 }
 0x6c3   : > { %v16058_v7 = vpop.f32.mrf.mxu3 }
 0x6c4   : > { %18610 = vst [vmem:[#allocation233_spill] sm:$0xff] %v16058_v7  ;;  %v16076_v7 = vrot.slane %v15211_v53, 2  ;;  %v12535_v53 = vld [vmem:[%s18230_s4 + $0x18] sm:$0xff] }
 0x6c5   : > { %6084 = vmatpush.bf16.msrb.mxu3 %v12536_v25  ;;  %v12534_v25 = vld [vmem:[%s18230_s4 + $0x10] sm:$0xff] }
 0x6c6   : > { %v16063_v15 = vpop.f32.mrf.mxu1  ;;  %v16065_v41 = vpop.f32.mrf.mxu2  ;;  %18613 = vst [vmem:[#allocation236_spill] sm:$0xff] %v16076_v7  ;;  %v16088_v56 = vsel %vm4661_vm4, %v15597_v37, %v16076_v7 }
 0x6c7   : > { %18611 = vst [vmem:[#allocation234_spill] sm:$0xff] %v16063_v15 }
 0x6c8   : > { %18612 = vst [vmem:[#allocation235_spill] sm:$0xff] %v16065_v41  ;;  %v16067_v46 = vpop.f32.mrf.mxu0 }
 0x6c9   : > { %5854 = vmatmul.bf16.gmra.mxu1 %v15020_v31  ;;  %18616 = vst [vmem:[#allocation239_spill] sm:$0xff] %v16088_v56  ;;  %6085 = vmatpush.bf16.msrb.mxu3 %v12535_v53 }
 0x6cb   : > { %v4970_v2 = vpop.f32.mrf.mxu3  ;;  %5985 = vmatmul.bf16.gmra.mxu2 %v15443_v22  ;;  %6656 = vmatmul.bf16.vlgmr.msra.gmra.mxu0 %v14842_v5 }
 0x6cd   : > { %6086 = vmatpush.bf16.msrb.mxu3 %v12534_v25  ;;  %v12532_v25 = vld [vmem:[%s18230_s4] sm:$0xff] }
 0x6ce   : > { %v16081_v41 = vpop.f32.mrf.mxu1  ;;  %v16083_v15 = vpop.f32.mrf.mxu2 }
 0x6cf   : > { %18614 = vst [vmem:[#allocation237_spill] sm:$0xff] %v16081_v41 }
 0x6d0   : > { %18615 = vst [vmem:[#allocation238_spill] sm:$0xff] %v16083_v15  ;;  %5563 = vmatmul.bf16.gmra.mxu3 %v16088_v56  ;;  %v16091_v2 = vpop.f32.mrf.mxu0 }
 0x6d1   : > { %6087 = vmatpush.bf16.msrb.mxu3 %v12533_v6 }
 0x6d3   : > { %v16096_v30 = vpop.f32.mrf.mxu3 }
 0x6d4   : > { %18617 = vst [vmem:[#allocation240_spill] sm:$0xff] %v16096_v30 }
 0x6d5   : > { %6088 = vmatpush.bf16.msrb.mxu3 %v12532_v25 }
 0x6d6   : > { %v16101_v15 = vpop.f32.mrf.mxu1  ;;  %v16103_v41 = vpop.f32.mrf.mxu2 }
 0x6d7   : > { %18618 = vst [vmem:[#allocation241_spill] sm:$0xff] %v16101_v15  ;;  %v16116_v15 = vrot.slane %v15272_v63, 2 }
 0x6d8   : > { %18619 = vst [vmem:[#allocation242_spill] sm:$0xff] %v16103_v41  ;;  %v16105_v37 = vpop.f32.mrf.mxu0 }
 0x6d9   : > { %5859 = vmatmul.bf16.gmra.mxu1 %v15043_v44  ;;  %v16128_v6 = vsel %vm4661_vm4, %v16076_v7, %v16116_v15 }
 0x6db   : > { %v16111_v53 = vpop.f32.mrf.mxu3  ;;  %5990 = vmatmul.bf16.gmra.mxu2 %v15471_v20  ;;  %6661 = vmatmul.bf16.gmra.mxu0 %v14872_v57 }
 0x6dc   : > { %18620 = vst [vmem:[#allocation243_spill] sm:$0xff] %v16111_v53 }
 0x6de   : > { %v16121_v41 = vpop.f32.mrf.mxu1  ;;  %v16123_v30 = vpop.f32.mrf.mxu2 }
 0x6df   : > { %18621 = vst [vmem:[#allocation244_spill] sm:$0xff] %v16121_v41 }
 0x6e0   : > { %18622 = vst [vmem:[#allocation245_spill] sm:$0xff] %v16123_v30  ;;  %5568 = vmatmul.bf16.gmra.mxu3 %v16128_v6  ;;  %v16131_v53 = vpop.f32.mrf.mxu0 }
 0x6e3   : > { %v16133_v63 = vpop.f32.mrf.mxu3 }
 0x6e4   : > { %18623 = vst [vmem:[#allocation246_spill] sm:$0xff] %v16133_v63 }
 0x6e6   : > { %v16135_v11 = vpop.f32.mrf.mxu1  ;;  %v16137_v36 = vpop.f32.mrf.mxu2 }
 0x6e7   : > { %18624 = vst [vmem:[#allocation247_spill] sm:$0xff] %v16135_v11 }
 0x6e8   : > { %18625 = vst [vmem:[#allocation248_spill] sm:$0xff] %v16137_v36  ;;  %v16139_v35 = vpop.f32.mrf.mxu0 }
 0x6e9   : > { %5864 = vmatmul.bf16.gmra.mxu1 %v15089_v23 }
 0x6eb   : > { %v16142_v25 = vpop.f32.mrf.mxu3  ;;  %5995 = vmatmul.bf16.gmra.mxu2 %v15502_v19  ;;  %6666 = vmatmul.bf16.gmra.mxu0 %v14914_v26 }
 0x6ec   : > { %18626 = vst [vmem:[#allocation249_spill] sm:$0xff] %v16142_v25 }
 0x6ee   : > { %v16146_v30 = vpop.f32.mrf.mxu1  ;;  %v16148_v41 = vpop.f32.mrf.mxu2 }
 0x6ef   : > { %18627 = vst [vmem:[#allocation250_spill] sm:$0xff] %v16146_v30 }
 0x6f0   : > { %18628 = vst [vmem:[#allocation251_spill] sm:$0xff] %v16148_v41  ;;  %5573 = vmatmul.bf16.gmra.mxu3 %v16116_v15  ;;  %v16151_v63 = vpop.f32.mrf.mxu0 }
 0x6f3   : > { %v16153_v11 = vpop.f32.mrf.mxu3 }
 0x6f4   : > { %18629 = vst [vmem:[#allocation252_spill] sm:$0xff] %v16153_v11 }
 0x6f6   : > { %v16155_v36 = vpop.f32.mrf.mxu1  ;;  %v16157_v7 = vpop.f32.mrf.mxu2 }
 0x6f7   : > { %18630 = vst [vmem:[#allocation253_spill] sm:$0xff] %v16155_v36 }
 0x6f8   : > { %18631 = vst [vmem:[#allocation254_spill] sm:$0xff] %v16157_v7  ;;  %v16159_v34 = vpop.f32.mrf.mxu0 }
 0x6f9   : > { %5869 = vmatmul.bf16.gmra.mxu1 %v15141_v21 }
 0x6fb   : > { %v16162_v25 = vpop.f32.mrf.mxu3  ;;  %6000 = vmatmul.bf16.gmra.mxu2 %v15556_v49  ;;  %6671 = vmatmul.bf16.gmra.mxu0 %v14953_v10 }
 0x6fc   : > { %18632 = vst [vmem:[#allocation255_spill] sm:$0xff] %v16162_v25 }
 0x6fe   : > { %v16166_v41 = vpop.f32.mrf.mxu1  ;;  %v16168_v30 = vpop.f32.mrf.mxu2 }
 0x6ff   : > { %18633 = vst [vmem:[#allocation256_spill] sm:$0xff] %v16166_v41 }
 0x700   : > { %18634 = vst [vmem:[#allocation257_spill] sm:$0xff] %v16168_v30  ;;  %6089 = vmatmul.bf16.vlgmr.msrb.gmra.mxu3 %v14791_v43  ;;  %v16171_v11 = vpop.f32.mrf.mxu0 }
 0x703   : > { %v16173_v36 = vpop.f32.mrf.mxu3 }
 0x704   : > { %18635 = vst [vmem:[#allocation258_spill] sm:$0xff] %v16173_v36 }
 0x706   : > { %v16175_v7 = vpop.f32.mrf.mxu1  ;;  %v16177_v51 = vpop.f32.mrf.mxu2 }
 0x707   : > { %18636 = vst [vmem:[#allocation259_spill] sm:$0xff] %v16175_v7 }
 0x708   : > { %18637 = vst [vmem:[#allocation260_spill] sm:$0xff] %v16177_v51  ;;  %v16179_v40 = vpop.f32.mrf.mxu0 }
 0x709   : > { %5874 = vmatmul.bf16.gmra.mxu1 %v15190_v39 }
 0x70b   : > { %v16182_v25 = vpop.f32.mrf.mxu3  ;;  %6005 = vmatmul.bf16.gmra.mxu2 %v15613_v59  ;;  %6676 = vmatmul.bf16.gmra.mxu0 %v14985_v18 }
 0x70c   : > { %18638 = vst [vmem:[#allocation261_spill] sm:$0xff] %v16182_v25  ;;  %v12571_v25 = vld [vmem:[%s18230_s4 + $0x138] sm:$0xff] }
 0x70d   : > { %6311 = vmatpush.bf16.msra.mxu1 %v12571_v25 }
 0x70e   : > { %v16186_v30 = vpop.f32.mrf.mxu1  ;;  %v16188_v41 = vpop.f32.mrf.mxu2 }
 0x70f   : > { %18639 = vst [vmem:[#allocation262_spill] sm:$0xff] %v16186_v30 }
 0x710   : > { %18640 = vst [vmem:[#allocation263_spill] sm:$0xff] %v16188_v41  ;;  %6094 = vmatmul.bf16.gmra.mxu3 %v14817_v27  ;;  %v16191_v36 = vpop.f32.mrf.mxu0  ;;  %v12587_v41 = vld [vmem:[%s18230_s4 + $0x1b8] sm:$0xff] }
 0x711   : > { %6423 = vmatpush.bf16.msra.mxu2 %v12587_v41  ;;  %v12569_v41 = vld [vmem:[%s18230_s4 + $0x128] sm:$0xff] }
 0x713   : > { %v16193_v7 = vpop.f32.mrf.mxu3 }
 0x714   : > { %18641 = vst [vmem:[#allocation264_spill] sm:$0xff] %v16193_v7 }
 0x716   : > { %v16195_v51 = vpop.f32.mrf.mxu1  ;;  %v16197_v0 = vpop.f32.mrf.mxu2 }
 0x717   : > { %18642 = vst [vmem:[#allocation265_spill] sm:$0xff] %v16195_v51 }
 0x718   : > { %18643 = vst [vmem:[#allocation266_spill] sm:$0xff] %v16197_v0  ;;  %v16199_v55 = vpop.f32.mrf.mxu0  ;;  %v12570_v0 = vld [vmem:[%s18230_s4 + $0x130] sm:$0xff] }
 0x719   : > { %5879 = vmatmul.bf16.gmra.mxu1 %v15256_v62 }
 0x71a   : > { %6312 = vmatpush.bf16.msra.mxu1 %v12570_v0  ;;  %v12584_v0 = vld [vmem:[%s18230_s4 + $0x1a0] sm:$0xff] }
 0x71b   : > { %v16205_v30 = vpop.f32.mrf.mxu3  ;;  %6010 = vmatmul.bf16.gmra.mxu2 %v16088_v56  ;;  %6681 = vmatmul.bf16.gmra.mxu0 %v15007_v4 }
 0x71c   : > { %18644 = vst [vmem:[#allocation267_spill] sm:$0xff] %v16205_v30  ;;  %v12586_v30 = vld [vmem:[%s18230_s4 + $0x1b0] sm:$0xff] }
 0x71d   : > { %6424 = vmatpush.bf16.msra.mxu2 %v12586_v30 }
 0x71e   : > { %v5273_v51 = vpop.f32.mrf.mxu1  ;;  %v16215_v7 = vpop.f32.mrf.mxu2  ;;  %6313 = vmatpush.bf16.msra.mxu1 %v12569_v41 }
 0x71f   : > { %18645 = vst [vmem:[#allocation268_spill] sm:$0xff] %v16215_v7  ;;  %v12585_v51 = vld [vmem:[%s18230_s4 + $0x1a8] sm:$0xff] }
 0x720   : > { %6099 = vmatmul.bf16.gmra.mxu3 %v14842_v5  ;;  %v16221_v56 = vpop.f32.mrf.mxu0  ;;  %v12568_v5 = vld [vmem:[%s18230_s4 + $0x120] sm:$0xff] }
 0x721   : > { %6425 = vmatpush.bf16.msra.mxu2 %v12585_v51  ;;  %v12583_v51 = vld [vmem:[%s18230_s4 + $0x198] sm:$0xff] }
 0x722   : > { %6314 = vmatpush.bf16.msra.mxu1 %v12568_v5 }
 0x723   : > { %v16226_v25 = vpop.f32.mrf.mxu3 }
 0x724   : > { %18646 = vst [vmem:[#allocation269_spill] sm:$0xff] %v16226_v25  ;;  %v16244_v25 = vsel %vm4127_vm3, %v15241_v50, %v15295_v13  ;;  %v12566_v50 = vld [vmem:[%s18230_s4 + $0x110] sm:$0xff] }
 0x725   : > { %6426 = vmatpush.bf16.msra.mxu2 %v12584_v0 }
 0x726   : > { %v5426_v7 = vpop.f32.mrf.mxu2  ;;  %v16234_v59 = vpop.f32.mrf.mxu1 }
 0x727   : > { %18647 = vst [vmem:[#allocation270_spill] sm:$0xff] %v16234_v59  ;;  %v12567_v7 = vld [vmem:[%s18230_s4 + $0x118] sm:$0xff] }
 0x728   : > { %v16239_v30 = vpop.f32.mrf.mxu0  ;;  %6315 = vmatpush.bf16.msra.mxu1 %v12567_v7  ;;  %v12565_v7 = vld [vmem:[%s18230_s4 + $0x108] sm:$0xff] }
 0x729   : > { %5884 = vmatmul.bf16.gmra.mxu1 %v16244_v25  ;;  %6427 = vmatpush.bf16.msra.mxu2 %v12583_v51 }
 0x72b   : > { %v16250_v41 = vpop.f32.mrf.mxu3  ;;  %6015 = vmatmul.bf16.gmra.mxu2 %v16128_v6  ;;  %6686 = vmatmul.bf16.gmra.mxu0 %v15027_v24  ;;  %v12582_v6 = vld [vmem:[%s18230_s4 + $0x190] sm:$0xff] }
 0x72c   : > { %18648 = vst [vmem:[#allocation271_spill] sm:$0xff] %v16250_v41  ;;  %6316 = vmatpush.bf16.msra.mxu1 %v12566_v50 }
 0x72d   : > { %6428 = vmatpush.bf16.msra.mxu2 %v12582_v6  ;;  %v5915_v6 = vrot.slane %v15316_v60, 2 }
 0x72e   : > { %v16260_v5 = vpop.f32.mrf.mxu1  ;;  %v16262_v0 = vpop.f32.mrf.mxu2 }
 0x72f   : > { %18649 = vst [vmem:[#allocation272_spill] sm:$0xff] %v16260_v5  ;;  %v12581_v5 = vld [vmem:[%s18230_s4 + $0x188] sm:$0xff] }
 0x730   : > { %18650 = vst [vmem:[#allocation273_spill] sm:$0xff] %v16262_v0  ;;  %6104 = vmatmul.bf16.gmra.mxu3 %v14872_v57  ;;  %v16268_v41 = vpop.f32.mrf.mxu0  ;;  %6317 = vmatpush.bf16.msra.mxu1 %v12565_v7  ;;  %v12564_v57 = vld [vmem:[%s18230_s4 + $0x100] sm:$0xff]  ;;  %v5916_v7 = vsel %vm4661_vm4, %v16116_v15, %v5915_v6 }
 0x731   : > { %6429 = vmatpush.bf16.msra.mxu2 %v12581_v5  ;;  %v5784_v5 = vsel %vm4127_vm3, %v15295_v13, %v15341_v54 }
 0x733   : > { %v16273_v51 = vpop.f32.mrf.mxu3 }
 0x734   : > { %18651 = vst [vmem:[#allocation274_spill] sm:$0xff] %v16273_v51  ;;  %v12580_v51 = vld [vmem:[%s18230_s4 + $0x180] sm:$0xff]  ;;  %6318 = vmatpush.bf16.msra.mxu1 %v12564_v57 }
 0x735   : > { %6430 = vmatpush.bf16.msra.mxu2 %v12580_v51  ;;  %v12682_v51 = vld [vmem:[%s18230_s4 + $0x4b0] sm:$0xff] }
 0x736   : > { %v16281_v0 = vpop.f32.mrf.mxu1  ;;  %v16283_v50 = vpop.f32.mrf.mxu2 }
 0x737   : > { %18652 = vst [vmem:[#allocation275_spill] sm:$0xff] %v16281_v0 }
 0x738   : > { %18653 = vst [vmem:[#allocation276_spill] sm:$0xff] %v16283_v50  ;;  %v16289_v59 = vpop.f32.mrf.mxu0  ;;  %v12683_v50 = vld [vmem:[%s18230_s4 + $0x4b8] sm:$0xff] }
 0x739   : > { %18654 = vst [vmem:[#allocation277_spill] sm:$0xff] %v16289_v59  ;;  %5889 = vmatmul.bf16.gmra.mxu1 %v5784_v5  ;;  %7096 = vmatpush.bf16.msrb.mxu0 %v12683_v50  ;;  %v12681_v5 = vld [vmem:[%s18230_s4 + $0x4a8] sm:$0xff] }
 0x73b   : > { %v16296_v0 = vpop.f32.mrf.mxu3  ;;  %6020 = vmatmul.bf16.gmra.mxu2 %v5916_v7  ;;  %6691 = vmatmul.bf16.gmra.mxu0 %v15062_v61 }
 0x73c   : > { %18655 = vst [vmem:[#allocation278_spill] sm:$0xff] %v16296_v0  ;;  %v12680_v0 = vld [vmem:[%s18230_s4 + $0x4a0] sm:$0xff] }
 0x73d   : > { %7097 = vmatpush.bf16.msrb.mxu0 %v12682_v51 }
 0x73e   : > { %v16302_v60 = vpop.f32.mrf.mxu1  ;;  %v16304_v59 = vpop.f32.mrf.mxu2 }
 0x73f   : > { %18656 = vst [vmem:[#allocation279_spill] sm:$0xff] %v16302_v60 }
 0x740   : > { %18657 = vst [vmem:[#allocation280_spill] sm:$0xff] %v16304_v59  ;;  %6109 = vmatmul.bf16.gmra.mxu3 %v14914_v26  ;;  %v6257_v15 = vpop.f32.mrf.mxu0 }
 0x741   : > { %7098 = vmatpush.bf16.msrb.mxu0 %v12681_v5  ;;  %v12679_v15 = vld [vmem:[%s18230_s4 + $0x498] sm:$0xff] }
 0x743   : > { %v16310_v57 = vpop.f32.mrf.mxu3 }
 0x744   : > { %18658 = vst [vmem:[#allocation281_spill] sm:$0xff] %v16310_v57 }
 0x745   : > { %7099 = vmatpush.bf16.msrb.mxu0 %v12680_v0 }
 0x746   : > { %v16315_v50 = vpop.f32.mrf.mxu1  ;;  %v16317_v7 = vpop.f32.mrf.mxu2 }
 0x747   : > { %18659 = vst [vmem:[#allocation282_spill] sm:$0xff] %v16315_v50 }
 0x748   : > { %18660 = vst [vmem:[#allocation283_spill] sm:$0xff] %v16317_v7  ;;  %v16322_v60 = vpop.f32.mrf.mxu0  ;;  %v12678_v7 = vld [vmem:[%s18230_s4 + $0x490] sm:$0xff] }
 0x749   : > { %5894 = vmatmul.bf16.gmra.mxu1 %v15341_v54  ;;  %7100 = vmatpush.bf16.msrb.mxu0 %v12679_v15 }
 0x74b   : > { %v16325_v51 = vpop.f32.mrf.mxu3  ;;  %6025 = vmatmul.bf16.gmra.mxu2 %v5915_v6  ;;  %6696 = vmatmul.bf16.gmra.mxu0 %v15115_v38  ;;  %v12677_v6 = vld [vmem:[%s18230_s4 + $0x488] sm:$0xff] }
 0x74c   : > { %18661 = vst [vmem:[#allocation284_spill] sm:$0xff] %v16325_v51 }
 0x74d   : > { %7101 = vmatpush.bf16.msrb.mxu0 %v12678_v7  ;;  %v18667_v7 = vrot.slane %v14817_v27, 2 }
 0x74e   : > { %v16331_v5 = vpop.f32.mrf.mxu1  ;;  %v16333_v50 = vpop.f32.mrf.mxu2 }
 0x74f   : > { %18662 = vst [vmem:[#allocation285_spill] sm:$0xff] %v16331_v5  ;;  %v6259_v5 = vrot.slane %v14791_v43, 2 }
 0x750   : > { %18663 = vst [vmem:[#allocation286_spill] sm:$0xff] %v16333_v50  ;;  %6114 = vmatmul.bf16.gmra.mxu3 %v14953_v10  ;;  %v16339_v54 = vpop.f32.mrf.mxu0  ;;  %v12676_v50 = vld [vmem:[%s18230_s4 + $0x480] sm:$0xff]  ;;  %v18693_v10 = vld [vmem:[#allocation23_spill] sm:$0xff] }
 0x751   : > { %7102 = vmatpush.bf16.msrb.mxu0 %v12677_v6 }
 0x753   : > { %v16341_v0 = vpop.f32.mrf.mxu3 }
 0x754   : > { %18664 = vst [vmem:[#allocation287_spill] sm:$0xff] %v16341_v0  ;;  %v6260_v0 = vsel %vm4661_vm4, %v6259_v5, %v18667_v7  ;;  %v18676_v7 = vld [vmem:[#allocation43_spill] sm:$0xff] }
 0x755   : > { %7103 = vmatpush.bf16.msrb.mxu0 %v12676_v50 }
 0x756   : > { %v16346_v15 = vpop.f32.mrf.mxu1  ;;  %v16348_v51 = vpop.f32.mrf.mxu2 }
 0x757   : > { %18665 = vst [vmem:[#allocation288_spill] sm:$0xff] %v16346_v15 }
 0x758   : > { %18666 = vst [vmem:[#allocation289_spill] sm:$0xff] %v16348_v51  ;;  %v16354_v59 = vpop.f32.mrf.mxu0 }
 0x759   : > { %6319 = vmatmul.bf16.vlgmr.msra.gmra.mxu1 %v6260_v0  ;;  %v18675_v0 = vld [vmem:[#allocation39_spill] sm:$0xff] }
 0x75b   : > { %v16359_v57 = vpop.f32.mrf.mxu3  ;;  %6431 = vmatmul.bf16.vlgmr.msra.gmra.mxu2 %v14850_v12  ;;  %6701 = vmatmul.bf16.gmra.mxu0 %v15161_v45  ;;  %v6598_v12 = vpack.c.b16 %v18675_v0, %v18675_v0 }
 0x75c   : > { %18668 = vst [vmem:[#allocation290_spill] sm:$0xff] %v16359_v57 }
 0x75e   : > { %v16363_v6 = vpop.f32.mrf.mxu1  ;;  %v16365_v43 = vpop.f32.mrf.mxu2 }
 0x75f   : > { %18669 = vst [vmem:[#allocation291_spill] sm:$0xff] %v16363_v6  ;;  %v18678_v6 = vld [vmem:[#allocation10_spill] sm:$0xff] }
 0x760   : > { %18670 = vst [vmem:[#allocation292_spill] sm:$0xff] %v16365_v43  ;;  %6119 = vmatmul.bf16.gmra.mxu3 %v14985_v18  ;;  %v16368_v15 = vpop.f32.mrf.mxu0 }
 0x763   : > { %v16370_v51 = vpop.f32.mrf.mxu3 }
 0x764   : > { %18671 = vst [vmem:[#allocation293_spill] sm:$0xff] %v16370_v51  ;;  %v18688_v51 = vld [vmem:[#allocation12_spill] sm:$0xff] }
 0x766   : > { %v16372_v27 = vpop.f32.mrf.mxu1  ;;  %v16374_v5 = vpop.f32.mrf.mxu2 }
 0x767   : > { %18672 = vst [vmem:[#allocation294_spill] sm:$0xff] %v16372_v27 }
 0x768   : > { %18673 = vst [vmem:[#allocation295_spill] sm:$0xff] %v16374_v5  ;;  %v16376_v50 = vpop.f32.mrf.mxu0  ;;  %v12603_v5 = vld [vmem:[%s18230_s4 + $0x238] sm:$0xff] }
 0x769   : > { %18674 = vst [vmem:[#allocation296_spill] sm:$0xff] %v16376_v50  ;;  %6324 = vmatmul.bf16.gmra.mxu1 %v18676_v7  ;;  %6535 = vmatpush.bf16.msra.mxu3 %v12603_v5 }
 0x76b   : > { %v16381_v57 = vpop.f32.mrf.mxu3  ;;  %6436 = vmatmul.bf16.gmra.mxu2 %v18678_v6  ;;  %6706 = vmatmul.bf16.gmra.mxu0 %v6598_v12  ;;  %v12602_v6 = vld [vmem:[%s18230_s4 + $0x230] sm:$0xff] }
 0x76c   : > { %18677 = vst [vmem:[#allocation39_spill] sm:$0xff] %v16381_v57  ;;  %v18686_v57 = vld [vmem:[#allocation50_spill] sm:$0xff] }
 0x76d   : > { %6536 = vmatpush.bf16.msra.mxu3 %v12602_v6 }
 0x76e   : > { %v16384_v43 = vpop.f32.mrf.mxu1  ;;  %v16386_v45 = vpop.f32.mrf.mxu2 }
 0x76f   : > { %18679 = vst [vmem:[#allocation43_spill] sm:$0xff] %v16384_v43 }
 0x770   : > { %18680 = vst [vmem:[#allocation10_spill] sm:$0xff] %v16386_v45  ;;  %6124 = vmatmul.bf16.gmra.mxu3 %v15007_v4  ;;  %v16389_v27 = vpop.f32.mrf.mxu0  ;;  %v12601_v45 = vld [vmem:[%s18230_s4 + $0x228] sm:$0xff]  ;;  %v18692_v4 = vld [vmem:[#allocation20_spill] sm:$0xff] }
 0x771   : > { %18681 = vst [vmem:[#allocation297_spill] sm:$0xff] %v16389_v27  ;;  %6537 = vmatpush.bf16.msra.mxu3 %v12601_v45  ;;  %v12599_v45 = vld [vmem:[%s18230_s4 + $0x218] sm:$0xff]  ;;  %v6206_v18 = vadd.f32 %v15990_v14, %v18692_v4  ;;  %v18697_v4 = vld [vmem:[#allocation3_spill] sm:$0xff]  ;;  %v18699_v14 = vld [vmem:[#allocation6_spill] sm:$0xff] }
 0x772   : > { %v18716_v27 = vld [vmem:[#allocation26_spill] sm:$0xff] }
 0x773   : > { %v16394_v0 = vpop.f32.mrf.mxu3 }
 0x774   : > { %18682 = vst [vmem:[#allocation298_spill] sm:$0xff] %v16394_v0  ;;  %v18687_v0 = vld [vmem:[#allocation2_spill] sm:$0xff] }
 0x776   : > { %v16399_v12 = vpop.f32.mrf.mxu1  ;;  %v16401_v7 = vpop.f32.mrf.mxu2 }
 0x777   : > { %18683 = vst [vmem:[#allocation299_spill] sm:$0xff] %v16399_v12  ;;  %v12600_v12 = vld [vmem:[%s18230_s4 + $0x220] sm:$0xff] }
 0x778   : > { %18684 = vst [vmem:[#allocation300_spill] sm:$0xff] %v16401_v7  ;;  %v16403_v43 = vpop.f32.mrf.mxu0  ;;  %6538 = vmatpush.bf16.msra.mxu3 %v12600_v12 }
 0x779   : > { %18685 = vst [vmem:[#allocation301_spill] sm:$0xff] %v16403_v43  ;;  %6329 = vmatmul.bf16.gmra.mxu1 %v18686_v57  ;;  %v18703_v43 = vld [vmem:[#allocation29_spill] sm:$0xff] }
 0x77b   : > { %v5576_v5 = vpop.f32.mrf.mxu3  ;;  %6441 = vmatmul.bf16.gmra.mxu2 %v18687_v0  ;;  %7104 = vmatmul.bf16.vlgmr.msrb.gmra.mxu0 %v18688_v51 }
 0x77c   : > { %6539 = vmatpush.bf16.msra.mxu3 %v12599_v45  ;;  %v12597_v45 = vld [vmem:[%s18230_s4 + $0x208] sm:$0xff] }
 0x77e   : > { %v16414_v7 = vpop.f32.mrf.mxu1  ;;  %v16416_v6 = vpop.f32.mrf.mxu2 }
 0x77f   : > { %18689 = vst [vmem:[#allocation50_spill] sm:$0xff] %v16414_v7  ;;  %v12598_v7 = vld [vmem:[%s18230_s4 + $0x210] sm:$0xff] }
 0x780   : > { %18690 = vst [vmem:[#allocation12_spill] sm:$0xff] %v16416_v6  ;;  %6129 = vmatmul.bf16.gmra.mxu3 %v15027_v24  ;;  %v16419_v38 = vpop.f32.mrf.mxu0 }
 0x781   : > { %18691 = vst [vmem:[#allocation302_spill] sm:$0xff] %v16419_v38  ;;  %6540 = vmatpush.bf16.msra.mxu3 %v12598_v7  ;;  %v12596_v7 = vld [vmem:[%s18230_s4 + $0x200] sm:$0xff] }
 0x783   : > { %v6090_v5 = vpop.f32.mrf.mxu3 }
 0x784   : > { %v6091_v26 = vadd.f32 %v6090_v5, %v18693_v10 }
 0x785   : > { %6541 = vmatpush.bf16.msra.mxu3 %v12597_v45 }
 0x786   : > { %v16430_v12 = vadd.f32 %v6206_v18, %v6091_v26  ;;  %v16432_v6 = vpop.f32.mrf.mxu1  ;;  %v16434_v24 = vpop.f32.mrf.mxu2  ;;  %v18698_v26 = vld [vmem:[#allocation27_spill] sm:$0xff] }
 0x787   : > { %18694 = vst [vmem:[#allocation20_spill] sm:$0xff] %v16432_v6  ;;  %v6208_v18 = vadd.f32 %v16007_v8, %v18698_v26  ;;  %v6211_v8 = vadd.f32 %v16021_v1, %v18703_v43  ;;  %v18710_v43 = vld [vmem:[#allocation24_spill] sm:$0xff] }
 0x788   : > { %18695 = vst [vmem:[#allocation23_spill] sm:$0xff] %v16434_v24  ;;  %v16436_v38 = vpop.f32.mrf.mxu0 }
 0x789   : > { %18696 = vst [vmem:[#allocation303_spill] sm:$0xff] %v16436_v38  ;;  %6334 = vmatmul.bf16.gmra.mxu1 %v15345_v3  ;;  %6542 = vmatpush.bf16.msra.mxu3 %v12596_v7 }
 0x78b   : > { %v6092_v10 = vpop.f32.mrf.mxu3  ;;  %6446 = vmatmul.bf16.gmra.mxu2 %v18697_v4  ;;  %7109 = vmatmul.bf16.gmra.mxu0 %v14974_v9 }
 0x78c   : > { %v6093_v5 = vadd.f32 %v6092_v10, %v18699_v14  ;;  %v18704_v10 = vld [vmem:[#allocation22_spill] sm:$0xff] }
 0x78e   : > { %v16450_v6 = vadd.f32 %v6208_v18, %v6093_v5  ;;  %v16452_v24 = vpop.f32.mrf.mxu1  ;;  %v16454_v38 = vpop.f32.mrf.mxu2 }
 0x78f   : > { %18700 = vst [vmem:[#allocation27_spill] sm:$0xff] %v16452_v24  ;;  %v18708_v24 = vld [vmem:[#allocation19_spill] sm:$0xff] }
 0x790   : > { %18701 = vst [vmem:[#allocation6_spill] sm:$0xff] %v16454_v38  ;;  %6134 = vmatmul.bf16.gmra.mxu3 %v15062_v61  ;;  %v16457_v45 = vpop.f32.mrf.mxu0  ;;  %v18709_v38 = vld [vmem:[#allocation32_spill] sm:$0xff] }
 0x791   : > { %18702 = vst [vmem:[#allocation304_spill] sm:$0xff] %v16457_v45  ;;  %v6213_v1 = vadd.f32 %v16033_v48, %v18709_v38 }
 0x793   : > { %v6095_v4 = vpop.f32.mrf.mxu3 }
 0x794   : > { %v6096_v26 = vadd.f32 %v6095_v4, %v18704_v10 }
 0x796   : > { %v16462_v14 = vadd.f32 %v6211_v8, %v6096_v26  ;;  %v16464_v0 = vpop.f32.mrf.mxu1  ;;  %v16466_v18 = vpop.f32.mrf.mxu2  ;;  %v18711_v8 = vld [vmem:[#allocation25_spill] sm:$0xff] }
 0x797   : > { %18705 = vst [vmem:[#allocation29_spill] sm:$0xff] %v16464_v0  ;;  %v6030_v10 = vpack.c.b16 %v18711_v8, %v18711_v8  ;;  %v18720_v8 = vld [vmem:[#allocation16_spill] sm:$0xff] }
 0x798   : > { %18706 = vst [vmem:[#allocation22_spill] sm:$0xff] %v16466_v18  ;;  %v16468_v5 = vpop.f32.mrf.mxu0 }
 0x799   : > { %18707 = vst [vmem:[#allocation305_spill] sm:$0xff] %v16468_v5  ;;  %6339 = vmatmul.bf16.gmra.mxu1 %v15383_v33 }
 0x79b   : > { %v6097_v7 = vpop.f32.mrf.mxu3  ;;  %6451 = vmatmul.bf16.gmra.mxu2 %v18708_v24  ;;  %7114 = vmatmul.bf16.gmra.mxu0 %v15000_v28  ;;  %v18715_v24 = vld [vmem:[#allocation38_spill] sm:$0xff] }
 0x79c   : > { %v6098_v4 = vadd.f32 %v6097_v7, %v18710_v43  ;;  %v6216_v45 = vadd.f32 %v16041_v58, %v18715_v24  ;;  %v18722_v58 = vld [vmem:[#allocation37_spill] sm:$0xff] }
 0x79e   : > { %v16478_v26 = vadd.f32 %v6213_v1, %v6098_v4  ;;  %v16480_v0 = vpop.f32.mrf.mxu1  ;;  %v16482_v18 = vpop.f32.mrf.mxu2 }
 0x79f   : > { %18712 = vst [vmem:[#allocation32_spill] sm:$0xff] %v16480_v0 }
 0x7a0   : > { %18713 = vst [vmem:[#allocation24_spill] sm:$0xff] %v16482_v18  ;;  %6139 = vmatmul.bf16.gmra.mxu3 %v6030_v10  ;;  %v16484_v61 = vpop.f32.mrf.mxu0  ;;  %v18721_v10 = vld [vmem:[#allocation41_spill] sm:$0xff] }
 0x7a1   : > { %18714 = vst [vmem:[#allocation25_spill] sm:$0xff] %v16484_v61  ;;  %v6218_v24 = vadd.f32 %v16053_v42, %v18721_v10  ;;  %v18727_v18 = vld [vmem:[#allocation45_spill] sm:$0xff] }
 0x7a3   : > { %v6100_v5 = vpop.f32.mrf.mxu3 }
 0x7a4   : > { %v6101_v38 = vadd.f32 %v6100_v5, %v18716_v27 }
 0x7a6   : > { %v16489_v48 = vadd.f32 %v6216_v45, %v6101_v38  ;;  %v16491_v7 = vpop.f32.mrf.mxu1  ;;  %v16493_v43 = vpop.f32.mrf.mxu2 }
 0x7a7   : > { %18717 = vst [vmem:[#allocation38_spill] sm:$0xff] %v16491_v7  ;;  %v18725_v7 = vld [vmem:[#allocation31_spill] sm:$0xff] }
 0x7a8   : > { %18718 = vst [vmem:[#allocation26_spill] sm:$0xff] %v16493_v43  ;;  %v16495_v1 = vpop.f32.mrf.mxu0 }
 0x7a9   : > { %18719 = vst [vmem:[#allocation306_spill] sm:$0xff] %v16495_v1  ;;  %6344 = vmatmul.bf16.gmra.mxu1 %v15414_v17  ;;  %v6221_v1 = vadd.f32 %v16067_v46, %v18727_v18  ;;  %v18734_v18 = vld [vmem:[#allocation44_spill] sm:$0xff] }
 0x7ab   : > { %v6102_v4 = vpop.f32.mrf.mxu3  ;;  %6456 = vmatmul.bf16.gmra.mxu2 %v18720_v8  ;;  %7119 = vmatmul.bf16.gmra.mxu0 %v15020_v31  ;;  %v18728_v8 = vld [vmem:[#allocation28_spill] sm:$0xff] }
 0x7ac   : > { %v6103_v27 = vadd.f32 %v6102_v4, %v18722_v58  ;;  %v18733_v58 = vld [vmem:[#allocation48_spill] sm:$0xff] }
 0x7ad   : > { %v6223_v46 = vadd.f32 %v16091_v2, %v18733_v58 }
 0x7ae   : > { %v16503_v45 = vadd.f32 %v6218_v24, %v6103_v27  ;;  %v16505_v5 = vpop.f32.mrf.mxu1  ;;  %v16507_v38 = vpop.f32.mrf.mxu2  ;;  %v18737_v27 = vld [vmem:[#allocation15_spill] sm:$0xff] }
 0x7af   : > { %18723 = vst [vmem:[#allocation41_spill] sm:$0xff] %v16505_v5  ;;  %v18738_v5 = vld [vmem:[#allocation52_spill] sm:$0xff] }
 0x7b0   : > { %18724 = vst [vmem:[#allocation37_spill] sm:$0xff] %v16507_v38  ;;  %6543 = vmatmul.bf16.vlgmr.msra.gmra.mxu3 %v18725_v7  ;;  %v16510_v43 = vpop.f32.mrf.mxu0  ;;  %v18732_v7 = vld [vmem:[#allocation5_spill] sm:$0xff]  ;;  %v6226_v38 = vadd.f32 %v16105_v37, %v18738_v5 }
 0x7b1   : > { %18726 = vst [vmem:[#allocation31_spill] sm:$0xff] %v16510_v43  ;;  %v12651_v37 = vld [vmem:[%s18230_s4 + $0x3b8] sm:$0xff] }
 0x7b2   : > { %v18742_v5 = vld [vmem:[#allocation57_spill] sm:$0xff]  ;;  %6872 = vmatpush.bf16.msrb.mxu2 %v12651_v37  ;;  %v12649_v37 = vld [vmem:[%s18230_s4 + $0x3a8] sm:$0xff] }
 0x7b3   : > { %v6105_v0 = vpop.f32.mrf.mxu3 }
 0x7b4   : > { %v6106_v61 = vadd.f32 %v6105_v0, %v18728_v8 }
 0x7b6   : > { %v16515_v50 = vadd.f32 %v6221_v1, %v6106_v61  ;;  %v16517_v42 = vpop.f32.mrf.mxu1  ;;  %v16519_v4 = vpop.f32.mrf.mxu2 }
 0x7b7   : > { %18729 = vst [vmem:[#allocation45_spill] sm:$0xff] %v16517_v42 }
 0x7b8   : > { %18730 = vst [vmem:[#allocation28_spill] sm:$0xff] %v16519_v4  ;;  %v16521_v10 = vpop.f32.mrf.mxu0 }
 0x7b9   : > { %18731 = vst [vmem:[#allocation307_spill] sm:$0xff] %v16521_v10  ;;  %6349 = vmatmul.bf16.gmra.mxu1 %v15443_v22  ;;  %v18739_v10 = vld [vmem:[#allocation47_spill] sm:$0xff] }
 0x7bb   : > { %v6107_v24 = vpop.f32.mrf.mxu3  ;;  %6461 = vmatmul.bf16.gmra.mxu2 %v18732_v7  ;;  %7124 = vmatmul.bf16.gmra.mxu0 %v15043_v44 }
 0x7bc   : > { %v6108_v0 = vadd.f32 %v6107_v24, %v18734_v18 }
 0x7be   : > { %v16529_v61 = vadd.f32 %v6223_v46, %v6108_v0  ;;  %v16531_v1 = vpop.f32.mrf.mxu1  ;;  %v16533_v8 = vpop.f32.mrf.mxu2  ;;  %v12635_v46 = vld [vmem:[%s18230_s4 + $0x338] sm:$0xff] }
 0x7bf   : > { %18735 = vst [vmem:[#allocation48_spill] sm:$0xff] %v16531_v1  ;;  %6760 = vmatpush.bf16.msrb.mxu1 %v12635_v46  ;;  %v12633_v46 = vld [vmem:[%s18230_s4 + $0x328] sm:$0xff] }
 0x7c0   : > { %18736 = vst [vmem:[#allocation44_spill] sm:$0xff] %v16533_v8  ;;  %6548 = vmatmul.bf16.gmra.mxu3 %v18737_v27  ;;  %v16536_v42 = vpop.f32.mrf.mxu0  ;;  %v18751_v8 = vld [vmem:[#allocation62_spill] sm:$0xff] }
 0x7c3   : > { %v6110_v4 = vpop.f32.mrf.mxu3 }
 0x7c4   : > { %v6111_v7 = vadd.f32 %v6110_v4, %v18739_v10  ;;  %v18743_v4 = vld [vmem:[#allocation51_spill] sm:$0xff] }
 0x7c6   : > { %v16541_v43 = vadd.f32 %v6226_v38, %v6111_v7  ;;  %v16543_v2 = vpop.f32.mrf.mxu1  ;;  %v16545_v24 = vpop.f32.mrf.mxu2  ;;  %v6228_v38 = vadd.f32 %v16131_v53, %v18742_v5  ;;  %v12634_v7 = vld [vmem:[%s18230_s4 + $0x330] sm:$0xff] }
 0x7c7   : > { %18740 = vst [vmem:[#allocation15_spill] sm:$0xff] %v16543_v2  ;;  %6761 = vmatpush.bf16.msrb.mxu1 %v12634_v7  ;;  %v18746_v5 = vld [vmem:[#allocation60_spill] sm:$0xff] }
 0x7c8   : > { %18741 = vst [vmem:[#allocation52_spill] sm:$0xff] %v16545_v24  ;;  %v16547_v58 = vpop.f32.mrf.mxu0  ;;  %v12650_v24 = vld [vmem:[%s18230_s4 + $0x3b0] sm:$0xff] }
 0x7c9   : > { %6354 = vmatmul.bf16.gmra.mxu1 %v15471_v20  ;;  %6873 = vmatpush.bf16.msrb.mxu2 %v12650_v24 }
 0x7cb   : > { %v6112_v18 = vpop.f32.mrf.mxu3  ;;  %6466 = vmatmul.bf16.gmra.mxu2 %v15081_v52  ;;  %7129 = vmatmul.bf16.gmra.mxu0 %v15089_v23 }
 0x7cc   : > { %v6113_v10 = vadd.f32 %v6112_v18, %v18743_v4  ;;  %v18747_v4 = vld [vmem:[#allocation56_spill] sm:$0xff]  ;;  %6762 = vmatpush.bf16.msrb.mxu1 %v12633_v46 }
 0x7cd   : > { %6874 = vmatpush.bf16.msrb.mxu2 %v12649_v37  ;;  %v18749_v37 = vld [vmem:[#allocation64_spill] sm:$0xff] }
 0x7ce   : > { %v16564_v0 = vadd.f32 %v6228_v38, %v6113_v10  ;;  %v5897_v27 = vpop.f32.mrf.mxu1  ;;  %v16566_v2 = vpop.f32.mrf.mxu2  ;;  %v6231_v38 = vadd.f32 %v16139_v35, %v18746_v5  ;;  %v12631_v35 = vld [vmem:[%s18230_s4 + $0x318] sm:$0xff]  ;;  %v6233_v5 = vadd.f32 %v16151_v63, %v18749_v37  ;;  %v12646_v63 = vld [vmem:[%s18230_s4 + $0x390] sm:$0xff] }
 0x7cf   : > { %18744 = vst [vmem:[#allocation47_spill] sm:$0xff] %v16566_v2  ;;  %v12648_v2 = vld [vmem:[%s18230_s4 + $0x3a0] sm:$0xff] }
 0x7d0   : > { %6553 = vmatmul.bf16.gmra.mxu3 %v18688_v51  ;;  %v16572_v53 = vpop.f32.mrf.mxu0  ;;  %v12632_v51 = vld [vmem:[%s18230_s4 + $0x320] sm:$0xff] }
 0x7d1   : > { %18745 = vst [vmem:[#allocation57_spill] sm:$0xff] %v16572_v53  ;;  %6763 = vmatpush.bf16.msrb.mxu1 %v12632_v51  ;;  %6875 = vmatpush.bf16.msrb.mxu2 %v12648_v2  ;;  %v12630_v2 = vld [vmem:[%s18230_s4 + $0x310] sm:$0xff] }
 0x7d3   : > { %v6115_v18 = vpop.f32.mrf.mxu3 }
 0x7d4   : > { %v6116_v10 = vadd.f32 %v6115_v18, %v18747_v4  ;;  %v12647_v18 = vld [vmem:[%s18230_s4 + $0x398] sm:$0xff] }
 0x7d5   : > { %6764 = vmatpush.bf16.msrb.mxu1 %v12631_v35  ;;  %6876 = vmatpush.bf16.msrb.mxu2 %v12647_v18  ;;  %v12629_v18 = vld [vmem:[%s18230_s4 + $0x308] sm:$0xff] }
 0x7d6   : > { %v16586_v24 = vadd.f32 %v6231_v38, %v6116_v10  ;;  %v6028_v7 = vpop.f32.mrf.mxu2  ;;  %v6320_v27 = vpop.f32.mrf.mxu1  ;;  %v18750_v38 = vld [vmem:[#allocation59_spill] sm:$0xff] }
 0x7d8   : > { %v16591_v1 = vpop.f32.mrf.mxu0 }
 0x7d9   : > { %18748 = vst [vmem:[#allocation51_spill] sm:$0xff] %v16591_v1  ;;  %6359 = vmatmul.bf16.gmra.mxu1 %v15502_v19  ;;  %v6321_v1 = vadd.f32 %v6320_v27, %v18751_v8  ;;  %6877 = vmatpush.bf16.msrb.mxu2 %v12646_v63  ;;  %v18754_v27 = vld [vmem:[#allocation69_spill] sm:$0xff]  ;;  %v18757_v63 = vld [vmem:[#allocation112_spill] sm:$0xff] }
 0x7da   : > { %6765 = vmatpush.bf16.msrb.mxu1 %v12630_v2  ;;  %v18756_v2 = vld [vmem:[#allocation67_spill] sm:$0xff] }
 0x7db   : > { %v6117_v46 = vpop.f32.mrf.mxu3  ;;  %6471 = vmatmul.bf16.gmra.mxu2 %v15136_v47  ;;  %7134 = vmatmul.bf16.gmra.mxu0 %v15141_v21  ;;  %v18752_v47 = vld [vmem:[#allocation107_spill] sm:$0xff] }
 0x7dc   : > { %v6118_v4 = vadd.f32 %v6117_v46, %v18750_v38 }
 0x7de   : > { %v16608_v10 = vadd.f32 %v6233_v5, %v6118_v4  ;;  %v6322_v51 = vpop.f32.mrf.mxu1  ;;  %v6432_v7 = vpop.f32.mrf.mxu2  ;;  %v18755_v5 = vld [vmem:[#allocation63_spill] sm:$0xff]  ;;  %6766 = vmatpush.bf16.msrb.mxu1 %v12629_v18 }
 0x7df   : > { %v6433_v53 = vadd.f32 %v6432_v7, %v18752_v47  ;;  %v12645_v47 = vld [vmem:[%s18230_s4 + $0x388] sm:$0xff]  ;;  %v6323_v7 = vadd.f32 %v6322_v51, %v18756_v2  ;;  %v18759_v51 = vld [vmem:[#allocation73_spill] sm:$0xff] }
 0x7e0   : > { %6558 = vmatmul.bf16.gmra.mxu3 %v14974_v9  ;;  %v16616_v35 = vpop.f32.mrf.mxu0  ;;  %v6236_v9 = vadd.f32 %v16159_v34, %v18754_v27  ;;  %6878 = vmatpush.bf16.msrb.mxu2 %v12645_v47  ;;  %v12644_v34 = vld [vmem:[%s18230_s4 + $0x380] sm:$0xff] }
 0x7e1   : > { %18753 = vst [vmem:[#allocation60_spill] sm:$0xff] %v16616_v35  ;;  %v7409_v46 = vadd.f32 %v6433_v53, %v6321_v1  ;;  %v12628_v1 = vld [vmem:[%s18230_s4 + $0x300] sm:$0xff] }
 0x7e2   : > { %6767 = vmatpush.bf16.msrb.mxu1 %v12628_v1  ;;  %v18763_v35 = vld [vmem:[#allocation78_spill] sm:$0xff] }
 0x7e3   : > { %v16622_v37 = vadd.f32 %v7409_v46, %v16430_v12  ;;  %v6120_v8 = vpop.f32.mrf.mxu3 }
 0x7e4   : > { %v6121_v38 = vadd.f32 %v6120_v8, %v18755_v5  ;;  %6879 = vmatpush.bf16.msrb.mxu2 %v12644_v34  ;;  %v18760_v5 = vld [vmem:[#allocation68_spill] sm:$0xff] }
 0x7e6   : > { %v16633_v53 = vadd.f32 %v6236_v9, %v6121_v38  ;;  %v6325_v12 = vpop.f32.mrf.mxu1  ;;  %v6434_v4 = vpop.f32.mrf.mxu2  ;;  %v6238_v9 = vadd.f32 %v16171_v11, %v18759_v51  ;;  %v6241_v11 = vadd.f32 %v16179_v40, %v18763_v35  ;;  %v18768_v40 = vld [vmem:[#allocation36_spill] sm:$0xff] }
 0x7e7   : > { %v6435_v46 = vadd.f32 %v6434_v4, %v18757_v63 }
 0x7e8   : > { %v16640_v27 = vpop.f32.mrf.mxu0 }
 0x7e9   : > { %18758 = vst [vmem:[#allocation56_spill] sm:$0xff] %v16640_v27  ;;  %v7410_v18 = vadd.f32 %v6435_v46, %v6323_v7  ;;  %6364 = vmatmul.bf16.gmra.mxu1 %v15556_v49  ;;  %v18761_v7 = vld [vmem:[#allocation71_spill] sm:$0xff]  ;;  %v18762_v46 = vld [vmem:[#allocation116_spill] sm:$0xff] }
 0x7ea   : > { %v6326_v63 = vadd.f32 %v6325_v12, %v18761_v7  ;;  %v18765_v12 = vld [vmem:[#allocation76_spill] sm:$0xff] }
 0x7eb   : > { %v16644_v8 = vadd.f32 %v7410_v18, %v16450_v6  ;;  %v6122_v47 = vpop.f32.mrf.mxu3  ;;  %6476 = vmatmul.bf16.gmra.mxu2 %v15183_v16  ;;  %7139 = vmatmul.bf16.gmra.mxu0 %v15190_v39 }
 0x7ec   : > { %v6123_v38 = vadd.f32 %v6122_v47, %v18760_v5  ;;  %v18764_v47 = vld [vmem:[#allocation72_spill] sm:$0xff] }
 0x7ee   : > { %v16651_v4 = vadd.f32 %v6238_v9, %v6123_v38  ;;  %v6327_v1 = vpop.f32.mrf.mxu1  ;;  %v6437_v2 = vpop.f32.mrf.mxu2 }
 0x7ef   : > { %v6438_v34 = vadd.f32 %v6437_v2, %v18762_v46  ;;  %v6328_v7 = vadd.f32 %v6327_v1, %v18765_v12  ;;  %v18766_v2 = vld [vmem:[#allocation123_spill] sm:$0xff] }
 0x7f0   : > { %6563 = vmatmul.bf16.gmra.mxu3 %v15000_v28  ;;  %v6709_v6 = vpop.f32.mrf.mxu0 }
 0x7f1   : > { %v7411_v18 = vadd.f32 %v6438_v34, %v6326_v63  ;;  %v18767_v34 = vld [vmem:[#allocation108_spill] sm:$0xff] }
 0x7f3   : > { %v16657_v27 = vadd.f32 %v7411_v18, %v16462_v14  ;;  %v6125_v16 = vpop.f32.mrf.mxu3  ;;  %v18770_v18 = vld [vmem:[#allocation77_spill] sm:$0xff] }
 0x7f4   : > { %v6126_v51 = vadd.f32 %v6125_v16, %v18764_v47  ;;  %v18769_v16 = vld [vmem:[#allocation82_spill] sm:$0xff] }
 0x7f5   : > { %v6243_v35 = vadd.f32 %v16191_v36, %v18769_v16  ;;  %v18774_v36 = vld [vmem:[#allocation87_spill] sm:$0xff] }
 0x7f6   : > { %v16662_v9 = vadd.f32 %v6241_v11, %v6126_v51  ;;  %v6330_v5 = vpop.f32.mrf.mxu1  ;;  %v6439_v38 = vpop.f32.mrf.mxu2 }
 0x7f7   : > { %v6440_v46 = vadd.f32 %v6439_v38, %v18766_v2  ;;  %v18771_v38 = vld [vmem:[#allocation80_spill] sm:$0xff] }
 0x7f8   : > { %v16666_v28 = vpop.f32.mrf.mxu0  ;;  %v6331_v12 = vadd.f32 %v6330_v5, %v18771_v38 }
 0x7f9   : > { %v7412_v63 = vadd.f32 %v6440_v46, %v6328_v7  ;;  %6369 = vmatmul.bf16.gmra.mxu1 %v18767_v34  ;;  %v18772_v7 = vld [vmem:[#allocation126_spill] sm:$0xff]  ;;  %v6246_v34 = vadd.f32 %v16199_v55, %v18774_v36  ;;  %v18778_v55 = vld [vmem:[#allocation91_spill] sm:$0xff] }
 0x7fb   : > { %v16670_v14 = vadd.f32 %v7412_v63, %v16478_v26  ;;  %v6127_v6 = vpop.f32.mrf.mxu3  ;;  %6481 = vmatmul.bf16.gmra.mxu2 %v18768_v40  ;;  %7144 = vmatmul.bf16.gmra.mxu0 %v15256_v62 }
 0x7fc   : > { %v6128_v1 = vadd.f32 %v6127_v6, %v18770_v18  ;;  %v18775_v6 = vld [vmem:[#allocation81_spill] sm:$0xff] }
 0x7fd   : > { %v18776_v18 = vld [vmem:[#allocation85_spill] sm:$0xff] }
 0x7fe   : > { %v16677_v11 = vadd.f32 %v6243_v35, %v6128_v1  ;;  %v6332_v47 = vpop.f32.mrf.mxu1  ;;  %v6442_v51 = vpop.f32.mrf.mxu2 }
 0x7ff   : > { %v6443_v2 = vadd.f32 %v6442_v51, %v18772_v7  ;;  %v6333_v1 = vadd.f32 %v6332_v47, %v18776_v18  ;;  %v18777_v51 = vld [vmem:[#allocation131_spill] sm:$0xff] }
 0x800   : > { %6568 = vmatmul.bf16.gmra.mxu3 %v15020_v31  ;;  %v16682_v26 = vpop.f32.mrf.mxu0 }
 0x801   : > { %18773 = vst [vmem:[#allocation64_spill] sm:$0xff] %v16682_v26  ;;  %v7413_v46 = vadd.f32 %v6443_v2, %v6331_v12  ;;  %v6248_v2 = vadd.f32 %v16221_v56, %v18778_v55  ;;  %v18783_v56 = vld [vmem:[#allocation96_spill] sm:$0xff]  ;;  %v18785_v55 = vld [vmem:[#allocation94_spill] sm:$0xff] }
 0x803   : > { %v16685_v62 = vadd.f32 %v7413_v46, %v16489_v48  ;;  %v6130_v63 = vpop.f32.mrf.mxu3  ;;  %v18779_v46 = vld [vmem:[#allocation86_spill] sm:$0xff] }
 0x804   : > { %v6131_v40 = vadd.f32 %v6130_v63, %v18775_v6  ;;  %v18780_v6 = vld [vmem:[#allocation89_spill] sm:$0xff] }
 0x806   : > { %v16690_v16 = vadd.f32 %v6246_v34, %v6131_v40  ;;  %v6335_v35 = vpop.f32.mrf.mxu1  ;;  %v6444_v5 = vpop.f32.mrf.mxu2 }
 0x807   : > { %v6445_v31 = vadd.f32 %v6444_v5, %v18777_v51  ;;  %v6336_v40 = vadd.f32 %v6335_v35, %v18780_v6  ;;  %v18784_v51 = vld [vmem:[#allocation90_spill] sm:$0xff] }
 0x808   : > { %v16694_v38 = vpop.f32.mrf.mxu0 }
 0x809   : > { %v7414_v12 = vadd.f32 %v6445_v31, %v6333_v1  ;;  %6768 = vmatmul.bf16.vlgmr.msrb.gmra.mxu1 %v15292_v29  ;;  %v18781_v29 = vld [vmem:[#allocation135_spill] sm:$0xff]  ;;  %v6251_v1 = vadd.f32 %v16239_v30, %v18783_v56  ;;  %v18787_v30 = vld [vmem:[#allocation100_spill] sm:$0xff]  ;;  %v18789_v56 = vld [vmem:[#allocation98_spill] sm:$0xff] }
 0x80b   : > { %v16698_v48 = vadd.f32 %v7414_v12, %v16503_v45  ;;  %v6132_v7 = vpop.f32.mrf.mxu3  ;;  %6880 = vmatmul.bf16.vlgmr.msrb.gmra.mxu2 %v18686_v57  ;;  %7149 = vmatmul.bf16.gmra.mxu0 %v16244_v25 }
 0x80c   : > { %v6133_v47 = vadd.f32 %v6132_v7, %v18779_v46  ;;  %v18786_v46 = vld [vmem:[#allocation140_spill] sm:$0xff] }
 0x80e   : > { %v16705_v63 = vadd.f32 %v6248_v2, %v6133_v47  ;;  %v6337_v36 = vpop.f32.mrf.mxu1  ;;  %v6447_v34 = vpop.f32.mrf.mxu2 }
 0x80f   : > { %v6448_v5 = vadd.f32 %v6447_v34, %v18781_v29  ;;  %v6338_v2 = vadd.f32 %v6337_v36, %v18785_v55  ;;  %v18788_v29 = vld [vmem:[#allocation95_spill] sm:$0xff]  ;;  %v18793_v55 = vld [vmem:[#allocation277_spill] sm:$0xff] }
 0x810   : > { %6573 = vmatmul.bf16.gmra.mxu3 %v15043_v44  ;;  %v16710_v45 = vpop.f32.mrf.mxu0 }
 0x811   : > { %18782 = vst [vmem:[#allocation59_spill] sm:$0xff] %v16710_v45  ;;  %v7415_v57 = vadd.f32 %v6448_v5, %v6336_v40  ;;  %v6253_v40 = vadd.f32 %v16268_v41, %v18787_v30  ;;  %v18795_v30 = vld [vmem:[#allocation103_spill] sm:$0xff] }
 0x813   : > { %v16713_v25 = vadd.f32 %v7415_v57, %v16515_v50  ;;  %v6135_v18 = vpop.f32.mrf.mxu3 }
 0x814   : > { %v6136_v31 = vadd.f32 %v6135_v18, %v18784_v51 }
 0x816   : > { %v16718_v12 = vadd.f32 %v6251_v1, %v6136_v31  ;;  %v6340_v7 = vpop.f32.mrf.mxu1  ;;  %v6449_v35 = vpop.f32.mrf.mxu2 }
 0x817   : > { %v6450_v44 = vadd.f32 %v6449_v35, %v18786_v46  ;;  %v6341_v1 = vadd.f32 %v6340_v7, %v18789_v56  ;;  %v18792_v35 = vld [vmem:[#allocation104_spill] sm:$0xff]  ;;  %v18794_v7 = vld [vmem:[#allocation99_spill] sm:$0xff] }
 0x818   : > { %v16722_v47 = vpop.f32.mrf.mxu0 }
 0x819   : > { %v7416_v34 = vadd.f32 %v6450_v44, %v6338_v2  ;;  %6773 = vmatmul.bf16.gmra.mxu1 %v15336_v32  ;;  %v18790_v32 = vld [vmem:[#allocation144_spill] sm:$0xff]  ;;  %v6256_v2 = vadd.f32 %v18793_v55, %v18792_v35 }
 0x81a   : > { %v18799_v55 = vld [vmem:[#allocation152_spill] sm:$0xff] }
 0x81b   : > { %v16726_v50 = vadd.f32 %v7416_v34, %v16529_v61  ;;  %v6137_v6 = vpop.f32.mrf.mxu3  ;;  %6885 = vmatmul.bf16.gmra.mxu2 %v15345_v3  ;;  %7154 = vmatmul.bf16.gmra.mxu0 %v15295_v13  ;;  %v12667_v13 = vld [vmem:[%s18230_s4 + $0x438] sm:$0xff] }
 0x81c   : > { %v6138_v36 = vadd.f32 %v6137_v6, %v18788_v29  ;;  %6984 = vmatpush.bf16.msrb.mxu3 %v12667_v13  ;;  %v18796_v29 = vld [vmem:[#allocation148_spill] sm:$0xff] }
 0x81e   : > { %v16733_v5 = vadd.f32 %v6253_v40, %v6138_v36  ;;  %v6342_v57 = vpop.f32.mrf.mxu1  ;;  %v6452_v18 = vpop.f32.mrf.mxu2 }
 0x81f   : > { %v6453_v51 = vadd.f32 %v6452_v18, %v18790_v32  ;;  %v6343_v40 = vadd.f32 %v6342_v57, %v18795_v30  ;;  %v12665_v18 = vld [vmem:[%s18230_s4 + $0x428] sm:$0xff]  ;;  %v12664_v57 = vld [vmem:[%s18230_s4 + $0x420] sm:$0xff] }
 0x820   : > { %6578 = vmatmul.bf16.gmra.mxu3 %v15089_v23  ;;  %v16738_v61 = vpop.f32.mrf.mxu0  ;;  %v12666_v23 = vld [vmem:[%s18230_s4 + $0x430] sm:$0xff] }
 0x821   : > { %18791 = vst [vmem:[#allocation62_spill] sm:$0xff] %v16738_v61  ;;  %v7417_v3 = vadd.f32 %v6453_v51, %v6341_v1  ;;  %6985 = vmatpush.bf16.msrb.mxu3 %v12666_v23  ;;  %v18797_v1 = vld [vmem:[#allocation66_spill] sm:$0xff] }
 0x823   : > { %v16744_v41 = vadd.f32 %v7417_v3, %v16541_v43  ;;  %v6140_v31 = vpop.f32.mrf.mxu3 }
 0x824   : > { %v6141_v46 = vadd.f32 %v6140_v31, %v18794_v7  ;;  %v18798_v31 = vld [vmem:[#allocation106_spill] sm:$0xff] }
 0x825   : > { %6986 = vmatpush.bf16.msrb.mxu3 %v12665_v18 }
 0x826   : > { %v16752_v44 = vadd.f32 %v6256_v2, %v6141_v46  ;;  %v6345_v34 = vpop.f32.mrf.mxu1  ;;  %v6454_v6 = vpop.f32.mrf.mxu2 }
 0x827   : > { %v6455_v43 = vadd.f32 %v6454_v6, %v18796_v29  ;;  %v6346_v35 = vadd.f32 %v6345_v34, %v18798_v31  ;;  %v18801_v6 = vld [vmem:[#allocation158_spill] sm:$0xff]  ;;  %v18802_v34 = vld [vmem:[#allocation113_spill] sm:$0xff] }
 0x828   : > { %v16756_v36 = vpop.f32.mrf.mxu0  ;;  %v6658_v30 = vadd.f32 %v16322_v60, %v18801_v6  ;;  %v12661_v60 = vld [vmem:[%s18230_s4 + $0x408] sm:$0xff]  ;;  %v12660_v6 = vld [vmem:[%s18230_s4 + $0x400] sm:$0xff] }
 0x829   : > { %v7418_v56 = vadd.f32 %v6455_v43, %v6343_v40  ;;  %6778 = vmatmul.bf16.gmra.mxu1 %v18797_v1  ;;  %6987 = vmatpush.bf16.msrb.mxu3 %v12664_v57  ;;  %v18804_v57 = vld [vmem:[#allocation155_spill] sm:$0xff] }
 0x82b   : > { %v16763_v32 = vadd.f32 %v7418_v56, %v16564_v0  ;;  %v6142_v51 = vpop.f32.mrf.mxu3  ;;  %6890 = vmatmul.bf16.gmra.mxu2 %v15383_v33  ;;  %v12663_v0 = vld [vmem:[%s18230_s4 + $0x418] sm:$0xff]  ;;  %v18803_v56 = vld [vmem:[#allocation111_spill] sm:$0xff] }
 0x82d   : > { %6988 = vmatpush.bf16.msrb.mxu3 %v12663_v0  ;;  %v18806_v0 = vld [vmem:[#allocation162_spill] sm:$0xff] }
 0x82e   : > { %v6347_v13 = vpop.f32.mrf.mxu1  ;;  %v6457_v3 = vpop.f32.mrf.mxu2 }
 0x82f   : > { %v6458_v2 = vadd.f32 %v6457_v3, %v18799_v55  ;;  %v6348_v51 = vadd.f32 %v6347_v13, %v18803_v56  ;;  %v6660_v13 = vadd.f32 %v16339_v54, %v18806_v0 }
 0x830   : > { %6583 = vmatmul.bf16.gmra.mxu3 %v15141_v21  ;;  %v16772_v7 = vpop.f32.mrf.mxu0  ;;  %v12662_v21 = vld [vmem:[%s18230_s4 + $0x410] sm:$0xff] }
 0x831   : > { %18800 = vst [vmem:[#allocation107_spill] sm:$0xff] %v16772_v7  ;;  %v7419_v33 = vadd.f32 %v6458_v2, %v6346_v35  ;;  %6989 = vmatpush.bf16.msrb.mxu3 %v12662_v21  ;;  %v18805_v35 = vld [vmem:[#allocation75_spill] sm:$0xff] }
 0x832   : > { %v18808_v21 = vld [vmem:[#allocation115_spill] sm:$0xff] }
 0x833   : > { %v16778_v46 = vadd.f32 %v7419_v33, %v16586_v24  ;;  %v6544_v23 = vpop.f32.mrf.mxu3  ;;  %v18807_v33 = vld [vmem:[#allocation117_spill] sm:$0xff] }
 0x834   : > { %v6545_v40 = vadd.f32 %v6544_v23, %v18802_v34 }
 0x835   : > { %6990 = vmatpush.bf16.msrb.mxu3 %v12661_v60 }
 0x836   : > { %v16786_v29 = vadd.f32 %v6658_v30, %v6545_v40  ;;  %v6350_v43 = vpop.f32.mrf.mxu1  ;;  %v6459_v18 = vpop.f32.mrf.mxu2 }
 0x837   : > { %v6460_v24 = vadd.f32 %v6459_v18, %v18804_v57  ;;  %v18809_v18 = vld [vmem:[#allocation159_spill] sm:$0xff] }
 0x838   : > { %v16790_v3 = vpop.f32.mrf.mxu0 }
 0x839   : > { %v7420_v31 = vadd.f32 %v6460_v24, %v6348_v51  ;;  %6783 = vmatmul.bf16.gmra.mxu1 %v18805_v35  ;;  %6991 = vmatpush.bf16.msrb.mxu3 %v12660_v6  ;;  %v18811_v24 = vld [vmem:[#allocation166_spill] sm:$0xff]  ;;  %v18814_v6 = vld [vmem:[#allocation163_spill] sm:$0xff] }
 0x83a   : > { %v6663_v60 = vadd.f32 %v16354_v59, %v18811_v24  ;;  %v18817_v59 = vld [vmem:[#allocation170_spill] sm:$0xff] }
 0x83b   : > { %v16797_v55 = vadd.f32 %v7420_v31, %v16608_v10  ;;  %v6546_v2 = vpop.f32.mrf.mxu3  ;;  %6895 = vmatmul.bf16.gmra.mxu2 %v15414_v17  ;;  %v6351_v10 = vadd.f32 %v6350_v43, %v18808_v21  ;;  %v18812_v31 = vld [vmem:[#allocation124_spill] sm:$0xff] }
 0x83c   : > { %v6547_v23 = vadd.f32 %v6546_v2, %v18807_v33  ;;  %v18813_v33 = vld [vmem:[#allocation122_spill] sm:$0xff] }
 0x83e   : > { %v16806_v30 = vadd.f32 %v6660_v13, %v6547_v23  ;;  %v6352_v34 = vpop.f32.mrf.mxu1  ;;  %v6462_v40 = vpop.f32.mrf.mxu2 }
 0x83f   : > { %v6463_v56 = vadd.f32 %v6462_v40, %v18809_v18  ;;  %v6353_v23 = vadd.f32 %v6352_v34, %v18813_v33 }
 0x840   : > { %6588 = vmatmul.bf16.gmra.mxu3 %v15190_v39  ;;  %v16811_v17 = vpop.f32.mrf.mxu0 }
 0x841   : > { %18810 = vst [vmem:[#allocation69_spill] sm:$0xff] %v16811_v17  ;;  %v7421_v54 = vadd.f32 %v6463_v56, %v6351_v10  ;;  %v18816_v10 = vld [vmem:[#allocation84_spill] sm:$0xff]  ;;  %v6665_v56 = vadd.f32 %v16368_v15, %v18817_v59  ;;  %v18823_v15 = vld [vmem:[#allocation174_spill] sm:$0xff] }
 0x842   : > { %v18825_v59 = vld [vmem:[#allocation132_spill] sm:$0xff] }
 0x843   : > { %v16814_v51 = vadd.f32 %v7421_v54, %v16633_v53  ;;  %v6549_v57 = vpop.f32.mrf.mxu3  ;;  %v18818_v54 = vld [vmem:[#allocation127_spill] sm:$0xff] }
 0x844   : > { %v6550_v2 = vadd.f32 %v6549_v57, %v18812_v31  ;;  %v18819_v31 = vld [vmem:[#allocation125_spill] sm:$0xff] }
 0x846   : > { %v16819_v0 = vadd.f32 %v6663_v60, %v6550_v2  ;;  %v6355_v13 = vpop.f32.mrf.mxu1  ;;  %v6464_v43 = vpop.f32.mrf.mxu2 }
 0x847   : > { %v6465_v39 = vadd.f32 %v6464_v43, %v18814_v6  ;;  %v6356_v2 = vadd.f32 %v6355_v13, %v18819_v31  ;;  %v18820_v43 = vld [vmem:[#allocation167_spill] sm:$0xff]  ;;  %v18826_v31 = vld [vmem:[#allocation130_spill] sm:$0xff] }
 0x848   : > { %v16823_v40 = vpop.f32.mrf.mxu0 }
 0x849   : > { %18815 = vst [vmem:[#allocation63_spill] sm:$0xff] %v16823_v40  ;;  %v7422_v21 = vadd.f32 %v6465_v39, %v6353_v23  ;;  %6788 = vmatmul.bf16.gmra.mxu1 %v18816_v10  ;;  %v18821_v23 = vld [vmem:[#allocation34_spill] sm:$0xff] }
 0x84b   : > { %v16827_v53 = vadd.f32 %v7422_v21, %v16651_v4  ;;  %v6551_v18 = vpop.f32.mrf.mxu3  ;;  %6900 = vmatmul.bf16.gmra.mxu2 %v15443_v22  ;;  %v18824_v21 = vld [vmem:[#allocation296_spill] sm:$0xff] }
 0x84c   : > { %v6552_v57 = vadd.f32 %v6551_v18, %v18818_v54  ;;  %v6668_v18 = vadd.f32 %v18824_v21, %v18823_v15  ;;  %v18831_v15 = vld [vmem:[#allocation297_spill] sm:$0xff] }
 0x84e   : > { %v16833_v24 = vadd.f32 %v6665_v56, %v6552_v57  ;;  %v6357_v34 = vpop.f32.mrf.mxu1  ;;  %v6467_v60 = vpop.f32.mrf.mxu2 }
 0x84f   : > { %v6468_v33 = vadd.f32 %v6467_v60, %v18820_v43  ;;  %v6358_v60 = vadd.f32 %v6357_v34, %v18826_v31  ;;  %v18827_v43 = vld [vmem:[#allocation171_spill] sm:$0xff]  ;;  %v18833_v31 = vld [vmem:[#allocation134_spill] sm:$0xff] }
 0x850   : > { %6593 = vmatmul.bf16.gmra.mxu3 %v18821_v23  ;;  %v16838_v4 = vpop.f32.mrf.mxu0 }
 0x851   : > { %18822 = vst [vmem:[#allocation67_spill] sm:$0xff] %v16838_v4  ;;  %v7423_v6 = vadd.f32 %v6468_v33, %v6356_v2  ;;  %v18829_v33 = vld [vmem:[#allocation93_spill] sm:$0xff]  ;;  %v18835_v4 = vld [vmem:[#allocation2_spill] sm:$0xff] }
 0x853   : > { %v16841_v22 = vadd.f32 %v7423_v6, %v16662_v9  ;;  %v6554_v39 = vpop.f32.mrf.mxu3 }
 0x854   : > { %v6555_v56 = vadd.f32 %v6554_v39, %v18825_v59  ;;  %v18830_v39 = vld [vmem:[#allocation178_spill] sm:$0xff] }
 0x855   : > { %v6670_v21 = vadd.f32 %v18831_v15, %v18830_v39  ;;  %v18837_v39 = vld [vmem:[#allocation182_spill] sm:$0xff]  ;;  %v18838_v15 = vld [vmem:[#allocation301_spill] sm:$0xff] }
 0x856   : > { %v16846_v54 = vadd.f32 %v6668_v18, %v6555_v56  ;;  %v6360_v57 = vpop.f32.mrf.mxu1  ;;  %v6469_v13 = vpop.f32.mrf.mxu2  ;;  %v18832_v18 = vld [vmem:[#allocation136_spill] sm:$0xff] }
 0x857   : > { %v6470_v23 = vadd.f32 %v6469_v13, %v18827_v43  ;;  %v6361_v43 = vadd.f32 %v6360_v57, %v18833_v31  ;;  %v18840_v31 = vld [vmem:[#allocation139_spill] sm:$0xff] }
 0x858   : > { %v16850_v17 = vpop.f32.mrf.mxu0 }
 0x859   : > { %18828 = vst [vmem:[#allocation112_spill] sm:$0xff] %v16850_v17  ;;  %v7424_v2 = vadd.f32 %v6470_v23, %v6358_v60  ;;  %6793 = vmatmul.bf16.gmra.mxu1 %v18829_v33  ;;  %v18834_v60 = vld [vmem:[#allocation175_spill] sm:$0xff] }
 0x85b   : > { %v16854_v9 = vadd.f32 %v7424_v2, %v16677_v11  ;;  %v6556_v6 = vpop.f32.mrf.mxu3  ;;  %6905 = vmatmul.bf16.gmra.mxu2 %v15471_v20 }
 0x85c   : > { %v6557_v59 = vadd.f32 %v6556_v6, %v18832_v18  ;;  %v6673_v6 = vadd.f32 %v18838_v15, %v18837_v39  ;;  %v18845_v39 = vld [vmem:[#allocation302_spill] sm:$0xff] }
 0x85e   : > { %v16860_v56 = vadd.f32 %v6670_v21, %v6557_v59  ;;  %v6362_v34 = vpop.f32.mrf.mxu1  ;;  %v6472_v13 = vpop.f32.mrf.mxu2  ;;  %v18839_v21 = vld [vmem:[#allocation141_spill] sm:$0xff] }
 0x85f   : > { %v6473_v23 = vadd.f32 %v6472_v13, %v18834_v60  ;;  %v6363_v13 = vadd.f32 %v6362_v34, %v18840_v31  ;;  %v18841_v60 = vld [vmem:[#allocation179_spill] sm:$0xff] }
 0x860   : > { %6992 = vmatmul.bf16.vlgmr.msrb.gmra.mxu3 %v18835_v4  ;;  %v16865_v11 = vpop.f32.mrf.mxu0  ;;  %v18847_v31 = vld [vmem:[#allocation143_spill] sm:$0xff] }
 0x861   : > { %18836 = vst [vmem:[#allocation73_spill] sm:$0xff] %v16865_v11  ;;  %v7425_v2 = vadd.f32 %v6473_v23, %v6361_v43  ;;  %v18843_v23 = vld [vmem:[#allocation102_spill] sm:$0xff]  ;;  %v18849_v11 = vld [vmem:[#allocation3_spill] sm:$0xff] }
 0x863   : > { %v16868_v20 = vadd.f32 %v7425_v2, %v16690_v16  ;;  %v6559_v7 = vpop.f32.mrf.mxu3 }
 0x864   : > { %v6560_v18 = vadd.f32 %v6559_v7, %v18839_v21  ;;  %v18844_v7 = vld [vmem:[#allocation186_spill] sm:$0xff] }
 0x865   : > { %v6675_v15 = vadd.f32 %v18845_v39, %v18844_v7  ;;  %v18851_v7 = vld [vmem:[#allocation190_spill] sm:$0xff]  ;;  %v18852_v39 = vld [vmem:[#allocation303_spill] sm:$0xff] }
 0x866   : > { %v16873_v59 = vadd.f32 %v6673_v6, %v6560_v18  ;;  %v6365_v61 = vpop.f32.mrf.mxu1  ;;  %v6474_v57 = vpop.f32.mrf.mxu2  ;;  %v18846_v6 = vld [vmem:[#allocation145_spill] sm:$0xff] }
 0x867   : > { %v6475_v4 = vadd.f32 %v6474_v57, %v18841_v60  ;;  %v6366_v60 = vadd.f32 %v6365_v61, %v18847_v31  ;;  %v18854_v31 = vld [vmem:[#allocation147_spill] sm:$0xff] }
 0x868   : > { %v16877_v45 = vpop.f32.mrf.mxu0 }
 0x869   : > { %18842 = vst [vmem:[#allocation68_spill] sm:$0xff] %v16877_v45  ;;  %v7426_v43 = vadd.f32 %v6475_v4, %v6363_v13  ;;  %6798 = vmatmul.bf16.gmra.mxu1 %v18843_v23  ;;  %v18848_v13 = vld [vmem:[#allocation183_spill] sm:$0xff] }
 0x86b   : > { %v16881_v16 = vadd.f32 %v7426_v43, %v16705_v63  ;;  %v6561_v2 = vpop.f32.mrf.mxu3  ;;  %6910 = vmatmul.bf16.gmra.mxu2 %v15502_v19 }
 0x86c   : > { %v6562_v21 = vadd.f32 %v6561_v2, %v18846_v6  ;;  %v6678_v2 = vadd.f32 %v18852_v39, %v18851_v7  ;;  %v18859_v7 = vld [vmem:[#allocation194_spill] sm:$0xff]  ;;  %v18860_v39 = vld [vmem:[#allocation304_spill] sm:$0xff] }
 0x86e   : > { %v16887_v18 = vadd.f32 %v6675_v15, %v6562_v21  ;;  %v6367_v34 = vpop.f32.mrf.mxu1  ;;  %v6477_v57 = vpop.f32.mrf.mxu2  ;;  %v18853_v15 = vld [vmem:[#allocation149_spill] sm:$0xff] }
 0x86f   : > { %v6478_v4 = vadd.f32 %v6477_v57, %v18848_v13  ;;  %v6368_v57 = vadd.f32 %v6367_v34, %v18854_v31  ;;  %v18855_v13 = vld [vmem:[#allocation187_spill] sm:$0xff]  ;;  %v12715_v34 = vld [vmem:[%s18230_s4 + $0x5b8] sm:$0xff] }
 0x870   : > { %6997 = vmatmul.bf16.gmra.mxu3 %v18849_v11  ;;  %v16892_v63 = vpop.f32.mrf.mxu0  ;;  %7325 = vmatpush.bf16.msra.mxu2 %v12715_v34 }
 0x871   : > { %18850 = vst [vmem:[#allocation71_spill] sm:$0xff] %v16892_v63  ;;  %v7427_v43 = vadd.f32 %v6478_v4, %v6366_v60  ;;  %v18857_v4 = vld [vmem:[#allocation110_spill] sm:$0xff] }
 0x873   : > { %v16895_v19 = vadd.f32 %v7427_v43, %v16718_v12  ;;  %v6564_v45 = vpop.f32.mrf.mxu3  ;;  %v12699_v12 = vld [vmem:[%s18230_s4 + $0x538] sm:$0xff] }
 0x874   : > { %v6565_v6 = vadd.f32 %v6564_v45, %v18853_v15  ;;  %7210 = vmatpush.bf16.msra.mxu1 %v12699_v12  ;;  %v18861_v15 = vld [vmem:[#allocation153_spill] sm:$0xff]  ;;  %v12714_v12 = vld [vmem:[%s18230_s4 + $0x5b0] sm:$0xff] }
 0x875   : > { %7326 = vmatpush.bf16.msra.mxu2 %v12714_v12  ;;  %v12712_v12 = vld [vmem:[%s18230_s4 + $0x5a0] sm:$0xff] }
 0x876   : > { %v16900_v21 = vadd.f32 %v6678_v2, %v6565_v6  ;;  %v6370_v26 = vpop.f32.mrf.mxu1  ;;  %v6479_v61 = vpop.f32.mrf.mxu2  ;;  %v6680_v2 = vadd.f32 %v18860_v39, %v18859_v7  ;;  %v18864_v7 = vld [vmem:[#allocation19_spill] sm:$0xff] }
 0x877   : > { %v6480_v11 = vadd.f32 %v6479_v61, %v18855_v13  ;;  %v12698_v61 = vld [vmem:[%s18230_s4 + $0x530] sm:$0xff]  ;;  %v12697_v39 = vld [vmem:[%s18230_s4 + $0x528] sm:$0xff] }
 0x878   : > { %v16904_v17 = vpop.f32.mrf.mxu0  ;;  %7211 = vmatpush.bf16.msra.mxu1 %v12698_v61  ;;  %v18868_v61 = vld [vmem:[#allocation305_spill] sm:$0xff] }
 0x879   : > { %18856 = vst [vmem:[#allocation116_spill] sm:$0xff] %v16904_v17  ;;  %v7428_v60 = vadd.f32 %v6480_v11, %v6368_v57  ;;  %6803 = vmatmul.bf16.gmra.mxu1 %v18857_v4  ;;  %v18863_v11 = vld [vmem:[#allocation191_spill] sm:$0xff] }
 0x87b   : > { %v16911_v43 = vadd.f32 %v7428_v60, %v16733_v5  ;;  %v6566_v45 = vpop.f32.mrf.mxu3  ;;  %6915 = vmatmul.bf16.gmra.mxu2 %v15556_v49  ;;  %v18862_v49 = vld [vmem:[#allocation151_spill] sm:$0xff] }
 0x87c   : > { %v6567_v6 = vadd.f32 %v6566_v45, %v18861_v15  ;;  %v6371_v13 = vadd.f32 %v6370_v26, %v18862_v49  ;;  %7212 = vmatpush.bf16.msra.mxu1 %v12697_v39  ;;  %v12713_v15 = vld [vmem:[%s18230_s4 + $0x5a8] sm:$0xff]  ;;  %v12695_v39 = vld [vmem:[%s18230_s4 + $0x518] sm:$0xff] }
 0x87d   : > { %18858 = vst [vmem:[#allocation78_spill] sm:$0xff] %v16911_v43  ;;  %7327 = vmatpush.bf16.msra.mxu2 %v12713_v15  ;;  %v18872_v15 = vld [vmem:[#allocation120_spill] sm:$0xff] }
 0x87e   : > { %v16923_v5 = vadd.f32 %v6680_v2, %v6567_v6  ;;  %v6372_v31 = vpop.f32.mrf.mxu1  ;;  %v6482_v57 = vpop.f32.mrf.mxu2  ;;  %v18867_v6 = vld [vmem:[#allocation197_spill] sm:$0xff] }
 0x87f   : > { %v6483_v60 = vadd.f32 %v6482_v57, %v18863_v11  ;;  %v6683_v31 = vadd.f32 %v18868_v61, %v18867_v6  ;;  %v18869_v57 = vld [vmem:[#allocation156_spill] sm:$0xff]  ;;  %v12711_v6 = vld [vmem:[%s18230_s4 + $0x598] sm:$0xff]  ;;  %v18873_v61 = vld [vmem:[#allocation202_spill] sm:$0xff] }
 0x880   : > { %7002 = vmatmul.bf16.gmra.mxu3 %v18864_v7  ;;  %v16931_v45 = vpop.f32.mrf.mxu0 }
 0x881   : > { %18865 = vst [vmem:[#allocation72_spill] sm:$0xff] %v16931_v45  ;;  %v7429_v34 = vadd.f32 %v6483_v60, %v6371_v13  ;;  %v12696_v13 = vld [vmem:[%s18230_s4 + $0x520] sm:$0xff]  ;;  %7328 = vmatpush.bf16.msra.mxu2 %v12712_v12 }
 0x882   : > { %7213 = vmatpush.bf16.msra.mxu1 %v12696_v13 }
 0x883   : > { %v16937_v2 = vadd.f32 %v7429_v34, %v16752_v44  ;;  %v6569_v26 = vpop.f32.mrf.mxu3  ;;  %v18871_v34 = vld [vmem:[#allocation119_spill] sm:$0xff] }
 0x884   : > { %v6570_v49 = vadd.f32 %v6569_v26, %v18869_v57 }
 0x885   : > { %18866 = vst [vmem:[#allocation76_spill] sm:$0xff] %v16937_v2  ;;  %7329 = vmatpush.bf16.msra.mxu2 %v12711_v6  ;;  %v18885_v2 = vld [vmem:[#allocation203_spill] sm:$0xff] }
 0x886   : > { %v16948_v11 = vadd.f32 %v6683_v31, %v6570_v49  ;;  %v6484_v44 = vpop.f32.mrf.mxu2  ;;  %v6769_v60 = vpop.f32.mrf.mxu1  ;;  %7214 = vmatpush.bf16.msra.mxu1 %v12695_v39  ;;  %v18874_v31 = vld [vmem:[#allocation25_spill] sm:$0xff]  ;;  %v18875_v49 = vld [vmem:[#allocation160_spill] sm:$0xff] }
 0x887   : > { %v6685_v57 = vadd.f32 %v18874_v31, %v18873_v61  ;;  %v12694_v44 = vld [vmem:[%s18230_s4 + $0x510] sm:$0xff] }
 0x888   : > { %v16953_v7 = vpop.f32.mrf.mxu0  ;;  %v12710_v61 = vld [vmem:[%s18230_s4 + $0x590] sm:$0xff] }
 0x889   : > { %18870 = vst [vmem:[#allocation123_spill] sm:$0xff] %v16953_v7  ;;  %6808 = vmatmul.bf16.gmra.mxu1 %v18871_v34  ;;  %v18877_v7 = vld [vmem:[#allocation198_spill] sm:$0xff]  ;;  %v18878_v31 = vld [vmem:[#allocation16_spill] sm:$0xff]  ;;  %7330 = vmatpush.bf16.msra.mxu2 %v12710_v61 }
 0x88a   : > { %7215 = vmatpush.bf16.msra.mxu1 %v12694_v44 }
 0x88b   : > { %v6571_v26 = vpop.f32.mrf.mxu3  ;;  %6920 = vmatmul.bf16.gmra.mxu2 %v18872_v15  ;;  %v18876_v15 = vld [vmem:[#allocation33_spill] sm:$0xff] }
 0x88c   : > { %v6572_v13 = vadd.f32 %v6571_v26, %v18875_v49  ;;  %v6770_v39 = vadd.f32 %v6769_v60, %v18876_v15  ;;  %v18882_v15 = vld [vmem:[#allocation164_spill] sm:$0xff] }
 0x88e   : > { %v16969_v12 = vadd.f32 %v6685_v57, %v6572_v13  ;;  %v6771_v45 = vpop.f32.mrf.mxu1  ;;  %v6881_v63 = vpop.f32.mrf.mxu2  ;;  %v12693_v57 = vld [vmem:[%s18230_s4 + $0x508] sm:$0xff]  ;;  %v18881_v13 = vld [vmem:[#allocation306_spill] sm:$0xff] }
 0x88f   : > { %v6882_v17 = vadd.f32 %v6881_v63, %v18877_v7  ;;  %7216 = vmatpush.bf16.msra.mxu1 %v12693_v57  ;;  %v12709_v63 = vld [vmem:[%s18230_s4 + $0x588] sm:$0xff]  ;;  %v18880_v7 = vld [vmem:[#allocation206_spill] sm:$0xff]  ;;  %v18884_v57 = vld [vmem:[#allocation40_spill] sm:$0xff] }
 0x890   : > { %7007 = vmatmul.bf16.gmra.mxu3 %v18878_v31  ;;  %v16977_v26 = vpop.f32.mrf.mxu0  ;;  %v6688_v44 = vadd.f32 %v18881_v13, %v18880_v7  ;;  %7331 = vmatpush.bf16.msra.mxu2 %v12709_v63  ;;  %v18887_v63 = vld [vmem:[#allocation201_spill] sm:$0xff] }
 0x891   : > { %18879 = vst [vmem:[#allocation108_spill] sm:$0xff] %v16977_v26  ;;  %v7451_v6 = vadd.f32 %v6882_v17, %v6770_v39  ;;  %v12692_v39 = vld [vmem:[%s18230_s4 + $0x500] sm:$0xff]  ;;  %v6772_v26 = vadd.f32 %v6771_v45, %v18884_v57  ;;  %v18890_v45 = vld [vmem:[#allocation31_spill] sm:$0xff] }
 0x893   : > { %v7535_v49 = vadd.f32 %v7451_v6, %v16786_v29  ;;  %v6574_v60 = vpop.f32.mrf.mxu3  ;;  %7217 = vmatpush.bf16.msra.mxu1 %v12692_v39 }
 0x894   : > { %v6575_v31 = vadd.f32 %v6574_v60, %v18882_v15  ;;  %v12708_v60 = vld [vmem:[%s18230_s4 + $0x580] sm:$0xff]  ;;  %v18889_v15 = vld [vmem:[#allocation212_spill] sm:$0xff] }
 0x895   : > { %v16990_v17 = vadd.f32 %v7535_v49, %v16622_v37  ;;  %7332 = vmatpush.bf16.msra.mxu2 %v12708_v60  ;;  %v18893_v60 = vld [vmem:[#allocation207_spill] sm:$0xff] }
 0x896   : > { %v16995_v29 = vadd.f32 %v6688_v44, %v6575_v31  ;;  %v6774_v61 = vpop.f32.mrf.mxu1  ;;  %v6883_v6 = vpop.f32.mrf.mxu2  ;;  %v18888_v44 = vld [vmem:[#allocation239_spill] sm:$0xff]  ;;  %v6690_v31 = vadd.f32 %v18890_v45, %v18889_v15 }
 0x897   : > { %18883 = vst [vmem:[#allocation36_spill] sm:$0xff] %v16990_v17  ;;  %v6884_v40 = vadd.f32 %v6883_v6, %v18885_v2  ;;  %v18891_v2 = vld [vmem:[#allocation168_spill] sm:$0xff]  ;;  %v18895_v45 = vld [vmem:[#allocation215_spill] sm:$0xff] }
 0x898   : > { %v17002_v37 = vpop.f32.mrf.mxu0 }
 0x899   : > { %18886 = vst [vmem:[#allocation82_spill] sm:$0xff] %v17002_v37  ;;  %v7452_v49 = vadd.f32 %v6884_v40, %v6772_v26  ;;  %6813 = vmatmul.bf16.gmra.mxu1 %v18887_v63  ;;  %v18892_v26 = vld [vmem:[#allocation42_spill] sm:$0xff] }
 0x89a   : > { %v6775_v17 = vadd.f32 %v6774_v61, %v18892_v26 }
 0x89b   : > { %v7536_v7 = vadd.f32 %v7452_v49, %v16806_v30  ;;  %v6576_v13 = vpop.f32.mrf.mxu3  ;;  %6925 = vmatmul.bf16.gmra.mxu2 %v18888_v44  ;;  %v18894_v30 = vld [vmem:[#allocation5_spill] sm:$0xff] }
 0x89c   : > { %v6577_v39 = vadd.f32 %v6576_v13, %v18891_v2  ;;  %v18896_v13 = vld [vmem:[#allocation307_spill] sm:$0xff] }
 0x89d   : > { %v17011_v6 = vadd.f32 %v7536_v7, %v16644_v8  ;;  %v6693_v2 = vadd.f32 %v18896_v13, %v18895_v45  ;;  %v18897_v8 = vld [vmem:[#allocation172_spill] sm:$0xff] }
 0x89e   : > { %v17013_v57 = vadd.f32 %v6690_v31, %v6577_v39  ;;  %v6776_v37 = vpop.f32.mrf.mxu1  ;;  %v6886_v40 = vpop.f32.mrf.mxu2  ;;  %v18901_v45 = vld [vmem:[#allocation236_spill] sm:$0xff] }
 0x89f   : > { %v6887_v43 = vadd.f32 %v6886_v40, %v18893_v60  ;;  %v18898_v40 = vld [vmem:[#allocation46_spill] sm:$0xff] }
 0x8a0   : > { %7012 = vmatmul.bf16.gmra.mxu3 %v18894_v30  ;;  %v7157_v49 = vpop.f32.mrf.mxu0  ;;  %v6777_v60 = vadd.f32 %v6776_v37, %v18898_v40  ;;  %v18899_v30 = vld [vmem:[#allocation213_spill] sm:$0xff] }
 0x8a1   : > { %v7453_v44 = vadd.f32 %v6887_v43, %v6775_v17  ;;  %v18900_v17 = vld [vmem:[#allocation199_spill] sm:$0xff] }
 0x8a3   : > { %v7537_v63 = vadd.f32 %v7453_v44, %v16819_v0  ;;  %v6579_v15 = vpop.f32.mrf.mxu3 }
 0x8a4   : > { %v6580_v7 = vadd.f32 %v6579_v15, %v18897_v8  ;;  %v18902_v15 = vld [vmem:[#allocation218_spill] sm:$0xff] }
 0x8a5   : > { %v17023_v31 = vadd.f32 %v7537_v63, %v16657_v27  ;;  %v6695_v27 = vadd.f32 %v16536_v42, %v18902_v15  ;;  %v18903_v63 = vld [vmem:[#allocation176_spill] sm:$0xff]  ;;  %v18906_v42 = vld [vmem:[#allocation221_spill] sm:$0xff] }
 0x8a6   : > { %v17025_v39 = vadd.f32 %v6693_v2, %v6580_v7  ;;  %v6779_v61 = vpop.f32.mrf.mxu1  ;;  %v6888_v26 = vpop.f32.mrf.mxu2 }
 0x8a7   : > { %v6889_v49 = vadd.f32 %v6888_v26, %v18899_v30  ;;  %v18904_v26 = vld [vmem:[#allocation49_spill] sm:$0xff] }
 0x8a8   : > { %v6780_v40 = vadd.f32 %v6779_v61, %v18904_v26  ;;  %v18910_v26 = vld [vmem:[#allocation30_spill] sm:$0xff] }
 0x8a9   : > { %v7454_v43 = vadd.f32 %v6889_v49, %v6777_v60  ;;  %6818 = vmatmul.bf16.gmra.mxu1 %v18900_v17  ;;  %v18905_v60 = vld [vmem:[#allocation216_spill] sm:$0xff]  ;;  %v6698_v17 = vadd.f32 %v16547_v58, %v18906_v42 }
 0x8aa   : > { %v18911_v58 = vld [vmem:[#allocation224_spill] sm:$0xff] }
 0x8ab   : > { %v7538_v0 = vadd.f32 %v7454_v43, %v16833_v24  ;;  %v6581_v44 = vpop.f32.mrf.mxu3  ;;  %6930 = vmatmul.bf16.gmra.mxu2 %v18901_v45 }
 0x8ac   : > { %v6582_v13 = vadd.f32 %v6581_v44, %v18903_v63  ;;  %v18907_v44 = vld [vmem:[#allocation180_spill] sm:$0xff] }
 0x8ad   : > { %v17036_v2 = vadd.f32 %v7538_v0, %v16670_v14 }
 0x8ae   : > { %v17038_v8 = vadd.f32 %v6695_v27, %v6582_v13  ;;  %v6781_v37 = vpop.f32.mrf.mxu1  ;;  %v6891_v7 = vpop.f32.mrf.mxu2  ;;  %v18908_v27 = vld [vmem:[#allocation54_spill] sm:$0xff]  ;;  %v18909_v13 = vld [vmem:[#allocation219_spill] sm:$0xff] }
 0x8af   : > { %v6892_v30 = vadd.f32 %v6891_v7, %v18905_v60  ;;  %v6782_v63 = vadd.f32 %v6781_v37, %v18908_v27  ;;  %v18912_v60 = vld [vmem:[#allocation57_spill] sm:$0xff] }
 0x8b0   : > { %7017 = vmatmul.bf16.gmra.mxu3 %v15081_v52 }
 0x8b1   : > { %v7455_v24 = vadd.f32 %v6892_v30, %v6780_v40  ;;  %v18913_v30 = vld [vmem:[#allocation184_spill] sm:$0xff] }
 0x8b3   : > { %v7539_v49 = vadd.f32 %v7455_v24, %v16846_v54  ;;  %v6584_v43 = vpop.f32.mrf.mxu3 }
 0x8b4   : > { %v6585_v14 = vadd.f32 %v6584_v43, %v18907_v44 }
 0x8b5   : > { %v17048_v0 = vadd.f32 %v7539_v49, %v16685_v62  ;;  %v6700_v62 = vadd.f32 %v18912_v60, %v18911_v58  ;;  %v18920_v60 = vld [vmem:[#allocation61_spill] sm:$0xff] }
 0x8b6   : > { %v17050_v45 = vadd.f32 %v6698_v17, %v6585_v14  ;;  %v6784_v15 = vpop.f32.mrf.mxu1  ;;  %v6893_v61 = vpop.f32.mrf.mxu2  ;;  %v18914_v17 = vld [vmem:[#allocation58_spill] sm:$0xff] }
 0x8b7   : > { %v6894_v52 = vadd.f32 %v6893_v61, %v18909_v13  ;;  %v6785_v44 = vadd.f32 %v6784_v15, %v18914_v17  ;;  %v18915_v14 = vld [vmem:[#allocation222_spill] sm:$0xff]  ;;  %v18917_v13 = vld [vmem:[#allocation227_spill] sm:$0xff]  ;;  %v18922_v17 = vld [vmem:[#allocation17_spill] sm:$0xff] }
 0x8b9   : > { %v7456_v7 = vadd.f32 %v6894_v52, %v6782_v63  ;;  %7218 = vmatmul.bf16.vlgmr.msra.gmra.mxu1 %v18910_v26  ;;  %v18918_v52 = vld [vmem:[#allocation51_spill] sm:$0xff]  ;;  %v18919_v26 = vld [vmem:[#allocation188_spill] sm:$0xff] }
 0x8bb   : > { %v7540_v54 = vadd.f32 %v7456_v7, %v16860_v56  ;;  %v6586_v40 = vpop.f32.mrf.mxu3  ;;  %7333 = vmatmul.bf16.vlgmr.msra.gmra.mxu2 %v18797_v1  ;;  %v18916_v56 = vld [vmem:[#allocation8_spill] sm:$0xff]  ;;  %v6703_v7 = vadd.f32 %v18918_v52, %v18917_v13  ;;  %v18926_v52 = vld [vmem:[#allocation65_spill] sm:$0xff] }
 0x8bc   : > { %v6587_v24 = vadd.f32 %v6586_v40, %v18913_v30  ;;  %v18921_v30 = vld [vmem:[#allocation225_spill] sm:$0xff] }
 0x8bd   : > { %v17061_v49 = vadd.f32 %v7540_v54, %v16698_v48 }
 0x8be   : > { %v17063_v43 = vadd.f32 %v6700_v62, %v6587_v24  ;;  %v6786_v37 = vpop.f32.mrf.mxu1  ;;  %v6896_v42 = vpop.f32.mrf.mxu2 }
 0x8bf   : > { %v6897_v61 = vadd.f32 %v6896_v42, %v18915_v14  ;;  %v6787_v62 = vadd.f32 %v6786_v37, %v18920_v60  ;;  %v18923_v14 = vld [vmem:[#allocation230_spill] sm:$0xff] }
 0x8c0   : > { %7022 = vmatmul.bf16.gmra.mxu3 %v18916_v56  ;;  %v18925_v56 = vld [vmem:[#allocation192_spill] sm:$0xff] }
 0x8c1   : > { %v7457_v27 = vadd.f32 %v6897_v61, %v6785_v44  ;;  %v18924_v61 = vld [vmem:[#allocation60_spill] sm:$0xff] }
 0x8c3   : > { %v7541_v1 = vadd.f32 %v7457_v27, %v16873_v59  ;;  %v6589_v63 = vpop.f32.mrf.mxu3 }
 0x8c4   : > { %v6590_v48 = vadd.f32 %v6589_v63, %v18919_v26  ;;  %v18927_v26 = vld [vmem:[#allocation228_spill] sm:$0xff] }
 0x8c5   : > { %v17073_v54 = vadd.f32 %v7541_v1, %v16713_v25  ;;  %v6705_v25 = vadd.f32 %v18924_v61, %v18923_v14  ;;  %v18932_v14 = vld [vmem:[#allocation70_spill] sm:$0xff] }
 0x8c6   : > { %v17075_v40 = vadd.f32 %v6703_v7, %v6590_v48  ;;  %v6789_v58 = vpop.f32.mrf.mxu1  ;;  %v6898_v15 = vpop.f32.mrf.mxu2 }
 0x8c7   : > { %v6899_v24 = vadd.f32 %v6898_v15, %v18921_v30  ;;  %v6790_v7 = vadd.f32 %v6789_v58, %v18926_v52  ;;  %v18930_v30 = vld [vmem:[#allocation56_spill] sm:$0xff] }
 0x8c9   : > { %v7458_v42 = vadd.f32 %v6899_v24, %v6787_v62  ;;  %7223 = vmatmul.bf16.gmra.mxu1 %v18922_v17  ;;  %v18929_v62 = vld [vmem:[#allocation233_spill] sm:$0xff] }
 0x8ca   : > { %v6708_v24 = vadd.f32 %v18930_v30, %v18929_v62 }
 0x8cb   : > { %v7542_v59 = vadd.f32 %v7458_v42, %v16887_v18  ;;  %v6591_v44 = vpop.f32.mrf.mxu3  ;;  %7338 = vmatmul.bf16.gmra.mxu2 %v18805_v35  ;;  %v18928_v18 = vld [vmem:[#allocation35_spill] sm:$0xff] }
 0x8cc   : > { %v6592_v27 = vadd.f32 %v6591_v44, %v18925_v56  ;;  %v18931_v42 = vld [vmem:[#allocation195_spill] sm:$0xff] }
 0x8cd   : > { %v17086_v1 = vadd.f32 %v7542_v59, %v16726_v50 }
 0x8ce   : > { %v17088_v63 = vadd.f32 %v6705_v25, %v6592_v27  ;;  %v6791_v37 = vpop.f32.mrf.mxu1  ;;  %v6901_v13 = vpop.f32.mrf.mxu2  ;;  %v18933_v25 = vld [vmem:[#allocation231_spill] sm:$0xff] }
 0x8cf   : > { %v6902_v48 = vadd.f32 %v6901_v13, %v18927_v26  ;;  %v6792_v61 = vadd.f32 %v6791_v37, %v18932_v14  ;;  %v18934_v13 = vld [vmem:[#allocation14_spill] sm:$0xff]  ;;  %v18937_v37 = vld [vmem:[#allocation121_spill] sm:$0xff]  ;;  %v18940_v14 = vld [vmem:[#allocation79_spill] sm:$0xff] }
 0x8d0   : > { %7027 = vmatmul.bf16.gmra.mxu3 %v18928_v18 }
 0x8d1   : > { %v7459_v15 = vadd.f32 %v6902_v48, %v6790_v7  ;;  %v18935_v48 = vld [vmem:[#allocation74_spill] sm:$0xff] }
 0x8d3   : > { %v7543_v35 = vadd.f32 %v7459_v15, %v16900_v21  ;;  %v6594_v60 = vpop.f32.mrf.mxu3  ;;  %v18936_v15 = vld [vmem:[#allocation234_spill] sm:$0xff] }
 0x8d4   : > { %v6595_v50 = vadd.f32 %v6594_v60, %v18931_v42  ;;  %v18939_v42 = vld [vmem:[#allocation204_spill] sm:$0xff] }
 0x8d5   : > { %v17098_v17 = vadd.f32 %v7543_v35, %v16744_v41 }
 0x8d6   : > { %v17100_v59 = vadd.f32 %v6708_v24, %v6595_v50  ;;  %v6794_v44 = vpop.f32.mrf.mxu1  ;;  %v6903_v58 = vpop.f32.mrf.mxu2  ;;  %v18938_v24 = vld [vmem:[#allocation240_spill] sm:$0xff] }
 0x8d7   : > { %v6904_v56 = vadd.f32 %v6903_v58, %v18933_v25  ;;  %v6795_v18 = vadd.f32 %v6794_v44, %v18935_v48  ;;  %v18941_v25 = vld [vmem:[#allocation237_spill] sm:$0xff] }
 0x8d9   : > { %v7460_v27 = vadd.f32 %v6904_v56, %v6792_v61  ;;  %7228 = vmatmul.bf16.gmra.mxu1 %v18934_v13  ;;  %v18942_v13 = vld [vmem:[#allocation4_spill] sm:$0xff] }
 0x8db   : > { %v7544_v21 = vadd.f32 %v7460_v27, %v16923_v5  ;;  %v6596_v52 = vpop.f32.mrf.mxu3  ;;  %7343 = vmatmul.bf16.gmra.mxu2 %v18816_v10  ;;  %v7106_v5 = vadd.f32 %v16666_v28, %v18938_v24 }
 0x8dd   : > { %v17108_v7 = vadd.f32 %v7544_v21, %v16763_v32 }
 0x8de   : > { %v6796_v41 = vpop.f32.mrf.mxu1  ;;  %v6906_v26 = vpop.f32.mrf.mxu2 }
 0x8df   : > { %v6907_v35 = vadd.f32 %v6906_v26, %v18936_v15  ;;  %v6797_v61 = vadd.f32 %v6796_v41, %v18940_v14  ;;  %v18943_v26 = vld [vmem:[#allocation83_spill] sm:$0xff]  ;;  %v18945_v15 = vld [vmem:[#allocation129_spill] sm:$0xff] }
 0x8e0   : > { %7032 = vmatmul.bf16.gmra.mxu3 %v18937_v37 }
 0x8e1   : > { %v7461_v60 = vadd.f32 %v6907_v35, %v6795_v18  ;;  %v18944_v18 = vld [vmem:[#allocation241_spill] sm:$0xff] }
 0x8e3   : > { %v7545_v62 = vadd.f32 %v7461_v60, %v16948_v11  ;;  %v6993_v30 = vpop.f32.mrf.mxu3 }
 0x8e4   : > { %v6994_v10 = vadd.f32 %v6993_v30, %v18939_v42  ;;  %v18947_v30 = vld [vmem:[#allocation214_spill] sm:$0xff] }
 0x8e5   : > { %v17118_v32 = vadd.f32 %v7545_v62, %v16778_v46 }
 0x8e6   : > { %v17120_v50 = vadd.f32 %v7106_v5, %v6994_v10  ;;  %v6799_v58 = vpop.f32.mrf.mxu1  ;;  %v6908_v44 = vpop.f32.mrf.mxu2  ;;  %v18948_v10 = vld [vmem:[#allocation88_spill] sm:$0xff] }
 0x8e7   : > { %v6909_v56 = vadd.f32 %v6908_v44, %v18941_v25  ;;  %v6800_v48 = vadd.f32 %v6799_v58, %v18943_v26  ;;  %v18949_v44 = vld [vmem:[#allocation244_spill] sm:$0xff]  ;;  %v18950_v25 = vld [vmem:[#allocation21_spill] sm:$0xff]  ;;  %v18953_v26 = vld [vmem:[#allocation138_spill] sm:$0xff] }
 0x8e9   : > { %v7462_v27 = vadd.f32 %v6909_v56, %v6797_v61  ;;  %7233 = vmatmul.bf16.gmra.mxu1 %v18942_v13  ;;  %v18951_v13 = vld [vmem:[#allocation92_spill] sm:$0xff] }
 0x8eb   : > { %v7546_v11 = vadd.f32 %v7462_v27, %v16969_v12  ;;  %v17126_v21 = vpop.f32.mrf.mxu3  ;;  %7348 = vmatmul.bf16.gmra.mxu2 %v18829_v33  ;;  %v18946_v12 = vld [vmem:[#allocation246_spill] sm:$0xff] }
 0x8ec   : > { %v7111_v62 = vadd.f32 %v16694_v38, %v18946_v12 }
 0x8ed   : > { %v17130_v28 = vadd.f32 %v7546_v11, %v16797_v55 }
 0x8ee   : > { %v6801_v46 = vpop.f32.mrf.mxu1  ;;  %v6911_v52 = vpop.f32.mrf.mxu2 }
 0x8ef   : > { %v6912_v41 = vadd.f32 %v6911_v52, %v18944_v18  ;;  %v6802_v58 = vadd.f32 %v6801_v46, %v18948_v10  ;;  %v18952_v52 = vld [vmem:[#allocation247_spill] sm:$0xff]  ;;  %v18958_v10 = vld [vmem:[#allocation18_spill] sm:$0xff] }
 0x8f0   : > { %7037 = vmatmul.bf16.gmra.mxu3 %v18945_v15 }
 0x8f1   : > { %v7463_v35 = vadd.f32 %v6912_v41, %v6800_v48 }
 0x8f3   : > { %v7547_v37 = vadd.f32 %v7463_v35, %v16995_v29  ;;  %v6998_v60 = vpop.f32.mrf.mxu3  ;;  %v18955_v35 = vld [vmem:[#allocation220_spill] sm:$0xff] }
 0x8f4   : > { %v6999_v33 = vadd.f32 %v6998_v60, %v18947_v30 }
 0x8f5   : > { %v17140_v55 = vadd.f32 %v7547_v37, %v16814_v51 }
 0x8f6   : > { %v17142_v24 = vadd.f32 %v7111_v62, %v6999_v33  ;;  %v6804_v5 = vpop.f32.mrf.mxu1  ;;  %v6913_v42 = vpop.f32.mrf.mxu2  ;;  %v18956_v62 = vld [vmem:[#allocation97_spill] sm:$0xff]  ;;  %v18957_v33 = vld [vmem:[#allocation250_spill] sm:$0xff] }
 0x8f7   : > { %v6914_v14 = vadd.f32 %v6913_v42, %v18949_v44  ;;  %v6805_v11 = vadd.f32 %v6804_v5, %v18951_v13 }
 0x8f9   : > { %v7464_v61 = vadd.f32 %v6914_v14, %v6802_v58  ;;  %7238 = vmatmul.bf16.gmra.mxu1 %v18950_v25  ;;  %v18959_v14 = vld [vmem:[#allocation101_spill] sm:$0xff] }
 0x8fa   : > { %v18960_v25 = vld [vmem:[#allocation253_spill] sm:$0xff] }
 0x8fb   : > { %v7548_v29 = vadd.f32 %v7464_v61, %v17013_v57  ;;  %v17148_v56 = vpop.f32.mrf.mxu3  ;;  %7353 = vmatmul.bf16.gmra.mxu2 %v18843_v23  ;;  %v18954_v57 = vld [vmem:[#allocation252_spill] sm:$0xff] }
 0x8fc   : > { %v7116_v15 = vadd.f32 %v16722_v47, %v18954_v57  ;;  %v18964_v57 = vld [vmem:[#allocation256_spill] sm:$0xff] }
 0x8fd   : > { %v17152_v38 = vadd.f32 %v7548_v29, %v16827_v53 }
 0x8fe   : > { %v6806_v51 = vpop.f32.mrf.mxu1  ;;  %v6916_v27 = vpop.f32.mrf.mxu2 }
 0x8ff   : > { %v6917_v46 = vadd.f32 %v6916_v27, %v18952_v52  ;;  %v6807_v30 = vadd.f32 %v6806_v51, %v18956_v62  ;;  %v18962_v52 = vld [vmem:[#allocation226_spill] sm:$0xff] }
 0x900   : > { %7042 = vmatmul.bf16.gmra.mxu3 %v18953_v26 }
 0x901   : > { %v7465_v48 = vadd.f32 %v6917_v46, %v6805_v11  ;;  %v18961_v11 = vld [vmem:[#allocation258_spill] sm:$0xff] }
 0x903   : > { %v7549_v18 = vadd.f32 %v7465_v48, %v17025_v39  ;;  %v7003_v41 = vpop.f32.mrf.mxu3 }
 0x904   : > { %v7004_v23 = vadd.f32 %v7003_v41, %v18955_v35 }
 0x905   : > { %v17162_v53 = vadd.f32 %v7549_v18, %v16841_v22  ;;  %v18963_v18 = vld [vmem:[#allocation105_spill] sm:$0xff] }
 0x906   : > { %v17164_v37 = vadd.f32 %v7116_v15, %v7004_v23  ;;  %v6809_v60 = vpop.f32.mrf.mxu1  ;;  %v6918_v12 = vpop.f32.mrf.mxu2  ;;  %v18965_v23 = vld [vmem:[#allocation7_spill] sm:$0xff] }
 0x907   : > { %v6919_v5 = vadd.f32 %v6918_v12, %v18957_v33  ;;  %v6810_v61 = vadd.f32 %v6809_v60, %v18959_v14  ;;  %v12746_v12 = vld [vmem:[%s18232_s6 + $0x70] sm:$0xff]  ;;  %v18966_v33 = vld [vmem:[#allocation109_spill] sm:$0xff] }
 0x908   : > { %v18969_v14 = vld [vmem:[#allocation232_spill] sm:$0xff] }
 0x909   : > { %v7466_v42 = vadd.f32 %v6919_v5, %v6807_v30  ;;  %7243 = vmatmul.bf16.gmra.mxu1 %v18958_v10 }
 0x90b   : > { %v7550_v39 = vadd.f32 %v7466_v42, %v17038_v8  ;;  %v17170_v58 = vpop.f32.mrf.mxu3  ;;  %7358 = vmatmul.bf16.gmra.mxu2 %v18857_v4  ;;  %v7121_v8 = vadd.f32 %v16756_v36, %v18961_v11  ;;  %v12747_v36 = vld [vmem:[%s18232_s6 + $0x78] sm:$0xff]  ;;  %v18967_v42 = vld [vmem:[#allocation259_spill] sm:$0xff]  ;;  %v18970_v11 = vld [vmem:[#allocation114_spill] sm:$0xff] }
 0x90c   : > { %7975 = vmatpush.bf16.msra.mxu3 %v12747_v36  ;;  %v18975_v36 = vld [vmem:[#allocation118_spill] sm:$0xff] }
 0x90d   : > { %v17174_v47 = vadd.f32 %v7550_v39, %v16854_v9 }
 0x90e   : > { %v6811_v22 = vpop.f32.mrf.mxu1  ;;  %v6921_v44 = vpop.f32.mrf.mxu2 }
 0x90f   : > { %v6922_v29 = vadd.f32 %v6921_v44, %v18960_v25  ;;  %v6812_v41 = vadd.f32 %v6811_v22, %v18963_v18  ;;  %v18968_v22 = vld [vmem:[#allocation264_spill] sm:$0xff]  ;;  %v18973_v18 = vld [vmem:[#allocation201_spill] sm:$0xff] }
 0x910   : > { %7976 = vmatpush.bf16.msra.mxu3 %v12746_v12  ;;  %v7126_v44 = vadd.f32 %v16790_v3, %v18968_v22  ;;  %v18972_v3 = vld [vmem:[#allocation9_spill] sm:$0xff] }
 0x911   : > { %v7467_v51 = vadd.f32 %v6922_v29, %v6810_v61  ;;  %v12744_v29 = vld [vmem:[%s18232_s6 + $0x60] sm:$0xff]  ;;  %v18976_v12 = vld [vmem:[#allocation265_spill] sm:$0xff] }
 0x913   : > { %v7551_v27 = vadd.f32 %v7467_v51, %v17050_v45  ;;  %v7008_v13 = vpop.f32.mrf.mxu3 }
 0x914   : > { %v7009_v46 = vadd.f32 %v7008_v13, %v18962_v52 }
 0x915   : > { %v17183_v4 = vadd.f32 %v7551_v27, %v16868_v20 }
 0x916   : > { %v17185_v9 = vadd.f32 %v7121_v8, %v7009_v46  ;;  %v6814_v26 = vpop.f32.mrf.mxu1  ;;  %v6923_v48 = vpop.f32.mrf.mxu2  ;;  %v18971_v8 = vld [vmem:[#allocation262_spill] sm:$0xff] }
 0x917   : > { %v6924_v15 = vadd.f32 %v6923_v48, %v18964_v57  ;;  %v6815_v5 = vadd.f32 %v6814_v26, %v18966_v33 }
 0x919   : > { %v7468_v35 = vadd.f32 %v6924_v15, %v6812_v41  ;;  %7248 = vmatmul.bf16.gmra.mxu1 %v18965_v23  ;;  %v18974_v41 = vld [vmem:[#allocation78_spill] sm:$0xff]  ;;  %v12742_v15 = vld [vmem:[%s18232_s6 + $0x50] sm:$0xff] }
 0x91b   : > { %v7552_v45 = vadd.f32 %v7468_v35, %v17063_v43  ;;  %v17194_v60 = vpop.f32.mrf.mxu3  ;;  %7363 = vmatmul.bf16.gmra.mxu2 %v18871_v34  ;;  %v12745_v34 = vld [vmem:[%s18232_s6 + $0x68] sm:$0xff] }
 0x91c   : > { %7977 = vmatpush.bf16.msra.mxu3 %v12745_v34  ;;  %v18979_v34 = vld [vmem:[#allocation238_spill] sm:$0xff] }
 0x91d   : > { %v17198_v20 = vadd.f32 %v7552_v45, %v16881_v16 }
 0x91e   : > { %v6816_v62 = vpop.f32.mrf.mxu1  ;;  %v6926_v30 = vpop.f32.mrf.mxu2 }
 0x91f   : > { %v6927_v10 = vadd.f32 %v6926_v30, %v18967_v42  ;;  %v12741_v30 = vld [vmem:[%s18232_s6 + $0x48] sm:$0xff]  ;;  %v18977_v42 = vld [vmem:[#allocation269_spill] sm:$0xff] }
 0x920   : > { %7978 = vmatpush.bf16.msra.mxu3 %v12744_v29 }
 0x921   : > { %v7469_v43 = vadd.f32 %v6927_v10, %v6815_v5  ;;  %v18978_v10 = vld [vmem:[#allocation63_spill] sm:$0xff] }
 0x923   : > { %v7553_v39 = vadd.f32 %v7469_v43, %v17075_v40  ;;  %v7013_v16 = vpop.f32.mrf.mxu3  ;;  %v6817_v40 = vadd.f32 %v6816_v62, %v18970_v11  ;;  %v7131_v43 = vadd.f32 %v18978_v10, %v18977_v42  ;;  %v18989_v42 = vld [vmem:[#allocation273_spill] sm:$0xff] }
 0x924   : > { %v7014_v61 = vadd.f32 %v7013_v16, %v18969_v14  ;;  %v18980_v16 = vld [vmem:[#allocation76_spill] sm:$0xff] }
 0x925   : > { %v17213_v25 = vadd.f32 %v7553_v39, %v16895_v19  ;;  %v12743_v19 = vld [vmem:[%s18232_s6 + $0x58] sm:$0xff] }
 0x926   : > { %v17218_v51 = vadd.f32 %v7126_v44, %v7014_v61  ;;  %v6819_v27 = vpop.f32.mrf.mxu1  ;;  %v6928_v13 = vpop.f32.mrf.mxu2  ;;  %7979 = vmatpush.bf16.msra.mxu3 %v12743_v19  ;;  %v12740_v44 = vld [vmem:[%s18232_s6 + $0x40] sm:$0xff] }
 0x927   : > { %v6929_v52 = vadd.f32 %v6928_v13, %v18971_v8  ;;  %v6820_v45 = vadd.f32 %v6819_v27, %v18975_v36  ;;  %v18981_v27 = vld [vmem:[#allocation11_spill] sm:$0xff]  ;;  %v12762_v13 = vld [vmem:[%s18232_s6 + $0xf0] sm:$0xff]  ;;  %v18985_v36 = vld [vmem:[#allocation274_spill] sm:$0xff] }
 0x929   : > { %v7470_v46 = vadd.f32 %v6929_v52, %v6817_v40  ;;  %7253 = vmatmul.bf16.gmra.mxu1 %v18972_v3  ;;  %v18982_v40 = vld [vmem:[#allocation211_spill] sm:$0xff]  ;;  %v18983_v3 = vld [vmem:[#allocation128_spill] sm:$0xff] }
 0x92a   : > { %7980 = vmatpush.bf16.msra.mxu3 %v12742_v15  ;;  %v12760_v15 = vld [vmem:[%s18232_s6 + $0xe0] sm:$0xff] }
 0x92b   : > { %v7554_v26 = vadd.f32 %v7470_v46, %v17088_v63  ;;  %v17227_v48 = vpop.f32.mrf.mxu3  ;;  %7368 = vmatmul.bf16.gmra.mxu2 %v18973_v18  ;;  %v12761_v46 = vld [vmem:[%s18232_s6 + $0xe8] sm:$0xff] }
 0x92d   : > { %v17231_v57 = vadd.f32 %v7554_v26, %v18974_v41  ;;  %v18984_v26 = vld [vmem:[#allocation270_spill] sm:$0xff] }
 0x92e   : > { %v6821_v35 = vpop.f32.mrf.mxu1  ;;  %v6931_v23 = vpop.f32.mrf.mxu2  ;;  %7981 = vmatpush.bf16.msra.mxu3 %v12741_v30  ;;  %v12811_v30 = vld [vmem:[%s18232_s6 + $0x278] sm:$0xff] }
 0x92f   : > { %v6932_v62 = vadd.f32 %v6931_v23, %v18976_v12  ;;  %8354 = vmatpush.bf16.msra.mxu0 %v12811_v30 }
 0x931   : > { %v7471_v63 = vadd.f32 %v6932_v62, %v6820_v45  ;;  %v18986_v45 = vld [vmem:[#allocation112_spill] sm:$0xff]  ;;  %v18987_v62 = vld [vmem:[#allocation245_spill] sm:$0xff] }
 0x932   : > { %7982 = vmatpush.bf16.msra.mxu3 %v12740_v44  ;;  %v7136_v12 = vadd.f32 %v18986_v45, %v18985_v36  ;;  %v12759_v44 = vld [vmem:[%s18232_s6 + $0xd8] sm:$0xff]  ;;  %v12809_v45 = vld [vmem:[%s18232_s6 + $0x268] sm:$0xff] }
 0x933   : > { %v7555_v33 = vadd.f32 %v7471_v63, %v17100_v59  ;;  %v7018_v5 = vpop.f32.mrf.mxu3  ;;  %v12763_v59 = vld [vmem:[%s18232_s6 + $0xf8] sm:$0xff] }
 0x934   : > { %v7019_v39 = vadd.f32 %v7018_v5, %v18979_v34 }
 0x935   : > { %v17246_v22 = vadd.f32 %v7555_v33, %v18980_v16  ;;  %v18988_v33 = vld [vmem:[#allocation208_spill] sm:$0xff] }
 0x936   : > { %v17251_v14 = vadd.f32 %v7131_v43, %v7019_v39  ;;  %v6933_v61 = vpop.f32.mrf.mxu2  ;;  %v7219_v29 = vpop.f32.mrf.mxu1  ;;  %8070 = vmatpush.bf16.msrb.mxu3 %v12763_v59  ;;  %v6996_v5 = vadd.f32 %v17126_v21, %v18988_v33  ;;  %v18990_v39 = vld [vmem:[#allocation55_spill] sm:$0xff] }
 0x937   : > { %v7220_v19 = vadd.f32 %v7219_v29, %v18983_v3  ;;  %v7273_v16 = vrot.slane %v18990_v39, 1  ;;  %v18991_v61 = vld [vmem:[#allocation243_spill] sm:$0xff]  ;;  %v18992_v29 = vld [vmem:[#allocation64_spill] sm:$0xff]  ;;  %v12804_v39 = vld [vmem:[%s18232_s6 + $0x240] sm:$0xff] }
 0x938   : > { %v7108_v59 = vadd.f32 %v18992_v29, %v18991_v61  ;;  %v12810_v3 = vld [vmem:[%s18232_s6 + $0x270] sm:$0xff]  ;;  %v12808_v29 = vld [vmem:[%s18232_s6 + $0x260] sm:$0xff] }
 0x939   : > { %7258 = vmatmul.bf16.gmra.mxu1 %v18981_v27  ;;  %v18993_v27 = vld [vmem:[#allocation133_spill] sm:$0xff]  ;;  %8355 = vmatpush.bf16.msra.mxu0 %v12810_v3 }
 0x93a   : > { %8071 = vmatpush.bf16.msrb.mxu3 %v12762_v13 }
 0x93b   : > { %v17260_v11 = vpop.f32.mrf.mxu3  ;;  %7373 = vmatmul.bf16.gmra.mxu2 %v18982_v40  ;;  %v18994_v40 = vld [vmem:[#allocation36_spill] sm:$0xff] }
 0x93d   : > { %8356 = vmatpush.bf16.msra.mxu0 %v12809_v45  ;;  %v19005_v45 = vld [vmem:[#allocation280_spill] sm:$0xff] }
 0x93e   : > { %v7221_v8 = vpop.f32.mrf.mxu1  ;;  %v7334_v52 = vpop.f32.mrf.mxu2  ;;  %8072 = vmatpush.bf16.msrb.mxu3 %v12761_v46 }
 0x93f   : > { %v7335_v18 = vadd.f32 %v7334_v52, %v18984_v26  ;;  %v7222_v13 = vadd.f32 %v7221_v8, %v18993_v27  ;;  %v18995_v52 = vld [vmem:[#allocation272_spill] sm:$0xff]  ;;  %v17298_v26 = vld [vmem:[%s18231_s5] ss:$0 sm:$0xff]  ;;  %v18997_v8 = vld [vmem:[#allocation209_spill] sm:$0xff] }
 0x941   : > { %v7493_v41 = vadd.f32 %v7335_v18, %v7220_v19  ;;  %v7473_v19 = vadd.f32 %v7108_v59, %v6996_v5  ;;  %v12757_v5 = vld [vmem:[%s18232_s6 + $0xc8] sm:$0xff]  ;;  %8357 = vmatpush.bf16.msra.mxu0 %v12808_v29 }
 0x942   : > { %8073 = vmatpush.bf16.msrb.mxu3 %v12760_v15  ;;  %v7274_v15 = vsel %vm1533_vm0, %v18997_v8, %v7273_v16  ;;  %v19004_v8 = vld [vmem:[#allocation217_spill] sm:$0xff] }
 0x943   : > { %v7556_v35 = vadd.f32 %v7493_v41, %v17120_v50  ;;  %v7023_v23 = vpop.f32.mrf.mxu3  ;;  %v18996_v41 = vld [vmem:[#allocation13_spill] sm:$0xff] }
 0x944   : > { %v7024_v63 = vadd.f32 %v7023_v23, %v18987_v62  ;;  %v18998_v62 = vld [vmem:[#allocation276_spill] sm:$0xff] }
 0x945   : > { %v7598_v10 = vadd.f32 %v7556_v35, %v18989_v42  ;;  %v12758_v35 = vld [vmem:[%s18232_s6 + $0xd0] sm:$0xff]  ;;  %v18999_v42 = vld [vmem:[#allocation137_spill] sm:$0xff] }
 0x946   : > { %v17281_v43 = vadd.f32 %v7136_v12, %v7024_v63  ;;  %v7224_v34 = vpop.f32.mrf.mxu1  ;;  %v7336_v50 = vpop.f32.mrf.mxu2  ;;  %8074 = vmatpush.bf16.msrb.mxu3 %v12759_v44  ;;  %v19000_v44 = vld [vmem:[#allocation275_spill] sm:$0xff] }
 0x947   : > { %v7619_v21 = vadd.f32 %v7598_v10, %v18994_v40  ;;  %v7337_v46 = vadd.f32 %v7336_v50, %v18995_v52  ;;  %v7225_v10 = vadd.f32 %v7224_v34, %v18999_v42  ;;  %v12756_v40 = vld [vmem:[%s18232_s6 + $0xc0] sm:$0xff]  ;;  %v19001_v52 = vld [vmem:[#allocation281_spill] sm:$0xff] }
 0x949   : > { %v7494_v18 = vadd.f32 %v7337_v46, %v7222_v13  ;;  %7263 = vmatmul.bf16.gmra.mxu1 %v18996_v41  ;;  %v7644_v12 = vadd.f32 %v17298_v26, %v7619_v21  ;;  %v19002_v46 = vld [vmem:[#allocation68_spill] sm:$0xff]  ;;  %v12807_v41 = vld [vmem:[%s18232_s6 + $0x258] sm:$0xff] }
 0x94a   : > { %8075 = vmatpush.bf16.msrb.mxu3 %v12758_v35  ;;  %v7141_v3 = vadd.f32 %v19002_v46, %v19001_v52  ;;  %8358 = vmatpush.bf16.msra.mxu0 %v12807_v41 }
 0x94b   : > { %v7557_v23 = vadd.f32 %v7494_v18, %v7473_v19  ;;  %v17308_v36 = vpop.f32.mrf.mxu3  ;;  %7378 = vmatmul.bf16.gmra.mxu2 %v7274_v15  ;;  %v7665_v59 = vmax.f32 %v7644_v12, 0.0  ;;  %v19003_v19 = vld [vmem:[#allocation251_spill] sm:$0xff]  ;;  %v7001_v15 = vadd.f32 %v17148_v56, %v19004_v8 }
 0x94d   : > { %v7599_v63 = vadd.f32 %v7557_v23, %v18998_v62  ;;  %v7737_v35 = vrot.slane %v7665_v59, 1  ;;  %v19006_v62 = vld [vmem:[#allocation53_spill] sm:$0xff] }
 0x94e   : > { %v7226_v30 = vpop.f32.mrf.mxu1  ;;  %v7339_v33 = vpop.f32.mrf.mxu2  ;;  %8076 = vmatpush.bf16.msrb.mxu3 %v12757_v5 }
 0x94f   : > { %v7620_v50 = vadd.f32 %v7599_v63, %v17011_v6  ;;  %v7340_v61 = vadd.f32 %v7339_v33, %v19000_v44  ;;  %v19007_v63 = vld [vmem:[#allocation249_spill] sm:$0xff]  ;;  %v19008_v33 = vld [vmem:[#allocation59_spill] sm:$0xff] }
 0x950   : > { %v7113_v5 = vadd.f32 %v19008_v33, %v19007_v63 }
 0x951   : > { %v7645_v27 = vadd.f32 %v17298_v26, %v7620_v50  ;;  %v7495_v13 = vadd.f32 %v7340_v61, %v7225_v10  ;;  %v19009_v61 = vld [vmem:[#allocation142_spill] sm:$0xff] }
 0x952   : > { %8077 = vmatpush.bf16.msrb.mxu3 %v12756_v40  ;;  %v7227_v29 = vadd.f32 %v7226_v30, %v19009_v61  ;;  %v19014_v61 = vld [vmem:[#allocation287_spill] sm:$0xff] }
 0x953   : > { %v7666_v21 = vmax.f32 %v7645_v27, 0.0  ;;  %v7558_v34 = vadd.f32 %v7495_v13, %v17142_v24  ;;  %v7028_v6 = vpop.f32.mrf.mxu3  ;;  %v7159_v24 = vpack.c.b16 %v19006_v62, %v19006_v62  ;;  %v19010_v27 = vld [vmem:[#allocation279_spill] sm:$0xff]  ;;  %v19013_v62 = vld [vmem:[#allocation282_spill] sm:$0xff] }
 0x954   : > { %v7029_v18 = vadd.f32 %v7028_v6, %v19003_v19  ;;  %v7475_v6 = vadd.f32 %v7113_v5, %v7001_v15 }
 0x955   : > { %v7738_v23 = vrot.slane %v7666_v21, 1  ;;  %v7600_v12 = vadd.f32 %v7558_v34, %v19005_v45  ;;  %v12806_v34 = vld [vmem:[%s18232_s6 + $0x250] sm:$0xff] }
 0x956   : > { %v17342_v42 = vadd.f32 %v7141_v3, %v7029_v18  ;;  %v7229_v10 = vpop.f32.mrf.mxu1  ;;  %v7341_v50 = vpop.f32.mrf.mxu2  ;;  %8359 = vmatpush.bf16.msra.mxu0 %v12806_v34 }
 0x957   : > { %v7739_v44 = vsel %vm1533_vm0, %v7737_v35, %v7738_v23  ;;  %v7621_v56 = vadd.f32 %v7600_v12, %v17023_v31  ;;  %v7342_v13 = vadd.f32 %v7341_v50, %v19010_v27  ;;  %v12805_v31 = vld [vmem:[%s18232_s6 + $0x248] sm:$0xff]  ;;  %v19012_v35 = vld [vmem:[#allocation146_spill] sm:$0xff]  ;;  %v12843_v50 = vld [vmem:[%s18232_s6 + $0x378] sm:$0xff] }
 0x958   : > { %v7772_v40 = vmax.f32 %v7665_v59, %v7739_v44  ;;  %v19011_v59 = vld [vmem:[#allocation283_spill] sm:$0xff]  ;;  %v7230_v45 = vadd.f32 %v7229_v10, %v19012_v35 }
 0x959   : > { %v7646_v52 = vadd.f32 %v17298_v26, %v7621_v56  ;;  %v7496_v46 = vadd.f32 %v7342_v13, %v7227_v29  ;;  %7268 = vmatmul.bf16.gmra.mxu1 %v7159_v24  ;;  %v19016_v56 = vld [vmem:[#allocation257_spill] sm:$0xff]  ;;  %v19017_v13 = vld [vmem:[#allocation223_spill] sm:$0xff] }
 0x95a   : > { %8360 = vmatpush.bf16.msra.mxu0 %v12805_v31  ;;  %v19020_v31 = vld [vmem:[#allocation62_spill] sm:$0xff] }
 0x95b   : > { %v7667_v3 = vmax.f32 %v7646_v52, 0.0  ;;  %v7559_v19 = vadd.f32 %v7496_v46, %v7475_v6  ;;  %v17352_v18 = vpop.f32.mrf.mxu3  ;;  %7383 = vmatmul.bf16.gmra.mxu2 %v7273_v16  ;;  %v19018_v6 = vld [vmem:[#allocation286_spill] sm:$0xff]  ;;  %v12842_v46 = vld [vmem:[%s18232_s6 + $0x370] sm:$0xff] }
 0x95d   : > { %v7740_v30 = vrot.slane %v7667_v3, 1  ;;  %v7601_v41 = vadd.f32 %v7559_v19, %v19011_v59  ;;  %v19019_v19 = vld [vmem:[#allocation255_spill] sm:$0xff] }
 0x95e   : > { %v7231_v8 = vpop.f32.mrf.mxu1  ;;  %v7344_v15 = vpop.f32.mrf.mxu2  ;;  %8361 = vmatpush.bf16.msra.mxu0 %v12804_v39 }
 0x95f   : > { %v7622_v12 = vadd.f32 %v7601_v41, %v17036_v2  ;;  %v7345_v24 = vadd.f32 %v7344_v15, %v19013_v62  ;;  %v7741_v63 = vsel %vm1533_vm0, %v7738_v23, %v7740_v30  ;;  %v19015_v23 = vld [vmem:[#allocation116_spill] sm:$0xff]  ;;  %v19022_v62 = vld [vmem:[#allocation285_spill] sm:$0xff] }
 0x960   : > { %v7773_v16 = vmax.f32 %v7666_v21, %v7741_v63  ;;  %v7146_v29 = vadd.f32 %v19015_v23, %v19014_v61  ;;  %v7006_v21 = vadd.f32 %v17170_v58, %v19017_v13  ;;  %v19023_v23 = vld [vmem:[#allocation289_spill] sm:$0xff] }
 0x961   : > { %v7647_v33 = vadd.f32 %v17298_v26, %v7622_v12  ;;  %v7497_v5 = vadd.f32 %v7345_v24, %v7230_v45  ;;  %v19021_v45 = vld [vmem:[#allocation150_spill] sm:$0xff] }
 0x962   : > { %8547 = vmatpush.bf16.msrb.mxu0 %v12843_v50  ;;  %v7232_v12 = vadd.f32 %v7231_v8, %v19021_v45  ;;  %v12841_v50 = vld [vmem:[%s18232_s6 + $0x368] sm:$0xff]  ;;  %v12779_v45 = vld [vmem:[%s18232_s6 + $0x178] sm:$0xff] }
 0x963   : > { %v7668_v10 = vmax.f32 %v7647_v33, 0.0  ;;  %v7560_v2 = vadd.f32 %v7497_v5, %v17164_v37  ;;  %v7033_v44 = vpop.f32.mrf.mxu3  ;;  %v7118_v37 = vadd.f32 %v19020_v31, %v19019_v19 }
 0x964   : > { %v7034_v27 = vadd.f32 %v7033_v44, %v19016_v56 }
 0x965   : > { %v7804_v34 = vrot.slane %v7668_v10, 1  ;;  %v7602_v52 = vadd.f32 %v7560_v2, %v19018_v6  ;;  %v7477_v39 = vadd.f32 %v7118_v37, %v7006_v21  ;;  %v19024_v21 = vld [vmem:[#allocation154_spill] sm:$0xff] }
 0x966   : > { %v17383_v59 = vadd.f32 %v7146_v29, %v7034_v27  ;;  %v7234_v41 = vpop.f32.mrf.mxu1  ;;  %v7346_v15 = vpop.f32.mrf.mxu2  ;;  %8548 = vmatpush.bf16.msrb.mxu0 %v12842_v46 }
 0x967   : > { %v7805_v35 = vsel %vm1533_vm0, %v7740_v30, %v7804_v34  ;;  %v7623_v58 = vadd.f32 %v7602_v52, %v17048_v0  ;;  %v7347_v24 = vadd.f32 %v7346_v15, %v19022_v62  ;;  %v19025_v52 = vld [vmem:[#allocation288_spill] sm:$0xff] }
 0x968   : > { %v7830_v63 = vmax.f32 %v7667_v3, %v7805_v35  ;;  %v12840_v3 = vld [vmem:[%s18232_s6 + $0x360] sm:$0xff] }
 0x969   : > { %v7648_v33 = vadd.f32 %v17298_v26, %v7623_v58  ;;  %v7498_v5 = vadd.f32 %v7347_v24, %v7232_v12  ;;  %v19027_v24 = vld [vmem:[#allocation123_spill] sm:$0xff] }
 0x96a   : > { %v7870_v2 = vmax.f32 %v7772_v40, %v7830_v63  ;;  %8549 = vmatpush.bf16.msrb.mxu0 %v12841_v50  ;;  %v7235_v40 = vadd.f32 %v7234_v41, %v19024_v21  ;;  %v12839_v41 = vld [vmem:[%s18232_s6 + $0x358] sm:$0xff] }
 0x96b   : > { %v7669_v44 = vmax.f32 %v7648_v33, 0.0  ;;  %v7561_v61 = vadd.f32 %v7498_v5, %v7477_v39  ;;  %v17393_v30 = vpop.f32.mrf.mxu3  ;;  %v19028_v39 = vld [vmem:[#allocation263_spill] sm:$0xff]  ;;  %v19029_v5 = vld [vmem:[#allocation229_spill] sm:$0xff] }
 0x96c   : > { %v17395_v8 = vpack.c.bf16 %v7870_v2, %v7870_v2  ;;  %v7011_v50 = vadd.f32 %v17194_v60, %v19029_v5  ;;  %v19033_v60 = vld [vmem:[#allocation157_spill] sm:$0xff]  ;;  %v19038_v5 = vld [vmem:[#allocation295_spill] sm:$0xff] }
 0x96d   : > { %v7742_v0 = vrot.slane %v7669_v44, 1  ;;  %v7603_v29 = vadd.f32 %v7561_v61, %v19023_v23  ;;  %v19030_v61 = vld [vmem:[#allocation292_spill] sm:$0xff] }
 0x96e   : > { %v7236_v56 = vpop.f32.mrf.mxu1  ;;  %v7349_v27 = vpop.f32.mrf.mxu2  ;;  %v7923_v13 = vunpack.c.l.b16 %v17395_v8  ;;  %8550 = vmatpush.bf16.msrb.mxu0 %v12840_v3  ;;  %v19032_v3 = vld [vmem:[#allocation107_spill] sm:$0xff] }
 0x96f   : > { %v7624_v6 = vadd.f32 %v7603_v29, %v17061_v49  ;;  %v7350_v46 = vadd.f32 %v7349_v27, %v19025_v52  ;;  %v7806_v19 = vsel %vm1533_vm0, %v7804_v34, %v7742_v0  ;;  %v19031_v29 = vld [vmem:[#allocation261_spill] sm:$0xff] }
 0x970   : > { %v17406_v31 = vpack.c.b16 %v7923_v13, %v7923_v13  ;;  %v7831_v37 = vmax.f32 %v7668_v10, %v7806_v19  ;;  %v19026_v10 = vld [vmem:[#allocation293_spill] sm:$0xff]  ;;  %v7123_v27 = vadd.f32 %v19032_v3, %v19031_v29 }
 0x971   : > { %v7649_v15 = vadd.f32 %v17298_v26, %v7624_v6  ;;  %v7499_v35 = vadd.f32 %v7350_v46, %v7235_v40  ;;  %v7151_v63 = vadd.f32 %v19027_v24, %v19026_v10  ;;  %v7237_v6 = vadd.f32 %v7236_v56, %v19033_v60  ;;  %v19034_v46 = vld [vmem:[#allocation291_spill] sm:$0xff]  ;;  %v19036_v10 = vld [vmem:[#allocation108_spill] sm:$0xff]  ;;  %v19039_v3 = vld [vmem:[#allocation161_spill] sm:$0xff] }
 0x972   : > { %v7925_v49 = vrot.slane %v17406_v31, 1  ;;  %v17416_v12 = vmax.f32 %v7773_v16, %v7831_v37  ;;  %8551 = vmatpush.bf16.msrb.mxu0 %v12839_v41  ;;  %v12778_v16 = vld [vmem:[%s18232_s6 + $0x170] sm:$0xff]  ;;  %v19040_v60 = vld [vmem:[#allocation294_spill] sm:$0xff] }
 0x973   : > { %v7670_v58 = vmax.f32 %v7649_v15, 0.0  ;;  %v7562_v34 = vadd.f32 %v7499_v35, %v17185_v9  ;;  %v7038_v62 = vpop.f32.mrf.mxu3  ;;  %v12838_v9 = vld [vmem:[%s18232_s6 + $0x350] sm:$0xff]  ;;  %v7479_v35 = vadd.f32 %v7123_v27, %v7011_v50 }
 0x974   : > { %v7039_v33 = vadd.f32 %v7038_v62, %v19028_v39  ;;  %7983 = vmatmul.bf16.vlgmr.msra.gmra.mxu3 %v7925_v49  ;;  %v12777_v49 = vld [vmem:[%s18232_s6 + $0x168] sm:$0xff] }
 0x975   : > { %v7743_v2 = vrot.slane %v7670_v58, 1  ;;  %v7604_v23 = vadd.f32 %v7562_v34, %v19030_v61  ;;  %8163 = vmatpush.bf16.msra.mxu3 %v12779_v45  ;;  %v12776_v61 = vld [vmem:[%s18232_s6 + $0x160] sm:$0xff] }
 0x976   : > { %v17433_v13 = vadd.f32 %v7151_v63, %v7039_v33  ;;  %v7239_v21 = vpop.f32.mrf.mxu1  ;;  %v7351_v40 = vpop.f32.mrf.mxu2  ;;  %8552 = vmatpush.bf16.msrb.mxu0 %v12838_v9  ;;  %v19037_v63 = vld [vmem:[#allocation266_spill] sm:$0xff] }
 0x977   : > { %v7625_v52 = vadd.f32 %v7604_v23, %v17073_v54  ;;  %v7352_v19 = vadd.f32 %v7351_v40, %v19034_v46  ;;  %v7744_v37 = vsel %vm1533_vm0, %v7742_v0, %v7743_v2  ;;  %v12837_v54 = vld [vmem:[%s18232_s6 + $0x348] sm:$0xff]  ;;  %v12836_v23 = vld [vmem:[%s18232_s6 + $0x340] sm:$0xff]  ;;  %v7240_v27 = vadd.f32 %v7239_v21, %v19039_v3  ;;  %v12890_v46 = vld [vmem:[%s18232_s6 + $0x4f0] sm:$0xff] }
 0x978   : > { %v17439_v15 = vmax.f32 %v7669_v44, %v7744_v37  ;;  %v12891_v44 = vld [vmem:[%s18232_s6 + $0x4f8] sm:$0xff]  ;;  %v19035_v0 = vld [vmem:[#allocation39_spill] sm:$0xff] }
 0x979   : > { %v7650_v45 = vadd.f32 %v17298_v26, %v7625_v52  ;;  %v7500_v41 = vadd.f32 %v7352_v19, %v7237_v6  ;;  %8164 = vmatpush.bf16.msra.mxu3 %v12778_v16  ;;  %v7153_v24 = vadd.f32 %v19036_v10, %v19035_v0  ;;  %8831 = vmatpush.bf16.msrb.mxu1 %v12891_v44  ;;  %v12775_v21 = vld [vmem:[%s18232_s6 + $0x158] sm:$0xff]  ;;  %v19044_v0 = vld [vmem:[#allocation235_spill] sm:$0xff] }
 0x97a   : > { %8553 = vmatpush.bf16.msrb.mxu0 %v12837_v54  ;;  %v19042_v54 = vld [vmem:[#allocation82_spill] sm:$0xff]  ;;  %v7016_v10 = vadd.f32 %v17227_v48, %v19044_v0  ;;  %v19051_v0 = vld [vmem:[#allocation169_spill] sm:$0xff] }
 0x97b   : > { %v7671_v56 = vmax.f32 %v7650_v45, 0.0  ;;  %v7563_v34 = vadd.f32 %v7500_v41, %v7479_v35  ;;  %v7040_v62 = vpop.f32.mrf.mxu3 }
 0x97c   : > { %v7041_v39 = vadd.f32 %v7040_v62, %v19037_v63  ;;  %v19043_v62 = vld [vmem:[#allocation268_spill] sm:$0xff]  ;;  %v19045_v63 = vld [vmem:[#allocation10_spill] sm:$0xff] }
 0x97d   : > { %v7745_v33 = vrot.slane %v7671_v56, 1  ;;  %v7605_v50 = vadd.f32 %v7563_v34, %v19038_v5  ;;  %8165 = vmatpush.bf16.msra.mxu3 %v12777_v49  ;;  %8832 = vmatpush.bf16.msrb.mxu1 %v12890_v46  ;;  %v12889_v49 = vld [vmem:[%s18232_s6 + $0x4e8] sm:$0xff]  ;;  %v12888_v46 = vld [vmem:[%s18232_s6 + $0x4e0] sm:$0xff] }
 0x97e   : > { %v17461_v16 = vadd.f32 %v7153_v24, %v7041_v39  ;;  %v7241_v9 = vpop.f32.mrf.mxu1  ;;  %v7354_v29 = vpop.f32.mrf.mxu2  ;;  %8554 = vmatpush.bf16.msrb.mxu0 %v12836_v23  ;;  %v19046_v5 = vld [vmem:[#allocation267_spill] sm:$0xff] }
 0x97f   : > { %v7626_v40 = vadd.f32 %v7605_v50, %v17086_v1  ;;  %v7355_v6 = vadd.f32 %v7354_v29, %v19040_v60  ;;  %v7746_v52 = vsel %vm1533_vm0, %v7743_v2, %v7745_v33  ;;  %v8020_v1 = vrot.slane %v17406_v31, 3  ;;  %v19047_v50 = vld [vmem:[#allocation69_spill] sm:$0xff]  ;;  %v19049_v60 = vld [vmem:[#allocation43_spill] sm:$0xff] }
 0x980   : > { %v7775_v19 = vmax.f32 %v7670_v58, %v7746_v52  ;;  %v19041_v58 = vld [vmem:[#allocation298_spill] sm:$0xff] }
 0x981   : > { %v7651_v37 = vadd.f32 %v17298_v26, %v7626_v40  ;;  %v7501_v35 = vadd.f32 %v7355_v6, %v7240_v27  ;;  %8166 = vmatpush.bf16.msra.mxu3 %v12776_v61  ;;  %v7156_v34 = vadd.f32 %v19042_v54, %v19041_v58  ;;  %8833 = vmatpush.bf16.msrb.mxu1 %v12889_v49  ;;  %v19048_v27 = vld [vmem:[#allocation165_spill] sm:$0xff]  ;;  %v19050_v58 = vld [vmem:[#allocation300_spill] sm:$0xff] }
 0x982   : > { %v7128_v61 = vadd.f32 %v19047_v50, %v19046_v5  ;;  %v7242_v40 = vadd.f32 %v7241_v9, %v19048_v27  ;;  %v12773_v9 = vld [vmem:[%s18232_s6 + $0x148] sm:$0xff]  ;;  %v12887_v49 = vld [vmem:[%s18232_s6 + $0x4d8] sm:$0xff]  ;;  %v12886_v50 = vld [vmem:[%s18232_s6 + $0x4d0] sm:$0xff] }
 0x983   : > { %v7672_v45 = vmax.f32 %v7651_v37, 0.0  ;;  %v7564_v2 = vadd.f32 %v7501_v35, %v17218_v51  ;;  %v7043_v41 = vpop.f32.mrf.mxu3  ;;  %v12774_v51 = vld [vmem:[%s18232_s6 + $0x150] sm:$0xff] }
 0x984   : > { %v7044_v44 = vadd.f32 %v7043_v41, %v19043_v62  ;;  %8078 = vmatmul.bf16.vlgmr.msrb.gmra.mxu3 %v8020_v1  ;;  %v7481_v35 = vadd.f32 %v7128_v61, %v7016_v10 }
 0x985   : > { %v7807_v24 = vrot.slane %v7672_v45, 1  ;;  %v7606_v39 = vadd.f32 %v7564_v2, %v19045_v63  ;;  %8167 = vmatpush.bf16.msra.mxu3 %v12775_v21  ;;  %8834 = vmatpush.bf16.msrb.mxu1 %v12888_v46 }
 0x986   : > { %v17490_v23 = vadd.f32 %v7156_v34, %v7044_v44  ;;  %v7244_v29 = vpop.f32.mrf.mxu1  ;;  %v7356_v3 = vpop.f32.mrf.mxu2  ;;  %v12772_v34 = vld [vmem:[%s18232_s6 + $0x140] sm:$0xff] }
 0x987   : > { %v7627_v48 = vadd.f32 %v7606_v39, %v17098_v17  ;;  %v7357_v6 = vadd.f32 %v7356_v3, %v19049_v60  ;;  %v7808_v52 = vsel %vm1533_vm0, %v7745_v33, %v7807_v24  ;;  %v7245_v10 = vadd.f32 %v7244_v29, %v19051_v0  ;;  %v19052_v39 = vld [vmem:[#allocation299_spill] sm:$0xff] }
 0x988   : > { %v7832_v37 = vmax.f32 %v7671_v56, %v7808_v52  ;;  %v12885_v60 = vld [vmem:[%s18232_s6 + $0x4c8] sm:$0xff]  ;;  %v19053_v52 = vld [vmem:[#allocation242_spill] sm:$0xff] }
 0x989   : > { %v7652_v21 = vadd.f32 %v17298_v26, %v7627_v48  ;;  %v7502_v1 = vadd.f32 %v7357_v6, %v7242_v40  ;;  %8168 = vmatpush.bf16.msra.mxu3 %v12774_v51  ;;  %8835 = vmatpush.bf16.msrb.mxu1 %v12887_v49  ;;  %v7021_v46 = vadd.f32 %v17260_v11, %v19053_v52  ;;  %v19057_v49 = vld [vmem:[#allocation173_spill] sm:$0xff] }
 0x98a   : > { %v7872_v17 = vmax.f32 %v17439_v15, %v7832_v37  ;;  %v12795_v15 = vld [vmem:[%s18232_s6 + $0x1f8] sm:$0xff] }
 0x98b   : > { %v7673_v2 = vmax.f32 %v7652_v21, 0.0  ;;  %v7565_v41 = vadd.f32 %v7502_v1, %v7481_v35  ;;  %v7045_v33 = vpop.f32.mrf.mxu3  ;;  %v19055_v21 = vld [vmem:[#allocation271_spill] sm:$0xff] }
 0x98c   : > { %v17524_v40 = vpack.c.bf16 %v7872_v17, %v7872_v17 }
 0x98d   : > { %v7747_v56 = vrot.slane %v7673_v2, 1  ;;  %v7607_v54 = vadd.f32 %v7565_v41, %v19050_v58  ;;  %8169 = vmatpush.bf16.msra.mxu3 %v12773_v9  ;;  %8836 = vmatpush.bf16.msrb.mxu1 %v12886_v50  ;;  %v12793_v41 = vld [vmem:[%s18232_s6 + $0x1e8] sm:$0xff]  ;;  %v12738_v50 = vld [vmem:[%s18232_s6 + $0x30] sm:$0xff] }
 0x98e   : > { %v7246_v62 = vpop.f32.mrf.mxu1  ;;  %v7359_v44 = vpop.f32.mrf.mxu2 }
 0x98f   : > { %v7628_v63 = vadd.f32 %v7607_v54, %v17108_v7  ;;  %v7360_v51 = vadd.f32 %v7359_v44, %v19052_v39  ;;  %v7809_v5 = vsel %vm1533_vm0, %v7807_v24, %v7747_v56  ;;  %v12794_v7 = vld [vmem:[%s18232_s6 + $0x1f0] sm:$0xff]  ;;  %v7247_v58 = vadd.f32 %v7246_v62, %v19057_v49  ;;  %v19058_v54 = vld [vmem:[#allocation50_spill] sm:$0xff]  ;;  %v12871_v49 = vld [vmem:[%s18232_s6 + $0x458] sm:$0xff] }
 0x990   : > { %v7833_v61 = vmax.f32 %v7672_v45, %v7809_v5  ;;  %v12875_v45 = vld [vmem:[%s18232_s6 + $0x478] sm:$0xff]  ;;  %v12874_v44 = vld [vmem:[%s18232_s6 + $0x470] sm:$0xff]  ;;  %v12792_v39 = vld [vmem:[%s18232_s6 + $0x1e0] sm:$0xff] }
 0x991   : > { %v17522_v3 = vadd.f32 %v17298_v26, %v7628_v63  ;;  %v7503_v27 = vadd.f32 %v7360_v51, %v7245_v10  ;;  %8170 = vmatpush.bf16.msra.mxu3 %v12772_v34  ;;  %8837 = vmatpush.bf16.msrb.mxu1 %v12885_v60  ;;  %v12907_v63 = vld [vmem:[%s18232_s6 + $0x578] sm:$0xff]  ;;  %v12873_v5 = vld [vmem:[%s18232_s6 + $0x468] sm:$0xff] }
 0x992   : > { %v7873_v29 = vmax.f32 %v7775_v19, %v7833_v61  ;;  %v19054_v19 = vld [vmem:[#allocation12_spill] sm:$0xff]  ;;  %8929 = vmatpush.bf16.msrb.mxu2 %v12907_v63  ;;  %v19060_v60 = vld [vmem:[#allocation177_spill] sm:$0xff] }
 0x993   : > { %v7674_v24 = vmax.f32 %v17522_v3, 0.0  ;;  %v7566_v48 = vadd.f32 %v7503_v27, %v17251_v14  ;;  %v19056_v14 = vld [vmem:[#allocation67_spill] sm:$0xff] }
 0x994   : > { %8171 = vmatmul.bf16.vlgmr.msra.gmra.mxu3 %v17524_v40  ;;  %v7883_v6 = vpack.c.bf16 %v7873_v29, %v7873_v29  ;;  %v7133_v1 = vadd.f32 %v19056_v14, %v19055_v21  ;;  %v19059_v3 = vld [vmem:[#allocation23_spill] sm:$0xff] }
 0x995   : > { %8261 = vmatpush.bf16.msrb.mxu3 %v12795_v15  ;;  %v7748_v37 = vrot.slane %v7674_v24, 1  ;;  %v7608_v35 = vadd.f32 %v7566_v48, %v19054_v19  ;;  %v12884_v15 = vld [vmem:[%s18232_s6 + $0x4c0] sm:$0xff]  ;;  %v12737_v21 = vld [vmem:[%s18232_s6 + $0x28] sm:$0xff] }
 0x996   : > { %v7249_v9 = vpop.f32.mrf.mxu1  ;;  %v7361_v17 = vpop.f32.mrf.mxu2  ;;  %8362 = vmatmul.bf16.vlgmr.msra.gmra.mxu0 %v7883_v6  ;;  %v7483_v62 = vadd.f32 %v7133_v1, %v7021_v46  ;;  %8838 = vmatpush.bf16.msrb.mxu1 %v12884_v15  ;;  %v19061_v46 = vld [vmem:[#allocation20_spill] sm:$0xff]  ;;  %v19064_v15 = vld [vmem:[#allocation278_spill] sm:$0xff] }
 0x997   : > { %v7749_v33 = vsel %vm1533_vm0, %v7747_v56, %v7748_v37  ;;  %v7629_v11 = vadd.f32 %v7608_v35, %v17118_v32  ;;  %v7362_v34 = vadd.f32 %v7361_v17, %v19058_v54  ;;  %8738 = vmatpush.bf16.msra.mxu0 %v12875_v45  ;;  %v12739_v56 = vld [vmem:[%s18232_s6 + $0x38] sm:$0xff]  ;;  %v7250_v6 = vadd.f32 %v7249_v9, %v19060_v60  ;;  %v12872_v35 = vld [vmem:[%s18232_s6 + $0x460] sm:$0xff] }
 0x998   : > { %v17556_v0 = vmax.f32 %v7673_v2, %v7749_v33  ;;  %v12791_v45 = vld [vmem:[%s18232_s6 + $0x1d8] sm:$0xff]  ;;  %v12788_v60 = vld [vmem:[%s18232_s6 + $0x1c0] sm:$0xff] }
 0x999   : > { %8262 = vmatpush.bf16.msrb.mxu3 %v12794_v7  ;;  %v7654_v32 = vadd.f32 %v17298_v26, %v7629_v11  ;;  %v7504_v10 = vadd.f32 %v7362_v34, %v7247_v58  ;;  %v12906_v7 = vld [vmem:[%s18232_s6 + $0x570] sm:$0xff]  ;;  %v19063_v34 = vld [vmem:[#allocation6_spill] sm:$0xff] }
 0x99a   : > { %9162 = vmatpush.bf16.msra.mxu1 %v12739_v56  ;;  %8930 = vmatpush.bf16.msrb.mxu2 %v12906_v7  ;;  %v19062_v58 = vld [vmem:[#allocation248_spill] sm:$0xff]  ;;  %v19065_v56 = vld [vmem:[#allocation73_spill] sm:$0xff] }
 0x99b   : > { %v7675_v2 = vmax.f32 %v7654_v32, 0.0  ;;  %v7567_v51 = vadd.f32 %v7504_v10, %v7483_v62  ;;  %8739 = vmatpush.bf16.msra.mxu0 %v12874_v44  ;;  %v7026_v11 = vadd.f32 %v17308_v36, %v19062_v58  ;;  %v7138_v62 = vadd.f32 %v19065_v56, %v19064_v15  ;;  %v12789_v36 = vld [vmem:[%s18232_s6 + $0x1c8] sm:$0xff]  ;;  %v19069_v58 = vld [vmem:[#allocation185_spill] sm:$0xff]  ;;  %v12826_v56 = vld [vmem:[%s18232_s6 + $0x2f0] sm:$0xff] }
 0x99c   : > { %v8209_v32 = vunpack.c.l.b16 %v17524_v40  ;;  %v12870_v40 = vld [vmem:[%s18232_s6 + $0x450] sm:$0xff] }
 0x99d   : > { %8263 = vmatpush.bf16.msrb.mxu3 %v12793_v41  ;;  %v7750_v61 = vrot.slane %v7675_v2, 1  ;;  %v7609_v27 = vadd.f32 %v7567_v51, %v19059_v3  ;;  %v12790_v41 = vld [vmem:[%s18232_s6 + $0x1d0] sm:$0xff]  ;;  %v19066_v51 = vld [vmem:[#allocation181_spill] sm:$0xff]  ;;  %v19067_v3 = vld [vmem:[#allocation27_spill] sm:$0xff] }
 0x99e   : > { %v7251_v29 = vpop.f32.mrf.mxu1  ;;  %v7364_v48 = vpop.f32.mrf.mxu2  ;;  %9163 = vmatpush.bf16.msra.mxu1 %v12738_v50 }
 0x99f   : > { %v7630_v52 = vadd.f32 %v7609_v27, %v17130_v28  ;;  %v7365_v19 = vadd.f32 %v7364_v48, %v19061_v46  ;;  %8740 = vmatpush.bf16.msra.mxu0 %v12873_v5  ;;  %v7751_v14 = vsel %vm1533_vm0, %v7748_v37, %v7750_v61  ;;  %v12905_v28 = vld [vmem:[%s18232_s6 + $0x568] sm:$0xff]  ;;  %v7252_v5 = vadd.f32 %v7251_v29, %v19066_v51  ;;  %v12735_v48 = vld [vmem:[%s18232_s6 + $0x18] sm:$0xff] }
 0x9a0   : > { %v17597_v17 = vmax.f32 %v7674_v24, %v7751_v14  ;;  %8931 = vmatpush.bf16.msrb.mxu2 %v12905_v28  ;;  %v12736_v24 = vld [vmem:[%s18232_s6 + $0x20] sm:$0xff]  ;;  %v12901_v51 = vld [vmem:[%s18232_s6 + $0x548] sm:$0xff] }
 0x9a1   : > { %8264 = vmatpush.bf16.msrb.mxu3 %v12792_v39  ;;  %v17592_v1 = vadd.f32 %v17298_v26, %v7630_v52  ;;  %v7505_v9 = vadd.f32 %v7365_v19, %v7250_v6  ;;  %v17644_v6 = vpack.c.b16 %v8209_v32, %v8209_v32  ;;  %v12827_v19 = vld [vmem:[%s18232_s6 + $0x2f8] sm:$0xff] }
 0x9a2   : > { %9164 = vmatpush.bf16.msra.mxu1 %v12737_v21 }
 0x9a3   : > { %v7676_v33 = vmax.f32 %v17592_v1, 0.0  ;;  %v7568_v37 = vadd.f32 %v7505_v9, %v17281_v43  ;;  %8741 = vmatpush.bf16.msra.mxu0 %v12872_v35  ;;  %v12904_v43 = vld [vmem:[%s18232_s6 + $0x560] sm:$0xff]  ;;  %v12869_v35 = vld [vmem:[%s18232_s6 + $0x448] sm:$0xff]  ;;  %v8211_v15 = vrot.slane %v17644_v6, 2 }
 0x9a4   : > { %8932 = vmatpush.bf16.msrb.mxu2 %v12904_v43  ;;  %v19068_v9 = vld [vmem:[#allocation22_spill] sm:$0xff] }
 0x9a5   : > { %8265 = vmatpush.bf16.msrb.mxu3 %v12791_v45  ;;  %v7810_v54 = vrot.slane %v7676_v33, 1  ;;  %v7610_v44 = vadd.f32 %v7568_v37, %v19063_v34  ;;  %v7485_v45 = vadd.f32 %v7138_v62, %v7026_v11  ;;  %v12868_v62 = vld [vmem:[%s18232_s6 + $0x440] sm:$0xff] }
 0x9a6   : > { %v7254_v10 = vpop.f32.mrf.mxu1  ;;  %v7366_v63 = vpop.f32.mrf.mxu2  ;;  %9165 = vmatpush.bf16.msra.mxu1 %v12736_v24  ;;  %v12732_v1 = vld [vmem:[%s18232_s6] sm:$0xff] }
 0x9a7   : > { %v7811_v39 = vsel %vm1533_vm0, %v7750_v61, %v7810_v54  ;;  %v7631_v50 = vadd.f32 %v7610_v44, %v17140_v55  ;;  %v7367_v27 = vadd.f32 %v7366_v63, %v19067_v3  ;;  %8742 = vmatpush.bf16.msra.mxu0 %v12871_v49  ;;  %v12903_v55 = vld [vmem:[%s18232_s6 + $0x558] sm:$0xff]  ;;  %v7255_v11 = vadd.f32 %v7254_v10, %v19069_v58 }
 0x9a8   : > { %v7834_v7 = vmax.f32 %v7675_v2, %v7811_v39  ;;  %8933 = vmatpush.bf16.msrb.mxu2 %v12903_v55  ;;  %v19070_v44 = vld [vmem:[#allocation29_spill] sm:$0xff]  ;;  %v19074_v55 = vld [vmem:[#allocation71_spill] sm:$0xff] }
 0x9a9   : > { %8266 = vmatpush.bf16.msrb.mxu3 %v12790_v41  ;;  %v17635_v61 = vadd.f32 %v17298_v26, %v7631_v50  ;;  %v7506_v29 = vadd.f32 %v7367_v27, %v7252_v5  ;;  %v12902_v41 = vld [vmem:[%s18232_s6 + $0x550] sm:$0xff]  ;;  %v12931_v39 = vld [vmem:[%s18232_s6 + $0x638] sm:$0xff]  ;;  %v12825_v27 = vld [vmem:[%s18232_s6 + $0x2e8] sm:$0xff] }
 0x9aa   : > { %v7874_v2 = vmax.f32 %v17556_v0, %v7834_v7  ;;  %9166 = vmatpush.bf16.msra.mxu1 %v12735_v48  ;;  %v12734_v0 = vld [vmem:[%s18232_s6 + $0x10] sm:$0xff] }
 0x9ab   : > { %v7677_v52 = vmax.f32 %v17635_v61, 0.0  ;;  %v7569_v46 = vadd.f32 %v7506_v29, %v7485_v45  ;;  %8743 = vmatpush.bf16.msra.mxu0 %v12870_v40  ;;  %v12930_v61 = vld [vmem:[%s18232_s6 + $0x630] sm:$0xff] }
 0x9ac   : > { %v17653_v21 = vpack.c.bf16 %v7874_v2, %v7874_v2  ;;  %8934 = vmatpush.bf16.msrb.mxu2 %v12902_v41  ;;  %v19073_v29 = vld [vmem:[#allocation284_spill] sm:$0xff] }
 0x9ad   : > { %8267 = vmatpush.bf16.msrb.mxu3 %v12789_v36  ;;  %v7752_v14 = vrot.slane %v7677_v52, 1  ;;  %v7611_v28 = vadd.f32 %v7569_v46, %v19068_v9 }
 0x9ae   : > { %v7256_v37 = vpop.f32.mrf.mxu1  ;;  %v7369_v49 = vpop.f32.mrf.mxu2  ;;  %v8400_v24 = vunpack.c.l.b16 %v17653_v21  ;;  %9167 = vmatpush.bf16.msra.mxu1 %v12734_v0 }
 0x9af   : > { %v7632_v34 = vadd.f32 %v7611_v28, %v17152_v38  ;;  %v7370_v43 = vadd.f32 %v7369_v49, %v19070_v44  ;;  %8744 = vmatpush.bf16.msra.mxu0 %v12869_v35  ;;  %v12733_v38 = vld [vmem:[%s18232_s6 + $0x8] sm:$0xff]  ;;  %v7812_v10 = vsel %vm1533_vm0, %v7810_v54, %v7752_v14  ;;  %v19075_v35 = vld [vmem:[#allocation189_spill] sm:$0xff]  ;;  %v19076_v28 = vld [vmem:[#allocation32_spill] sm:$0xff] }
 0x9b0   : > { %v17673_v32 = vpack.c.b16 %v8400_v24, %v8400_v24  ;;  %v7835_v5 = vmax.f32 %v7676_v33, %v7812_v10  ;;  %8935 = vmatpush.bf16.msrb.mxu2 %v12901_v51  ;;  %v19071_v33 = vld [vmem:[#allocation254_spill] sm:$0xff]  ;;  %v7257_v0 = vadd.f32 %v7256_v37, %v19075_v35 }
 0x9b1   : > { %8268 = vmatpush.bf16.msrb.mxu3 %v12788_v60  ;;  %v7657_v63 = vadd.f32 %v17298_v26, %v7632_v34  ;;  %v7507_v36 = vadd.f32 %v7370_v43, %v7255_v11  ;;  %v7031_v7 = vadd.f32 %v17352_v18, %v19071_v33  ;;  %v7143_v60 = vadd.f32 %v19074_v55, %v19073_v29  ;;  %v12755_v18 = vld [vmem:[%s18232_s6 + $0xb8] sm:$0xff]  ;;  %v12824_v49 = vld [vmem:[%s18232_s6 + $0x2e0] sm:$0xff] }
 0x9b2   : > { %v8497_v50 = vrot.slane %v17673_v32, 3  ;;  %9168 = vmatpush.bf16.msra.mxu1 %v12733_v38  ;;  %v17694_v40 = vmax.f32 %v17597_v17, %v7835_v5  ;;  %v12900_v17 = vld [vmem:[%s18232_s6 + $0x540] sm:$0xff]  ;;  %v19081_v55 = vld [vmem:[#allocation37_spill] sm:$0xff] }
 0x9b3   : > { %v7678_v3 = vmax.f32 %v7657_v63, 0.0  ;;  %v7570_v54 = vadd.f32 %v7507_v36, %v17342_v42  ;;  %8745 = vmatpush.bf16.msra.mxu0 %v12868_v62  ;;  %v19072_v42 = vld [vmem:[#allocation24_spill] sm:$0xff]  ;;  %v7487_v58 = vadd.f32 %v7143_v60, %v7031_v7  ;;  %v12928_v62 = vld [vmem:[%s18232_s6 + $0x620] sm:$0xff]  ;;  %v12753_v63 = vld [vmem:[%s18232_s6 + $0xa8] sm:$0xff] }
 0x9b4   : > { %8269 = vmatmul.bf16.vlgmr.msrb.gmra.mxu3 %v8211_v15  ;;  %8555 = vmatmul.bf16.vlgmr.msrb.gmra.mxu0 %v8497_v50  ;;  %v19077_v15 = vld [vmem:[#allocation26_spill] sm:$0xff]  ;;  %v19078_v36 = vld [vmem:[#allocation193_spill] sm:$0xff] }
 0x9b5   : > { %8452 = vmatpush.bf16.msra.mxu3 %v12827_v19  ;;  %v7753_v48 = vrot.slane %v7678_v3, 1  ;;  %v7612_v45 = vadd.f32 %v7570_v54, %v19072_v42  ;;  %8936 = vmatpush.bf16.msrb.mxu2 %v12900_v17  ;;  %v19079_v5 = vld [vmem:[#allocation38_spill] sm:$0xff]  ;;  %v12822_v54 = vld [vmem:[%s18232_s6 + $0x2d0] sm:$0xff]  ;;  %v12927_v42 = vld [vmem:[%s18232_s6 + $0x618] sm:$0xff] }
 0x9b6   : > { %v7259_v2 = vpop.f32.mrf.mxu1  ;;  %v7371_v46 = vpop.f32.mrf.mxu2  ;;  %9169 = vmatpush.bf16.msra.mxu1 %v12732_v1 }
 0x9b7   : > { %9101 = vmatpush.bf16.msrb.mxu0 %v12931_v39  ;;  %v7754_v19 = vsel %vm1533_vm0, %v7752_v14, %v7753_v48  ;;  %v7633_v9 = vadd.f32 %v7612_v45, %v17162_v53  ;;  %v7372_v41 = vadd.f32 %v7371_v46, %v19076_v28  ;;  %v12929_v14 = vld [vmem:[%s18232_s6 + $0x628] sm:$0xff]  ;;  %v12754_v53 = vld [vmem:[%s18232_s6 + $0xb0] sm:$0xff]  ;;  %v7260_v39 = vadd.f32 %v7259_v2, %v19078_v36  ;;  %v19082_v46 = vld [vmem:[#allocation290_spill] sm:$0xff] }
 0x9b8   : > { %v7778_v24 = vmax.f32 %v7677_v52, %v7754_v19  ;;  %v12823_v52 = vld [vmem:[%s18232_s6 + $0x2d8] sm:$0xff]  ;;  %v12926_v2 = vld [vmem:[%s18232_s6 + $0x610] sm:$0xff] }
 0x9b9   : > { %8453 = vmatpush.bf16.msra.mxu3 %v12826_v56  ;;  %v7658_v11 = vadd.f32 %v17298_v26, %v7633_v9  ;;  %v7508_v34 = vadd.f32 %v7372_v41, %v7257_v0  ;;  %9225 = vmatpush.bf16.msra.mxu2 %v12755_v18  ;;  %v19083_v18 = vld [vmem:[#allocation72_spill] sm:$0xff]  ;;  %v12751_v0 = vld [vmem:[%s18232_s6 + $0x98] sm:$0xff] }
 0x9ba   : > { %v19084_v9 = vld [vmem:[#allocation196_spill] sm:$0xff] }
 0x9bb   : > { %9102 = vmatpush.bf16.msrb.mxu0 %v12930_v61  ;;  %v7679_v37 = vmax.f32 %v7658_v11, 0.0  ;;  %v7571_v44 = vadd.f32 %v7508_v34, %v7487_v58  ;;  %v12820_v11 = vld [vmem:[%s18232_s6 + $0x2c0] sm:$0xff]  ;;  %v19086_v36 = vld [vmem:[#allocation28_spill] sm:$0xff] }
 0x9bd   : > { %8454 = vmatpush.bf16.msra.mxu3 %v12825_v27  ;;  %v7755_v43 = vrot.slane %v7679_v37, 1  ;;  %v7613_v56 = vadd.f32 %v7571_v44, %v19077_v15  ;;  %9226 = vmatpush.bf16.msra.mxu2 %v12754_v53  ;;  %v12750_v15 = vld [vmem:[%s18232_s6 + $0x90] sm:$0xff] }
 0x9be   : > { %v7261_v38 = vpop.f32.mrf.mxu1  ;;  %v7374_v10 = vpop.f32.mrf.mxu2 }
 0x9bf   : > { %9103 = vmatpush.bf16.msrb.mxu0 %v12929_v14  ;;  %v7634_v51 = vadd.f32 %v7613_v56, %v17174_v47  ;;  %v7375_v50 = vadd.f32 %v7374_v10, %v19079_v5  ;;  %v7756_v27 = vsel %vm1533_vm0, %v7753_v48, %v7755_v43  ;;  %v12752_v47 = vld [vmem:[%s18232_s6 + $0xa0] sm:$0xff]  ;;  %v19080_v48 = vld [vmem:[#allocation260_spill] sm:$0xff]  ;;  %v7262_v28 = vadd.f32 %v7261_v38, %v19084_v9  ;;  %v12859_v14 = vld [vmem:[%s18232_s6 + $0x3f8] sm:$0xff] }
 0x9c0   : > { %v17744_v1 = vmax.f32 %v7678_v3, %v7756_v27  ;;  %v12821_v3 = vld [vmem:[%s18232_s6 + $0x2c8] sm:$0xff]  ;;  %v7036_v17 = vadd.f32 %v17393_v30, %v19080_v48  ;;  %v12858_v38 = vld [vmem:[%s18232_s6 + $0x3f0] sm:$0xff] }
 0x9c1   : > { %8455 = vmatpush.bf16.msra.mxu3 %v12824_v49  ;;  %v7659_v33 = vadd.f32 %v17298_v26, %v7634_v51  ;;  %v7509_v7 = vadd.f32 %v7375_v50, %v7260_v39  ;;  %9227 = vmatpush.bf16.msra.mxu2 %v12753_v63  ;;  %v19085_v49 = vld [vmem:[#allocation41_spill] sm:$0xff]  ;;  %v19087_v27 = vld [vmem:[#allocation200_spill] sm:$0xff] }
 0x9c3   : > { %9104 = vmatpush.bf16.msrb.mxu0 %v12928_v62  ;;  %v7680_v45 = vmax.f32 %v7659_v33, 0.0  ;;  %v7572_v61 = vadd.f32 %v7509_v7, %v17383_v59  ;;  %v7148_v59 = vadd.f32 %v19083_v18, %v19082_v46  ;;  %v8402_v62 = vrot.slane %v17673_v32, 1  ;;  %v12748_v46 = vld [vmem:[%s18232_s6 + $0x80] sm:$0xff] }
 0x9c5   : > { %8456 = vmatpush.bf16.msra.mxu3 %v12823_v52  ;;  %v7813_v29 = vrot.slane %v7680_v45, 1  ;;  %v7614_v60 = vadd.f32 %v7572_v61, %v19081_v55  ;;  %9228 = vmatpush.bf16.msra.mxu2 %v12752_v47  ;;  %v7489_v53 = vadd.f32 %v7148_v59, %v7036_v17 }
 0x9c6   : > { %v7264_v19 = vpop.f32.mrf.mxu1  ;;  %v7376_v35 = vpop.f32.mrf.mxu2 }
 0x9c7   : > { %9105 = vmatpush.bf16.msrb.mxu0 %v12927_v42  ;;  %v7814_v30 = vsel %vm1533_vm0, %v7755_v43, %v7813_v29  ;;  %v7635_v41 = vadd.f32 %v7614_v60, %v17183_v4  ;;  %v7377_v58 = vadd.f32 %v7376_v35, %v19085_v49  ;;  %v12925_v4 = vld [vmem:[%s18232_s6 + $0x608] sm:$0xff]  ;;  %v7265_v33 = vadd.f32 %v7264_v19, %v19087_v27  ;;  %v19088_v42 = vld [vmem:[#allocation45_spill] sm:$0xff]  ;;  %v12856_v19 = vld [vmem:[%s18232_s6 + $0x3e0] sm:$0xff] }
 0x9c8   : > { %v7836_v34 = vmax.f32 %v7679_v37, %v7814_v30  ;;  %v12786_v30 = vld [vmem:[%s18232_s6 + $0x1b0] sm:$0xff] }
 0x9c9   : > { %8457 = vmatpush.bf16.msra.mxu3 %v12822_v54  ;;  %v7660_v44 = vadd.f32 %v17298_v26, %v7635_v41  ;;  %v7510_v52 = vadd.f32 %v7377_v58, %v7262_v28  ;;  %9229 = vmatpush.bf16.msra.mxu2 %v12751_v0  ;;  %v12749_v54 = vld [vmem:[%s18232_s6 + $0x88] sm:$0xff]  ;;  %v19090_v41 = vld [vmem:[#allocation205_spill] sm:$0xff] }
 0x9ca   : > { %v7876_v43 = vmax.f32 %v7778_v24, %v7836_v34  ;;  %v12924_v24 = vld [vmem:[%s18232_s6 + $0x600] sm:$0xff] }
 0x9cb   : > { %9106 = vmatpush.bf16.msrb.mxu0 %v12926_v2  ;;  %v7681_v37 = vmax.f32 %v7660_v44, 0.0  ;;  %v7573_v56 = vadd.f32 %v7510_v52, %v7489_v53  ;;  %v12855_v44 = vld [vmem:[%s18232_s6 + $0x3d8] sm:$0xff]  ;;  %v12961_v52 = vld [vmem:[%s18231_s5] ss:$0 sm:$0xff] }
 0x9cc   : > { %v17789_v10 = vpack.c.bf16 %v7876_v43, %v7876_v43 }
 0x9cd   : > { %8458 = vmatpush.bf16.msra.mxu3 %v12821_v3  ;;  %v7757_v63 = vrot.slane %v7681_v37, 1  ;;  %v7615_v39 = vadd.f32 %v7573_v56, %v19086_v36  ;;  %9230 = vmatpush.bf16.msra.mxu2 %v12750_v15  ;;  %v12857_v3 = vld [vmem:[%s18232_s6 + $0x3e8] sm:$0xff] }
 0x9ce   : > { %v7266_v51 = vpop.f32.mrf.mxu1  ;;  %v7379_v5 = vpop.f32.mrf.mxu2  ;;  %v8686_v50 = vunpack.c.l.b16 %v17789_v10 }
 0x9cf   : > { %9107 = vmatpush.bf16.msrb.mxu0 %v12925_v4  ;;  %v7636_v7 = vadd.f32 %v7615_v39, %v17198_v20  ;;  %v7380_v47 = vadd.f32 %v7379_v5, %v19088_v42  ;;  %v7815_v61 = vsel %vm1533_vm0, %v7813_v29, %v7757_v63  ;;  %v12787_v20 = vld [vmem:[%s18232_s6 + $0x1b8] sm:$0xff]  ;;  %v7267_v49 = vadd.f32 %v7266_v51, %v19090_v41  ;;  %v12784_v39 = vld [vmem:[%s18232_s6 + $0x1a0] sm:$0xff]  ;;  %v12853_v42 = vld [vmem:[%s18232_s6 + $0x3c8] sm:$0xff] }
 0x9d0   : > { %v17806_v48 = vpack.c.b16 %v8686_v50, %v8686_v50  ;;  %v7837_v17 = vmax.f32 %v7680_v45, %v7815_v61  ;;  %v19093_v51 = vld [vmem:[#allocation210_spill] sm:$0xff]  ;;  %v12921_v41 = vld [vmem:[%s18232_s6 + $0x5e8] sm:$0xff] }
 0x9d1   : > { %8459 = vmatpush.bf16.msra.mxu3 %v12820_v11  ;;  %v7661_v55 = vadd.f32 %v17298_v26, %v7636_v7  ;;  %v7511_v60 = vadd.f32 %v7380_v47, %v7265_v33  ;;  %9231 = vmatpush.bf16.msra.mxu2 %v12749_v54  ;;  %v12803_v26 = vld [vmem:[%s18232_s6 + $0x238] sm:$0xff]  ;;  %v19091_v11 = vld [vmem:[#allocation48_spill] sm:$0xff]  ;;  %v19094_v54 = vld [vmem:[#allocation15_spill] sm:$0xff] }
 0x9d2   : > { %v8688_v2 = vrot.slane %v17806_v48, 2  ;;  %v7877_v29 = vmax.f32 %v17744_v1, %v7837_v17  ;;  %v19089_v1 = vld [vmem:[#allocation44_spill] sm:$0xff]  ;;  %v12800_v33 = vld [vmem:[%s18232_s6 + $0x220] sm:$0xff] }
 0x9d3   : > { %9108 = vmatpush.bf16.msrb.mxu0 %v12924_v24  ;;  %v7682_v18 = vmax.f32 %v7661_v55, 0.0  ;;  %v7574_v45 = vadd.f32 %v7511_v60, %v17433_v13  ;;  %v12799_v60 = vld [vmem:[%s18232_s6 + $0x218] sm:$0xff] }
 0x9d4   : > { %8460 = vmatmul.bf16.vlgmr.msra.gmra.mxu3 %v8402_v62  ;;  %8746 = vmatmul.bf16.vlgmr.msra.gmra.mxu0 %v8688_v2  ;;  %v7887_v59 = vpack.c.bf16 %v7877_v29, %v7877_v29  ;;  %v12854_v62 = vld [vmem:[%s18232_s6 + $0x3d0] sm:$0xff]  ;;  %v19095_v29 = vld [vmem:[#allocation47_spill] sm:$0xff] }
 0x9d5   : > { %8640 = vmatpush.bf16.msrb.mxu3 %v12859_v14  ;;  %v7758_v35 = vrot.slane %v7682_v18, 1  ;;  %v7616_v0 = vadd.f32 %v7574_v45, %v19089_v1  ;;  %9232 = vmatpush.bf16.msra.mxu2 %v12748_v46  ;;  %v12802_v14 = vld [vmem:[%s18232_s6 + $0x230] sm:$0xff] }
 0x9d6   : > { %v7269_v13 = vpop.f32.mrf.mxu1  ;;  %v7381_v9 = vpop.f32.mrf.mxu2  ;;  %8839 = vmatmul.bf16.vlgmr.msrb.gmra.mxu1 %v7887_v59 }
 0x9d7   : > { %9349 = vmatpush.bf16.msra.mxu0 %v12787_v20  ;;  %v7759_v28 = vsel %vm1533_vm0, %v7757_v63, %v7758_v35  ;;  %v7637_v58 = vadd.f32 %v7616_v0, %v17213_v25  ;;  %v7382_v34 = vadd.f32 %v7381_v9, %v19091_v11  ;;  %9412 = vmatpush.bf16.msrb.mxu1 %v12803_v26  ;;  %v12785_v25 = vld [vmem:[%s18232_s6 + $0x1a8] sm:$0xff]  ;;  %v19092_v63 = vld [vmem:[#allocation52_spill] sm:$0xff]  ;;  %v12852_v20 = vld [vmem:[%s18232_s6 + $0x3c0] sm:$0xff] }
 0x9d8   : > { %v7780_v53 = vmax.f32 %v7681_v37, %v7759_v28  ;;  %v12801_v37 = vld [vmem:[%s18232_s6 + $0x228] sm:$0xff]  ;;  %v7270_v5 = vadd.f32 %v7269_v13, %v19093_v51  ;;  %v12922_v0 = vld [vmem:[%s18232_s6 + $0x5f0] sm:$0xff] }
 0x9d9   : > { %8641 = vmatpush.bf16.msrb.mxu3 %v12858_v38  ;;  %v7662_v4 = vadd.f32 %v12961_v52, %v7637_v58  ;;  %v7512_v43 = vadd.f32 %v7382_v34, %v7267_v49  ;;  %v12797_v13 = vld [vmem:[%s18232_s6 + $0x208] sm:$0xff]  ;;  %v12780_v49 = vld [vmem:[%s18232_s6 + $0x180] sm:$0xff]  ;;  %v12867_v34 = vld [vmem:[%s18232_s6 + $0x438] sm:$0xff] }
 0x9da   : > { %v12796_v58 = vld [vmem:[%s18232_s6 + $0x200] sm:$0xff]  ;;  %v12849_v51 = vld [vmem:[%s18232_s6 + $0x3a8] sm:$0xff] }
 0x9db   : > { %9350 = vmatpush.bf16.msra.mxu0 %v12786_v30  ;;  %v7683_v15 = vmax.f32 %v7662_v4, 0.0  ;;  %v7575_v56 = vadd.f32 %v7512_v43, %v17461_v16  ;;  %9413 = vmatpush.bf16.msrb.mxu1 %v12802_v14 }
 0x9dd   : > { %8642 = vmatpush.bf16.msrb.mxu3 %v12857_v3  ;;  %v7760_v38 = vrot.slane %v7683_v15, 1  ;;  %v7617_v36 = vadd.f32 %v7575_v56, %v19092_v63  ;;  %v9362_v56 = vrot.slane %v17644_v6, 3 }
 0x9de   : > { %v7271_v24 = vpop.f32.mrf.mxu1  ;;  %v7384_v16 = vpop.f32.mrf.mxu2 }
 0x9df   : > { %9351 = vmatpush.bf16.msra.mxu0 %v12785_v25  ;;  %v7638_v50 = vadd.f32 %v7617_v36, %v17231_v57  ;;  %v7385_v27 = vadd.f32 %v7384_v16, %v19094_v54  ;;  %9414 = vmatpush.bf16.msrb.mxu1 %v12801_v37  ;;  %v7761_v7 = vsel %vm1533_vm0, %v7758_v35, %v7760_v38  ;;  %v12783_v57 = vld [vmem:[%s18232_s6 + $0x198] sm:$0xff]  ;;  %v12866_v37 = vld [vmem:[%s18232_s6 + $0x430] sm:$0xff]  ;;  %v12817_v16 = vld [vmem:[%s18232_s6 + $0x2a8] sm:$0xff] }
 0x9e0   : > { %v7781_v47 = vmax.f32 %v7682_v18, %v7761_v7  ;;  %v12923_v18 = vld [vmem:[%s18232_s6 + $0x5f8] sm:$0xff]  ;;  %v12850_v36 = vld [vmem:[%s18232_s6 + $0x3b0] sm:$0xff]  ;;  %v12816_v54 = vld [vmem:[%s18232_s6 + $0x2a0] sm:$0xff] }
 0x9e1   : > { %8643 = vmatpush.bf16.msrb.mxu3 %v12856_v19  ;;  %v7663_v61 = vadd.f32 %v12961_v52, %v7638_v50  ;;  %v7513_v3 = vadd.f32 %v7385_v27, %v7270_v5  ;;  %v12798_v19 = vld [vmem:[%s18232_s6 + $0x210] sm:$0xff]  ;;  %v12851_v25 = vld [vmem:[%s18232_s6 + $0x3b8] sm:$0xff]  ;;  %v12864_v5 = vld [vmem:[%s18232_s6 + $0x420] sm:$0xff] }
 0x9e2   : > { %v12918_v24 = vld [vmem:[%s18232_s6 + $0x5d0] sm:$0xff]  ;;  %v12917_v50 = vld [vmem:[%s18232_s6 + $0x5c8] sm:$0xff]  ;;  %v12863_v7 = vld [vmem:[%s18232_s6 + $0x418] sm:$0xff] }
 0x9e3   : > { %9352 = vmatpush.bf16.msra.mxu0 %v12784_v39  ;;  %v7684_v17 = vmax.f32 %v7663_v61, 0.0  ;;  %v7576_v55 = vadd.f32 %v7513_v3, %v17490_v23  ;;  %9415 = vmatpush.bf16.msrb.mxu1 %v12800_v33  ;;  %v12782_v23 = vld [vmem:[%s18232_s6 + $0x190] sm:$0xff]  ;;  %v12865_v39 = vld [vmem:[%s18232_s6 + $0x428] sm:$0xff]  ;;  %v12848_v33 = vld [vmem:[%s18232_s6 + $0x3a0] sm:$0xff]  ;;  %v9175_v61 = vrot.slane %v17406_v31, 2 }
 0x9e4   : > { %v12771_v3 = vld [vmem:[%s18232_s6 + $0x138] sm:$0xff]  ;;  %v12814_v31 = vld [vmem:[%s18232_s6 + $0x290] sm:$0xff] }
 0x9e5   : > { %8644 = vmatpush.bf16.msrb.mxu3 %v12855_v44  ;;  %v7816_v2 = vrot.slane %v7684_v17, 1  ;;  %v7618_v46 = vadd.f32 %v7576_v55, %v19095_v29  ;;  %v12920_v44 = vld [vmem:[%s18232_s6 + $0x5e0] sm:$0xff]  ;;  %v12862_v55 = vld [vmem:[%s18232_s6 + $0x410] sm:$0xff]  ;;  %v12861_v29 = vld [vmem:[%s18232_s6 + $0x408] sm:$0xff] }
 0x9e6   : > { %v7386_v45 = vpop.f32.mrf.mxu2  ;;  %9170 = vmatmul.bf16.vlgmr.msra.gmra.mxu1 %v17395_v8  ;;  %v12781_v8 = vld [vmem:[%s18232_s6 + $0x188] sm:$0xff] }
 0x9e7   : > { %9353 = vmatpush.bf16.msra.mxu0 %v12783_v57  ;;  %v7817_v26 = vsel %vm1533_vm0, %v7760_v38, %v7816_v2  ;;  %v7639_v59 = vadd.f32 %v7618_v46, %v17246_v22  ;;  %9416 = vmatpush.bf16.msrb.mxu1 %v12799_v60  ;;  %v12818_v38 = vld [vmem:[%s18232_s6 + $0x2b0] sm:$0xff]  ;;  %v12847_v57 = vld [vmem:[%s18232_s6 + $0x398] sm:$0xff]  ;;  %v12813_v46 = vld [vmem:[%s18232_s6 + $0x288] sm:$0xff] }
 0x9e8   : > { %v7838_v35 = vmax.f32 %v7683_v15, %v7817_v26  ;;  %v12860_v45 = vld [vmem:[%s18232_s6 + $0x400] sm:$0xff] }
 0x9e9   : > { %8645 = vmatpush.bf16.msrb.mxu3 %v12854_v62  ;;  %v7664_v1 = vadd.f32 %v12961_v52, %v7639_v59  ;;  %v12819_v52 = vld [vmem:[%s18232_s6 + $0x2b8] sm:$0xff]  ;;  %v12812_v26 = vld [vmem:[%s18232_s6 + $0x280] sm:$0xff] }
 0x9ea   : > { %v7878_v30 = vmax.f32 %v7780_v53, %v7838_v35  ;;  %v12919_v62 = vld [vmem:[%s18232_s6 + $0x5d8] sm:$0xff]  ;;  %v12768_v59 = vld [vmem:[%s18232_s6 + $0x120] sm:$0xff] }
 0x9eb   : > { %9354 = vmatpush.bf16.msra.mxu0 %v12782_v23  ;;  %v7685_v22 = vmax.f32 %v7664_v1, 0.0  ;;  %9417 = vmatpush.bf16.msrb.mxu1 %v12798_v19  ;;  %v12845_v23 = vld [vmem:[%s18232_s6 + $0x388] sm:$0xff]  ;;  %v12883_v19 = vld [vmem:[%s18232_s6 + $0x4b8] sm:$0xff]  ;;  %v12844_v1 = vld [vmem:[%s18232_s6 + $0x380] sm:$0xff] }
 0x9ec   : > { %v17898_v9 = vpack.c.bf16 %v7878_v30, %v7878_v30  ;;  %v12767_v30 = vld [vmem:[%s18232_s6 + $0x118] sm:$0xff] }
 0x9ed   : > { %8646 = vmatpush.bf16.msrb.mxu3 %v12853_v42  ;;  %v7818_v28 = vrot.slane %v7685_v22, 1  ;;  %v12916_v42 = vld [vmem:[%s18232_s6 + $0x5c0] sm:$0xff]  ;;  %v12882_v22 = vld [vmem:[%s18232_s6 + $0x4b0] sm:$0xff] }
 0x9ef   : > { %9355 = vmatpush.bf16.msra.mxu0 %v12781_v8  ;;  %9418 = vmatpush.bf16.msrb.mxu1 %v12797_v13  ;;  %v7819_v11 = vsel %vm1533_vm0, %v7816_v2, %v7818_v28  ;;  %v12846_v2 = vld [vmem:[%s18232_s6 + $0x390] sm:$0xff]  ;;  %v9610_v8 = vrot.slane %v17806_v48, 1 }
 0x9f0   : > { %v7839_v53 = vmax.f32 %v7684_v17, %v7819_v11  ;;  %v9299_v17 = vrot.slane %v17644_v6, 1  ;;  %v12914_v28 = vld [vmem:[%s18232_s6 + $0x5b0] sm:$0xff]  ;;  %v12880_v11 = vld [vmem:[%s18232_s6 + $0x4a0] sm:$0xff] }
 0x9f1   : > { %8647 = vmatpush.bf16.msrb.mxu3 %v12852_v20  ;;  %v12770_v20 = vld [vmem:[%s18232_s6 + $0x130] sm:$0xff] }
 0x9f2   : > { %v7879_v43 = vmax.f32 %v7781_v47, %v7839_v53  ;;  %v12815_v47 = vld [vmem:[%s18232_s6 + $0x298] sm:$0xff]  ;;  %v12912_v53 = vld [vmem:[%s18232_s6 + $0x5a0] sm:$0xff] }
 0x9f3   : > { %9356 = vmatpush.bf16.msra.mxu0 %v12780_v49  ;;  %9419 = vmatpush.bf16.msrb.mxu1 %v12796_v58  ;;  %v12766_v49 = vld [vmem:[%s18232_s6 + $0x110] sm:$0xff] }
 0x9f4   : > { %8648 = vmatmul.bf16.vlgmr.msrb.gmra.mxu3 %v17789_v10  ;;  %v8877_v10 = vunpack.c.l.b16 %v17898_v9  ;;  %v7889_v15 = vpack.c.bf16 %v7879_v43, %v7879_v43  ;;  %v12835_v43 = vld [vmem:[%s18232_s6 + $0x338] sm:$0xff] }
 0x9f5   : > { %9024 = vmatpush.bf16.msra.mxu3 %v12923_v18  ;;  %v12769_v18 = vld [vmem:[%s18232_s6 + $0x128] sm:$0xff] }
 0x9f6   : > { %v17914_v14 = vpack.c.b16 %v8877_v10, %v8877_v10  ;;  %9109 = vmatmul.bf16.vlgmr.msrb.gmra.mxu0 %v7889_v15  ;;  %9420 = vmatmul.bf16.vlgmr.msrb.gmra.mxu1 %v9362_v56  ;;  %v12881_v10 = vld [vmem:[%s18232_s6 + $0x4a8] sm:$0xff]  ;;  %v12878_v15 = vld [vmem:[%s18232_s6 + $0x490] sm:$0xff]  ;;  %v7881_v56 = vpack.c.bf16 %v17416_v12, %v17416_v12 }
 0x9f7   : > { %9660 = vmatpush.bf16.msra.mxu1 %v12867_v34  ;;  %9597 = vmatpush.bf16.msrb.mxu0 %v12851_v25  ;;  %v17936_v63 = vpop.f32.mrf.mxu3  ;;  %v12911_v25 = vld [vmem:[%s18232_s6 + $0x598] sm:$0xff]  ;;  %v12833_v12 = vld [vmem:[%s18232_s6 + $0x328] sm:$0xff] }
 0x9f8   : > { %v8879_v4 = vrot.slane %v17914_v14, 1  ;;  %v8974_v60 = vrot.slane %v17914_v14, 3 }
 0x9f9   : > { %9025 = vmatpush.bf16.msra.mxu3 %v12922_v0  ;;  %v12915_v0 = vld [vmem:[%s18232_s6 + $0x5b8] sm:$0xff] }
 0x9fa   : > { %8937 = vmatmul.bf16.vlgmr.msrb.gmra.mxu2 %v8879_v4 }
 0x9fb   : > { %9473 = vmatpush.bf16.msrb.mxu2 %v12819_v52  ;;  %9661 = vmatpush.bf16.msra.mxu1 %v12866_v37  ;;  %v12879_v52 = vld [vmem:[%s18232_s6 + $0x498] sm:$0xff]  ;;  %v12834_v37 = vld [vmem:[%s18232_s6 + $0x330] sm:$0xff] }
 0x9fc   : > { %9598 = vmatpush.bf16.msrb.mxu0 %v12850_v36  ;;  %v12909_v36 = vld [vmem:[%s18232_s6 + $0x588] sm:$0xff] }
 0x9fd   : > { %9026 = vmatpush.bf16.msra.mxu3 %v12921_v41  ;;  %v7885_v41 = vpack.c.bf16 %v17694_v40, %v17694_v40  ;;  %v12765_v40 = vld [vmem:[%s18232_s6 + $0x108] sm:$0xff] }
 0x9ff   : > { %9474 = vmatpush.bf16.msrb.mxu2 %v12818_v38  ;;  %9662 = vmatpush.bf16.msra.mxu1 %v12865_v39  ;;  %v7986_v27 = vpop.f32.mrf.mxu3  ;;  %v12877_v38 = vld [vmem:[%s18232_s6 + $0x488] sm:$0xff]  ;;  %v12876_v39 = vld [vmem:[%s18232_s6 + $0x480] sm:$0xff] }
 0xa00   : > { %9599 = vmatpush.bf16.msrb.mxu0 %v12849_v51  ;;  %v9673_v51 = vrot.slane %v17806_v48, 3  ;;  %v12830_v27 = vld [vmem:[%s18232_s6 + $0x310] sm:$0xff]  ;;  %v12829_v48 = vld [vmem:[%s18232_s6 + $0x308] sm:$0xff] }
 0xa01   : > { %9027 = vmatpush.bf16.msra.mxu3 %v12920_v44  ;;  %v12764_v44 = vld [vmem:[%s18232_s6 + $0x100] sm:$0xff] }
 0xa03   : > { %9475 = vmatpush.bf16.msrb.mxu2 %v12817_v16  ;;  %9663 = vmatpush.bf16.msra.mxu1 %v12864_v5  ;;  %v12908_v16 = vld [vmem:[%s18232_s6 + $0x580] sm:$0xff]  ;;  %v12831_v5 = vld [vmem:[%s18232_s6 + $0x318] sm:$0xff] }
 0xa04   : > { %9600 = vmatpush.bf16.msrb.mxu0 %v12848_v33 }
 0xa05   : > { %9028 = vmatpush.bf16.msra.mxu3 %v12919_v62  ;;  %v12910_v62 = vld [vmem:[%s18232_s6 + $0x590] sm:$0xff] }
 0xa06   : > { %9357 = vmatmul.bf16.vlgmr.msra.gmra.mxu0 %v9299_v17  ;;  %v12896_v17 = vld [vmem:[%s18232_s6 + $0x520] sm:$0xff] }
 0xa07   : > { %9476 = vmatpush.bf16.msrb.mxu2 %v12816_v54  ;;  %9664 = vmatpush.bf16.msra.mxu1 %v12863_v7  ;;  %v17992_v6 = vpop.f32.mrf.mxu3  ;;  %v9797_v54 = vrot.slane %v17914_v14, 2 }
 0xa08   : > { %9601 = vmatpush.bf16.msrb.mxu0 %v12847_v57  ;;  %v12897_v57 = vld [vmem:[%s18232_s6 + $0x528] sm:$0xff] }
 0xa09   : > { %9029 = vmatpush.bf16.msra.mxu3 %v12918_v24  ;;  %v12832_v24 = vld [vmem:[%s18232_s6 + $0x320] sm:$0xff] }
 0xa0a   : > { %9233 = vmatmul.bf16.vlgmr.msra.gmra.mxu2 %v9175_v61  ;;  %v9486_v61 = vrot.slane %v17673_v32, 2  ;;  %v12895_v32 = vld [vmem:[%s18232_s6 + $0x518] sm:$0xff] }
 0xa0b   : > { %9477 = vmatpush.bf16.msrb.mxu2 %v12815_v47  ;;  %9665 = vmatpush.bf16.msra.mxu1 %v12862_v55  ;;  %v12899_v47 = vld [vmem:[%s18232_s6 + $0x538] sm:$0xff]  ;;  %v12894_v55 = vld [vmem:[%s18232_s6 + $0x510] sm:$0xff] }
 0xa0c   : > { %9602 = vmatpush.bf16.msrb.mxu0 %v12846_v2  ;;  %v12893_v2 = vld [vmem:[%s18232_s6 + $0x508] sm:$0xff] }
 0xa0d   : > { %9030 = vmatpush.bf16.msra.mxu3 %v12917_v50 }
 0xa0f   : > { %9478 = vmatpush.bf16.msrb.mxu2 %v12814_v31  ;;  %9666 = vmatpush.bf16.msra.mxu1 %v12861_v29  ;;  %v8081_v35 = vpop.f32.mrf.mxu3  ;;  %v12892_v29 = vld [vmem:[%s18232_s6 + $0x500] sm:$0xff] }
 0xa10   : > { %9603 = vmatpush.bf16.msrb.mxu0 %v12845_v23 }
 0xa11   : > { %9031 = vmatpush.bf16.msra.mxu3 %v12916_v42  ;;  %v12828_v42 = vld [vmem:[%s18232_s6 + $0x300] sm:$0xff] }
 0xa13   : > { %9479 = vmatpush.bf16.msrb.mxu2 %v12813_v46  ;;  %9667 = vmatpush.bf16.msra.mxu1 %v12860_v45  ;;  %v18034_v13 = vpop.f32.mrf.mxu0 }
 0xa14   : > { %9032 = vmatmul.bf16.vlgmr.msra.gmra.mxu3 %v8974_v60  ;;  %9604 = vmatpush.bf16.msrb.mxu0 %v12844_v1 }
 0xa15   : > { %9286 = vmatpush.bf16.msrb.mxu3 %v12771_v3  ;;  %v12898_v3 = vld [vmem:[%s18232_s6 + $0x530] sm:$0xff] }
 0xa16   : > { %9668 = vmatmul.bf16.vlgmr.msra.gmra.mxu1 %v9610_v8 }
 0xa17   : > { %9480 = vmatpush.bf16.msrb.mxu2 %v12812_v26  ;;  %9605 = vmatmul.bf16.vlgmr.msrb.gmra.mxu0 %v7885_v41  ;;  %v18048_v58 = vpop.f32.mrf.mxu3 }
 0xa18   : > { %9847 = vmatpush.bf16.msra.mxu0 %v12915_v0 }
 0xa19   : > { %9287 = vmatpush.bf16.msrb.mxu3 %v12770_v20 }
 0xa1a   : > { %9481 = vmatmul.bf16.vlgmr.msrb.gmra.mxu2 %v17653_v21  ;;  %v12913_v21 = vld [vmem:[%s18232_s6 + $0x5a8] sm:$0xff] }
 0xa1b   : > { %9723 = vmatpush.bf16.msra.mxu2 %v12883_v19  ;;  %v8365_v34 = vpop.f32.mrf.mxu0 }
 0xa1c   : > { %9848 = vmatpush.bf16.msra.mxu0 %v12914_v28 }
 0xa1d   : > { %9288 = vmatpush.bf16.msrb.mxu3 %v12769_v18 }
 0xa1f   : > { %9724 = vmatpush.bf16.msra.mxu2 %v12882_v22  ;;  %v8174_v4 = vpop.f32.mrf.mxu3 }
 0xa20   : > { %9849 = vmatpush.bf16.msra.mxu0 %v12913_v21 }
 0xa21   : > { %9289 = vmatpush.bf16.msrb.mxu3 %v12768_v59 }
 0xa23   : > { %9725 = vmatpush.bf16.msra.mxu2 %v12881_v10 }
 0xa24   : > { %9850 = vmatpush.bf16.msra.mxu0 %v12912_v53 }
 0xa25   : > { %9290 = vmatpush.bf16.msrb.mxu3 %v12767_v30 }
 0xa27   : > { %9726 = vmatpush.bf16.msra.mxu2 %v12880_v11 }
 0xa28   : > { %9851 = vmatpush.bf16.msra.mxu0 %v12911_v25 }
 0xa29   : > { %9291 = vmatpush.bf16.msrb.mxu3 %v12766_v49 }
 0xa2b   : > { %9727 = vmatpush.bf16.msra.mxu2 %v12879_v52 }
 0xa2c   : > { %9852 = vmatpush.bf16.msra.mxu0 %v12910_v62 }
 0xa2d   : > { %9292 = vmatpush.bf16.msrb.mxu3 %v12765_v40 }
 0xa2f   : > { %9728 = vmatpush.bf16.msra.mxu2 %v12878_v15 }
 0xa30   : > { %9853 = vmatpush.bf16.msra.mxu0 %v12909_v36 }
 0xa31   : > { %9293 = vmatpush.bf16.msrb.mxu3 %v12764_v44  ;;  %v18107_v50 = vpop.f32.mrf.mxu0 }
 0xa33   : > { %9729 = vmatpush.bf16.msra.mxu2 %v12877_v38 }
 0xa34   : > { %9294 = vmatmul.bf16.vlgmr.msrb.gmra.mxu3 %v7881_v56  ;;  %9854 = vmatpush.bf16.msra.mxu0 %v12908_v16 }
 0xa35   : > { %9536 = vmatpush.bf16.msra.mxu3 %v12835_v43 }
 0xa37   : > { %9730 = vmatpush.bf16.msra.mxu2 %v12876_v39  ;;  %9855 = vmatmul.bf16.vlgmr.msra.gmra.mxu0 %v9797_v54  ;;  %v18113_v33 = vpop.f32.mrf.mxu3 }
 0xa39   : > { %9537 = vmatpush.bf16.msra.mxu3 %v12834_v37  ;;  %v8558_v7 = vpop.f32.mrf.mxu0 }
 0xa3a   : > { %9731 = vmatmul.bf16.vlgmr.msra.gmra.mxu2 %v9673_v51 }
 0xa3d   : > { %9538 = vmatpush.bf16.msra.mxu3 %v12833_v12 }
 0xa3f   : > { %v8272_v14 = vpop.f32.mrf.mxu3 }
 0xa40   : > { %v12934_v14 = vld [vmem:[%s18234_s8 + $0x10] sm:$0xff] }
 0xa41   : > { %9539 = vmatpush.bf16.msra.mxu3 %v12832_v24  ;;  %v12939_v24 = vld [vmem:[%s18234_s8 + $0x38] sm:$0xff] }
 0xa42   : > { %9941 = vmatpush.bf16.msrb.mxu1 %v12939_v24 }
 0xa45   : > { %9540 = vmatpush.bf16.msra.mxu3 %v12831_v5  ;;  %v12937_v5 = vld [vmem:[%s18234_s8 + $0x28] sm:$0xff] }
 0xa49   : > { %9541 = vmatpush.bf16.msra.mxu3 %v12830_v27 }
 0xa4d   : > { %9542 = vmatpush.bf16.msra.mxu3 %v12829_v48  ;;  %v12935_v48 = vld [vmem:[%s18234_s8 + $0x18] sm:$0xff] }
 0xa51   : > { %9543 = vmatpush.bf16.msra.mxu3 %v12828_v42  ;;  %v8747_v60 = vpop.f32.mrf.mxu0 }
 0xa53   : > { %v18140_v20 = vpop.f32.mrf.mxu1 }
 0xa54   : > { %9544 = vmatmul.bf16.vlgmr.msra.gmra.mxu3 %v9486_v61 }
 0xa55   : > { %9784 = vmatpush.bf16.msrb.mxu3 %v12899_v47 }
 0xa57   : > { %v8461_v31 = vpop.f32.mrf.mxu3 }
 0xa59   : > { %9785 = vmatpush.bf16.msrb.mxu3 %v12898_v3  ;;  %v8749_v18 = vpop.f32.mrf.mxu0  ;;  %v12933_v3 = vld [vmem:[%s18234_s8 + $0x8] sm:$0xff] }
 0xa5b   : > { %v8842_v23 = vpop.f32.mrf.mxu1 }
 0xa5d   : > { %9786 = vmatpush.bf16.msrb.mxu3 %v12897_v57 }
 0xa5f   : > { %v8463_v46 = vpop.f32.mrf.mxu3 }
 0xa61   : > { %9787 = vmatpush.bf16.msrb.mxu3 %v12896_v17 }
 0xa63   : > { %v9171_v45 = vpop.f32.mrf.mxu1 }
 0xa64   : > { %v9172_v49 = vadd.f32 %v9171_v45, %v17936_v63 }
 0xa65   : > { %9788 = vmatpush.bf16.msrb.mxu3 %v12895_v32  ;;  %v12932_v32 = vld [vmem:[%s18234_s8] sm:$0xff] }
 0xa69   : > { %9789 = vmatpush.bf16.msrb.mxu3 %v12894_v55  ;;  %v12946_v55 = vld [vmem:[%s18236_s10 + $0x30] sm:$0xff] }
 0xa6b   : > { %v9173_v26 = vpop.f32.mrf.mxu1 }
 0xa6d   : > { %9790 = vmatpush.bf16.msrb.mxu3 %v12893_v2 }
 0xa71   : > { %9791 = vmatpush.bf16.msrb.mxu3 %v12892_v29  ;;  %v12943_v29 = vld [vmem:[%s18236_s10 + $0x18] sm:$0xff] }
 0xa73   : > { %v18149_v19 = vpop.f32.mrf.mxu0  ;;  %v9421_v35 = vpop.f32.mrf.mxu1 }
 0xa74   : > { %9792 = vmatmul.bf16.vlgmr.msrb.gmra.mxu3 %v17898_v9  ;;  %v9422_v25 = vadd.f32 %v9421_v35, %v18034_v13  ;;  %v12938_v13 = vld [vmem:[%s18234_s8 + $0x30] sm:$0xff] }
 0xa75   : > { %9942 = vmatpush.bf16.msrb.mxu1 %v12938_v13 }
 0xa77   : > { %v8649_v59 = vpop.f32.mrf.mxu3 }
 0xa79   : > { %9943 = vmatpush.bf16.msrb.mxu1 %v12937_v5 }
 0xa7b   : > { %v9112_v8 = vpop.f32.mrf.mxu0  ;;  %v9423_v30 = vpop.f32.mrf.mxu1 }
 0xa7d   : > { %v18151_v0 = vpop.f32.mrf.mxu2 }
 0xa7f   : > { %v8651_v1 = vpop.f32.mrf.mxu3 }
 0xa83   : > { %v9358_v28 = vpop.f32.mrf.mxu0 }
 0xa85   : > { %v8940_v22 = vpop.f32.mrf.mxu2 }
 0xa8b   : > { %v9360_v40 = vpop.f32.mrf.mxu0 }
 0xa8d   : > { %v9234_v41 = vpop.f32.mrf.mxu2 }
 0xa8e   : > { %v9235_v10 = vadd.f32 %v9234_v41, %v17992_v6  ;;  %v9359_v6 = vadd.f32 %v9358_v28, %v18113_v33  ;;  %v12941_v41 = vld [vmem:[%s18236_s10 + $0x8] sm:$0xff] }
 0xa90   : > { %v9860_v21 = vadd.f32 %v9235_v10, %v9172_v49  ;;  %v9892_v49 = vld [vmem:[%s18235_s9] sm:$0x1] }
 0xa93   : > { %v9669_v34 = vpop.f32.mrf.mxu1 }
 0xa94   : > { %v9670_v53 = vadd.f32 %v9669_v34, %v8747_v60  ;;  %v9606_v52 = vpop.f32.mrf.mxu0  ;;  %v12944_v60 = vld [vmem:[%s18236_s10 + $0x20] sm:$0xff] }
 0xa95   : > { %v9236_v11 = vpop.f32.mrf.mxu2  ;;  %v9607_v4 = vadd.f32 %v9606_v52, %v8649_v59  ;;  %v12942_v59 = vld [vmem:[%s18236_s10 + $0x10] sm:$0xff]  ;;  %v9972_v34 = vld [vmem:[%s18237_s11] sm:$0x1] }
 0xa97   : > { %v9033_v9 = vpop.f32.mrf.mxu3 }
 0xa9b   : > { %v9671_v56 = vpop.f32.mrf.mxu1 }
 0xa9c   : > { %v9608_v62 = vpop.f32.mrf.mxu0 }
 0xa9d   : > { %v9482_v43 = vpop.f32.mrf.mxu2 }
 0xa9e   : > { %v9483_v15 = vadd.f32 %v9482_v43, %v8461_v31  ;;  %v12945_v31 = vld [vmem:[%s18236_s10 + $0x28] sm:$0xff] }
 0xa9f   : > { %v9035_v44 = vpop.f32.mrf.mxu3 }
 0xaa0   : > { %v9862_v37 = vadd.f32 %v9483_v15, %v9422_v25 }
 0xaa5   : > { %v9484_v38 = vpop.f32.mrf.mxu2 }
 0xab4   : > { %v9856_v51 = vpop.f32.mrf.mxu0 }
 0xab5   : > { %v9857_v18 = vadd.f32 %v9856_v51, %v9033_v9 }
 0xab7   : > { %v9295_v63 = vpop.f32.mrf.mxu3 }
 0xab8   : > { %v9296_v12 = vadd.f32 %v9295_v63, %v18048_v58  ;;  %v12936_v58 = vld [vmem:[%s18234_s8 + $0x20] sm:$0xff] }
 0xab9   : > { %9944 = vmatpush.bf16.msrb.mxu1 %v12936_v58 }
 0xaba   : > { %v9861_v36 = vadd.f32 %v9359_v6, %v9296_v12 }
 0xabc   : > { %v9866_v39 = vadd.f32 %v9861_v36, %v9860_v21  ;;  %v9858_v27 = vpop.f32.mrf.mxu0 }
 0xabd   : > { %v9732_v54 = vpop.f32.mrf.mxu2  ;;  %9945 = vmatpush.bf16.msrb.mxu1 %v12935_v48 }
 0xabe   : > { %v9733_v2 = vadd.f32 %v9732_v54, %v18140_v20  ;;  %v9872_v20 = vld [vmem:[%s18233_s7] sm:$0x1] }
 0xabf   : > { %v9297_v16 = vpop.f32.mrf.mxu3 }
 0xac0   : > { %v9864_v45 = vadd.f32 %v9733_v2, %v9670_v53 }
 0xac1   : > { %9946 = vmatpush.bf16.msrb.mxu1 %v12934_v14 }
 0xac5   : > { %v9734_v33 = vpop.f32.mrf.mxu2  ;;  %9947 = vmatpush.bf16.msrb.mxu1 %v12933_v3 }
 0xac9   : > { %9948 = vmatpush.bf16.msrb.mxu1 %v12932_v32 }
 0xad7   : > { %v9545_v7 = vpop.f32.mrf.mxu3 }
 0xad8   : > { %v9546_v42 = vadd.f32 %v9545_v7, %v18107_v50  ;;  %v12947_v50 = vld [vmem:[%s18236_s10 + $0x38] sm:$0xff] }
 0xad9   : > { %10021 = vmatpush.bf16.msrb.mxu2 %v12947_v50 }
 0xada   : > { %v9863_v47 = vadd.f32 %v9607_v4, %v9546_v42 }
 0xadc   : > { %v9867_v61 = vadd.f32 %v9863_v47, %v9862_v37 }
 0xadd   : > { %10022 = vmatpush.bf16.msrb.mxu2 %v12946_v55 }
 0xade   : > { %v9869_v57 = vadd.f32 %v9867_v61, %v9866_v39 }
 0xadf   : > { %v9547_v17 = vpop.f32.mrf.mxu3 }
 0xae1   : > { %10023 = vmatpush.bf16.msrb.mxu2 %v12945_v31 }
 0xae5   : > { %10024 = vmatpush.bf16.msrb.mxu2 %v12944_v60 }
 0xae9   : > { %10025 = vmatpush.bf16.msrb.mxu2 %v12943_v29 }
 0xaed   : > { %10026 = vmatpush.bf16.msrb.mxu2 %v12942_v59 }
 0xaf1   : > { %10027 = vmatpush.bf16.msrb.mxu2 %v12941_v41 }
 0xaf7   : > { %v9793_v46 = vpop.f32.mrf.mxu3 }
 0xaf8   : > { %v9794_v23 = vadd.f32 %v9793_v46, %v18151_v0 }
 0xafa   : > { %v9865_v26 = vadd.f32 %v9857_v18, %v9794_v23 }
 0xafc   : > { %v9868_v35 = vadd.f32 %v9865_v26, %v9864_v45 }
 0xafe   : > { %v9870_v1 = vadd.f32 %v9868_v35, %v18149_v19  ;;  %v12940_v19 = vld [vmem:[%s18236_s10] sm:$0xff] }
 0xaff   : > { %v9795_v8 = vpop.f32.mrf.mxu3  ;;  %10028 = vmatpush.bf16.msrb.mxu2 %v12940_v19 }
 0xb00   : > { %v9871_v30 = vadd.f32 %v9870_v1, %v9869_v57 }
 0xb02   : > { %v9873_v22 = vadd.f32 %v9872_v20, %v9871_v30 }
 0xb04   : > { %v9874_v0 = vmax.f32 %v9873_v22, 0.0 }
 0xb06   : > { %v9875_v28 = vpack.c.bf16 %v9874_v0, %v9874_v0 }
 0xb08   : > { %9949 = vmatmul.bf16.vlgmr.msrb.gmra.mxu1 %v9875_v28 }
 0xb85   : > { %v9950_v10 = vpop.f32.mrf.mxu1 }
 0xb86   : > { %v9951_v21 = vadd.f32 %v9950_v10, %v9892_v49 }
 0xb88   : > { %v9954_v9 = vmax.f32 %v9951_v21, 0.0 }
 0xb8a   : > { %v9955_v40 = vpack.c.bf16 %v9954_v9, %v9954_v9 }
 0xb8c   : > { %10029 = vmatmul.bf16.vlgmr.msrb.gmra.mxu2 %v9955_v40 }
 0xb8d   : > { %v9952_v11 = vpop.f32.mrf.mxu1 }
 0xc0f   : > { %v10030_v53 = vpop.f32.mrf.mxu2 }
 0xc10   : > { %v10031_v44 = vadd.f32 %v10030_v53, %v9972_v34 }
 0xc12   : > { %v10034_v52 = vperm.slane %v10031_v44, 0 }
 0xc14   : > { %10035 = vst [vmem:[%s411_s27] sm:$0xff] %v10034_v52 }
 0xc17   : > { %v10032_v4 = vpop.f32.mrf.mxu2 }
 0xc18 PF: > { %s22_s21 = sadd.s32 1, %s12968_s21  }
 0xc19   : > { %p19_p4 = scmp.ge.s32.totalorder %s22_s21, 4  }
 0xc1b   :  { %21 = sbr.rel (!%p19_p4) target bundleno = 1 (0x1), region = 98 }

</bundles_post_ra>
